<compile_context>
chip_gen: v7x
topology: tpu7x:2x2x1
jax: 0.10.0
libtpu: 0.0.40
codegen_flags: <defaults>
</compile_context>

<pallas_src>
import functools

import jax
import jax.numpy as jnp
from jax import lax
from jax.experimental import pallas as pl
from jax.experimental.pallas import tpu as pltpu


# ----------------------------------------------------------------------------
# One-time on-device probe: does pltpu.roll follow jnp.roll's shift convention?
#   +1 -> matches jnp.roll,  -1 -> reversed,  0 -> unusable (use slice fallback)
# ----------------------------------------------------------------------------
def _probe_roll_direction():
    shape = (8, 16, 128)   # same rank / tiled dims as the real stage-1 operand

    def kern(x_ref, a_ref, b_ref):
        a_ref[...] = pltpu.roll(x_ref[...], shift=2, axis=1)
        b_ref[...] = pltpu.roll(x_ref[...], shift=15, axis=1)

    try:
        x = jnp.arange(8 * 16 * 128, dtype=jnp.float32).reshape(shape)
        a, b = pl.pallas_call(
            kern,
            out_shape=(jax.ShapeDtypeStruct(shape, jnp.float32),
                       jax.ShapeDtypeStruct(shape, jnp.float32)))(x)
        a, b = jax.block_until_ready((a, b))
        if (bool(jnp.array_equal(a, jnp.roll(x, 2, axis=1)))
                and bool(jnp.array_equal(b, jnp.roll(x, 15, axis=1)))):
            return 1
        if (bool(jnp.array_equal(a, jnp.roll(x, -2, axis=1)))
                and bool(jnp.array_equal(b, jnp.roll(x, -15, axis=1)))):
            return -1
        return 0
    except Exception:
        return 0


def _vmem_limit_bytes():
    """Generation-aware VMEM budget (v5e/v6e: 128 MiB physical, v7x: 64 MiB)."""
    try:
        cap = int(pltpu.get_tpu_info().vmem_capacity_bytes)
    except Exception:
        cap = 64 * 1024 * 1024            # conservative (v7x-sized) fallback
    return int(min(cap * 3 // 4, 96 * 1024 * 1024))


# ----------------------------------------------------------------------------
# Fused kernel: both GRU stages on one (H, W, C) channels-last slab.
# ----------------------------------------------------------------------------
def _sep_conv_gru_kernel(h_ref, x_ref,
                         wzr1h_ref, wzr1x_ref, bzr1_ref,
                         wq1h_ref, wq1x_ref, bq1_ref,
                         wzr2h_ref, wzr2x_ref, bzr2_ref,
                         wq2h_ref, wq2x_ref, bq2_ref,
                         out_ref, *, roll_sign):
    f32 = jnp.float32
    bf16 = jnp.bfloat16

    h = h_ref[...].astype(f32)            # (H, W, Ch) f32
    x = x_ref[...]                        # (H, W, Cx) bf16 (pre-cast in wrapper)
    Hd, Wd, Ch = h.shape
    M = Hd * Wd

    # ---- tap generators (5-wide, "same" padding of 2) ----------------------
    def taps_along_w(feat):
        """5 shifted copies along W (sublane axis), zero-filled at the edges."""
        if roll_sign != 0:
            # XLU sublane rotate + VPU edge mask: no padded-buffer relayouts.
            idx = lax.broadcasted_iota(jnp.int32, feat.shape, 1)
            taps = []
            for k in range(5):
                s = k - 2                                   # tap k reads feat[i + s]
                if s == 0:
                    taps.append(feat)
                    continue
                rolled = pltpu.roll(feat, shift=(-roll_sign * s) % Wd, axis=1)
                valid = (idx < Wd - s) if s > 0 else (idx >= -s)
                taps.append(jnp.where(valid, rolled, jnp.zeros_like(rolled)))
            return taps
        # Fallback: zero-pad once, 5 sublane-offset slices (proven path).
        zpad = jnp.zeros((Hd, 2, feat.shape[-1]), feat.dtype)
        fpad = jnp.concatenate([zpad, feat, zpad], axis=1)
        return [lax.slice_in_dim(fpad, k, k + Wd, axis=1) for k in range(5)]

    def taps_along_h(feat):
        """5 shifted copies along H (outer axis): pad once, address-only slices."""
        zpad = jnp.zeros((2,) + feat.shape[1:], feat.dtype)
        fpad = jnp.concatenate([zpad, feat, zpad], axis=0)
        return [lax.slice_in_dim(fpad, k, k + Hd, axis=0) for k in range(5)]

    def gate_conv(part_taps, w_refs, b_ref):
        """Per-tap accumulating MXU dots; no (M, 5*Cin) im2col materialization."""
        acc = None
        for taps, w_ref in zip(part_taps, w_refs):
            cp = taps[0].shape[-1]
            for k in range(5):
                d = jnp.dot(taps[k].reshape(M, cp), w_ref[k],
                            preferred_element_type=f32)
                acc = d if acc is None else acc + d
        return acc + b_ref[...]            # (M, Cout) f32 + (1, Cout) bias

    def gru_stage(h_f32, tap_fn, wzrh, wzrx, bzr, wqh, wqx, bq, x_taps):
        h_taps = tap_fn(h_f32.astype(bf16))
        zr = gate_conv([h_taps, x_taps], [wzrh, wzrx], bzr).reshape(Hd, Wd, 2 * Ch)
        z = jax.nn.sigmoid(zr[..., :Ch])
        r = jax.nn.sigmoid(zr[..., Ch:])
        rh_taps = tap_fn((r * h_f32).astype(bf16))
        q = jnp.tanh(gate_conv([rh_taps, x_taps], [wqh, wqx], bq)).reshape(Hd, Wd, Ch)
        return (1.0 - z) * h_f32 + z * q

    # stage 1: torch (1,5) conv -> 1-D conv along W.  x taps built once,
    # reused for the fused z/r gate and the q gate.
    x_taps1 = taps_along_w(x)
    h = gru_stage(h, taps_along_w, wzr1h_ref, wzr1x_ref, bzr1_ref,
                  wq1h_ref, wq1x_ref, bq1_ref, x_taps1)

    # stage 2: torch (5,1) conv -> 1-D conv along H, consuming stage-1 h
    # directly from VMEM (no HBM round trip, no layout change).
    x_taps2 = taps_along_h(x)
    h = gru_stage(h, taps_along_h, wzr2h_ref, wzr2x_ref, bzr2_ref,
                  wq2h_ref, wq2x_ref, bq2_ref, x_taps2)

    out_ref[...] = h.astype(out_ref.dtype)


# ----------------------------------------------------------------------------
# Wrapper: NCHW in / NCHW out, same semantics as the PyTorch module.
# ----------------------------------------------------------------------------
def sep_conv_gru(h, x, params, *, roll_sign=0):
    B, Ch, H, W = h.shape
    Cx = x.shape[1]

    h_l = jnp.transpose(h, (0, 2, 3, 1))                        # (B, H, W, Ch) f32
    x_l = jnp.transpose(x, (0, 2, 3, 1)).astype(jnp.bfloat16)   # (B, H, W, Cx) bf16

    blk_h = (None, H, W, Ch)       # leading batch dim squeezed in-kernel
    blk_x = (None, H, W, Cx)
    imap = lambda b: (b, 0, 0, 0)
    # Weights/biases: whole-array VMEM residency (single copy, never re-DMA'd).
    wspec = pl.BlockSpec(memory_space=pltpu.MemorySpace.VMEM)

    kernel = functools.partial(_sep_conv_gru_kernel, roll_sign=roll_sign)

    out = pl.pallas_call(
        kernel,
        out_shape=jax.ShapeDtypeStruct(h_l.shape, h_l.dtype),
        grid=(B,),
        in_specs=[pl.BlockSpec(blk_h, imap), pl.BlockSpec(blk_x, imap)]
                 + [wspec] * 12,
        out_specs=pl.BlockSpec(blk_h, imap),
        input_output_aliases={0: 0},        # overwrite the hidden state in place
        compiler_params=pltpu.CompilerParams(
            dimension_semantics=("parallel",),
            vmem_limit_bytes=_vmem_limit_bytes()),
    )(h_l, x_l,
      params["wzr1_h"], params["wzr1_x"], params["bzr1"],
      params["wq1_h"], params["wq1_x"], params["bq1"],
      params["wzr2_h"], params["wzr2_x"], params["bzr2"],
      params["wq2_h"], params["wq2_x"], params["bq2"])

    return jnp.transpose(out, (0, 3, 1, 2))   # back to NCHW


# ----------------------------------------------------------------------------
# Pure-JAX reference (mirrors the PyTorch forward exactly, NCHW / OIHW, f32).
# ----------------------------------------------------------------------------
def _conv2d_ref(x, w, b, pad):
    out = lax.conv_general_dilated(
        x, w, window_strides=(1, 1), padding=pad,
        dimension_numbers=("NCHW", "OIHW", "NCHW"))
    return out + b[None, :, None, None]


def sep_conv_gru_ref(h, x, tw):
    hx = jnp.concatenate([h, x], axis=1)
    z = jax.nn.sigmoid(_conv2d_ref(hx, tw["Wz1"], tw["bz1"], ((0, 0), (2, 2))))
    r = jax.nn.sigmoid(_conv2d_ref(hx, tw["Wr1"], tw["br1"], ((0, 0), (2, 2))))
    q = jnp.tanh(_conv2d_ref(jnp.concatenate([r * h, x], axis=1),
                             tw["Wq1"], tw["bq1"], ((0, 0), (2, 2))))
    h = (1 - z) * h + z * q
    hx = jnp.concatenate([h, x], axis=1)
    z = jax.nn.sigmoid(_conv2d_ref(hx, tw["Wz2"], tw["bz2"], ((2, 2), (0, 0))))
    r = jax.nn.sigmoid(_conv2d_ref(hx, tw["Wr2"], tw["br2"], ((2, 2), (0, 0))))
    q = jnp.tanh(_conv2d_ref(jnp.concatenate([r * h, x], axis=1),
                             tw["Wq2"], tw["bq2"], ((2, 2), (0, 0))))
    return (1 - z) * h + z * q


# ----------------------------------------------------------------------------
# Deterministic parameter init + conversion to the kernel's layout:
#   wzr*_h: (5, Ch, 2*Ch) bf16   wzr*_x: (5, Cx, 2*Ch) bf16   (z cols, then r)
#   wq*_h : (5, Ch, Ch)   bf16   wq*_x : (5, Cx, Ch)   bf16
#   b*    : (1, Cout*)    f32
# ----------------------------------------------------------------------------
def make_params(key, hidden_dim, input_dim):
    cin = hidden_dim + input_dim
    keys = jax.random.split(key, 12)
    scale = 0.05

    def w_h(k):  # torch (1,5) conv weight: (Cout, Cin, 1, 5)
        return scale * jax.random.normal(k, (hidden_dim, cin, 1, 5), jnp.float32)

    def w_v(k):  # torch (5,1) conv weight: (Cout, Cin, 5, 1)
        return scale * jax.random.normal(k, (hidden_dim, cin, 5, 1), jnp.float32)

    def b(k):
        return scale * jax.random.normal(k, (hidden_dim,), jnp.float32)

    torch_w = {
        "Wz1": w_h(keys[0]), "bz1": b(keys[1]),
        "Wr1": w_h(keys[2]), "br1": b(keys[3]),
        "Wq1": w_h(keys[4]), "bq1": b(keys[5]),
        "Wz2": w_v(keys[6]), "bz2": b(keys[7]),
        "Wr2": w_v(keys[8]), "br2": b(keys[9]),
        "Wq2": w_v(keys[10]), "bq2": b(keys[11]),
    }

    def taps_h(Wt):   # (Cout, Cin, 1, 5) -> (5, Cin, Cout)
        return jnp.transpose(Wt[:, :, 0, :], (2, 1, 0))

    def taps_v(Wt):   # (Cout, Cin, 5, 1) -> (5, Cin, Cout)
        return jnp.transpose(Wt[:, :, :, 0], (2, 1, 0))

    def split(w):     # (5, Cin, Cout) -> h-part, x-part (torch concat order [h; x])
        return w[:, :hidden_dim, :], w[:, hidden_dim:, :]

    def fuse_zr(wz, wr):   # -> (5, Cp, 2*Cout), z columns first
        return jnp.concatenate([wz, wr], axis=-1)

    wz1h, wz1x = split(taps_h(torch_w["Wz1"]))
    wr1h, wr1x = split(taps_h(torch_w["Wr1"]))
    wq1h, wq1x = split(taps_h(torch_w["Wq1"]))
    wz2h, wz2x = split(taps_v(torch_w["Wz2"]))
    wr2h, wr2x = split(taps_v(torch_w["Wr2"]))
    wq2h, wq2x = split(taps_v(torch_w["Wq2"]))

    bf16 = jnp.bfloat16
    kp = {
        "wzr1_h": fuse_zr(wz1h, wr1h).astype(bf16),
        "wzr1_x": fuse_zr(wz1x, wr1x).astype(bf16),
        "bzr1": jnp.concatenate([torch_w["bz1"], torch_w["br1"]])[None, :],
        "wq1_h": wq1h.astype(bf16), "wq1_x": wq1x.astype(bf16),
        "bq1": torch_w["bq1"][None, :],
        "wzr2_h": fuse_zr(wz2h, wr2h).astype(bf16),
        "wzr2_x": fuse_zr(wz2x, wr2x).astype(bf16),
        "bzr2": jnp.concatenate([torch_w["bz2"], torch_w["br2"]])[None, :],
        "wq2_h": wq2h.astype(bf16), "wq2_x": wq2x.astype(bf16),
        "bq2": torch_w["bq2"][None, :],
    }
    return torch_w, kp


if __name__ == "__main__":
    # Small shapes; channel dims lane-dense (multiple of 128), matching real
    # RAFT's hidden_dim=128 (input_dim shrunk to 128 to keep the demo small).
    B, hidden_dim, input_dim, H, W = 2, 128, 128, 8, 16

    key = jax.random.PRNGKey(0)
    k_h, k_x, k_p = jax.random.split(key, 3)
    h = jax.random.normal(k_h, (B, hidden_dim, H, W), jnp.float32)
    x = jax.random.normal(k_x, (B, input_dim, H, W), jnp.float32)

    torch_w, kernel_p = make_params(k_p, hidden_dim, input_dim)

    roll_sign = _probe_roll_direction()   # static config for the fused kernel
    fn = jax.jit(functools.partial(sep_conv_gru, roll_sign=roll_sign))
    out = jax.block_until_ready(fn(h, x, kernel_p))

    # Check against the pure-JAX (PyTorch-equivalent) f32 reference.
    # Tolerance accounts for bf16 MXU operands (f32 accumulation / gating).
    ref = jax.block_until_ready(sep_conv_gru_ref(h, x, torch_w))
    assert out.shape == (B, hidden_dim, H, W)
    max_err = float(jnp.max(jnp.abs(out - ref)))
    assert jnp.allclose(out, ref, atol=5e-2, rtol=5e-2), max_err

    print("KERNEL_OK")
</pallas_src>

<mosaic_0001>
module attributes {stable_mosaic.version = 11 : i64} {
  func.func @kern(%arg0: memref<8x16x128xf32, #tpu.memory_space<vmem>>, %arg1: memref<8x16x128xf32, #tpu.memory_space<vmem>>, %arg2: memref<8x16x128xf32, #tpu.memory_space<vmem>>) attributes {dimension_semantics = [], scalar_prefetch = 0 : i64, scratch_operands = 0 : i64, tpu.core_type = #tpu.core_type<tc>} {
    %c0 = arith.constant 0 : index
    %c0_0 = arith.constant 0 : index
    %c0_1 = arith.constant 0 : index
    %0 = vector.load %arg0[%c0, %c0_0, %c0_1] : memref<8x16x128xf32, #tpu.memory_space<vmem>>, vector<8x16x128xf32>
    %c2_i32 = arith.constant 2 : i32
    %1 = tpu.dynamic_rotate %0 by %c2_i32 dim 1 : vector<8x16x128xf32>, i32 -> vector<8x16x128xf32>
    %c0_2 = arith.constant 0 : index
    %c0_3 = arith.constant 0 : index
    %c0_4 = arith.constant 0 : index
    %2 = vector.load %arg1[%c0_2, %c0_3, %c0_4] : memref<8x16x128xf32, #tpu.memory_space<vmem>>, vector<8x16x128xf32>
    tpu.vector_store %arg1[%c0_2, %c0_3, %c0_4], %1 {strides = array<i32>} : memref<8x16x128xf32, #tpu.memory_space<vmem>>, vector<8x16x128xf32>,
    %c0_5 = arith.constant 0 : index
    %c0_6 = arith.constant 0 : index
    %c0_7 = arith.constant 0 : index
    %3 = vector.load %arg0[%c0_5, %c0_6, %c0_7] : memref<8x16x128xf32, #tpu.memory_space<vmem>>, vector<8x16x128xf32>
    %c15_i32 = arith.constant 15 : i32
    %4 = tpu.dynamic_rotate %3 by %c15_i32 dim 1 : vector<8x16x128xf32>, i32 -> vector<8x16x128xf32>
    %c0_8 = arith.constant 0 : index
    %c0_9 = arith.constant 0 : index
    %c0_10 = arith.constant 0 : index
    %5 = vector.load %arg2[%c0_8, %c0_9, %c0_10] : memref<8x16x128xf32, #tpu.memory_space<vmem>>, vector<8x16x128xf32>
    tpu.vector_store %arg2[%c0_8, %c0_9, %c0_10], %4 {strides = array<i32>} : memref<8x16x128xf32, #tpu.memory_space<vmem>>, vector<8x16x128xf32>,
    return
  }
}

module attributes {stable_mosaic.version = 11 : i64} {
  func.func @_sep_conv_gru_kernel(%arg0: i32, %arg1: memref<1x8x16x128xf32, #tpu.memory_space<vmem>>, %arg2: memref<1x8x16x128xbf16, #tpu.memory_space<vmem>>, %arg3: memref<5x128x256xbf16, #tpu.memory_space<vmem>>, %arg4: memref<5x128x256xbf16, #tpu.memory_space<vmem>>, %arg5: memref<1x256xf32, #tpu.memory_space<vmem>>, %arg6: memref<5x128x128xbf16, #tpu.memory_space<vmem>>, %arg7: memref<5x128x128xbf16, #tpu.memory_space<vmem>>, %arg8: memref<1x128xf32, #tpu.memory_space<vmem>>, %arg9: memref<5x128x256xbf16, #tpu.memory_space<vmem>>, %arg10: memref<5x128x256xbf16, #tpu.memory_space<vmem>>, %arg11: memref<1x256xf32, #tpu.memory_space<vmem>>, %arg12: memref<5x128x128xbf16, #tpu.memory_space<vmem>>, %arg13: memref<5x128x128xbf16, #tpu.memory_space<vmem>>, %arg14: memref<1x128xf32, #tpu.memory_space<vmem>>, %arg15: memref<1x8x16x128xf32, #tpu.memory_space<vmem>>) attributes {dimension_semantics = [#tpu.dimension_semantics<parallel>], iteration_bounds = array<i64: 2>, scalar_prefetch = 0 : i64, scratch_operands = 0 : i64, tpu.core_type = #tpu.core_type<tc>, window_params = [{transform_indices = @transform_0, window_bounds = array<i64: 1, 8, 16, 128>}, {transform_indices = @transform_1, window_bounds = array<i64: 1, 8, 16, 128>}, {pipeline_mode = #tpu.pipeline_mode<synchronous>, transform_indices = @transform_2, window_bounds = array<i64: 5, 128, 256>}, {pipeline_mode = #tpu.pipeline_mode<synchronous>, transform_indices = @transform_3, window_bounds = array<i64: 5, 128, 256>}, {pipeline_mode = #tpu.pipeline_mode<synchronous>, transform_indices = @transform_4, window_bounds = array<i64: 1, 256>}, {pipeline_mode = #tpu.pipeline_mode<synchronous>, transform_indices = @transform_5, window_bounds = array<i64: 5, 128, 128>}, {pipeline_mode = #tpu.pipeline_mode<synchronous>, transform_indices = @transform_6, window_bounds = array<i64: 5, 128, 128>}, {pipeline_mode = #tpu.pipeline_mode<synchronous>, transform_indices = @transform_7, window_bounds = array<i64: 1, 128>}, {pipeline_mode = #tpu.pipeline_mode<synchronous>, transform_indices = @transform_8, window_bounds = array<i64: 5, 128, 256>}, {pipeline_mode = #tpu.pipeline_mode<synchronous>, transform_indices = @transform_9, window_bounds = array<i64: 5, 128, 256>}, {pipeline_mode = #tpu.pipeline_mode<synchronous>, transform_indices = @transform_10, window_bounds = array<i64: 1, 256>}, {pipeline_mode = #tpu.pipeline_mode<synchronous>, transform_indices = @transform_11, window_bounds = array<i64: 5, 128, 128>}, {pipeline_mode = #tpu.pipeline_mode<synchronous>, transform_indices = @transform_12, window_bounds = array<i64: 5, 128, 128>}, {pipeline_mode = #tpu.pipeline_mode<synchronous>, transform_indices = @transform_13, window_bounds = array<i64: 1, 128>}, {transform_indices = @transform_14, window_bounds = array<i64: 1, 8, 16, 128>}]} {
    %c0 = arith.constant 0 : index
    %c0_0 = arith.constant 0 : index
    %c0_1 = arith.constant 0 : index
    %c0_2 = arith.constant 0 : index
    %0 = vector.load %arg1[%c0, %c0_0, %c0_1, %c0_2] : memref<1x8x16x128xf32, #tpu.memory_space<vmem>>, vector<1x8x16x128xf32>
    %1 = vector.shape_cast %0 : vector<1x8x16x128xf32> to vector<8x16x128xf32>
    %c0_3 = arith.constant 0 : index
    %c0_4 = arith.constant 0 : index
    %c0_5 = arith.constant 0 : index
    %c0_6 = arith.constant 0 : index
    %2 = vector.load %arg2[%c0_3, %c0_4, %c0_5, %c0_6] : memref<1x8x16x128xbf16, #tpu.memory_space<vmem>>, vector<1x8x16x128xbf16>
    %3 = vector.shape_cast %2 : vector<1x8x16x128xbf16> to vector<8x16x128xbf16>
    %cst = arith.constant 0.000000e+00 : bf16
    %4 = vector.broadcast %cst : bf16 to vector<8x2x128xbf16>
    %5 = tpu.concatenate %4, %3, %4 in 1 : vector<8x2x128xbf16>, vector<8x16x128xbf16>, vector<8x2x128xbf16> -> vector<8x20x128xbf16>
    %6 = vector.extract_strided_slice %5 {offsets = [0, 0, 0], sizes = [8, 16, 128], strides = [1, 1, 1]} : vector<8x20x128xbf16> to vector<8x16x128xbf16>
    %7 = vector.extract_strided_slice %5 {offsets = [0, 1, 0], sizes = [8, 16, 128], strides = [1, 1, 1]} : vector<8x20x128xbf16> to vector<8x16x128xbf16>
    %8 = vector.extract_strided_slice %5 {offsets = [0, 2, 0], sizes = [8, 16, 128], strides = [1, 1, 1]} : vector<8x20x128xbf16> to vector<8x16x128xbf16>
    %9 = vector.extract_strided_slice %5 {offsets = [0, 3, 0], sizes = [8, 16, 128], strides = [1, 1, 1]} : vector<8x20x128xbf16> to vector<8x16x128xbf16>
    %10 = vector.extract_strided_slice %5 {offsets = [0, 4, 0], sizes = [8, 16, 128], strides = [1, 1, 1]} : vector<8x20x128xbf16> to vector<8x16x128xbf16>
    %11 = arith.truncf %1 : vector<8x16x128xf32> to vector<8x16x128xbf16>
    %cst_7 = arith.constant 0.000000e+00 : bf16
    %12 = vector.broadcast %cst_7 : bf16 to vector<8x2x128xbf16>
    %13 = tpu.concatenate %12, %11, %12 in 1 : vector<8x2x128xbf16>, vector<8x16x128xbf16>, vector<8x2x128xbf16> -> vector<8x20x128xbf16>
    %14 = vector.extract_strided_slice %13 {offsets = [0, 0, 0], sizes = [8, 16, 128], strides = [1, 1, 1]} : vector<8x20x128xbf16> to vector<8x16x128xbf16>
    %15 = vector.extract_strided_slice %13 {offsets = [0, 1, 0], sizes = [8, 16, 128], strides = [1, 1, 1]} : vector<8x20x128xbf16> to vector<8x16x128xbf16>
    %16 = vector.extract_strided_slice %13 {offsets = [0, 2, 0], sizes = [8, 16, 128], strides = [1, 1, 1]} : vector<8x20x128xbf16> to vector<8x16x128xbf16>
    %17 = vector.extract_strided_slice %13 {offsets = [0, 3, 0], sizes = [8, 16, 128], strides = [1, 1, 1]} : vector<8x20x128xbf16> to vector<8x16x128xbf16>
    %18 = vector.extract_strided_slice %13 {offsets = [0, 4, 0], sizes = [8, 16, 128], strides = [1, 1, 1]} : vector<8x20x128xbf16> to vector<8x16x128xbf16>
    %19 = vector.shape_cast %14 : vector<8x16x128xbf16> to vector<128x128xbf16>
    %c0_8 = arith.constant 0 : index
    %c0_9 = arith.constant 0 : index
    %c0_10 = arith.constant 0 : index
    %20 = vector.load %arg3[%c0_8, %c0_9, %c0_10] : memref<5x128x256xbf16, #tpu.memory_space<vmem>>, vector<1x128x256xbf16>
    %21 = vector.shape_cast %20 : vector<1x128x256xbf16> to vector<128x256xbf16>
    %cst_11 = arith.constant dense<0.000000e+00> : vector<128x256xf32>
    %22 = tpu.matmul %19, %21, %cst_11 {dimension_numbers = #tpu.dot_dimension_numbers<[1], [0], [0], [1], [0, 0, 1, 1], [], []>} : vector<128x128xbf16>, vector<128x256xbf16>, vector<128x256xf32> -> vector<128x256xf32>
    %23 = vector.shape_cast %15 : vector<8x16x128xbf16> to vector<128x128xbf16>
    %c1 = arith.constant 1 : index
    %c0_12 = arith.constant 0 : index
    %c0_13 = arith.constant 0 : index
    %24 = vector.load %arg3[%c1, %c0_12, %c0_13] : memref<5x128x256xbf16, #tpu.memory_space<vmem>>, vector<1x128x256xbf16>
    %25 = vector.shape_cast %24 : vector<1x128x256xbf16> to vector<128x256xbf16>
    %cst_14 = arith.constant dense<0.000000e+00> : vector<128x256xf32>
    %26 = tpu.matmul %23, %25, %cst_14 {dimension_numbers = #tpu.dot_dimension_numbers<[1], [0], [0], [1], [0, 0, 1, 1], [], []>} : vector<128x128xbf16>, vector<128x256xbf16>, vector<128x256xf32> -> vector<128x256xf32>
    %27 = arith.addf %22, %26 : vector<128x256xf32>
    %28 = vector.shape_cast %16 : vector<8x16x128xbf16> to vector<128x128xbf16>
    %c2 = arith.constant 2 : index
    %c0_15 = arith.constant 0 : index
    %c0_16 = arith.constant 0 : index
    %29 = vector.load %arg3[%c2, %c0_15, %c0_16] : memref<5x128x256xbf16, #tpu.memory_space<vmem>>, vector<1x128x256xbf16>
    %30 = vector.shape_cast %29 : vector<1x128x256xbf16> to vector<128x256xbf16>
    %cst_17 = arith.constant dense<0.000000e+00> : vector<128x256xf32>
    %31 = tpu.matmul %28, %30, %cst_17 {dimension_numbers = #tpu.dot_dimension_numbers<[1], [0], [0], [1], [0, 0, 1, 1], [], []>} : vector<128x128xbf16>, vector<128x256xbf16>, vector<128x256xf32> -> vector<128x256xf32>
    %32 = arith.addf %27, %31 : vector<128x256xf32>
    %33 = vector.shape_cast %17 : vector<8x16x128xbf16> to vector<128x128xbf16>
    %c3 = arith.constant 3 : index
    %c0_18 = arith.constant 0 : index
    %c0_19 = arith.constant 0 : index
    %34 = vector.load %arg3[%c3, %c0_18, %c0_19] : memref<5x128x256xbf16, #tpu.memory_space<vmem>>, vector<1x128x256xbf16>
    %35 = vector.shape_cast %34 : vector<1x128x256xbf16> to vector<128x256xbf16>
    %cst_20 = arith.constant dense<0.000000e+00> : vector<128x256xf32>
    %36 = tpu.matmul %33, %35, %cst_20 {dimension_numbers = #tpu.dot_dimension_numbers<[1], [0], [0], [1], [0, 0, 1, 1], [], []>} : vector<128x128xbf16>, vector<128x256xbf16>, vector<128x256xf32> -> vector<128x256xf32>
    %37 = arith.addf %32, %36 : vector<128x256xf32>
    %38 = vector.shape_cast %18 : vector<8x16x128xbf16> to vector<128x128xbf16>
    %c4 = arith.constant 4 : index
    %c0_21 = arith.constant 0 : index
    %c0_22 = arith.constant 0 : index
    %39 = vector.load %arg3[%c4, %c0_21, %c0_22] : memref<5x128x256xbf16, #tpu.memory_space<vmem>>, vector<1x128x256xbf16>
    %40 = vector.shape_cast %39 : vector<1x128x256xbf16> to vector<128x256xbf16>
    %cst_23 = arith.constant dense<0.000000e+00> : vector<128x256xf32>
    %41 = tpu.matmul %38, %40, %cst_23 {dimension_numbers = #tpu.dot_dimension_numbers<[1], [0], [0], [1], [0, 0, 1, 1], [], []>} : vector<128x128xbf16>, vector<128x256xbf16>, vector<128x256xf32> -> vector<128x256xf32>
    %42 = arith.addf %37, %41 : vector<128x256xf32>
    %43 = vector.shape_cast %6 : vector<8x16x128xbf16> to vector<128x128xbf16>
    %c0_24 = arith.constant 0 : index
    %c0_25 = arith.constant 0 : index
    %c0_26 = arith.constant 0 : index
    %44 = vector.load %arg4[%c0_24, %c0_25, %c0_26] : memref<5x128x256xbf16, #tpu.memory_space<vmem>>, vector<1x128x256xbf16>
    %45 = vector.shape_cast %44 : vector<1x128x256xbf16> to vector<128x256xbf16>
    %cst_27 = arith.constant dense<0.000000e+00> : vector<128x256xf32>
    %46 = tpu.matmul %43, %45, %cst_27 {dimension_numbers = #tpu.dot_dimension_numbers<[1], [0], [0], [1], [0, 0, 1, 1], [], []>} : vector<128x128xbf16>, vector<128x256xbf16>, vector<128x256xf32> -> vector<128x256xf32>
    %47 = arith.addf %42, %46 : vector<128x256xf32>
    %48 = vector.shape_cast %7 : vector<8x16x128xbf16> to vector<128x128xbf16>
    %c1_28 = arith.constant 1 : index
    %c0_29 = arith.constant 0 : index
    %c0_30 = arith.constant 0 : index
    %49 = vector.load %arg4[%c1_28, %c0_29, %c0_30] : memref<5x128x256xbf16, #tpu.memory_space<vmem>>, vector<1x128x256xbf16>
    %50 = vector.shape_cast %49 : vector<1x128x256xbf16> to vector<128x256xbf16>
    %cst_31 = arith.constant dense<0.000000e+00> : vector<128x256xf32>
    %51 = tpu.matmul %48, %50, %cst_31 {dimension_numbers = #tpu.dot_dimension_numbers<[1], [0], [0], [1], [0, 0, 1, 1], [], []>} : vector<128x128xbf16>, vector<128x256xbf16>, vector<128x256xf32> -> vector<128x256xf32>
    %52 = arith.addf %47, %51 : vector<128x256xf32>
    %53 = vector.shape_cast %8 : vector<8x16x128xbf16> to vector<128x128xbf16>
    %c2_32 = arith.constant 2 : index
    %c0_33 = arith.constant 0 : index
    %c0_34 = arith.constant 0 : index
    %54 = vector.load %arg4[%c2_32, %c0_33, %c0_34] : memref<5x128x256xbf16, #tpu.memory_space<vmem>>, vector<1x128x256xbf16>
    %55 = vector.shape_cast %54 : vector<1x128x256xbf16> to vector<128x256xbf16>
    %cst_35 = arith.constant dense<0.000000e+00> : vector<128x256xf32>
    %56 = tpu.matmul %53, %55, %cst_35 {dimension_numbers = #tpu.dot_dimension_numbers<[1], [0], [0], [1], [0, 0, 1, 1], [], []>} : vector<128x128xbf16>, vector<128x256xbf16>, vector<128x256xf32> -> vector<128x256xf32>
    %57 = arith.addf %52, %56 : vector<128x256xf32>
    %58 = vector.shape_cast %9 : vector<8x16x128xbf16> to vector<128x128xbf16>
    %c3_36 = arith.constant 3 : index
    %c0_37 = arith.constant 0 : index
    %c0_38 = arith.constant 0 : index
    %59 = vector.load %arg4[%c3_36, %c0_37, %c0_38] : memref<5x128x256xbf16, #tpu.memory_space<vmem>>, vector<1x128x256xbf16>
    %60 = vector.shape_cast %59 : vector<1x128x256xbf16> to vector<128x256xbf16>
    %cst_39 = arith.constant dense<0.000000e+00> : vector<128x256xf32>
    %61 = tpu.matmul %58, %60, %cst_39 {dimension_numbers = #tpu.dot_dimension_numbers<[1], [0], [0], [1], [0, 0, 1, 1], [], []>} : vector<128x128xbf16>, vector<128x256xbf16>, vector<128x256xf32> -> vector<128x256xf32>
    %62 = arith.addf %57, %61 : vector<128x256xf32>
    %63 = vector.shape_cast %10 : vector<8x16x128xbf16> to vector<128x128xbf16>
    %c4_40 = arith.constant 4 : index
    %c0_41 = arith.constant 0 : index
    %c0_42 = arith.constant 0 : index
    %64 = vector.load %arg4[%c4_40, %c0_41, %c0_42] : memref<5x128x256xbf16, #tpu.memory_space<vmem>>, vector<1x128x256xbf16>
    %65 = vector.shape_cast %64 : vector<1x128x256xbf16> to vector<128x256xbf16>
    %cst_43 = arith.constant dense<0.000000e+00> : vector<128x256xf32>
    %66 = tpu.matmul %63, %65, %cst_43 {dimension_numbers = #tpu.dot_dimension_numbers<[1], [0], [0], [1], [0, 0, 1, 1], [], []>} : vector<128x128xbf16>, vector<128x256xbf16>, vector<128x256xf32> -> vector<128x256xf32>
    %67 = arith.addf %62, %66 : vector<128x256xf32>
    %c0_44 = arith.constant 0 : index
    %c0_45 = arith.constant 0 : index
    %68 = vector.load %arg5[%c0_44, %c0_45] : memref<1x256xf32, #tpu.memory_space<vmem>>, vector<1x256xf32>
    %69 = vector.broadcast %68 : vector<1x256xf32> to vector<128x256xf32>
    %70 = arith.addf %67, %69 : vector<128x256xf32>
    %71 = vector.shape_cast %70 : vector<128x256xf32> to vector<8x16x256xf32>
    %72 = vector.extract_strided_slice %71 {offsets = [0, 0, 0], sizes = [8, 16, 128], strides = [1, 1, 1]} : vector<8x16x256xf32> to vector<8x16x128xf32>
    %73 = arith.negf %72 : vector<8x16x128xf32>
    %74 = math.exp %73 : vector<8x16x128xf32>
    %cst_46 = arith.constant 1.000000e+00 : f32
    %75 = vector.broadcast %cst_46 : f32 to vector<8x16x128xf32>
    %76 = arith.addf %75, %74 : vector<8x16x128xf32>
    %77 = arith.divf %75, %76 : vector<8x16x128xf32>
    %78 = vector.extract_strided_slice %71 {offsets = [0, 0, 128], sizes = [8, 16, 128], strides = [1, 1, 1]} : vector<8x16x256xf32> to vector<8x16x128xf32>
    %79 = arith.negf %78 : vector<8x16x128xf32>
    %80 = math.exp %79 : vector<8x16x128xf32>
    %cst_47 = arith.constant 1.000000e+00 : f32
    %81 = vector.broadcast %cst_47 : f32 to vector<8x16x128xf32>
    %82 = arith.addf %81, %80 : vector<8x16x128xf32>
    %83 = arith.divf %81, %82 : vector<8x16x128xf32>
    %84 = arith.mulf %83, %1 : vector<8x16x128xf32>
    %85 = arith.truncf %84 : vector<8x16x128xf32> to vector<8x16x128xbf16>
    %cst_48 = arith.constant 0.000000e+00 : bf16
    %86 = vector.broadcast %cst_48 : bf16 to vector<8x2x128xbf16>
    %87 = tpu.concatenate %86, %85, %86 in 1 : vector<8x2x128xbf16>, vector<8x16x128xbf16>, vector<8x2x128xbf16> -> vector<8x20x128xbf16>
    %88 = vector.extract_strided_slice %87 {offsets = [0, 0, 0], sizes = [8, 16, 128], strides = [1, 1, 1]} : vector<8x20x128xbf16> to vector<8x16x128xbf16>
    %89 = vector.extract_strided_slice %87 {offsets = [0, 1, 0], sizes = [8, 16, 128], strides = [1, 1, 1]} : vector<8x20x128xbf16> to vector<8x16x128xbf16>
    %90 = vector.extract_strided_slice %87 {offsets = [0, 2, 0], sizes = [8, 16, 128], strides = [1, 1, 1]} : vector<8x20x128xbf16> to vector<8x16x128xbf16>
    %91 = vector.extract_strided_slice %87 {offsets = [0, 3, 0], sizes = [8, 16, 128], strides = [1, 1, 1]} : vector<8x20x128xbf16> to vector<8x16x128xbf16>
    %92 = vector.extract_strided_slice %87 {offsets = [0, 4, 0], sizes = [8, 16, 128], strides = [1, 1, 1]} : vector<8x20x128xbf16> to vector<8x16x128xbf16>
    %93 = vector.shape_cast %88 : vector<8x16x128xbf16> to vector<128x128xbf16>
    %c0_49 = arith.constant 0 : index
    %c0_50 = arith.constant 0 : index
    %c0_51 = arith.constant 0 : index
    %94 = vector.load %arg6[%c0_49, %c0_50, %c0_51] : memref<5x128x128xbf16, #tpu.memory_space<vmem>>, vector<1x128x128xbf16>
    %95 = vector.shape_cast %94 : vector<1x128x128xbf16> to vector<128x128xbf16>
    %cst_52 = arith.constant dense<0.000000e+00> : vector<128x128xf32>
    %96 = tpu.matmul %93, %95, %cst_52 {dimension_numbers = #tpu.dot_dimension_numbers<[1], [0], [0], [1], [0, 0, 1, 1], [], []>} : vector<128x128xbf16>, vector<128x128xbf16>, vector<128x128xf32> -> vector<128x128xf32>
    %97 = vector.shape_cast %89 : vector<8x16x128xbf16> to vector<128x128xbf16>
    %c1_53 = arith.constant 1 : index
    %c0_54 = arith.constant 0 : index
    %c0_55 = arith.constant 0 : index
    %98 = vector.load %arg6[%c1_53, %c0_54, %c0_55] : memref<5x128x128xbf16, #tpu.memory_space<vmem>>, vector<1x128x128xbf16>
    %99 = vector.shape_cast %98 : vector<1x128x128xbf16> to vector<128x128xbf16>
    %cst_56 = arith.constant dense<0.000000e+00> : vector<128x128xf32>
    %100 = tpu.matmul %97, %99, %cst_56 {dimension_numbers = #tpu.dot_dimension_numbers<[1], [0], [0], [1], [0, 0, 1, 1], [], []>} : vector<128x128xbf16>, vector<128x128xbf16>, vector<128x128xf32> -> vector<128x128xf32>
    %101 = arith.addf %96, %100 : vector<128x128xf32>
    %102 = vector.shape_cast %90 : vector<8x16x128xbf16> to vector<128x128xbf16>
    %c2_57 = arith.constant 2 : index
    %c0_58 = arith.constant 0 : index
    %c0_59 = arith.constant 0 : index
    %103 = vector.load %arg6[%c2_57, %c0_58, %c0_59] : memref<5x128x128xbf16, #tpu.memory_space<vmem>>, vector<1x128x128xbf16>
    %104 = vector.shape_cast %103 : vector<1x128x128xbf16> to vector<128x128xbf16>
    %cst_60 = arith.constant dense<0.000000e+00> : vector<128x128xf32>
    %105 = tpu.matmul %102, %104, %cst_60 {dimension_numbers = #tpu.dot_dimension_numbers<[1], [0], [0], [1], [0, 0, 1, 1], [], []>} : vector<128x128xbf16>, vector<128x128xbf16>, vector<128x128xf32> -> vector<128x128xf32>
    %106 = arith.addf %101, %105 : vector<128x128xf32>
    %107 = vector.shape_cast %91 : vector<8x16x128xbf16> to vector<128x128xbf16>
    %c3_61 = arith.constant 3 : index
    %c0_62 = arith.constant 0 : index
    %c0_63 = arith.constant 0 : index
    %108 = vector.load %arg6[%c3_61, %c0_62, %c0_63] : memref<5x128x128xbf16, #tpu.memory_space<vmem>>, vector<1x128x128xbf16>
    %109 = vector.shape_cast %108 : vector<1x128x128xbf16> to vector<128x128xbf16>
    %cst_64 = arith.constant dense<0.000000e+00> : vector<128x128xf32>
    %110 = tpu.matmul %107, %109, %cst_64 {dimension_numbers = #tpu.dot_dimension_numbers<[1], [0], [0], [1], [0, 0, 1, 1], [], []>} : vector<128x128xbf16>, vector<128x128xbf16>, vector<128x128xf32> -> vector<128x128xf32>
    %111 = arith.addf %106, %110 : vector<128x128xf32>
    %112 = vector.shape_cast %92 : vector<8x16x128xbf16> to vector<128x128xbf16>
    %c4_65 = arith.constant 4 : index
    %c0_66 = arith.constant 0 : index
    %c0_67 = arith.constant 0 : index
    %113 = vector.load %arg6[%c4_65, %c0_66, %c0_67] : memref<5x128x128xbf16, #tpu.memory_space<vmem>>, vector<1x128x128xbf16>
    %114 = vector.shape_cast %113 : vector<1x128x128xbf16> to vector<128x128xbf16>
    %cst_68 = arith.constant dense<0.000000e+00> : vector<128x128xf32>
    %115 = tpu.matmul %112, %114, %cst_68 {dimension_numbers = #tpu.dot_dimension_numbers<[1], [0], [0], [1], [0, 0, 1, 1], [], []>} : vector<128x128xbf16>, vector<128x128xbf16>, vector<128x128xf32> -> vector<128x128xf32>
    %116 = arith.addf %111, %115 : vector<128x128xf32>
    %117 = vector.shape_cast %6 : vector<8x16x128xbf16> to vector<128x128xbf16>
    %c0_69 = arith.constant 0 : index
    %c0_70 = arith.constant 0 : index
    %c0_71 = arith.constant 0 : index
    %118 = vector.load %arg7[%c0_69, %c0_70, %c0_71] : memref<5x128x128xbf16, #tpu.memory_space<vmem>>, vector<1x128x128xbf16>
    %119 = vector.shape_cast %118 : vector<1x128x128xbf16> to vector<128x128xbf16>
    %cst_72 = arith.constant dense<0.000000e+00> : vector<128x128xf32>
    %120 = tpu.matmul %117, %119, %cst_72 {dimension_numbers = #tpu.dot_dimension_numbers<[1], [0], [0], [1], [0, 0, 1, 1], [], []>} : vector<128x128xbf16>, vector<128x128xbf16>, vector<128x128xf32> -> vector<128x128xf32>
    %121 = arith.addf %116, %120 : vector<128x128xf32>
    %122 = vector.shape_cast %7 : vector<8x16x128xbf16> to vector<128x128xbf16>
    %c1_73 = arith.constant 1 : index
    %c0_74 = arith.constant 0 : index
    %c0_75 = arith.constant 0 : index
    %123 = vector.load %arg7[%c1_73, %c0_74, %c0_75] : memref<5x128x128xbf16, #tpu.memory_space<vmem>>, vector<1x128x128xbf16>
    %124 = vector.shape_cast %123 : vector<1x128x128xbf16> to vector<128x128xbf16>
    %cst_76 = arith.constant dense<0.000000e+00> : vector<128x128xf32>
    %125 = tpu.matmul %122, %124, %cst_76 {dimension_numbers = #tpu.dot_dimension_numbers<[1], [0], [0], [1], [0, 0, 1, 1], [], []>} : vector<128x128xbf16>, vector<128x128xbf16>, vector<128x128xf32> -> vector<128x128xf32>
    %126 = arith.addf %121, %125 : vector<128x128xf32>
    %127 = vector.shape_cast %8 : vector<8x16x128xbf16> to vector<128x128xbf16>
    %c2_77 = arith.constant 2 : index
    %c0_78 = arith.constant 0 : index
    %c0_79 = arith.constant 0 : index
    %128 = vector.load %arg7[%c2_77, %c0_78, %c0_79] : memref<5x128x128xbf16, #tpu.memory_space<vmem>>, vector<1x128x128xbf16>
    %129 = vector.shape_cast %128 : vector<1x128x128xbf16> to vector<128x128xbf16>
    %cst_80 = arith.constant dense<0.000000e+00> : vector<128x128xf32>
    %130 = tpu.matmul %127, %129, %cst_80 {dimension_numbers = #tpu.dot_dimension_numbers<[1], [0], [0], [1], [0, 0, 1, 1], [], []>} : vector<128x128xbf16>, vector<128x128xbf16>, vector<128x128xf32> -> vector<128x128xf32>
    %131 = arith.addf %126, %130 : vector<128x128xf32>
    %132 = vector.shape_cast %9 : vector<8x16x128xbf16> to vector<128x128xbf16>
    %c3_81 = arith.constant 3 : index
    %c0_82 = arith.constant 0 : index
    %c0_83 = arith.constant 0 : index
    %133 = vector.load %arg7[%c3_81, %c0_82, %c0_83] : memref<5x128x128xbf16, #tpu.memory_space<vmem>>, vector<1x128x128xbf16>
    %134 = vector.shape_cast %133 : vector<1x128x128xbf16> to vector<128x128xbf16>
    %cst_84 = arith.constant dense<0.000000e+00> : vector<128x128xf32>
    %135 = tpu.matmul %132, %134, %cst_84 {dimension_numbers = #tpu.dot_dimension_numbers<[1], [0], [0], [1], [0, 0, 1, 1], [], []>} : vector<128x128xbf16>, vector<128x128xbf16>, vector<128x128xf32> -> vector<128x128xf32>
    %136 = arith.addf %131, %135 : vector<128x128xf32>
    %137 = vector.shape_cast %10 : vector<8x16x128xbf16> to vector<128x128xbf16>
    %c4_85 = arith.constant 4 : index
    %c0_86 = arith.constant 0 : index
    %c0_87 = arith.constant 0 : index
    %138 = vector.load %arg7[%c4_85, %c0_86, %c0_87] : memref<5x128x128xbf16, #tpu.memory_space<vmem>>, vector<1x128x128xbf16>
    %139 = vector.shape_cast %138 : vector<1x128x128xbf16> to vector<128x128xbf16>
    %cst_88 = arith.constant dense<0.000000e+00> : vector<128x128xf32>
    %140 = tpu.matmul %137, %139, %cst_88 {dimension_numbers = #tpu.dot_dimension_numbers<[1], [0], [0], [1], [0, 0, 1, 1], [], []>} : vector<128x128xbf16>, vector<128x128xbf16>, vector<128x128xf32> -> vector<128x128xf32>
    %141 = arith.addf %136, %140 : vector<128x128xf32>
    %c0_89 = arith.constant 0 : index
    %c0_90 = arith.constant 0 : index
    %142 = vector.load %arg8[%c0_89, %c0_90] : memref<1x128xf32, #tpu.memory_space<vmem>>, vector<1x128xf32>
    %143 = vector.broadcast %142 : vector<1x128xf32> to vector<128x128xf32>
    %144 = arith.addf %141, %143 : vector<128x128xf32>
    %145 = math.tanh %144 : vector<128x128xf32>
    %146 = vector.shape_cast %145 : vector<128x128xf32> to vector<8x16x128xf32>
    %cst_91 = arith.constant 1.000000e+00 : f32
    %147 = vector.broadcast %cst_91 : f32 to vector<8x16x128xf32>
    %148 = arith.subf %147, %77 : vector<8x16x128xf32>
    %149 = arith.mulf %148, %1 : vector<8x16x128xf32>
    %150 = arith.mulf %77, %146 : vector<8x16x128xf32>
    %151 = arith.addf %149, %150 : vector<8x16x128xf32>
    %cst_92 = arith.constant 0.000000e+00 : bf16
    %152 = vector.broadcast %cst_92 : bf16 to vector<2x16x128xbf16>
    %153 = tpu.concatenate %152, %3, %152 in 0 : vector<2x16x128xbf16>, vector<8x16x128xbf16>, vector<2x16x128xbf16> -> vector<12x16x128xbf16>
    %154 = vector.extract_strided_slice %153 {offsets = [0, 0, 0], sizes = [8, 16, 128], strides = [1, 1, 1]} : vector<12x16x128xbf16> to vector<8x16x128xbf16>
    %155 = vector.extract_strided_slice %153 {offsets = [1, 0, 0], sizes = [8, 16, 128], strides = [1, 1, 1]} : vector<12x16x128xbf16> to vector<8x16x128xbf16>
    %156 = vector.extract_strided_slice %153 {offsets = [2, 0, 0], sizes = [8, 16, 128], strides = [1, 1, 1]} : vector<12x16x128xbf16> to vector<8x16x128xbf16>
    %157 = vector.extract_strided_slice %153 {offsets = [3, 0, 0], sizes = [8, 16, 128], strides = [1, 1, 1]} : vector<12x16x128xbf16> to vector<8x16x128xbf16>
    %158 = vector.extract_strided_slice %153 {offsets = [4, 0, 0], sizes = [8, 16, 128], strides = [1, 1, 1]} : vector<12x16x128xbf16> to vector<8x16x128xbf16>
    %159 = arith.truncf %151 : vector<8x16x128xf32> to vector<8x16x128xbf16>
    %cst_93 = arith.constant 0.000000e+00 : bf16
    %160 = vector.broadcast %cst_93 : bf16 to vector<2x16x128xbf16>
    %161 = tpu.concatenate %160, %159, %160 in 0 : vector<2x16x128xbf16>, vector<8x16x128xbf16>, vector<2x16x128xbf16> -> vector<12x16x128xbf16>
    %162 = vector.extract_strided_slice %161 {offsets = [0, 0, 0], sizes = [8, 16, 128], strides = [1, 1, 1]} : vector<12x16x128xbf16> to vector<8x16x128xbf16>
    %163 = vector.extract_strided_slice %161 {offsets = [1, 0, 0], sizes = [8, 16, 128], strides = [1, 1, 1]} : vector<12x16x128xbf16> to vector<8x16x128xbf16>
    %164 = vector.extract_strided_slice %161 {offsets = [2, 0, 0], sizes = [8, 16, 128], strides = [1, 1, 1]} : vector<12x16x128xbf16> to vector<8x16x128xbf16>
    %165 = vector.extract_strided_slice %161 {offsets = [3, 0, 0], sizes = [8, 16, 128], strides = [1, 1, 1]} : vector<12x16x128xbf16> to vector<8x16x128xbf16>
    %166 = vector.extract_strided_slice %161 {offsets = [4, 0, 0], sizes = [8, 16, 128], strides = [1, 1, 1]} : vector<12x16x128xbf16> to vector<8x16x128xbf16>
    %167 = vector.shape_cast %162 : vector<8x16x128xbf16> to vector<128x128xbf16>
    %c0_94 = arith.constant 0 : index
    %c0_95 = arith.constant 0 : index
    %c0_96 = arith.constant 0 : index
    %168 = vector.load %arg9[%c0_94, %c0_95, %c0_96] : memref<5x128x256xbf16, #tpu.memory_space<vmem>>, vector<1x128x256xbf16>
    %169 = vector.shape_cast %168 : vector<1x128x256xbf16> to vector<128x256xbf16>
    %cst_97 = arith.constant dense<0.000000e+00> : vector<128x256xf32>
    %170 = tpu.matmul %167, %169, %cst_97 {dimension_numbers = #tpu.dot_dimension_numbers<[1], [0], [0], [1], [0, 0, 1, 1], [], []>} : vector<128x128xbf16>, vector<128x256xbf16>, vector<128x256xf32> -> vector<128x256xf32>
    %171 = vector.shape_cast %163 : vector<8x16x128xbf16> to vector<128x128xbf16>
    %c1_98 = arith.constant 1 : index
    %c0_99 = arith.constant 0 : index
    %c0_100 = arith.constant 0 : index
    %172 = vector.load %arg9[%c1_98, %c0_99, %c0_100] : memref<5x128x256xbf16, #tpu.memory_space<vmem>>, vector<1x128x256xbf16>
    %173 = vector.shape_cast %172 : vector<1x128x256xbf16> to vector<128x256xbf16>
    %cst_101 = arith.constant dense<0.000000e+00> : vector<128x256xf32>
    %174 = tpu.matmul %171, %173, %cst_101 {dimension_numbers = #tpu.dot_dimension_numbers<[1], [0], [0], [1], [0, 0, 1, 1], [], []>} : vector<128x128xbf16>, vector<128x256xbf16>, vector<128x256xf32> -> vector<128x256xf32>
    %175 = arith.addf %170, %174 : vector<128x256xf32>
    %176 = vector.shape_cast %164 : vector<8x16x128xbf16> to vector<128x128xbf16>
    %c2_102 = arith.constant 2 : index
    %c0_103 = arith.constant 0 : index
    %c0_104 = arith.constant 0 : index
    %177 = vector.load %arg9[%c2_102, %c0_103, %c0_104] : memref<5x128x256xbf16, #tpu.memory_space<vmem>>, vector<1x128x256xbf16>
    %178 = vector.shape_cast %177 : vector<1x128x256xbf16> to vector<128x256xbf16>
    %cst_105 = arith.constant dense<0.000000e+00> : vector<128x256xf32>
    %179 = tpu.matmul %176, %178, %cst_105 {dimension_numbers = #tpu.dot_dimension_numbers<[1], [0], [0], [1], [0, 0, 1, 1], [], []>} : vector<128x128xbf16>, vector<128x256xbf16>, vector<128x256xf32> -> vector<128x256xf32>
    %180 = arith.addf %175, %179 : vector<128x256xf32>
    %181 = vector.shape_cast %165 : vector<8x16x128xbf16> to vector<128x128xbf16>
    %c3_106 = arith.constant 3 : index
    %c0_107 = arith.constant 0 : index
    %c0_108 = arith.constant 0 : index
    %182 = vector.load %arg9[%c3_106, %c0_107, %c0_108] : memref<5x128x256xbf16, #tpu.memory_space<vmem>>, vector<1x128x256xbf16>
    %183 = vector.shape_cast %182 : vector<1x128x256xbf16> to vector<128x256xbf16>
    %cst_109 = arith.constant dense<0.000000e+00> : vector<128x256xf32>
    %184 = tpu.matmul %181, %183, %cst_109 {dimension_numbers = #tpu.dot_dimension_numbers<[1], [0], [0], [1], [0, 0, 1, 1], [], []>} : vector<128x128xbf16>, vector<128x256xbf16>, vector<128x256xf32> -> vector<128x256xf32>
    %185 = arith.addf %180, %184 : vector<128x256xf32>
    %186 = vector.shape_cast %166 : vector<8x16x128xbf16> to vector<128x128xbf16>
    %c4_110 = arith.constant 4 : index
    %c0_111 = arith.constant 0 : index
    %c0_112 = arith.constant 0 : index
    %187 = vector.load %arg9[%c4_110, %c0_111, %c0_112] : memref<5x128x256xbf16, #tpu.memory_space<vmem>>, vector<1x128x256xbf16>
    %188 = vector.shape_cast %187 : vector<1x128x256xbf16> to vector<128x256xbf16>
    %cst_113 = arith.constant dense<0.000000e+00> : vector<128x256xf32>
    %189 = tpu.matmul %186, %188, %cst_113 {dimension_numbers = #tpu.dot_dimension_numbers<[1], [0], [0], [1], [0, 0, 1, 1], [], []>} : vector<128x128xbf16>, vector<128x256xbf16>, vector<128x256xf32> -> vector<128x256xf32>
    %190 = arith.addf %185, %189 : vector<128x256xf32>
    %191 = vector.shape_cast %154 : vector<8x16x128xbf16> to vector<128x128xbf16>
    %c0_114 = arith.constant 0 : index
    %c0_115 = arith.constant 0 : index
    %c0_116 = arith.constant 0 : index
    %192 = vector.load %arg10[%c0_114, %c0_115, %c0_116] : memref<5x128x256xbf16, #tpu.memory_space<vmem>>, vector<1x128x256xbf16>
    %193 = vector.shape_cast %192 : vector<1x128x256xbf16> to vector<128x256xbf16>
    %cst_117 = arith.constant dense<0.000000e+00> : vector<128x256xf32>
    %194 = tpu.matmul %191, %193, %cst_117 {dimension_numbers = #tpu.dot_dimension_numbers<[1], [0], [0], [1], [0, 0, 1, 1], [], []>} : vector<128x128xbf16>, vector<128x256xbf16>, vector<128x256xf32> -> vector<128x256xf32>
    %195 = arith.addf %190, %194 : vector<128x256xf32>
    %196 = vector.shape_cast %155 : vector<8x16x128xbf16> to vector<128x128xbf16>
    %c1_118 = arith.constant 1 : index
    %c0_119 = arith.constant 0 : index
    %c0_120 = arith.constant 0 : index
    %197 = vector.load %arg10[%c1_118, %c0_119, %c0_120] : memref<5x128x256xbf16, #tpu.memory_space<vmem>>, vector<1x128x256xbf16>
    %198 = vector.shape_cast %197 : vector<1x128x256xbf16> to vector<128x256xbf16>
    %cst_121 = arith.constant dense<0.000000e+00> : vector<128x256xf32>
    %199 = tpu.matmul %196, %198, %cst_121 {dimension_numbers = #tpu.dot_dimension_numbers<[1], [0], [0], [1], [0, 0, 1, 1], [], []>} : vector<128x128xbf16>, vector<128x256xbf16>, vector<128x256xf32> -> vector<128x256xf32>
    %200 = arith.addf %195, %199 : vector<128x256xf32>
    %201 = vector.shape_cast %156 : vector<8x16x128xbf16> to vector<128x128xbf16>
    %c2_122 = arith.constant 2 : index
    %c0_123 = arith.constant 0 : index
    %c0_124 = arith.constant 0 : index
    %202 = vector.load %arg10[%c2_122, %c0_123, %c0_124] : memref<5x128x256xbf16, #tpu.memory_space<vmem>>, vector<1x128x256xbf16>
    %203 = vector.shape_cast %202 : vector<1x128x256xbf16> to vector<128x256xbf16>
    %cst_125 = arith.constant dense<0.000000e+00> : vector<128x256xf32>
    %204 = tpu.matmul %201, %203, %cst_125 {dimension_numbers = #tpu.dot_dimension_numbers<[1], [0], [0], [1], [0, 0, 1, 1], [], []>} : vector<128x128xbf16>, vector<128x256xbf16>, vector<128x256xf32> -> vector<128x256xf32>
    %205 = arith.addf %200, %204 : vector<128x256xf32>
    %206 = vector.shape_cast %157 : vector<8x16x128xbf16> to vector<128x128xbf16>
    %c3_126 = arith.constant 3 : index
    %c0_127 = arith.constant 0 : index
    %c0_128 = arith.constant 0 : index
    %207 = vector.load %arg10[%c3_126, %c0_127, %c0_128] : memref<5x128x256xbf16, #tpu.memory_space<vmem>>, vector<1x128x256xbf16>
    %208 = vector.shape_cast %207 : vector<1x128x256xbf16> to vector<128x256xbf16>
    %cst_129 = arith.constant dense<0.000000e+00> : vector<128x256xf32>
    %209 = tpu.matmul %206, %208, %cst_129 {dimension_numbers = #tpu.dot_dimension_numbers<[1], [0], [0], [1], [0, 0, 1, 1], [], []>} : vector<128x128xbf16>, vector<128x256xbf16>, vector<128x256xf32> -> vector<128x256xf32>
    %210 = arith.addf %205, %209 : vector<128x256xf32>
    %211 = vector.shape_cast %158 : vector<8x16x128xbf16> to vector<128x128xbf16>
    %c4_130 = arith.constant 4 : index
    %c0_131 = arith.constant 0 : index
    %c0_132 = arith.constant 0 : index
    %212 = vector.load %arg10[%c4_130, %c0_131, %c0_132] : memref<5x128x256xbf16, #tpu.memory_space<vmem>>, vector<1x128x256xbf16>
    %213 = vector.shape_cast %212 : vector<1x128x256xbf16> to vector<128x256xbf16>
    %cst_133 = arith.constant dense<0.000000e+00> : vector<128x256xf32>
    %214 = tpu.matmul %211, %213, %cst_133 {dimension_numbers = #tpu.dot_dimension_numbers<[1], [0], [0], [1], [0, 0, 1, 1], [], []>} : vector<128x128xbf16>, vector<128x256xbf16>, vector<128x256xf32> -> vector<128x256xf32>
    %215 = arith.addf %210, %214 : vector<128x256xf32>
    %c0_134 = arith.constant 0 : index
    %c0_135 = arith.constant 0 : index
    %216 = vector.load %arg11[%c0_134, %c0_135] : memref<1x256xf32, #tpu.memory_space<vmem>>, vector<1x256xf32>
    %217 = vector.broadcast %216 : vector<1x256xf32> to vector<128x256xf32>
    %218 = arith.addf %215, %217 : vector<128x256xf32>
    %219 = vector.shape_cast %218 : vector<128x256xf32> to vector<8x16x256xf32>
    %220 = vector.extract_strided_slice %219 {offsets = [0, 0, 0], sizes = [8, 16, 128], strides = [1, 1, 1]} : vector<8x16x256xf32> to vector<8x16x128xf32>
    %221 = arith.negf %220 : vector<8x16x128xf32>
    %222 = math.exp %221 : vector<8x16x128xf32>
    %cst_136 = arith.constant 1.000000e+00 : f32
    %223 = vector.broadcast %cst_136 : f32 to vector<8x16x128xf32>
    %224 = arith.addf %223, %222 : vector<8x16x128xf32>
    %225 = arith.divf %223, %224 : vector<8x16x128xf32>
    %226 = vector.extract_strided_slice %219 {offsets = [0, 0, 128], sizes = [8, 16, 128], strides = [1, 1, 1]} : vector<8x16x256xf32> to vector<8x16x128xf32>
    %227 = arith.negf %226 : vector<8x16x128xf32>
    %228 = math.exp %227 : vector<8x16x128xf32>
    %cst_137 = arith.constant 1.000000e+00 : f32
    %229 = vector.broadcast %cst_137 : f32 to vector<8x16x128xf32>
    %230 = arith.addf %229, %228 : vector<8x16x128xf32>
    %231 = arith.divf %229, %230 : vector<8x16x128xf32>
    %232 = arith.mulf %231, %151 : vector<8x16x128xf32>
    %233 = arith.truncf %232 : vector<8x16x128xf32> to vector<8x16x128xbf16>
    %cst_138 = arith.constant 0.000000e+00 : bf16
    %234 = vector.broadcast %cst_138 : bf16 to vector<2x16x128xbf16>
    %235 = tpu.concatenate %234, %233, %234 in 0 : vector<2x16x128xbf16>, vector<8x16x128xbf16>, vector<2x16x128xbf16> -> vector<12x16x128xbf16>
    %236 = vector.extract_strided_slice %235 {offsets = [0, 0, 0], sizes = [8, 16, 128], strides = [1, 1, 1]} : vector<12x16x128xbf16> to vector<8x16x128xbf16>
    %237 = vector.extract_strided_slice %235 {offsets = [1, 0, 0], sizes = [8, 16, 128], strides = [1, 1, 1]} : vector<12x16x128xbf16> to vector<8x16x128xbf16>
    %238 = vector.extract_strided_slice %235 {offsets = [2, 0, 0], sizes = [8, 16, 128], strides = [1, 1, 1]} : vector<12x16x128xbf16> to vector<8x16x128xbf16>
    %239 = vector.extract_strided_slice %235 {offsets = [3, 0, 0], sizes = [8, 16, 128], strides = [1, 1, 1]} : vector<12x16x128xbf16> to vector<8x16x128xbf16>
    %240 = vector.extract_strided_slice %235 {offsets = [4, 0, 0], sizes = [8, 16, 128], strides = [1, 1, 1]} : vector<12x16x128xbf16> to vector<8x16x128xbf16>
    %241 = vector.shape_cast %236 : vector<8x16x128xbf16> to vector<128x128xbf16>
    %c0_139 = arith.constant 0 : index
    %c0_140 = arith.constant 0 : index
    %c0_141 = arith.constant 0 : index
    %242 = vector.load %arg12[%c0_139, %c0_140, %c0_141] : memref<5x128x128xbf16, #tpu.memory_space<vmem>>, vector<1x128x128xbf16>
    %243 = vector.shape_cast %242 : vector<1x128x128xbf16> to vector<128x128xbf16>
    %cst_142 = arith.constant dense<0.000000e+00> : vector<128x128xf32>
    %244 = tpu.matmul %241, %243, %cst_142 {dimension_numbers = #tpu.dot_dimension_numbers<[1], [0], [0], [1], [0, 0, 1, 1], [], []>} : vector<128x128xbf16>, vector<128x128xbf16>, vector<128x128xf32> -> vector<128x128xf32>
    %245 = vector.shape_cast %237 : vector<8x16x128xbf16> to vector<128x128xbf16>
    %c1_143 = arith.constant 1 : index
    %c0_144 = arith.constant 0 : index
    %c0_145 = arith.constant 0 : index
    %246 = vector.load %arg12[%c1_143, %c0_144, %c0_145] : memref<5x128x128xbf16, #tpu.memory_space<vmem>>, vector<1x128x128xbf16>
    %247 = vector.shape_cast %246 : vector<1x128x128xbf16> to vector<128x128xbf16>
    %cst_146 = arith.constant dense<0.000000e+00> : vector<128x128xf32>
    %248 = tpu.matmul %245, %247, %cst_146 {dimension_numbers = #tpu.dot_dimension_numbers<[1], [0], [0], [1], [0, 0, 1, 1], [], []>} : vector<128x128xbf16>, vector<128x128xbf16>, vector<128x128xf32> -> vector<128x128xf32>
    %249 = arith.addf %244, %248 : vector<128x128xf32>
    %250 = vector.shape_cast %238 : vector<8x16x128xbf16> to vector<128x128xbf16>
    %c2_147 = arith.constant 2 : index
    %c0_148 = arith.constant 0 : index
    %c0_149 = arith.constant 0 : index
    %251 = vector.load %arg12[%c2_147, %c0_148, %c0_149] : memref<5x128x128xbf16, #tpu.memory_space<vmem>>, vector<1x128x128xbf16>
    %252 = vector.shape_cast %251 : vector<1x128x128xbf16> to vector<128x128xbf16>
    %cst_150 = arith.constant dense<0.000000e+00> : vector<128x128xf32>
    %253 = tpu.matmul %250, %252, %cst_150 {dimension_numbers = #tpu.dot_dimension_numbers<[1], [0], [0], [1], [0, 0, 1, 1], [], []>} : vector<128x128xbf16>, vector<128x128xbf16>, vector<128x128xf32> -> vector<128x128xf32>
    %254 = arith.addf %249, %253 : vector<128x128xf32>
    %255 = vector.shape_cast %239 : vector<8x16x128xbf16> to vector<128x128xbf16>
    %c3_151 = arith.constant 3 : index
    %c0_152 = arith.constant 0 : index
    %c0_153 = arith.constant 0 : index
    %256 = vector.load %arg12[%c3_151, %c0_152, %c0_153] : memref<5x128x128xbf16, #tpu.memory_space<vmem>>, vector<1x128x128xbf16>
    %257 = vector.shape_cast %256 : vector<1x128x128xbf16> to vector<128x128xbf16>
    %cst_154 = arith.constant dense<0.000000e+00> : vector<128x128xf32>
    %258 = tpu.matmul %255, %257, %cst_154 {dimension_numbers = #tpu.dot_dimension_numbers<[1], [0], [0], [1], [0, 0, 1, 1], [], []>} : vector<128x128xbf16>, vector<128x128xbf16>, vector<128x128xf32> -> vector<128x128xf32>
    %259 = arith.addf %254, %258 : vector<128x128xf32>
    %260 = vector.shape_cast %240 : vector<8x16x128xbf16> to vector<128x128xbf16>
    %c4_155 = arith.constant 4 : index
    %c0_156 = arith.constant 0 : index
    %c0_157 = arith.constant 0 : index
    %261 = vector.load %arg12[%c4_155, %c0_156, %c0_157] : memref<5x128x128xbf16, #tpu.memory_space<vmem>>, vector<1x128x128xbf16>
    %262 = vector.shape_cast %261 : vector<1x128x128xbf16> to vector<128x128xbf16>
    %cst_158 = arith.constant dense<0.000000e+00> : vector<128x128xf32>
    %263 = tpu.matmul %260, %262, %cst_158 {dimension_numbers = #tpu.dot_dimension_numbers<[1], [0], [0], [1], [0, 0, 1, 1], [], []>} : vector<128x128xbf16>, vector<128x128xbf16>, vector<128x128xf32> -> vector<128x128xf32>
    %264 = arith.addf %259, %263 : vector<128x128xf32>
    %265 = vector.shape_cast %154 : vector<8x16x128xbf16> to vector<128x128xbf16>
    %c0_159 = arith.constant 0 : index
    %c0_160 = arith.constant 0 : index
    %c0_161 = arith.constant 0 : index
    %266 = vector.load %arg13[%c0_159, %c0_160, %c0_161] : memref<5x128x128xbf16, #tpu.memory_space<vmem>>, vector<1x128x128xbf16>
    %267 = vector.shape_cast %266 : vector<1x128x128xbf16> to vector<128x128xbf16>
    %cst_162 = arith.constant dense<0.000000e+00> : vector<128x128xf32>
    %268 = tpu.matmul %265, %267, %cst_162 {dimension_numbers = #tpu.dot_dimension_numbers<[1], [0], [0], [1], [0, 0, 1, 1], [], []>} : vector<128x128xbf16>, vector<128x128xbf16>, vector<128x128xf32> -> vector<128x128xf32>
    %269 = arith.addf %264, %268 : vector<128x128xf32>
    %270 = vector.shape_cast %155 : vector<8x16x128xbf16> to vector<128x128xbf16>
    %c1_163 = arith.constant 1 : index
    %c0_164 = arith.constant 0 : index
    %c0_165 = arith.constant 0 : index
    %271 = vector.load %arg13[%c1_163, %c0_164, %c0_165] : memref<5x128x128xbf16, #tpu.memory_space<vmem>>, vector<1x128x128xbf16>
    %272 = vector.shape_cast %271 : vector<1x128x128xbf16> to vector<128x128xbf16>
    %cst_166 = arith.constant dense<0.000000e+00> : vector<128x128xf32>
    %273 = tpu.matmul %270, %272, %cst_166 {dimension_numbers = #tpu.dot_dimension_numbers<[1], [0], [0], [1], [0, 0, 1, 1], [], []>} : vector<128x128xbf16>, vector<128x128xbf16>, vector<128x128xf32> -> vector<128x128xf32>
    %274 = arith.addf %269, %273 : vector<128x128xf32>
    %275 = vector.shape_cast %156 : vector<8x16x128xbf16> to vector<128x128xbf16>
    %c2_167 = arith.constant 2 : index
    %c0_168 = arith.constant 0 : index
    %c0_169 = arith.constant 0 : index
    %276 = vector.load %arg13[%c2_167, %c0_168, %c0_169] : memref<5x128x128xbf16, #tpu.memory_space<vmem>>, vector<1x128x128xbf16>
    %277 = vector.shape_cast %276 : vector<1x128x128xbf16> to vector<128x128xbf16>
    %cst_170 = arith.constant dense<0.000000e+00> : vector<128x128xf32>
    %278 = tpu.matmul %275, %277, %cst_170 {dimension_numbers = #tpu.dot_dimension_numbers<[1], [0], [0], [1], [0, 0, 1, 1], [], []>} : vector<128x128xbf16>, vector<128x128xbf16>, vector<128x128xf32> -> vector<128x128xf32>
    %279 = arith.addf %274, %278 : vector<128x128xf32>
    %280 = vector.shape_cast %157 : vector<8x16x128xbf16> to vector<128x128xbf16>
    %c3_171 = arith.constant 3 : index
    %c0_172 = arith.constant 0 : index
    %c0_173 = arith.constant 0 : index
    %281 = vector.load %arg13[%c3_171, %c0_172, %c0_173] : memref<5x128x128xbf16, #tpu.memory_space<vmem>>, vector<1x128x128xbf16>
    %282 = vector.shape_cast %281 : vector<1x128x128xbf16> to vector<128x128xbf16>
    %cst_174 = arith.constant dense<0.000000e+00> : vector<128x128xf32>
    %283 = tpu.matmul %280, %282, %cst_174 {dimension_numbers = #tpu.dot_dimension_numbers<[1], [0], [0], [1], [0, 0, 1, 1], [], []>} : vector<128x128xbf16>, vector<128x128xbf16>, vector<128x128xf32> -> vector<128x128xf32>
    %284 = arith.addf %279, %283 : vector<128x128xf32>
    %285 = vector.shape_cast %158 : vector<8x16x128xbf16> to vector<128x128xbf16>
    %c4_175 = arith.constant 4 : index
    %c0_176 = arith.constant 0 : index
    %c0_177 = arith.constant 0 : index
    %286 = vector.load %arg13[%c4_175, %c0_176, %c0_177] : memref<5x128x128xbf16, #tpu.memory_space<vmem>>, vector<1x128x128xbf16>
    %287 = vector.shape_cast %286 : vector<1x128x128xbf16> to vector<128x128xbf16>
    %cst_178 = arith.constant dense<0.000000e+00> : vector<128x128xf32>
    %288 = tpu.matmul %285, %287, %cst_178 {dimension_numbers = #tpu.dot_dimension_numbers<[1], [0], [0], [1], [0, 0, 1, 1], [], []>} : vector<128x128xbf16>, vector<128x128xbf16>, vector<128x128xf32> -> vector<128x128xf32>
    %289 = arith.addf %284, %288 : vector<128x128xf32>
    %c0_179 = arith.constant 0 : index
    %c0_180 = arith.constant 0 : index
    %290 = vector.load %arg14[%c0_179, %c0_180] : memref<1x128xf32, #tpu.memory_space<vmem>>, vector<1x128xf32>
    %291 = vector.broadcast %290 : vector<1x128xf32> to vector<128x128xf32>
    %292 = arith.addf %289, %291 : vector<128x128xf32>
    %293 = math.tanh %292 : vector<128x128xf32>
    %294 = vector.shape_cast %293 : vector<128x128xf32> to vector<8x16x128xf32>
    %cst_181 = arith.constant 1.000000e+00 : f32
    %295 = vector.broadcast %cst_181 : f32 to vector<8x16x128xf32>
    %296 = arith.subf %295, %225 : vector<8x16x128xf32>
    %297 = arith.mulf %296, %151 : vector<8x16x128xf32>
    %298 = arith.mulf %225, %294 : vector<8x16x128xf32>
    %299 = arith.addf %297, %298 : vector<8x16x128xf32>
    %c0_182 = arith.constant 0 : index
    %c0_183 = arith.constant 0 : index
    %c0_184 = arith.constant 0 : index
    %c0_185 = arith.constant 0 : index
    %300 = vector.load %arg15[%c0_182, %c0_183, %c0_184, %c0_185] : memref<1x8x16x128xf32, #tpu.memory_space<vmem>>, vector<1x8x16x128xf32>
    %301 = vector.shape_cast %300 : vector<1x8x16x128xf32> to vector<8x16x128xf32>
    %302 = vector.shape_cast %299 : vector<8x16x128xf32> to vector<1x8x16x128xf32>
    tpu.vector_store %arg15[%c0_182, %c0_183, %c0_184, %c0_185], %302 {strides = array<i32>} : memref<1x8x16x128xf32, #tpu.memory_space<vmem>>, vector<1x8x16x128xf32>,
    return
  }
  func.func @transform_0(%arg0: i32) -> (i32, i32, i32, i32) {
    %c0_i32 = arith.constant 0 : i32
    %c0_i32_0 = arith.constant 0 : i32
    %c0_i32_1 = arith.constant 0 : i32
    %c0_i32_2 = arith.constant 0 : i32
    return %arg0, %c0_i32, %c0_i32_0, %c0_i32_1 : i32, i32, i32, i32
  }
  func.func @transform_1(%arg0: i32) -> (i32, i32, i32, i32) {
    %c0_i32 = arith.constant 0 : i32
    %c0_i32_0 = arith.constant 0 : i32
    %c0_i32_1 = arith.constant 0 : i32
    %c0_i32_2 = arith.constant 0 : i32
    return %arg0, %c0_i32, %c0_i32_0, %c0_i32_1 : i32, i32, i32, i32
  }
  func.func @transform_2(%arg0: i32) -> (i32, i32, i32) {
    %c0_i32 = arith.constant 0 : i32
    %c0_i32_0 = arith.constant 0 : i32
    %c0_i32_1 = arith.constant 0 : i32
    %c0_i32_2 = arith.constant 0 : i32
    return %c0_i32, %c0_i32_0, %c0_i32_1 : i32, i32, i32
  }
  func.func @transform_3(%arg0: i32) -> (i32, i32, i32) {
    %c0_i32 = arith.constant 0 : i32
    %c0_i32_0 = arith.constant 0 : i32
    %c0_i32_1 = arith.constant 0 : i32
    %c0_i32_2 = arith.constant 0 : i32
    return %c0_i32, %c0_i32_0, %c0_i32_1 : i32, i32, i32
  }
  func.func @transform_4(%arg0: i32) -> (i32, i32) {
    %c0_i32 = arith.constant 0 : i32
    %c0_i32_0 = arith.constant 0 : i32
    %c0_i32_1 = arith.constant 0 : i32
    return %c0_i32, %c0_i32_0 : i32, i32
  }
  func.func @transform_5(%arg0: i32) -> (i32, i32, i32) {
    %c0_i32 = arith.constant 0 : i32
    %c0_i32_0 = arith.constant 0 : i32
    %c0_i32_1 = arith.constant 0 : i32
    %c0_i32_2 = arith.constant 0 : i32
    return %c0_i32, %c0_i32_0, %c0_i32_1 : i32, i32, i32
  }
  func.func @transform_6(%arg0: i32) -> (i32, i32, i32) {
    %c0_i32 = arith.constant 0 : i32
    %c0_i32_0 = arith.constant 0 : i32
    %c0_i32_1 = arith.constant 0 : i32
    %c0_i32_2 = arith.constant 0 : i32
    return %c0_i32, %c0_i32_0, %c0_i32_1 : i32, i32, i32
  }
  func.func @transform_7(%arg0: i32) -> (i32, i32) {
    %c0_i32 = arith.constant 0 : i32
    %c0_i32_0 = arith.constant 0 : i32
    %c0_i32_1 = arith.constant 0 : i32
    return %c0_i32, %c0_i32_0 : i32, i32
  }
  func.func @transform_8(%arg0: i32) -> (i32, i32, i32) {
    %c0_i32 = arith.constant 0 : i32
    %c0_i32_0 = arith.constant 0 : i32
    %c0_i32_1 = arith.constant 0 : i32
    %c0_i32_2 = arith.constant 0 : i32
    return %c0_i32, %c0_i32_0, %c0_i32_1 : i32, i32, i32
  }
  func.func @transform_9(%arg0: i32) -> (i32, i32, i32) {
    %c0_i32 = arith.constant 0 : i32
    %c0_i32_0 = arith.constant 0 : i32
    %c0_i32_1 = arith.constant 0 : i32
    %c0_i32_2 = arith.constant 0 : i32
    return %c0_i32, %c0_i32_0, %c0_i32_1 : i32, i32, i32
  }
  func.func @transform_10(%arg0: i32) -> (i32, i32) {
    %c0_i32 = arith.constant 0 : i32
    %c0_i32_0 = arith.constant 0 : i32
    %c0_i32_1 = arith.constant 0 : i32
    return %c0_i32, %c0_i32_0 : i32, i32
  }
  func.func @transform_11(%arg0: i32) -> (i32, i32, i32) {
    %c0_i32 = arith.constant 0 : i32
    %c0_i32_0 = arith.constant 0 : i32
    %c0_i32_1 = arith.constant 0 : i32
    %c0_i32_2 = arith.constant 0 : i32
    return %c0_i32, %c0_i32_0, %c0_i32_1 : i32, i32, i32
  }
  func.func @transform_12(%arg0: i32) -> (i32, i32, i32) {
    %c0_i32 = arith.constant 0 : i32
    %c0_i32_0 = arith.constant 0 : i32
    %c0_i32_1 = arith.constant 0 : i32
    %c0_i32_2 = arith.constant 0 : i32
    return %c0_i32, %c0_i32_0, %c0_i32_1 : i32, i32, i32
  }
  func.func @transform_13(%arg0: i32) -> (i32, i32) {
    %c0_i32 = arith.constant 0 : i32
    %c0_i32_0 = arith.constant 0 : i32
    %c0_i32_1 = arith.constant 0 : i32
    return %c0_i32, %c0_i32_0 : i32, i32
  }
  func.func @transform_14(%arg0: i32) -> (i32, i32, i32, i32) {
    %c0_i32 = arith.constant 0 : i32
    %c0_i32_0 = arith.constant 0 : i32
    %c0_i32_1 = arith.constant 0 : i32
    %c0_i32_2 = arith.constant 0 : i32
    return %arg0, %c0_i32, %c0_i32_0, %c0_i32_1 : i32, i32, i32, i32
  }
}

</mosaic_0001>

<bundles_post_ra>
// kernel: tpu_custom_call.1
= control target key start
LH: loop header
LB: loop body
LE: loop exit
PB: predicated region body
PF: predicated region fallthrough
CT: control target
= control target key end

     0   :  { %8 = vsyncpa [#allocation3], 0  ;;  %s472_s0 = inlined_call_operand.hbm [shape: f32[8,16,128], index: 0, kind: input, shape index: {}]   ;;  %s473_s1 = inlined_call_operand.hbm [shape: f32[8,16,128], index: 1, kind: output, shape index: {0}]   ;;  %s474_s2 = inlined_call_operand.hbm [shape: f32[8,16,128], index: 2, kind: output, shape index: {1}]  }
   0x1   :  { %9 = vsyncpa [#allocation4], 0 }
   0x2   :  { %10 = vsyncpa [#allocation7], 0  ;;  %s268_s9 = smov [#allocation2]   ;;  %s196_s13 = scalar_lea.hbm %s472_s0, 2048 }
   0x3   :  { %s16_s10 = sshll.u32 %s268_s9, 4  ;;  %p197_p0 = scmp.ne.s32.totalorder %s472_s0, %s196_s13  ;;  %s17_s10 = int_to_ptr.vmem [resolvable:$true] %s16_s10 }
   0x4   :  { %p200_p1 = scmp.lt.u32.totalorder %s196_s13, %s472_s0 }
   0x6   :  { %p202_p2 = pnand %p200_p1, %p197_p0 }
   0x8   :  { %205 = shalt.err (!%p202_p2)
}
   0x9   :  { %s206_s18 = scalar_lea.vmem %s17_s10, 2048  ;;  %p211_p4 = scmp.lt.s32.totalorder %s17_s10, %s17_s10 }
   0xa   :  { %p207_p3 = scmp.ne.s32.totalorder %s17_s10, %s206_s18  ;;  %p212_p5 = scmp.lt.s32.totalorder %s206_s18, %s206_s18 }
   0xc   :  { %p213_p6 = por %p212_p5, %p211_p4 }
   0xe   :  { %p214_p7 = pnand %p213_p6, %p207_p3 }
  0x10   :  { %217 = shalt.err (!%p214_p7)
}
  0x11   :  { %s269_s19 = smov 128   ;;  %s270_s20 = smov 8  }
  0x12   :  { %22 = dma.hbm_to_vmem [thread:$0]  %s472_s0, 2048, %s17_s10, [#allocation3], %s269_s19, %s269_s19, %s270_s20  }
  0x13   :  { %262 = dma.done.wait [#allocation3], 2048  }
  0x14   :  { %263 = vsyncadd [#allocation3], 4294965248  ;;  %v58_v0 = vlaneseq  ;;  %v305_v2 = vld [vmem:[#allocation2] sm:$0xff]  ;;  %v307_v3 = vld [vmem:[#allocation2 + $0x8] sm:$0xff]  ;;  %s271_s0 = smov [#allocation5]  }
  0x15   :  { %v310_v4 = vld [vmem:[#allocation2 + $0x10] sm:$0xff]  ;;  %v42_v5 = vrot.slane %v305_v2, 6  ;;  %v50_v6 = vrot.slane %v307_v3, 6  ;;  %v315_v7 = vld [vmem:[#allocation2 + $0x18] sm:$0xff]  ;;  %v318_v9 = vld [vmem:[#allocation2 + $0x20] sm:$0xff]  ;;  %s163_s23 = sshll.u32 %s271_s0, 4  ;;  %s383_s23 = int_to_ptr.vmem [resolvable:$true] %s163_s23 }
  0x16   :  { %v303_v1 = vshrl.u32 %v58_v0, 7  ;;  %v43_v8 = vrot.slane %v310_v4, 6  ;;  %v320_v10 = vld [vmem:[#allocation2 + $0x28] sm:$0xff]  ;;  %v51_v11 = vrot.slane %v315_v7, 6  ;;  %v44_v12 = vrot.slane %v318_v9, 6  ;;  %v325_v14 = vld [vmem:[#allocation2 + $0x30] sm:$0xff]  ;;  %p223_p9 = scmp.lt.s32.totalorder %s383_s23, %s383_s23 }
  0x17   :  { %v52_v13 = vrot.slane %v320_v10, 6  ;;  %v327_v15 = vld [vmem:[#allocation2 + $0x38] sm:$0xff]  ;;  %v329_v16 = vld [vmem:[#allocation2 + $0x40] sm:$0xff]  ;;  %v45_v19 = vrot.slane %v325_v14, 6  ;;  %v337_v21 = vld [vmem:[#allocation2 + $0x48] sm:$0xff]  ;;  %v109_v50 = vrot.slane %v305_v2, 1 }
  0x18   :  { %vm60_vm0 = vcmp.lt.s32.totalorder %v303_v1, 2  ;;  %vm125_vm1 = vcmp.lt.s32.totalorder %v303_v1, 7  ;;  %v53_v20 = vrot.slane %v327_v15, 6  ;;  %v339_v22 = vld [vmem:[#allocation2 + $0x50] sm:$0xff]  ;;  %v341_v23 = vld [vmem:[#allocation2 + $0x58] sm:$0xff]  ;;  %v351_v28 = vld [vmem:[#allocation2 + $0x60] sm:$0xff] }
  0x19   :  { %v69_v17 = vsel %vm60_vm0, %v50_v6, %v42_v5  ;;  %v61_v18 = vsel %vm60_vm0, %v42_v5, %v50_v6  ;;  %v70_v24 = vsel %vm60_vm0, %v51_v11, %v43_v8  ;;  %v62_v25 = vsel %vm60_vm0, %v43_v8, %v51_v11  ;;  %v353_v29 = vld [vmem:[#allocation2 + $0x68] sm:$0xff]  ;;  %v355_v30 = vld [vmem:[#allocation2 + $0x70] sm:$0xff]  ;;  %v363_v35 = vld [vmem:[#allocation2 + $0x78] sm:$0xff]  ;;  %s218_s24 = scalar_lea.vmem %s383_s23, 2048 }
  0x1a   :  { %77 = vst [vmem:[#allocation5] sm:$0xff] %v69_v17  ;;  %78 = vst [vmem:[#allocation5 + $0x8] sm:$0xff] %v61_v18  ;;  %v71_v26 = vsel %vm60_vm0, %v52_v13, %v44_v12  ;;  %v63_v27 = vsel %vm60_vm0, %v44_v12, %v52_v13  ;;  %v72_v31 = vsel %vm60_vm0, %v53_v20, %v45_v19  ;;  %v46_v33 = vrot.slane %v329_v16, 6  ;;  %p219_p8 = scmp.ne.s32.totalorder %s383_s23, %s218_s24  ;;  %p224_p10 = scmp.lt.s32.totalorder %s218_s24, %s218_s24 }
  0x1b   :  { %79 = vst [vmem:[#allocation5 + $0x10] sm:$0xff] %v70_v24  ;;  %80 = vst [vmem:[#allocation5 + $0x18] sm:$0xff] %v62_v25  ;;  %v64_v32 = vsel %vm60_vm0, %v45_v19, %v53_v20  ;;  %v54_v34 = vrot.slane %v337_v21, 6  ;;  %v47_v36 = vrot.slane %v339_v22, 6  ;;  %v55_v37 = vrot.slane %v341_v23, 6 }
  0x1c   :  { %81 = vst [vmem:[#allocation5 + $0x20] sm:$0xff] %v71_v26  ;;  %82 = vst [vmem:[#allocation5 + $0x28] sm:$0xff] %v63_v27  ;;  %v48_v38 = vrot.slane %v351_v28, 6  ;;  %v56_v39 = vrot.slane %v353_v29, 6  ;;  %v49_v42 = vrot.slane %v355_v30, 6  ;;  %v57_v43 = vrot.slane %v363_v35, 6  ;;  %p225_p11 = por %p224_p10, %p223_p9 }
  0x1d   :  { %83 = vst [vmem:[#allocation5 + $0x30] sm:$0xff] %v72_v31  ;;  %84 = vst [vmem:[#allocation5 + $0x38] sm:$0xff] %v64_v32  ;;  %v73_v40 = vsel %vm60_vm0, %v54_v34, %v46_v33  ;;  %v65_v41 = vsel %vm60_vm0, %v46_v33, %v54_v34  ;;  %v74_v44 = vsel %vm60_vm0, %v55_v37, %v47_v36  ;;  %v117_v51 = vrot.slane %v307_v3, 1 }
  0x1e   :  { %85 = vst [vmem:[#allocation5 + $0x40] sm:$0xff] %v73_v40  ;;  %86 = vst [vmem:[#allocation5 + $0x48] sm:$0xff] %v65_v41  ;;  %v66_v45 = vsel %vm60_vm0, %v47_v36, %v55_v37  ;;  %v75_v46 = vsel %vm60_vm0, %v56_v39, %v48_v38  ;;  %v67_v47 = vsel %vm60_vm0, %v48_v38, %v56_v39  ;;  %v110_v52 = vrot.slane %v310_v4, 1  ;;  %p226_p12 = pnand %p225_p11, %p219_p8 }
  0x1f   :  { %87 = vst [vmem:[#allocation5 + $0x50] sm:$0xff] %v74_v44  ;;  %88 = vst [vmem:[#allocation5 + $0x58] sm:$0xff] %v66_v45  ;;  %v76_v48 = vsel %vm60_vm0, %v57_v43, %v49_v42  ;;  %v68_v49 = vsel %vm60_vm0, %v49_v42, %v57_v43  ;;  %v118_v53 = vrot.slane %v315_v7, 1  ;;  %v111_v54 = vrot.slane %v318_v9, 1 }
  0x20   :  { %89 = vst [vmem:[#allocation5 + $0x60] sm:$0xff] %v75_v46  ;;  %90 = vst [vmem:[#allocation5 + $0x68] sm:$0xff] %v67_v47  ;;  %v119_v55 = vrot.slane %v320_v10, 1  ;;  %v126_v56 = vsel %vm125_vm1, %v109_v50, %v117_v51  ;;  %v134_v57 = vsel %vm125_vm1, %v117_v51, %v109_v50  ;;  %v112_v58 = vrot.slane %v325_v14, 1 }
  0x21   :  { %91 = vst [vmem:[#allocation5 + $0x70] sm:$0xff] %v76_v48  ;;  %92 = vst [vmem:[#allocation5 + $0x78] sm:$0xff] %v68_v49  ;;  %v120_v59 = vrot.slane %v327_v15, 1 }
  0x22   :  { %229 = shalt.err (!%p226_p12)
}
  0x23   :  { %s230_s27 = scalar_lea.hbm %s473_s1, 2048 }
  0x24   :  { %p231_p13 = scmp.ne.s32.totalorder %s473_s1, %s230_s27  ;;  %p234_p0 = scmp.lt.u32.totalorder %s230_s27, %s473_s1 }
  0x26   :  { %p236_p1 = pnand %p234_p0, %p231_p13 }
  0x28   :  { %239 = shalt.err (!%p236_p1)
}
  0x29   :  { %169 = dma.vmem_to_hbm [thread:$0]  %s383_s23, 2048, %s473_s1, [#allocation4], %s269_s19, %s269_s19, %s270_s20   ;;  %142 = vst [vmem:[#allocation6] sm:$0xff] %v126_v56  ;;  %143 = vst [vmem:[#allocation6 + $0x8] sm:$0xff] %v134_v57  ;;  %v127_v60 = vsel %vm125_vm1, %v110_v52, %v118_v53  ;;  %v135_v61 = vsel %vm125_vm1, %v118_v53, %v110_v52  ;;  %v128_v62 = vsel %vm125_vm1, %v111_v54, %v119_v55  ;;  %v113_v3 = vrot.slane %v329_v16, 1 }
  0x2a   :  { %v136_v63 = vsel %vm125_vm1, %v119_v55, %v111_v54  ;;  %144 = vst [vmem:[#allocation6 + $0x10] sm:$0xff] %v127_v60  ;;  %145 = vst [vmem:[#allocation6 + $0x18] sm:$0xff] %v135_v61  ;;  %v129_v0 = vsel %vm125_vm1, %v112_v58, %v120_v59  ;;  %v137_v2 = vsel %vm125_vm1, %v120_v59, %v112_v58  ;;  %v121_v4 = vrot.slane %v337_v21, 1  ;;  %s272_s1 = smov [#allocation6]  }
  0x2b   :  { %146 = vst [vmem:[#allocation6 + $0x20] sm:$0xff] %v128_v62  ;;  %147 = vst [vmem:[#allocation6 + $0x28] sm:$0xff] %v136_v63  ;;  %s175_s6 = sshll.u32 %s272_s1, 4  ;;  %v114_v5 = vrot.slane %v339_v22, 1  ;;  %v122_v6 = vrot.slane %v341_v23, 1  ;;  %v115_v7 = vrot.slane %v351_v28, 1  ;;  %s176_s6 = int_to_ptr.vmem [resolvable:$true] %s175_s6 }
  0x2c   :  { %148 = vst [vmem:[#allocation6 + $0x30] sm:$0xff] %v129_v0  ;;  %149 = vst [vmem:[#allocation6 + $0x38] sm:$0xff] %v137_v2  ;;  %v123_v8 = vrot.slane %v353_v29, 1  ;;  %v130_v9 = vsel %vm125_vm1, %v113_v3, %v121_v4  ;;  %v138_v10 = vsel %vm125_vm1, %v121_v4, %v113_v3  ;;  %v116_v11 = vrot.slane %v355_v30, 1  ;;  %s240_s7 = scalar_lea.vmem %s176_s6, 2048  ;;  %p245_p3 = scmp.lt.s32.totalorder %s176_s6, %s176_s6 }
  0x2d   :  { %v124_v12 = vrot.slane %v363_v35, 1  ;;  %150 = vst [vmem:[#allocation6 + $0x40] sm:$0xff] %v130_v9  ;;  %151 = vst [vmem:[#allocation6 + $0x48] sm:$0xff] %v138_v10  ;;  %v131_v13 = vsel %vm125_vm1, %v114_v5, %v122_v6  ;;  %v139_v14 = vsel %vm125_vm1, %v122_v6, %v114_v5  ;;  %p241_p2 = scmp.ne.s32.totalorder %s176_s6, %s240_s7  ;;  %p246_p4 = scmp.lt.s32.totalorder %s240_s7, %s240_s7 }
  0x2e   :  { %v132_v15 = vsel %vm125_vm1, %v115_v7, %v123_v8  ;;  %v140_v16 = vsel %vm125_vm1, %v123_v8, %v115_v7  ;;  %152 = vst [vmem:[#allocation6 + $0x50] sm:$0xff] %v131_v13  ;;  %153 = vst [vmem:[#allocation6 + $0x58] sm:$0xff] %v139_v14 }
  0x2f   :  { %154 = vst [vmem:[#allocation6 + $0x60] sm:$0xff] %v132_v15  ;;  %155 = vst [vmem:[#allocation6 + $0x68] sm:$0xff] %v140_v16  ;;  %v133_v17 = vsel %vm125_vm1, %v116_v11, %v124_v12  ;;  %v141_v18 = vsel %vm125_vm1, %v124_v12, %v116_v11  ;;  %p247_p5 = por %p246_p4, %p245_p3 }
  0x30   :  { %156 = vst [vmem:[#allocation6 + $0x70] sm:$0xff] %v133_v17  ;;  %157 = vst [vmem:[#allocation6 + $0x78] sm:$0xff] %v141_v18 }
  0x31   :  { %p248_p6 = pnand %p247_p5, %p241_p2 }
  0x33   :  { %251 = shalt.err (!%p248_p6)
}
  0x34   :  { %s252_s10 = scalar_lea.hbm %s474_s2, 2048 }
  0x35   :  { %p253_p7 = scmp.ne.s32.totalorder %s474_s2, %s252_s10  ;;  %p256_p8 = scmp.lt.u32.totalorder %s252_s10, %s474_s2 }
  0x37   :  { %p258_p9 = pnand %p256_p8, %p253_p7 }
  0x39   :  { %261 = shalt.err (!%p258_p9)
}
  0x3a   :  { %181 = dma.vmem_to_hbm [thread:$0]  %s176_s6, 2048, %s474_s2, [#allocation7], %s269_s19, %s269_s19, %s270_s20  }
  0x3b   :  { %264 = dma.done.wait [#allocation4], 2048  }
  0x3c   :  { %265 = vsyncadd [#allocation4], 4294965248 }
  0x3d   :  { %266 = dma.done.wait [#allocation7], 2048  }
  0x3e   :  { %267 = vsyncadd [#allocation7], 4294965248 }
  0x3f   :  { %188 = vsyncpa [#allocation3], 1 }
  0x40   :  { %189 = vsyncpa [#allocation4], 1 }
  0x41   :  { %190 = vsyncpa [#allocation7], 1 }

// kernel: sep_conv_gru.1
= control target key start
LH: loop header
LB: loop body
LE: loop exit
PB: predicated region body
PF: predicated region fallthrough
CT: control target
= control target key end

     0   :  { %s17015_s0 = inlined_call_operand.vmem [shape: f32[2,8,16,128], index: 0, kind: input, shape index: {}, may-alias: {0,14}]   ;;  %s17016_s1 = inlined_call_operand.vmem [shape: bf16[2,8,16,128], index: 1, kind: input, shape index: {}]   ;;  %s17017_s2 = inlined_call_operand.vmem [shape: bf16[5,128,256], index: 2, kind: input, shape index: {}]   ;;  %s17018_s3 = inlined_call_operand.hbm [shape: bf16[5,128,256], index: 3, kind: input, shape index: {}]   ;;  %s17019_s4 = inlined_call_operand.vmem [shape: f32[1,256], index: 4, kind: input, shape index: {}]   ;;  %s17020_s5 = inlined_call_operand.hbm [shape: bf16[5,128,128], index: 5, kind: input, shape index: {}]   ;;  %s17021_s6 = inlined_call_operand.hbm [shape: bf16[5,128,128], index: 6, kind: input, shape index: {}]   ;;  %s17022_s7 = inlined_call_operand.vmem [shape: f32[1,128], index: 7, kind: input, shape index: {}]   ;;  %s17023_s8 = inlined_call_operand.hbm [shape: bf16[5,128,256], index: 8, kind: input, shape index: {}]   ;;  %s17024_s9 = inlined_call_operand.hbm [shape: bf16[5,128,256], index: 9, kind: input, shape index: {}]   ;;  %s17025_s10 = inlined_call_operand.vmem [shape: f32[1,256], index: 10, kind: input, shape index: {}]   ;;  %s17026_s11 = inlined_call_operand.hbm [shape: bf16[5,128,128], index: 11, kind: input, shape index: {}]   ;;  %s17027_s12 = inlined_call_operand.hbm [shape: bf16[5,128,128], index: 12, kind: input, shape index: {}]   ;;  %s17028_s13 = inlined_call_operand.vmem [shape: f32[1,128], index: 13, kind: input, shape index: {}]   ;;  %s17029_s14 = inlined_call_operand.vmem [shape: f32[2,8,16,128], index: 14, kind: output, shape index: {}, may-alias: {0,14}]  }
   0x1   :  { %17114 = sst [smem:[#allocation77_spill]] %s17018_s3 }
   0x2   :  { %17115 = sst [smem:[#allocation78_spill]] %s17020_s5 }
   0x3   :  { %17116 = sst [smem:[#allocation79_spill]] %s17028_s13 }
   0x4   :  { %17117 = sst [smem:[#allocation80_spill]] %s17029_s14 }
   0x5   :  { %19 = vsyncpa [#allocation3], 0 }
   0x6   :  { %20 = vsyncpa [#allocation5], 0 }
   0x7   :  { %21 = vsyncpa [#allocation8], 0 }
   0x8   :  { %22 = vsyncpa [#allocation11], 0  ;;  %s14594_s29 = smov 0  }
   0x9 LB: > { %17118 = sst [smem:[#allocation17_spill]] %s14505_s29  ;;  %s14507_s30 = smov [#allocation4]   ;;  %s14505_s29 = sphi %s14594_s29, %s28_s29  }
   0xa   : > { %s394_s15 = sshll.u32 %s14507_s30, 4  ;;  %s14600_s16 = sadd.s32 4294967295, %s14505_s29   ;;  %s14605_s15 = int_to_ptr.vmem [resolvable:$true] %s394_s15 }
   0xb   : > { %p10653_p0 = scmp.ge.s32.totalorder %s14505_s29, 1  ;;  %p363_p1 = scmp.lt.s32.totalorder %s14505_s29, 3 }
   0xc   : > { %p17037_p2 = scmp.eq.s32.totalorder %s14600_s16, 0  ;;  %s14508_s19 = smov [#allocation7]  }
   0xd   : > { %p14607_p3 = pnand %p10653_p0, %p363_p1  ;;  %s423_s20 = sshll.u32 %s14508_s19, 4  ;;  %s14619_s20 = int_to_ptr.vmem [resolvable:$true] %s423_s20 }
   0xe   : > { %s14509_s21 = smov [#allocation10]   ;;  %s17121_s5 = sld [smem:[#allocation78_spill]] }
   0xf   : > { %s17119_s17 = scalar_select %p14607_p3, 1, 0 }
  0x10   : > { %p13215_p4 = pneg %p14607_p3  ;;  %s452_s22 = sshll.u32 %s14509_s21, 4  ;;  %s14621_s22 = int_to_ptr.vmem [resolvable:$true] %s452_s22 }
  0x12   : > { %p14615_p5 = pnand %p17037_p2, %p13215_p4 }
  0x14   : > { %s14287_s25 = scalar_lea.hbm %s17121_s5, 5120  ;;  %p14631_p7 = pneg %p14615_p5 }
  0x15   : > { %p14288_p6 = scmp.ne.s32.totalorder %s17121_s5, %s14287_s25  ;;  %p14294_p10 = scmp.lt.u32.totalorder %s14287_s25, %s17121_s5 }
  0x17   : > { %p14290_p8 = pnand %p14631_p7, %p14288_p6 }
  0x19   : > { %p14291_p9 = pneg %p14290_p8 }
  0x1b   : > { %p14296_p11 = pnand %p14294_p10, %p14291_p9 }
  0x1d   : > { %14299 = shalt.err (!%p14296_p11)
}
  0x1e   : > { %s14300_s21 = scalar_lea.vmem %s14605_s15, 5120  ;;  %p14308_p1 = scmp.lt.s32.totalorder %s14605_s15, %s14605_s15 }
  0x1f   : > { %p14301_p12 = scmp.ne.s32.totalorder %s14605_s15, %s14300_s21  ;;  %p14309_p4 = scmp.lt.s32.totalorder %s14300_s21, %s14300_s21 }
  0x21   : > { %p14303_p13 = pnand %p14301_p12, %p14631_p7  ;;  %p14310_p6 = por %p14309_p4, %p14308_p1 }
  0x23   : > { %p14304_p0 = pneg %p14303_p13 }
  0x25   : > { %p14311_p8 = pnand %p14310_p6, %p14304_p0 }
  0x27   : > { %14314 = shalt.err (!%p14311_p8)
}
  0x28   : > { %s17031_s23 = smov 64   ;;  %s17039_s24 = smov 4  }
  0x29   : > { %13221 = dma.hbm_to_vmem [thread:$0]  (!%p14615_p5), %s17121_s5, 5120, %s14605_s15, [#allocation5], %s17031_s23, %s17031_s23, %s17039_s24  }
  0x2a   : > { %s14315_s19 = scalar_lea.hbm %s17023_s8, 10240 }
  0x2b   : > { %p14316_p9 = scmp.ne.s32.totalorder %s17023_s8, %s14315_s19  ;;  %p14322_p12 = scmp.lt.u32.totalorder %s14315_s19, %s17023_s8 }
  0x2d   : > { %p14318_p10 = pnand %p14316_p9, %p14631_p7 }
  0x2f   : > { %p14319_p11 = pneg %p14318_p10 }
  0x31   : > { %p14324_p13 = pnand %p14322_p12, %p14319_p11 }
  0x33   : > { %14327 = shalt.err (!%p14324_p13)
}
  0x34   : > { %s14328_s15 = scalar_lea.vmem %s14619_s20, 10240  ;;  %p14336_p6 = scmp.lt.s32.totalorder %s14619_s20, %s14619_s20 }
  0x35   : > { %p14329_p0 = scmp.ne.s32.totalorder %s14619_s20, %s14328_s15  ;;  %p14337_p8 = scmp.lt.s32.totalorder %s14328_s15, %s14328_s15 }
  0x37   : > { %p14331_p1 = pnand %p14329_p0, %p14631_p7  ;;  %p14338_p9 = por %p14337_p8, %p14336_p6 }
  0x39   : > { %p14332_p4 = pneg %p14331_p1 }
  0x3b   : > { %p14339_p10 = pnand %p14338_p9, %p14332_p4 }
  0x3d   : > { %14342 = shalt.err (!%p14339_p10)
}
  0x3e   : > { %s17033_s29 = smov 128   ;;  %s17035_s13 = smov 8  }
  0x3f   : > { %13227 = dma.hbm_to_vmem [thread:$0]  (!%p14615_p5), %s17023_s8, 10240, %s14619_s20, [#allocation8], %s17033_s29, %s17033_s29, %s17035_s13  }
  0x40   : > { %s14343_s30 = scalar_lea.hbm %s17026_s11, 5120 }
  0x41   : > { %p14344_p11 = scmp.ne.s32.totalorder %s17026_s11, %s14343_s30  ;;  %p14350_p0 = scmp.lt.u32.totalorder %s14343_s30, %s17026_s11 }
  0x43   : > { %p14346_p12 = pnand %p14344_p11, %p14631_p7 }
  0x45   : > { %p14347_p13 = pneg %p14346_p12 }
  0x47   : > { %p14352_p1 = pnand %p14350_p0, %p14347_p13 }
  0x49   : > { %14355 = shalt.err (!%p14352_p1)
}
  0x4a   : > { %s14356_s20 = scalar_lea.vmem %s14621_s22, 5120  ;;  %p14364_p9 = scmp.lt.s32.totalorder %s14621_s22, %s14621_s22 }
  0x4b   : > { %p14357_p4 = scmp.ne.s32.totalorder %s14621_s22, %s14356_s20  ;;  %p14365_p10 = scmp.lt.s32.totalorder %s14356_s20, %s14356_s20 }
  0x4d   : > { %p14359_p6 = pnand %p14357_p4, %p14631_p7  ;;  %p14366_p11 = por %p14365_p10, %p14364_p9 }
  0x4f   : > { %p14360_p8 = pneg %p14359_p6 }
  0x51   : > { %p14367_p12 = pnand %p14366_p11, %p14360_p8 }
  0x53   : > { %14370 = shalt.err (!%p14367_p12)
}
  0x54   : > { %s17123_s23 = smov 64   ;;  %s14514_s26 = smov [#allocation2]  }
  0x55   : > { %13233 = dma.hbm_to_vmem [thread:$0]  (!%p14615_p5), %s17026_s11, 5120, %s14621_s22, [#allocation11], %s17123_s23, %s17123_s23, %s17039_s24  }
  0x56   : > { %s378_s27 = sshll.u32 %s14514_s26, 4  ;;  %s14515_s30 = smov [#allocation6]   ;;  %s379_s27 = int_to_ptr.vmem [resolvable:$true] %s378_s27 }
  0x57   : > { %s407_s19 = sshll.u32 %s14515_s30, 4  ;;  %s17124_s3 = sld [smem:[#allocation77_spill]]  ;;  %s14707_s19 = int_to_ptr.vmem [resolvable:$true] %s407_s19 }
  0x5d   : > { %s14371_s20 = scalar_lea.hbm %s17124_s3, 10240 }
  0x5e   : > { %p14372_p13 = scmp.ne.s32.totalorder %s17124_s3, %s14371_s20  ;;  %p14378_p4 = scmp.lt.u32.totalorder %s14371_s20, %s17124_s3 }
  0x60   : > { %p14374_p0 = pnand %p14372_p13, %p14631_p7 }
  0x62   : > { %p14375_p1 = pneg %p14374_p0 }
  0x64   : > { %p14380_p6 = pnand %p14378_p4, %p14375_p1 }
  0x66   : > { %14383 = shalt.err (!%p14380_p6)
}
  0x67   : > { %s14384_s25 = scalar_lea.vmem %s379_s27, 10240  ;;  %p14392_p11 = scmp.lt.s32.totalorder %s379_s27, %s379_s27 }
  0x68   : > { %p14385_p8 = scmp.ne.s32.totalorder %s379_s27, %s14384_s25  ;;  %p14393_p12 = scmp.lt.s32.totalorder %s14384_s25, %s14384_s25 }
  0x6a   : > { %p14387_p9 = pnand %p14385_p8, %p14631_p7  ;;  %p14394_p2 = por %p14393_p12, %p14392_p11 }
  0x6c   : > { %p14388_p10 = pneg %p14387_p9 }
  0x6e   : > { %p14395_p3 = pnand %p14394_p2, %p14388_p10 }
  0x70   : > { %14398 = shalt.err (!%p14395_p3)
}
  0x71   : > { %s17125_s29 = smov 8   ;;  %s17126_s13 = smov 128  }
  0x72   : > { %13218 = dma.hbm_to_vmem [thread:$0]  (!%p14615_p5), %s17124_s3, 10240, %s379_s27, [#allocation3], %s17126_s13, %s17126_s13, %s17125_s29  }
  0x73   : > { %s14399_s20 = scalar_lea.hbm %s17021_s6, 5120 }
  0x74   : > { %p14400_p13 = scmp.ne.s32.totalorder %s17021_s6, %s14399_s20  ;;  %p14406_p0 = scmp.lt.u32.totalorder %s14399_s20, %s17021_s6 }
  0x76   : > { %p14402_p2 = pnand %p14400_p13, %p14631_p7 }
  0x78   : > { %p14403_p3 = pneg %p14402_p2 }
  0x7a   : > { %p14408_p1 = pnand %p14406_p0, %p14403_p3 }
  0x7c   : > { %14411 = shalt.err (!%p14408_p1)
}
  0x7d   : > { %s14412_s27 = scalar_lea.vmem %s14707_s19, 5120  ;;  %p14420_p9 = scmp.lt.s32.totalorder %s14707_s19, %s14707_s19 }
  0x7e   : > { %p14413_p4 = scmp.ne.s32.totalorder %s14707_s19, %s14412_s27  ;;  %p14421_p10 = scmp.lt.s32.totalorder %s14412_s27, %s14412_s27 }
  0x80   : > { %p14415_p6 = pnand %p14413_p4, %p14631_p7  ;;  %p14422_p11 = por %p14421_p10, %p14420_p9 }
  0x82   : > { %p14416_p8 = pneg %p14415_p6 }
  0x84   : > { %p14423_p12 = pnand %p14422_p11, %p14416_p8 }
  0x86   : > { %14426 = shalt.err (!%p14423_p12)
}
  0x87   : > { %s17127_s24 = smov 4   ;;  %s14516_s21 = smov [#allocation9]  }
  0x88   : > { %13224 = dma.hbm_to_vmem [thread:$0]  (!%p14615_p5), %s17021_s6, 5120, %s14707_s19, [#allocation5], %s17123_s23, %s17123_s23, %s17127_s24  }
  0x89   : > { %s436_s15 = sshll.u32 %s14516_s21, 4  ;;  %s14517_s20 = smov [#allocation12]   ;;  %s437_s15 = int_to_ptr.vmem [resolvable:$true] %s436_s15 }
  0x8a   : > { %s465_s14 = sshll.u32 %s14517_s20, 4  ;;  %s14427_s27 = scalar_lea.hbm %s17024_s9, 10240  ;;  %s14756_s14 = int_to_ptr.vmem [resolvable:$true] %s465_s14 }
  0x8b   : > { %p14428_p13 = scmp.ne.s32.totalorder %s17024_s9, %s14427_s27  ;;  %p14434_p0 = scmp.lt.u32.totalorder %s14427_s27, %s17024_s9 }
  0x8d   : > { %p14430_p2 = pnand %p14428_p13, %p14631_p7 }
  0x8f   : > { %p14431_p3 = pneg %p14430_p2 }
  0x91   : > { %p14436_p1 = pnand %p14434_p0, %p14431_p3 }
  0x93   : > { %14439 = shalt.err (!%p14436_p1)
}
  0x94   : > { %s14440_s30 = scalar_lea.vmem %s437_s15, 10240  ;;  %p14448_p9 = scmp.lt.s32.totalorder %s437_s15, %s437_s15 }
  0x95   : > { %p14441_p4 = scmp.ne.s32.totalorder %s437_s15, %s14440_s30  ;;  %p14449_p10 = scmp.lt.s32.totalorder %s14440_s30, %s14440_s30 }
  0x97   : > { %p14443_p6 = pnand %p14441_p4, %p14631_p7  ;;  %p14450_p11 = por %p14449_p10, %p14448_p9 }
  0x99   : > { %p14444_p8 = pneg %p14443_p6 }
  0x9b   : > { %p14451_p12 = pnand %p14450_p11, %p14444_p8 }
  0x9d   : > { %14454 = shalt.err (!%p14451_p12)
}
  0x9e   : > { %13230 = dma.hbm_to_vmem [thread:$0]  (!%p14615_p5), %s17024_s9, 10240, %s437_s15, [#allocation8], %s17126_s13, %s17126_s13, %s17125_s29  }
  0x9f   : > { %s14455_s22 = scalar_lea.hbm %s17027_s12, 5120 }
  0xa0   : > { %p14456_p13 = scmp.ne.s32.totalorder %s17027_s12, %s14455_s22  ;;  %p14462_p0 = scmp.lt.u32.totalorder %s14455_s22, %s17027_s12 }
  0xa2   : > { %p14458_p2 = pnand %p14456_p13, %p14631_p7 }
  0xa4   : > { %p14459_p3 = pneg %p14458_p2 }
  0xa6   : > { %p14464_p1 = pnand %p14462_p0, %p14459_p3 }
  0xa8   : > { %14467 = shalt.err (!%p14464_p1)
}
  0xa9   : > { %s14468_s29 = scalar_lea.vmem %s14756_s14, 5120  ;;  %p14476_p9 = scmp.lt.s32.totalorder %s14756_s14, %s14756_s14 }
  0xaa   : > { %p14469_p4 = scmp.ne.s32.totalorder %s14756_s14, %s14468_s29  ;;  %p14477_p10 = scmp.lt.s32.totalorder %s14468_s29, %s14468_s29 }
  0xac   : > { %p14471_p6 = pnand %p14469_p4, %p14631_p7  ;;  %p14478_p11 = por %p14477_p10, %p14476_p9 }
  0xae   : > { %p14472_p8 = pneg %p14471_p6 }
  0xb0   : > { %p14479_p12 = pnand %p14478_p11, %p14472_p8 }
  0xb2   : > { %14482 = shalt.err (!%p14479_p12)
}
  0xb3   : > { %13236 = dma.hbm_to_vmem [thread:$0]  (!%p14615_p5), %s17027_s12, 5120, %s14756_s14, [#allocation11], %s17123_s23, %s17123_s23, %s17127_s24  }
  0xb4   : > { %p17128_p13 = scmp.ne.s32.totalorder %s17119_s17, 0 }
  0xb6   : > { %500 = sbr.rel (%p17128_p13) target bundleno = 3008 (0xbc0), region = 76 }
  0xbd   : > { %p17129_p7 = scmp.eq.s32.totalorder %s14600_s16, 0 }
  0xbf   : > { %14488 = dma.done.wait (%p17129_p7), [#allocation3], 10240   ;;  %p17130_p2 = pmov %p17129_p7 }
  0xc1   : > { %14490 = vsyncadd (%p17130_p2), [#allocation3], 4294957056  ;;  %p17131_p3 = pmov %p17130_p2 }
  0xc2   : > { %p17132_p0 = pmov %p17130_p2 }
  0xc3   : > { %14492 = dma.done.wait (%p17131_p3), [#allocation5], 10240  }
  0xc4   : > { %14494 = vsyncadd (%p17132_p0), [#allocation5], 4294957056  ;;  %p17133_p1 = pmov %p17132_p0 }
  0xc5   : > { %p17134_p5 = pmov %p17132_p0 }
  0xc6   : > { %14496 = dma.done.wait (%p17133_p1), [#allocation8], 20480  }
  0xc7   : > { %14498 = vsyncadd (%p17134_p5), [#allocation8], 4294946816  ;;  %p17135_p4 = pmov %p17132_p0 }
  0xc8   : > { %p17136_p6 = pmov %p17132_p0 }
  0xc9   : > { %14500 = dma.done.wait (%p17135_p4), [#allocation11], 10240  }
  0xca   : > { %14502 = vsyncadd (%p17136_p6), [#allocation11], 4294957056  ;;  %v17056_v0 = vmov 0   ;;  %p575_p8 = scmp.lt.s32.totalorder %s14600_s16, 1  ;;  %v13271_v1 = vld [vmem:[%s17017_s2 + $0x84] ss:$8 sps:$4 sm:$0xff]  }
  0xcb   : > { %995 = vmatprep.mubr.bf16.mxu0 %v17056_v0  ;;  %v13273_v2 = vld [vmem:[%s17017_s2 + $0x80] ss:$8 sps:$4 sm:$0xff]   ;;  %963 = vmatprep.subr.bf16.mxu0 %v13271_v1  ;;  %v13274_v3 = vld [vmem:[%s17017_s2 + $0x94] ss:$8 sps:$4 sm:$0xff]   ;;  %v13276_v4 = vld [vmem:[%s17017_s2 + $0x90] ss:$8 sps:$4 sm:$0xff]  }
  0xcc   : > { %s17299_s16 = smov (!%p575_p8, %s14600_s16), 1  ;;  %964 = vmatpush1.bf16.msra.mxu0 %v13273_v2  ;;  %v13277_v5 = vld [vmem:[%s17017_s2 + $0xa4] ss:$8 sps:$4 sm:$0xff]   ;;  %v13279_v6 = vld [vmem:[%s17017_s2 + $0xa0] ss:$8 sps:$4 sm:$0xff]   ;;  %vm671_vm0 = vcmask 1040384  }
  0xcd   : > { %965 = vmatprep.subr.bf16.mxu0 %v13274_v3  ;;  %s11360_s20 = sshll.u32 %s17299_s16, 7  ;;  %v13280_v7 = vld [vmem:[%s17017_s2 + $0xb4] ss:$8 sps:$4 sm:$0xff]   ;;  %v13282_v8 = vld [vmem:[%s17017_s2 + $0xb0] ss:$8 sps:$4 sm:$0xff]   ;;  %vm15124_vm2 = vmneg %vm671_vm0  ;;  %vm1285_vm4 = vcmask 1046528  }
  0xce   : > { %s14852_s19 = scalar_lea.vmem %s17015_s0, %s11360_s20  ;;  %v13283_v11 = vld [vmem:[%s17017_s2 + $0xc4] ss:$8 sps:$4 sm:$0xff]   ;;  %v13285_v16 = vld [vmem:[%s17017_s2 + $0xc0] ss:$8 sps:$4 sm:$0xff]   ;;  %v13286_v17 = vld [vmem:[%s17017_s2 + $0xd4] ss:$8 sps:$4 sm:$0xff]  }
  0xcf   : > { %v591_v9 = vld [vmem:[%s14852_s19] sm:$0xff]  ;;  %v592_v10 = vld [vmem:[%s14852_s19 + $0x8] sm:$0xff]  ;;  %v593_v13 = vld [vmem:[%s14852_s19 + $0x10] sm:$0xff]  ;;  %vm777_vm1 = vsmask.f32 7424  ;;  %s11361_s26 = sshll.u32 %s17299_s16, 6 }
  0xd0   : > { %966 = vmatpush1.bf16.msra.mxu0 %v13276_v4  ;;  %v705_v12 = vpack.c.bf16 %v592_v10, %v591_v9  ;;  %v594_v14 = vld [vmem:[%s14852_s19 + $0x18] sm:$0xff]  ;;  %v13289_v22 = vld [vmem:[%s17017_s2 + $0xe4] ss:$8 sps:$4 sm:$0xff]   ;;  %v13291_v27 = vld [vmem:[%s17017_s2 + $0xe0] ss:$8 sps:$4 sm:$0xff]   ;;  %s15307_s15 = scalar_lea.vmem %s17016_s1, %s11361_s26  ;;  %vm1883_vm5 = vcmask 1045504  }
  0xd1   : > { %967 = vmatprep.subr.bf16.mxu0 %v13277_v5  ;;  %v706_v19 = vpack.c.bf16 %v594_v14, %v593_v13  ;;  %v13288_v20 = vld [vmem:[%s17017_s2 + $0xd0] ss:$8 sps:$4 sm:$0xff]   ;;  %v595_v25 = vld [vmem:[%s14852_s19 + $0x20] sm:$0xff]  ;;  %v596_v26 = vld [vmem:[%s14852_s19 + $0x28] sm:$0xff]  ;;  %vm1560_vm3 = vsmask.f32 6400 }
  0xd2   : > { %v14867_v15 = vrot.slane %v705_v12, 7  ;;  %v13292_v31 = vld [vmem:[%s17017_s2 + $0xf4] ss:$8 sps:$4 sm:$0xff]   ;;  %v707_v33 = vpack.c.bf16 %v596_v26, %v595_v25  ;;  %v13294_v34 = vld [vmem:[%s17017_s2 + $0xf0] ss:$8 sps:$4 sm:$0xff]   ;;  %v599_v58 = vld [vmem:[%s14852_s19 + $0x40] sm:$0xff] }
  0xd3   : > { %v14890_v24 = vrot.slane %v706_v19, 7  ;;  %v13297_v38 = vld [vmem:[%s17017_s2 + $0x4] ss:$8 sps:$4 sm:$0xff]   ;;  %v597_v41 = vld [vmem:[%s14852_s19 + $0x30] sm:$0xff]  ;;  %v598_v42 = vld [vmem:[%s14852_s19 + $0x38] sm:$0xff]  ;;  %s17295_s24 = sld [smem:[#allocation79_spill]] }
  0xd4   : > { %968 = vmatpush1.bf16.msra.mxu0 %v13279_v6  ;;  %v14877_v18 = vsel %vm671_vm0, 0, %v14867_v15  ;;  %v14888_v23 = vsel %vm671_vm0, %v14867_v15, 0  ;;  %v14923_v40 = vrot.slane %v707_v33, 7  ;;  %v13295_v44 = vld [vmem:[%s17017_s2] ss:$8 sps:$4 sm:$0xff]   ;;  %v708_v50 = vpack.c.bf16 %v598_v42, %v597_v41  ;;  %v601_v13 = vld [vmem:[%s14852_s19 + $0x50] sm:$0xff] }
  0xd5   : > { %969 = vmatprep.subr.bf16.mxu0 %v13280_v7  ;;  %v780_v21 = vshll.u32 %v14877_v18, 16  ;;  %v778_v28 = vshrl.u32 %v14877_v18, 16  ;;  %v784_v30 = vshll.u32 %v14888_v23, 16  ;;  %v14906_v32 = vsel %vm671_vm0, 0, %v14890_v24  ;;  %v13300_v48 = vld [vmem:[%s17017_s2 + $0x14] ss:$8 sps:$4 sm:$0xff]  }
  0xd6   : > { %v790_v37 = vshll.u32 %v14906_v32, 16  ;;  %v14921_v39 = vsel %vm671_vm0, %v14890_v24, 0  ;;  %v788_v45 = vshrl.u32 %v14906_v32, 16  ;;  %v14940_v49 = vsel %vm671_vm0, 0, %v14923_v40  ;;  %v13298_v53 = vld [vmem:[%s17017_s2 + $0x10] ss:$8 sps:$4 sm:$0xff]  }
  0xd7   : > { %v782_v29 = vrot.slane %v780_v21, 1  ;;  %v786_v36 = vrot.slane %v784_v30, 1  ;;  %v794_v47 = vshll.u32 %v14921_v39, 16  ;;  %v800_v54 = vshll.u32 %v14940_v49, 16  ;;  %v13303_v56 = vld [vmem:[%s17017_s2 + $0x24] ss:$8 sps:$4 sm:$0xff]  }
  0xd8   : > { %970 = vmatpush1.bf16.msra.mxu0 %v13282_v8  ;;  %v792_v46 = vrot.slane %v790_v37, 1  ;;  %v14953_v55 = vsel %vm671_vm0, %v14923_v40, 0  ;;  %v14958_v57 = vrot.slane %v708_v50, 7  ;;  %v600_v59 = vld [vmem:[%s14852_s19 + $0x48] sm:$0xff]  ;;  %v798_v62 = vshrl.u32 %v14940_v49, 16  ;;  %v602_v14 = vld [vmem:[%s14852_s19 + $0x58] sm:$0xff] }
  0xd9   : > { %971 = vmatprep.subr.bf16.mxu0 %v13283_v11  ;;  %v783_v35 = vor.u32 %v782_v29, %v778_v28  ;;  %v796_v52 = vrot.slane %v794_v47, 1  ;;  %v13301_v60 = vld [vmem:[%s17017_s2 + $0x20] ss:$8 sps:$4 sm:$0xff]   ;;  %v802_v63 = vrot.slane %v800_v54, 1  ;;  %v804_v1 = vshll.u32 %v14953_v55, 16  ;;  %s17296_s3 = sld [smem:[#allocation80_spill]] }
  0xda   : > { %v793_v51 = vor.u32 %v792_v46, %v788_v45  ;;  %v14972_v2 = vsel %vm671_vm0, 0, %v14958_v57  ;;  %v13306_v3 = vld [vmem:[%s17017_s2 + $0x34] ss:$8 sps:$4 sm:$0xff]   ;;  %v709_v4 = vpack.c.bf16 %v600_v59, %v599_v58  ;;  %v13304_v8 = vld [vmem:[%s17017_s2 + $0x30] ss:$8 sps:$4 sm:$0xff]   ;;  %v14988_v9 = vsel %vm671_vm0, %v14958_v57, 0 }
  0xdb   : > { %v787_v43 = vsel %vm777_vm1, %v783_v35, %v786_v36  ;;  %v803_v5 = vor.u32 %v802_v63, %v798_v62  ;;  %v806_v6 = vrot.slane %v804_v1, 1  ;;  %v810_v7 = vshll.u32 %v14972_v2, 16  ;;  %v13309_v11 = vld [vmem:[%s17017_s2 + $0x44] ss:$8 sps:$4 sm:$0xff]   ;;  %v13307_v12 = vld [vmem:[%s17017_s2 + $0x40] ss:$8 sps:$4 sm:$0xff]  }
  0xdc   : > { %972 = vmatpush1.bf16.msra.mxu0 %v13285_v16  ;;  %v797_v61 = vsel %vm777_vm1, %v793_v51, %v796_v52  ;;  %v14990_v10 = vrot.slane %v709_v4, 7  ;;  %v13312_v16 = vld [vmem:[%s17017_s2 + $0x54] ss:$8 sps:$4 sm:$0xff]   ;;  %v808_v19 = vshrl.u32 %v14972_v2, 16  ;;  %v710_v26 = vpack.c.bf16 %v602_v14, %v601_v13  ;;  %v13315_v29 = vld [vmem:[%s17017_s2 + $0x64] ss:$8 sps:$4 sm:$0xff]  }
  0xdd   : > { %973 = vmatprep.subr.bf16.mxu0 %v13286_v17  ;;  %v807_v17 = vsel %vm777_vm1, %v803_v5, %v806_v6  ;;  %v603_v35 = vld [vmem:[%s14852_s19 + $0x60] sm:$0xff]  ;;  %v604_v36 = vld [vmem:[%s14852_s19 + $0x68] sm:$0xff]  ;;  %v606_v63 = vld [vmem:[%s14852_s19 + $0x78] sm:$0xff] }
  0xde   : > { %v15010_v25 = vsel %vm671_vm0, 0, %v14990_v10  ;;  %v15030_v41 = vrot.slane %v710_v26, 7  ;;  %v13313_v42 = vld [vmem:[%s17017_s2 + $0x60] ss:$8 sps:$4 sm:$0xff]   ;;  %v711_v52 = vpack.c.bf16 %v604_v36, %v603_v35 }
  0xdf   : > { %v818_v46 = vshrl.u32 %v15010_v25, 16  ;;  %s16960_s5 = scalar_lea.vmem %s17296_s3, %s11360_s20 }
  0xe0   : > { %974 = vmatpush1.bf16.msra.mxu0 %v13288_v20  ;;  %v812_v20 = vrot.slane %v810_v7, 1  ;;  %v15045_v51 = vsel %vm671_vm0, 0, %v15030_v41  ;;  %v15065_v4 = vrot.slane %v711_v52, 7 }
  0xe1   : > { %975 = vmatprep.subr.bf16.mxu0 %v13289_v22  ;;  %v814_v22 = vshll.u32 %v14988_v9, 16  ;;  %v828_v6 = vshrl.u32 %v15045_v51, 16 }
  0xe3   : > { %v816_v33 = vrot.slane %v814_v22, 1 }
  0xe4   : > { %976 = vmatpush1.bf16.msra.mxu0 %v13291_v27  ;;  %v13310_v27 = vld [vmem:[%s17017_s2 + $0x50] ss:$8 sps:$4 sm:$0xff]  }
  0xe5   : > { %977 = vmatprep.subr.bf16.mxu0 %v13292_v31  ;;  %v813_v31 = vor.u32 %v812_v20, %v808_v19  ;;  %v15084_v20 = vsel %vm671_vm0, %v15065_v4, 0 }
  0xe8   : > { %978 = vmatpush1.bf16.msra.mxu0 %v13294_v34  ;;  %v820_v34 = vshll.u32 %v15010_v25, 16 }
  0xe9   : > { %1156 = vmatprep.subr.bf16.mxu0 %v13297_v38  ;;  %v15028_v38 = vsel %vm671_vm0, %v14990_v10, 0 }
  0xea   : > { %v824_v50 = vshll.u32 %v15028_v38, 16 }
  0xeb   : > { %996 = vmatmul.mubr.bf16.vlgmr.msra.gmra.mrb[0].mxu0 %v787_v43  ;;  %v13318_v43 = vld [vmem:[%s17017_s2 + $0x74] ss:$8 sps:$4 sm:$0xff]  }
  0xec   : > { %1157 = vmatpush1.bf16.msra.mxu0 %v13295_v44  ;;  %1005 = vmatprep.mubr.bf16.mxu0 %v17056_v0  ;;  %v817_v44 = vsel %vm777_vm1, %v813_v31, %v816_v33  ;;  %v826_v59 = vrot.slane %v824_v50, 1  ;;  %v844_v33 = vshll.u32 %v15084_v20, 16 }
  0xed   : > { %1158 = vmatprep.subr.bf16.mxu0 %v13300_v48  ;;  %v822_v48 = vrot.slane %v820_v34, 1 }
  0xef   : > { %v823_v58 = vor.u32 %v822_v48, %v818_v46 }
  0xf0   : > { %1159 = vmatpush1.bf16.msra.mxu0 %v13298_v53  ;;  %v13316_v53 = vld [vmem:[%s17017_s2 + $0x70] ss:$8 sps:$4 sm:$0xff]  }
  0xf1   : > { %1160 = vmatprep.subr.bf16.mxu0 %v13303_v56  ;;  %v13321_v56 = vld [vmem:[%s17017_s2 + $0x104] ss:$8 sps:$4 sm:$0xff]   ;;  %v827_v5 = vsel %vm777_vm1, %v823_v58, %v826_v59 }
  0xf3   : > { %1006 = vmatmul.mubr.bf16.gmra.mrb[4].mxu0 %v797_v61  ;;  %v605_v61 = vld [vmem:[%s14852_s19 + $0x70] sm:$0xff] }
  0xf4   : > { %1015 = vmatprep.mubr.bf16.mxu0 %v17056_v0  ;;  %1161 = vmatpush1.bf16.msra.mxu0 %v13301_v60  ;;  %v830_v60 = vshll.u32 %v15045_v51, 16  ;;  %v712_v13 = vpack.c.bf16 %v606_v63, %v605_v61  ;;  %v1561_v61 = vrot.slane %v778_v28, 1  ;;  %v13319_v28 = vld [vmem:[%s17017_s2 + $0x100] ss:$8 sps:$4 sm:$0xff]  }
  0xf5   : > { %1162 = vmatprep.subr.bf16.mxu0 %v13306_v3  ;;  %v15063_v3 = vsel %vm671_vm0, %v15030_v41, 0 }
  0xf6   : > { %v15086_v26 = vrot.slane %v712_v13, 7  ;;  %v1562_v13 = vrot.slane %v780_v21, 2  ;;  %v13322_v21 = vld [vmem:[%s17017_s2 + $0x110] ss:$8 sps:$4 sm:$0xff]  }
  0xf8   : > { %1163 = vmatpush1.bf16.msra.mxu0 %v13304_v8  ;;  %v832_v8 = vrot.slane %v830_v60, 1  ;;  %v15095_v35 = vsel %vm671_vm0, 0, %v15086_v26 }
  0xf9   : > { %1164 = vmatprep.subr.bf16.mxu0 %v13309_v11  ;;  %v834_v11 = vshll.u32 %v15063_v3, 16  ;;  %v848_v52 = vshrl.u32 %v15095_v35, 16 }
  0xfa   : > { %v833_v14 = vor.u32 %v832_v8, %v828_v6 }
  0xfb   : > { %1016 = vmatmul.mubr.bf16.gmra.mrb[8].mxu0 %v807_v17 }
  0xfc   : > { %1025 = vmatprep.mubr.bf16.mxu0 %v17056_v0  ;;  %1165 = vmatpush1.bf16.msra.mxu0 %v13307_v12  ;;  %v15074_v12 = vsel %vm671_vm0, 0, %v15065_v4 }
  0xfd   : > { %1166 = vmatprep.subr.bf16.mxu0 %v13312_v16  ;;  %v836_v16 = vrot.slane %v834_v11, 1  ;;  %v840_v17 = vshll.u32 %v15074_v12, 16 }
  0xff   : > { %v842_v31 = vrot.slane %v840_v17, 1 }
 0x100   : > { %1167 = vmatpush1.bf16.msra.mxu0 %v13310_v27  ;;  %v837_v27 = vsel %vm777_vm1, %v833_v14, %v836_v16  ;;  %v1564_v14 = vshrl.u32 %v14888_v23, 16  ;;  %v1563_v16 = vor.u32 %v1562_v13, %v1561_v61  ;;  %v13334_v61 = vld [vmem:[%s17017_s2 + $0x150] ss:$8 sps:$4 sm:$0xff]  }
 0x101   : > { %1168 = vmatprep.subr.bf16.mxu0 %v13315_v29  ;;  %v838_v29 = vshrl.u32 %v15074_v12, 16  ;;  %v13340_v13 = vld [vmem:[%s17017_s2 + $0x170] ss:$8 sps:$4 sm:$0xff]  }
 0x103   : > { %1026 = vmatmul.mubr.bf16.gmra.mrb[12].mxu0 %v817_v44  ;;  %v843_v36 = vor.u32 %v842_v31, %v838_v29  ;;  %v15105_v44 = vsel %vm671_vm0, %v15086_v26, 0 }
 0x104   : > { %1035 = vmatprep.mubr.bf16.mxu0 %v17056_v0  ;;  %1169 = vmatpush1.bf16.msra.mxu0 %v13313_v42  ;;  %v846_v42 = vrot.slane %v844_v33, 1 }
 0x105   : > { %1170 = vmatprep.subr.bf16.mxu0 %v13318_v43  ;;  %v850_v43 = vshll.u32 %v15095_v35, 16 }
 0x106   : > { %v847_v48 = vsel %vm777_vm1, %v843_v36, %v846_v42  ;;  %v13327_v42 = vld [vmem:[%s17017_s2 + $0x124] ss:$8 sps:$4 sm:$0xff]  }
 0x108   : > { %1171 = vmatpush1.bf16.msra.mxu0 %v13316_v53  ;;  %v852_v53 = vrot.slane %v850_v43, 1 }
 0x109   : > { %1415 = vmatprep.subr.bf16.mxu0 %v13321_v56  ;;  %v854_v56 = vshll.u32 %v15105_v44, 16 }
 0x10a   : > { %v853_v58 = vor.u32 %v852_v53, %v848_v52  ;;  %v13328_v53 = vld [vmem:[%s17017_s2 + $0x130] ss:$8 sps:$4 sm:$0xff]  }
 0x10b   : > { %1036 = vmatmul.mubr.bf16.gmra.mrb[16].mxu0 %v827_v5  ;;  %v856_v59 = vrot.slane %v854_v56, 1  ;;  %v1567_v5 = vrot.slane %v784_v30, 2  ;;  %v1566_v30 = vrot.slane %v1564_v14, 1  ;;  %v13345_v14 = vld [vmem:[%s17017_s2 + $0x184] ss:$8 sps:$4 sm:$0xff]  }
 0x10c   : > { %1045 = vmatprep.mubr.bf16.mxu0 %v17056_v0 }
 0x10d   : > { %v857_v63 = vsel %vm777_vm1, %v853_v58, %v856_v59  ;;  %v1568_v31 = vor.u32 %v1567_v5, %v1566_v30  ;;  %v13333_v58 = vld [vmem:[%s17017_s2 + $0x144] ss:$8 sps:$4 sm:$0xff]   ;;  %v13331_v59 = vld [vmem:[%s17017_s2 + $0x140] ss:$8 sps:$4 sm:$0xff]   ;;  %v1289_v30 = vrot.slane %v14906_v32, 1 }
 0x10e   : > { %v13337_v5 = vld [vmem:[%s17017_s2 + $0x160] ss:$8 sps:$4 sm:$0xff]  }
 0x10f   : > { %v15138_v36 = vsel %vm1560_vm3, %v1563_v16, %v1568_v31  ;;  %v13351_v16 = vld [vmem:[%s17017_s2 + $0x1a4] ss:$8 sps:$4 sm:$0xff]   ;;  %v13349_v31 = vld [vmem:[%s17017_s2 + $0x1a0] ss:$8 sps:$4 sm:$0xff]  }
 0x113   : > { %1046 = vmatmul.mubr.bf16.gmra.mrb[20].mxu0 %v837_v27  ;;  %v13324_v27 = vld [vmem:[%s17017_s2 + $0x114] ss:$8 sps:$4 sm:$0xff]  }
 0x114   : > { %1055 = vmatprep.mubr.bf16.mxu0 %v17056_v0 }
 0x11b   : > { %1056 = vmatmul.mubr.bf16.gmra.mrb[24].mxu0 %v847_v48  ;;  %v13325_v48 = vld [vmem:[%s17017_s2 + $0x120] ss:$8 sps:$4 sm:$0xff]  }
 0x11c   : > { %1065 = vmatprep.mubr.bf16.mxu0 %v17056_v0 }
 0x123   : > { %1066 = vmatmul.mubr.bf16.gmra.mrb[28].mxu0 %v857_v63  ;;  %v13339_v63 = vld [vmem:[%s17017_s2 + $0x164] ss:$8 sps:$4 sm:$0xff]  }
 0x124   : > { %1188 = vmatprep.mubr.bf16.mxu0 %v17056_v0 }
 0x12b   : > { %10733 = vmatmul.mubr.msk.bf16.vlgmr.msra.gmra.mrb[0].mxu0 %vm15124_vm2, %v14867_v15  ;;  %v13330_v15 = vld [vmem:[%s17017_s2 + $0x134] ss:$8 sps:$4 sm:$0xff]  }
 0x12c   : > { %1416 = vmatpush1.bf16.msra.mxu0 %v13319_v28  ;;  %1198 = vmatprep.mubr.bf16.mxu0 %v17056_v0 }
 0x12d   : > { %1417 = vmatprep.subr.bf16.mxu0 %v13324_v27  ;;  %v1290_v27 = vrot.slane %v14921_v39, 1 }
 0x130   : > { %1418 = vmatpush1.bf16.msra.mxu0 %v13322_v21  ;;  %v13354_v21 = vld [vmem:[%s17017_s2 + $0x1b4] ss:$8 sps:$4 sm:$0xff]  }
 0x131   : > { %1419 = vmatprep.subr.bf16.mxu0 %v13327_v42  ;;  %v1291_v42 = vsel %vm1285_vm4, %v1289_v30, %v1290_v27  ;;  %v1301_v30 = vrot.slane %v15045_v51, 1  ;;  %v1302_v27 = vrot.slane %v15063_v3, 1 }
 0x133   : > { %10735 = vmatmul.mubr.msk.bf16.gmra.mrb[4].mxu0 %vm15124_vm2, %v14890_v24  ;;  %v13336_v24 = vld [vmem:[%s17017_s2 + $0x154] ss:$8 sps:$4 sm:$0xff]  }
 0x134   : > { %1208 = vmatprep.mubr.bf16.mxu0 %v17056_v0  ;;  %1420 = vmatpush1.bf16.msra.mxu0 %v13325_v48  ;;  %v13352_v48 = vld [vmem:[%s17017_s2 + $0x1b0] ss:$8 sps:$4 sm:$0xff]  }
 0x135   : > { %1421 = vmatprep.subr.bf16.mxu0 %v13330_v15  ;;  %v13357_v15 = vld [vmem:[%s17017_s2 + $0x1c4] ss:$8 sps:$4 sm:$0xff]  }
 0x138   : > { %1422 = vmatpush1.bf16.msra.mxu0 %v13328_v53  ;;  %v1292_v53 = vrot.slane %v14940_v49, 1 }
 0x139   : > { %1423 = vmatprep.subr.bf16.mxu0 %v13333_v58  ;;  %v1293_v58 = vrot.slane %v14953_v55, 1 }
 0x13b   : > { %10737 = vmatmul.mubr.msk.bf16.gmra.mrb[8].mxu0 %vm15124_vm2, %v14923_v40  ;;  %v13342_v40 = vld [vmem:[%s17017_s2 + $0x174] ss:$8 sps:$4 sm:$0xff]  }
 0x13c   : > { %1218 = vmatprep.mubr.bf16.mxu0 %v17056_v0  ;;  %1424 = vmatpush1.bf16.msra.mxu0 %v13331_v59  ;;  %v13355_v59 = vld [vmem:[%s17017_s2 + $0x1c0] ss:$8 sps:$4 sm:$0xff]  }
 0x13d   : > { %1425 = vmatprep.subr.bf16.mxu0 %v13336_v24  ;;  %v13360_v24 = vld [vmem:[%s17017_s2 + $0x1d4] ss:$8 sps:$4 sm:$0xff]  }
 0x140   : > { %1426 = vmatpush1.bf16.msra.mxu0 %v13334_v61  ;;  %v1294_v61 = vsel %vm1285_vm4, %v1292_v53, %v1293_v58  ;;  %v1308_v53 = vrot.slane %v15105_v44, 1  ;;  %v1573_v58 = vshrl.u32 %v14921_v39, 16 }
 0x141   : > { %1427 = vmatprep.subr.bf16.mxu0 %v13339_v63  ;;  %v13358_v63 = vld [vmem:[%s17017_s2 + $0x1d0] ss:$8 sps:$4 sm:$0xff]  }
 0x143   : > { %10739 = vmatmul.mubr.msk.bf16.gmra.mrb[12].mxu0 %vm15124_vm2, %v14958_v57  ;;  %v1286_v57 = vrot.slane %v14877_v18, 1 }
 0x144   : > { %1228 = vmatprep.mubr.bf16.mxu0 %v17056_v0  ;;  %1428 = vmatpush1.bf16.msra.mxu0 %v13337_v5  ;;  %v13363_v5 = vld [vmem:[%s17017_s2 + $0x1e4] ss:$8 sps:$4 sm:$0xff]  }
 0x145   : > { %1429 = vmatprep.subr.bf16.mxu0 %v13342_v40  ;;  %v1295_v40 = vrot.slane %v14972_v2, 1 }
 0x148   : > { %1430 = vmatpush1.bf16.msra.mxu0 %v13340_v13  ;;  %v1296_v13 = vrot.slane %v14988_v9, 1 }
 0x149   : > { %1738 = vmatprep.subr.bf16.mxu0 %v13345_v14  ;;  %v13361_v14 = vld [vmem:[%s17017_s2 + $0x1e0] ss:$8 sps:$4 sm:$0xff]  }
 0x14b   : > { %10741 = vmatmul.mubr.msk.bf16.gmra.mrb[16].mxu0 %vm15124_vm2, %v14990_v10  ;;  %v1287_v10 = vrot.slane %v14888_v23, 1 }
 0x14c   : > { %1238 = vmatprep.mubr.bf16.mxu0 %v17056_v0 }
 0x14d   : > { %v1288_v28 = vsel %vm1285_vm4, %v1286_v57, %v1287_v10  ;;  %v13366_v57 = vld [vmem:[%s17017_s2 + $0x1f4] ss:$8 sps:$4 sm:$0xff]   ;;  %v1297_v10 = vsel %vm1285_vm4, %v1295_v40, %v1296_v13  ;;  %v1579_v40 = vrot.slane %v798_v62, 1  ;;  %v1585_v62 = vrot.slane %v804_v1, 2 }
 0x14e   : > { %v13372_v13 = vld [vmem:[%s17017_s2 + $0x214] ss:$8 sps:$4 sm:$0xff]  }
 0x153   : > { %10743 = vmatmul.mubr.msk.bf16.gmra.mrb[20].mxu0 %vm15124_vm2, %v15030_v41  ;;  %v13343_v41 = vld [vmem:[%s17017_s2 + $0x180] ss:$8 sps:$4 sm:$0xff]  }
 0x154   : > { %1248 = vmatprep.mubr.bf16.mxu0 %v17056_v0 }
 0x15b   : > { %10745 = vmatmul.mubr.msk.bf16.gmra.mrb[24].mxu0 %vm15124_vm2, %v15065_v4  ;;  %v13348_v4 = vld [vmem:[%s17017_s2 + $0x194] ss:$8 sps:$4 sm:$0xff]  }
 0x15c   : > { %1258 = vmatprep.mubr.bf16.mxu0 %v17056_v0 }
 0x163   : > { %10747 = vmatmul.mubr.msk.bf16.gmra.mrb[28].mxu0 %vm15124_vm2, %v15086_v26  ;;  %v13346_v26 = vld [vmem:[%s17017_s2 + $0x190] ss:$8 sps:$4 sm:$0xff]  }
 0x164   : > { %1447 = vmatprep.mubr.bf16.mxu0 %v17056_v0 }
 0x16b   : > { %1448 = vmatmul.mubr.bf16.vlgmr.msra.gmra.mrb[0].mxu0 %v1288_v28  ;;  %v1298_v28 = vrot.slane %v15010_v25, 1 }
 0x16c   : > { %1739 = vmatpush1.bf16.msra.mxu0 %v13343_v41  ;;  %1457 = vmatprep.mubr.bf16.mxu0 %v17056_v0  ;;  %v13364_v41 = vld [vmem:[%s17017_s2 + $0x1f0] ss:$8 sps:$4 sm:$0xff]  }
 0x16d   : > { %1740 = vmatprep.subr.bf16.mxu0 %v13348_v4  ;;  %v13369_v4 = vld [vmem:[%s17017_s2 + $0x204] ss:$8 sps:$4 sm:$0xff]  }
 0x170   : > { %1741 = vmatpush1.bf16.msra.mxu0 %v13346_v26  ;;  %v1299_v26 = vrot.slane %v15028_v38, 1 }
 0x171   : > { %1742 = vmatprep.subr.bf16.mxu0 %v13351_v16 }
 0x172   : > { %v1300_v16 = vsel %vm1285_vm4, %v1298_v28, %v1299_v26  ;;  %v1589_v28 = vrot.slane %v810_v7, 2  ;;  %v1594_v26 = vrot.slane %v814_v22, 2  ;;  %v13376_v7 = vld [vmem:[%s17017_s2 + $0x230] ss:$8 sps:$4 sm:$0xff]   ;;  %v1597_v22 = vrot.slane %v818_v46, 1 }
 0x173   : > { %1458 = vmatmul.mubr.bf16.gmra.mrb[4].mxu0 %v1291_v42  ;;  %v1305_v42 = vrot.slane %v15084_v20, 1  ;;  %v13379_v46 = vld [vmem:[%s17017_s2 + $0x240] ss:$8 sps:$4 sm:$0xff]  }
 0x174   : > { %1467 = vmatprep.mubr.bf16.mxu0 %v17056_v0  ;;  %1743 = vmatpush1.bf16.msra.mxu0 %v13349_v31  ;;  %v1303_v31 = vsel %vm1285_vm4, %v1301_v30, %v1302_v27  ;;  %v1600_v30 = vshrl.u32 %v15028_v38, 16 }
 0x175   : > { %1744 = vmatprep.subr.bf16.mxu0 %v13354_v21  ;;  %v1304_v21 = vrot.slane %v15074_v12, 1 }
 0x178   : > { %1745 = vmatpush1.bf16.msra.mxu0 %v13352_v48  ;;  %v1306_v48 = vsel %vm1285_vm4, %v1304_v21, %v1305_v42  ;;  %v1602_v21 = vrot.slane %v1600_v30, 1  ;;  %v1603_v42 = vrot.slane %v824_v50, 2 }
 0x179   : > { %1746 = vmatprep.subr.bf16.mxu0 %v13357_v15  ;;  %v1307_v15 = vrot.slane %v15095_v35, 1 }
 0x17b   : > { %1468 = vmatmul.mubr.bf16.gmra.mrb[8].mxu0 %v1294_v61  ;;  %v1571_v61 = vrot.slane %v790_v37, 2  ;;  %v1580_v37 = vrot.slane %v800_v54, 2  ;;  %v13375_v54 = vld [vmem:[%s17017_s2 + $0x224] ss:$8 sps:$4 sm:$0xff]  }
 0x17c   : > { %1477 = vmatprep.mubr.bf16.mxu0 %v17056_v0  ;;  %1747 = vmatpush1.bf16.msra.mxu0 %v13355_v59  ;;  %v1309_v59 = vsel %vm1285_vm4, %v1307_v15, %v1308_v53  ;;  %v13381_v53 = vld [vmem:[%s17017_s2 + $0x244] ss:$8 sps:$4 sm:$0xff]  }
 0x17d   : > { %1748 = vmatprep.subr.bf16.mxu0 %v13360_v24  ;;  %v1570_v24 = vrot.slane %v788_v45, 1  ;;  %v13367_v45 = vld [vmem:[%s17017_s2 + $0x200] ss:$8 sps:$4 sm:$0xff]  }
 0x17f   : > { %v1572_v1 = vor.u32 %v1571_v61, %v1570_v24  ;;  %v13382_v24 = vld [vmem:[%s17017_s2 + $0x250] ss:$8 sps:$4 sm:$0xff]  }
 0x180   : > { %1749 = vmatpush1.bf16.msra.mxu0 %v13358_v63  ;;  %v1575_v63 = vrot.slane %v1573_v58, 1  ;;  %v1606_v58 = vrot.slane %v828_v6, 1  ;;  %v13385_v6 = vld [vmem:[%s17017_s2 + $0x260] ss:$8 sps:$4 sm:$0xff]  }
 0x181   : > { %1750 = vmatprep.subr.bf16.mxu0 %v13363_v5  ;;  %v1576_v5 = vrot.slane %v794_v47, 2  ;;  %v1582_v47 = vshrl.u32 %v14953_v55, 16 }
 0x183   : > { %1478 = vmatmul.mubr.bf16.gmra.mrb[12].mxu0 %v1297_v10  ;;  %v1584_v10 = vrot.slane %v1582_v47, 1  ;;  %v1612_v47 = vrot.slane %v834_v11, 2 }
 0x184   : > { %1487 = vmatprep.mubr.bf16.mxu0 %v17056_v0  ;;  %1751 = vmatpush1.bf16.msra.mxu0 %v13361_v14  ;;  %v1591_v14 = vshrl.u32 %v14988_v9, 16 }
 0x185   : > { %1752 = vmatprep.subr.bf16.mxu0 %v13366_v57  ;;  %v13370_v57 = vld [vmem:[%s17017_s2 + $0x210] ss:$8 sps:$4 sm:$0xff]   ;;  %v1586_v15 = vor.u32 %v1585_v62, %v1584_v10 }
 0x188   : > { %1753 = vmatpush1.bf16.msra.mxu0 %v13364_v41  ;;  %v1588_v41 = vrot.slane %v808_v19, 1  ;;  %v13378_v19 = vld [vmem:[%s17017_s2 + $0x234] ss:$8 sps:$4 sm:$0xff]  }
 0x189   : > { %2013 = vmatprep.subr.bf16.mxu0 %v13369_v4  ;;  %v1577_v4 = vor.u32 %v1576_v5, %v1575_v63  ;;  %v13387_v5 = vld [vmem:[%s17017_s2 + $0x264] ss:$8 sps:$4 sm:$0xff]  }
 0x18a   : > { %v1590_v61 = vor.u32 %v1589_v28, %v1588_v41  ;;  %v1621_v28 = vrot.slane %v844_v33, 2  ;;  %v1630_v33 = vrot.slane %v854_v56, 2  ;;  %v13391_v56 = vld [vmem:[#allocation2] ss:$8 sps:$4 sm:$0xff]  }
 0x18b   : > { %1488 = vmatmul.mubr.bf16.gmra.mrb[16].mxu0 %v1300_v16  ;;  %v1593_v16 = vrot.slane %v1591_v14, 1  ;;  %v1578_v27 = vsel %vm1560_vm3, %v1572_v1, %v1577_v4  ;;  %v1604_v14 = vor.u32 %v1603_v42, %v1602_v21  ;;  %v1616_v4 = vrot.slane %v840_v17, 2 }
 0x18c   : > { %1497 = vmatprep.mubr.bf16.mxu0 %v17056_v0 }
 0x18d   : > { %v1595_v63 = vor.u32 %v1594_v26, %v1593_v16 }
 0x193   : > { %1498 = vmatmul.mubr.bf16.gmra.mrb[20].mxu0 %v1303_v31  ;;  %v1598_v31 = vrot.slane %v820_v34, 2  ;;  %v13384_v34 = vld [vmem:[%s17017_s2 + $0x254] ss:$8 sps:$4 sm:$0xff]  }
 0x194   : > { %1507 = vmatprep.mubr.bf16.mxu0 %v17056_v0 }
 0x195   : > { %v1599_v62 = vor.u32 %v1598_v31, %v1597_v22 }
 0x197   : > { %v1605_v41 = vsel %vm1560_vm3, %v1599_v62, %v1604_v14  ;;  %v1899_v14 = vrot.slane %v15045_v51, 2  ;;  %v1906_v51 = vrot.slane %v15105_v44, 2 }
 0x19b   : > { %1508 = vmatmul.mubr.bf16.gmra.mrb[24].mxu0 %v1306_v48  ;;  %v1581_v48 = vor.u32 %v1580_v37, %v1579_v40  ;;  %v13390_v40 = vld [vmem:[%s17017_s2 + $0x274] ss:$8 sps:$4 sm:$0xff]   ;;  %v1607_v37 = vrot.slane %v830_v60, 2  ;;  %v1615_v60 = vrot.slane %v838_v29, 1 }
 0x19c   : > { %1517 = vmatprep.mubr.bf16.mxu0 %v17056_v0 }
 0x19d   : > { %v1587_v50 = vsel %vm1560_vm3, %v1581_v48, %v1586_v15  ;;  %v1608_v11 = vor.u32 %v1607_v37, %v1606_v58  ;;  %v1617_v30 = vor.u32 %v1616_v4, %v1615_v60  ;;  %v13396_v48 = vld [vmem:[#allocation2 + $0x14] ss:$8 sps:$4 sm:$0xff]   ;;  %v1887_v15 = vrot.slane %v14906_v32, 2  ;;  %v13400_v32 = vld [vmem:[#allocation2 + $0x30] ss:$8 sps:$4 sm:$0xff]   ;;  %v13415_v60 = vld [vmem:[%s15307_s15] sm:$0xff]  }
 0x19e   : > { %v1890_v58 = vrot.slane %v14940_v49, 2  ;;  %v13406_v49 = vld [vmem:[#allocation2 + $0x50] ss:$8 sps:$4 sm:$0xff]   ;;  %v13414_v37 = vld [vmem:[#allocation2 + $0x74] ss:$8 sps:$4 sm:$0xff]  }
 0x1a3   : > { %1518 = vmatmul.mubr.bf16.gmra.mrb[28].mxu0 %v1309_v59  ;;  %v1609_v59 = vshrl.u32 %v15063_v3, 16 }
 0x1a4   : > { %1770 = vmatprep.mubr.bf16.mxu0 %v17056_v0 }
 0x1a5   : > { %v1611_v10 = vrot.slane %v1609_v59, 1  ;;  %v1891_v59 = vrot.slane %v14953_v55, 2  ;;  %v13411_v55 = vld [vmem:[#allocation2 + $0x64] ss:$8 sps:$4 sm:$0xff]  }
 0x1a7   : > { %v1613_v1 = vor.u32 %v1612_v47, %v1611_v10  ;;  %v1896_v47 = vrot.slane %v15010_v25, 2  ;;  %v1903_v10 = vrot.slane %v15084_v20, 2 }
 0x1a9   : > { %v1614_v16 = vsel %vm1560_vm3, %v1608_v11, %v1613_v1  ;;  %v15443_v11 = vrot.slane %v13415_v60, 7  ;;  %v13419_v1 = vld [vmem:[%s15307_s15 + $0x8] sm:$0xff]   ;;  %v13458_v60 = vld [vmem:[#allocation2 + $0x134] ss:$8 sps:$4 sm:$0xff]  }
 0x1aa   : > { %v15450_v4 = vrot.slane %v13419_v1, 7 }
 0x1ab   : > { %1771 = vmatmul.mubr.bf16.vlgmr.msra.gmra.mrb[0].mxu0 %v15138_v36  ;;  %v13373_v36 = vld [vmem:[%s17017_s2 + $0x220] ss:$8 sps:$4 sm:$0xff]   ;;  %17139 = vst [vmem:[#allocation18_spill] sm:$0xff] %v15443_v11 }
 0x1ac   : > { %2014 = vmatpush1.bf16.msra.mxu0 %v13367_v45  ;;  %1780 = vmatprep.mubr.bf16.mxu0 %v17056_v0  ;;  %v1596_v45 = vsel %vm1560_vm3, %v1590_v61, %v1595_v63  ;;  %v13403_v61 = vld [vmem:[#allocation2 + $0x40] ss:$8 sps:$4 sm:$0xff]   ;;  %v13408_v63 = vld [vmem:[#allocation2 + $0x54] ss:$8 sps:$4 sm:$0xff]   ;;  %17140 = vst [vmem:[#allocation19_spill] sm:$0xff] %v15450_v4 }
 0x1ad   : > { %2015 = vmatprep.subr.bf16.mxu0 %v13372_v13  ;;  %v13388_v13 = vld [vmem:[%s17017_s2 + $0x270] ss:$8 sps:$4 sm:$0xff]  }
 0x1b0   : > { %2016 = vmatpush1.bf16.msra.mxu0 %v13370_v57  ;;  %v13393_v57 = vld [vmem:[#allocation2 + $0x4] ss:$8 sps:$4 sm:$0xff]  }
 0x1b1   : > { %2017 = vmatprep.subr.bf16.mxu0 %v13375_v54  ;;  %v1618_v54 = vshrl.u32 %v15084_v20, 16  ;;  %v13422_v20 = vld [vmem:[#allocation2 + $0x94] ss:$8 sps:$4 sm:$0xff]  }
 0x1b3   : > { %1781 = vmatmul.mubr.bf16.gmra.mrb[4].mxu0 %v1578_v27  ;;  %v1620_v26 = vrot.slane %v1618_v54, 1  ;;  %v1625_v27 = vrot.slane %v850_v43, 2  ;;  %v1885_v43 = vrot.slane %v14888_v23, 2  ;;  %v13397_v23 = vld [vmem:[#allocation2 + $0x20] ss:$8 sps:$4 sm:$0xff]  }
 0x1b4   : > { %1790 = vmatprep.mubr.bf16.mxu0 %v17056_v0  ;;  %2018 = vmatpush1.bf16.msra.mxu0 %v13373_v36  ;;  %v1627_v36 = vshrl.u32 %v15105_v44, 16  ;;  %v13426_v44 = vld [vmem:[#allocation2 + $0xa4] ss:$8 sps:$4 sm:$0xff]  }
 0x1b5   : > { %2019 = vmatprep.subr.bf16.mxu0 %v13378_v19  ;;  %v1622_v29 = vor.u32 %v1621_v28, %v1620_v26  ;;  %v1624_v19 = vrot.slane %v848_v52, 1  ;;  %v1884_v52 = vrot.slane %v14877_v18, 2  ;;  %v13424_v28 = vld [vmem:[#allocation2 + $0xa0] ss:$8 sps:$4 sm:$0xff]   ;;  %v13430_v26 = vld [vmem:[#allocation2 + $0xb4] ss:$8 sps:$4 sm:$0xff]  }
 0x1b6   : > { %v1629_v17 = vrot.slane %v1627_v36, 1  ;;  %v13423_v36 = vld [vmem:[%s15307_s15 + $0x10] sm:$0xff]  }
 0x1b7   : > { %v1626_v22 = vor.u32 %v1625_v27, %v1624_v19  ;;  %v1886_v42 = vsel %vm1883_vm5, %v1884_v52, %v1885_v43  ;;  %v13432_v19 = vld [vmem:[#allocation2 + $0xc0] ss:$8 sps:$4 sm:$0xff]   ;;  %v13438_v27 = vld [vmem:[#allocation2 + $0xd4] ss:$8 sps:$4 sm:$0xff]   ;;  %v13444_v43 = vld [vmem:[#allocation2 + $0xf0] ss:$8 sps:$4 sm:$0xff]  }
 0x1b8   : > { %2020 = vmatpush1.bf16.msra.mxu0 %v13376_v7  ;;  %v1623_v7 = vsel %vm1560_vm3, %v1617_v30, %v1622_v29  ;;  %v1631_v31 = vor.u32 %v1630_v33, %v1629_v17  ;;  %v13434_v30 = vld [vmem:[#allocation2 + $0xc4] ss:$8 sps:$4 sm:$0xff]   ;;  %v15457_v29 = vrot.slane %v13423_v36, 7  ;;  %v13427_v17 = vld [vmem:[%s15307_s15 + $0x18] sm:$0xff]  }
 0x1b9   : > { %2021 = vmatprep.subr.bf16.mxu0 %v13381_v53  ;;  %v1888_v53 = vrot.slane %v14921_v39, 2  ;;  %v13405_v39 = vld [vmem:[#allocation2 + $0x44] ss:$8 sps:$4 sm:$0xff]   ;;  %v13436_v33 = vld [vmem:[#allocation2 + $0xd0] ss:$8 sps:$4 sm:$0xff]  }
 0x1ba   : > { %v1632_v21 = vsel %vm1560_vm3, %v1626_v22, %v1631_v31  ;;  %17141 = vst [vmem:[#allocation20_spill] sm:$0xff] %v15457_v29  ;;  %v15464_v22 = vrot.slane %v13427_v17, 7  ;;  %v13440_v31 = vld [vmem:[#allocation2 + $0xe0] ss:$8 sps:$4 sm:$0xff]   ;;  %v13464_v17 = vld [vmem:[#allocation2 + $0x154] ss:$8 sps:$4 sm:$0xff]  }
 0x1bb   : > { %1791 = vmatmul.mubr.bf16.gmra.mrb[8].mxu0 %v1587_v50  ;;  %v1889_v18 = vsel %vm1883_vm5, %v1887_v15, %v1888_v53  ;;  %v13402_v50 = vld [vmem:[#allocation2 + $0x34] ss:$8 sps:$4 sm:$0xff]   ;;  %v13431_v52 = vld [vmem:[%s15307_s15 + $0x20] sm:$0xff]  }
 0x1bc   : > { %1800 = vmatprep.mubr.bf16.mxu0 %v17056_v0  ;;  %2022 = vmatpush1.bf16.msra.mxu0 %v13379_v46  ;;  %v13394_v46 = vld [vmem:[#allocation2 + $0x10] ss:$8 sps:$4 sm:$0xff]   ;;  %17142 = vst [vmem:[#allocation21_spill] sm:$0xff] %v15464_v22 }
 0x1bd   : > { %2023 = vmatprep.subr.bf16.mxu0 %v13384_v34  ;;  %v13399_v34 = vld [vmem:[#allocation2 + $0x24] ss:$8 sps:$4 sm:$0xff]   ;;  %v13439_v53 = vld [vmem:[%s15307_s15 + $0x30] sm:$0xff]  }
 0x1c0   : > { %2024 = vmatpush1.bf16.msra.mxu0 %v13382_v24  ;;  %v1892_v24 = vsel %vm1883_vm5, %v1890_v58, %v1891_v59 }
 0x1c1   : > { %2025 = vmatprep.subr.bf16.mxu0 %v13387_v5  ;;  %v1893_v5 = vrot.slane %v14972_v2, 2  ;;  %v13412_v2 = vld [vmem:[#allocation2 + $0x70] ss:$8 sps:$4 sm:$0xff]  }
 0x1c3   : > { %1801 = vmatmul.mubr.bf16.gmra.mrb[12].mxu0 %v1596_v45  ;;  %v13409_v45 = vld [vmem:[#allocation2 + $0x60] ss:$8 sps:$4 sm:$0xff]  }
 0x1c4   : > { %1810 = vmatprep.mubr.bf16.mxu0 %v17056_v0  ;;  %2026 = vmatpush1.bf16.msra.mxu0 %v13385_v6  ;;  %v1894_v6 = vrot.slane %v14988_v9, 2  ;;  %v13418_v9 = vld [vmem:[#allocation2 + $0x84] ss:$8 sps:$4 sm:$0xff]  }
 0x1c5   : > { %2027 = vmatprep.subr.bf16.mxu0 %v13390_v40 }
 0x1c6   : > { %v1895_v40 = vsel %vm1883_vm5, %v1893_v5, %v1894_v6  ;;  %v15522_v6 = vsel %vm671_vm0, %v15450_v4, 0 }
 0x1c8   : > { %2028 = vmatpush1.bf16.msra.mxu0 %v13388_v13  ;;  %v1897_v13 = vrot.slane %v15028_v38, 2  ;;  %v1902_v38 = vrot.slane %v15074_v12, 2  ;;  %v13416_v12 = vld [vmem:[#allocation2 + $0x80] ss:$8 sps:$4 sm:$0xff]  }
 0x1c9   : > { %2254 = vmatprep.subr.bf16.mxu0 %v13393_v57  ;;  %v1900_v57 = vrot.slane %v15063_v3, 2 }
 0x1ca   : > { %v1898_v62 = vsel %vm1883_vm5, %v1896_v47, %v1897_v13  ;;  %v1904_v54 = vsel %vm1883_vm5, %v1902_v38, %v1903_v10  ;;  %v13452_v47 = vld [vmem:[#allocation2 + $0x114] ss:$8 sps:$4 sm:$0xff]   ;;  %v15533_v13 = vsel %vm671_vm0, 0, %v15457_v29 }
 0x1cb   : > { %1811 = vmatmul.mubr.bf16.gmra.mrb[16].mxu0 %v1605_v41  ;;  %v1901_v25 = vsel %vm1883_vm5, %v1899_v14, %v1900_v57  ;;  %v1905_v41 = vrot.slane %v15095_v35, 2  ;;  %v13420_v35 = vld [vmem:[#allocation2 + $0x90] ss:$8 sps:$4 sm:$0xff]   ;;  %v2421_v14 = vshll.u32 %v15533_v13, 16  ;;  %v15544_v57 = vsel %vm671_vm0, %v15457_v29, 0 }
 0x1cc   : > { %1820 = vmatprep.mubr.bf16.mxu0 %v17056_v0  ;;  %v2419_v10 = vshrl.u32 %v15533_v13, 16 }
 0x1cd   : > { %v1907_v3 = vsel %vm1883_vm5, %v1905_v41, %v1906_v51  ;;  %v2425_v41 = vshll.u32 %v15544_v57, 16  ;;  %v13453_v51 = vld [vmem:[#allocation2 + $0x120] ss:$8 sps:$4 sm:$0xff]  }
 0x1d3   : > { %1821 = vmatmul.mubr.bf16.gmra.mrb[20].mxu0 %v1614_v16  ;;  %v13428_v16 = vld [vmem:[#allocation2 + $0xb0] ss:$8 sps:$4 sm:$0xff]  }
 0x1d4   : > { %1830 = vmatprep.mubr.bf16.mxu0 %v17056_v0 }
 0x1db   : > { %1831 = vmatmul.mubr.bf16.gmra.mrb[24].mxu0 %v1623_v7  ;;  %v13442_v7 = vld [vmem:[#allocation2 + $0xe4] ss:$8 sps:$4 sm:$0xff]  }
 0x1dc   : > { %1840 = vmatprep.mubr.bf16.mxu0 %v17056_v0 }
 0x1e3   : > { %1841 = vmatmul.mubr.bf16.gmra.mrb[28].mxu0 %v1632_v21  ;;  %v13446_v21 = vld [vmem:[#allocation2 + $0xf4] ss:$8 sps:$4 sm:$0xff]  }
 0x1e4   : > { %2045 = vmatprep.mubr.bf16.mxu0 %v17056_v0 }
 0x1eb   : > { %2046 = vmatmul.mubr.bf16.vlgmr.msra.gmra.mrb[0].mxu0 %v1886_v42  ;;  %v13449_v42 = vld [vmem:[#allocation2 + $0x104] ss:$8 sps:$4 sm:$0xff]  }
 0x1ec   : > { %2255 = vmatpush1.bf16.msra.mxu0 %v13391_v56  ;;  %2055 = vmatprep.mubr.bf16.mxu0 %v17056_v0  ;;  %v15471_v56 = vrot.slane %v13431_v52, 7 }
 0x1ed   : > { %2256 = vmatprep.subr.bf16.mxu0 %v13396_v48  ;;  %v13435_v48 = vld [vmem:[%s15307_s15 + $0x28] sm:$0xff]  }
 0x1ee   : > { %17143 = vst [vmem:[#allocation22_spill] sm:$0xff] %v15471_v56  ;;  %v15478_v15 = vrot.slane %v13435_v48, 7  ;;  %v15588_v52 = vsel %vm671_vm0, %v15471_v56, 0 }
 0x1f0   : > { %2257 = vmatpush1.bf16.msra.mxu0 %v13394_v46  ;;  %17144 = vst [vmem:[#allocation23_spill] sm:$0xff] %v15478_v15  ;;  %v15485_v46 = vrot.slane %v13439_v53, 7 }
 0x1f1   : > { %2258 = vmatprep.subr.bf16.mxu0 %v13399_v34  ;;  %v15489_v34 = vsel %vm671_vm0, 0, %v15443_v11 }
 0x1f2   : > { %17145 = vst [vmem:[#allocation24_spill] sm:$0xff] %v15485_v46  ;;  %v2399_v59 = vshrl.u32 %v15489_v34, 16 }
 0x1f3   : > { %2056 = vmatmul.mubr.bf16.gmra.mrb[4].mxu0 %v1889_v18  ;;  %v13443_v18 = vld [vmem:[%s15307_s15 + $0x38] sm:$0xff]  }
 0x1f4   : > { %2065 = vmatprep.mubr.bf16.mxu0 %v17056_v0  ;;  %2259 = vmatpush1.bf16.msra.mxu0 %v13397_v23  ;;  %v2401_v23 = vshll.u32 %v15489_v34, 16  ;;  %v15501_v58 = vrot.slane %v13443_v18, 7  ;;  %v17050_v18 = vshll.u32 %v15588_v52, 16 }
 0x1f5   : > { %2260 = vmatprep.subr.bf16.mxu0 %v13402_v50  ;;  %v15499_v50 = vsel %vm671_vm0, %v15443_v11, 0 }
 0x1f6   : > { %17146 = vst [vmem:[#allocation25_spill] sm:$0xff] %v15501_v58 }
 0x1f8   : > { %2261 = vmatpush1.bf16.msra.mxu0 %v13400_v32  ;;  %v2403_v32 = vrot.slane %v2401_v23, 1 }
 0x1f9   : > { %2262 = vmatprep.subr.bf16.mxu0 %v13405_v39  ;;  %v2405_v39 = vshll.u32 %v15499_v50, 16 }
 0x1fb   : > { %2066 = vmatmul.mubr.bf16.gmra.mrb[8].mxu0 %v1892_v24  ;;  %v15509_v24 = vsel %vm671_vm0, 0, %v15450_v4 }
 0x1fc   : > { %2075 = vmatprep.mubr.bf16.mxu0 %v17056_v0  ;;  %2263 = vmatpush1.bf16.msra.mxu0 %v13403_v61  ;;  %v2404_v61 = vor.u32 %v2403_v32, %v2399_v59  ;;  %v2411_v5 = vshll.u32 %v15509_v24, 16  ;;  %v13465_v32 = vld [vmem:[#allocation2 + $0x160] ss:$8 sps:$4 sm:$0xff]  }
 0x1fd   : > { %2264 = vmatprep.subr.bf16.mxu0 %v13408_v63  ;;  %v2407_v63 = vrot.slane %v2405_v39, 1 }
 0x200   : > { %2265 = vmatpush1.bf16.msra.mxu0 %v13406_v49  ;;  %v15525_v49 = vsel %vm777_vm1, %v2404_v61, %v2407_v63  ;;  %v15599_v61 = vsel %vm671_vm0, 0, %v15478_v15  ;;  %v13470_v63 = vld [vmem:[#allocation2 + $0x174] ss:$8 sps:$4 sm:$0xff]  }
 0x201   : > { %2266 = vmatprep.subr.bf16.mxu0 %v13411_v55  ;;  %17147 = vst [vmem:[#allocation26_spill] sm:$0xff] %v15525_v49  ;;  %v13447_v55 = vld [vmem:[#allocation2 + $0x100] ss:$8 sps:$4 sm:$0xff]  }
 0x203   : > { %2076 = vmatmul.mubr.bf16.gmra.mrb[12].mxu0 %v1895_v40  ;;  %v2409_v40 = vshrl.u32 %v15509_v24, 16 }
 0x204   : > { %2085 = vmatprep.mubr.bf16.mxu0 %v17056_v0  ;;  %2267 = vmatpush1.bf16.msra.mxu0 %v13409_v45  ;;  %v2413_v45 = vrot.slane %v2411_v5, 1 }
 0x205   : > { %2268 = vmatprep.subr.bf16.mxu0 %v13414_v37  ;;  %v2415_v37 = vshll.u32 %v15522_v6, 16 }
 0x208   : > { %2269 = vmatpush1.bf16.msra.mxu0 %v13412_v2  ;;  %v2414_v2 = vor.u32 %v2413_v45, %v2409_v40  ;;  %v2447_v45 = vrot.slane %v17050_v18, 1 }
 0x209   : > { %2584 = vmatprep.subr.bf16.mxu0 %v13418_v9  ;;  %v2417_v9 = vrot.slane %v2415_v37, 1 }
 0x20b   : > { %2086 = vmatmul.mubr.bf16.gmra.mrb[16].mxu0 %v1898_v62  ;;  %v13450_v62 = vld [vmem:[#allocation2 + $0x110] ss:$8 sps:$4 sm:$0xff]   ;;  %v15547_v38 = vsel %vm777_vm1, %v2414_v2, %v2417_v9  ;;  %v15610_v9 = vsel %vm671_vm0, %v15478_v15, 0 }
 0x20c   : > { %2095 = vmatprep.mubr.bf16.mxu0 %v17056_v0  ;;  %17148 = vst [vmem:[#allocation27_spill] sm:$0xff] %v15547_v38  ;;  %v13468_v2 = vld [vmem:[#allocation2 + $0x170] ss:$8 sps:$4 sm:$0xff]  }
 0x213   : > { %2096 = vmatmul.mubr.bf16.gmra.mrb[20].mxu0 %v1901_v25  ;;  %v13455_v25 = vld [vmem:[#allocation2 + $0x124] ss:$8 sps:$4 sm:$0xff]  }
 0x214   : > { %2105 = vmatprep.mubr.bf16.mxu0 %v17056_v0 }
 0x21b   : > { %2106 = vmatmul.mubr.bf16.gmra.mrb[24].mxu0 %v1904_v54  ;;  %v2423_v54 = vrot.slane %v2421_v14, 1 }
 0x21c   : > { %2115 = vmatprep.mubr.bf16.mxu0 %v17056_v0 }
 0x223   : > { %2116 = vmatmul.mubr.bf16.gmra.mrb[28].mxu0 %v1907_v3  ;;  %v15555_v3 = vsel %vm671_vm0, 0, %v15464_v22 }
 0x224   : > { %2286 = vmatprep.mubr.bf16.mxu0 %v17056_v0  ;;  %v2431_v1 = vshll.u32 %v15555_v3, 16  ;;  %v2429_v36 = vshrl.u32 %v15555_v3, 16 }
 0x22b   : > { %10861 = vmatmul.mubr.msk.bf16.vlgmr.msra.gmra.mrb[0].mxu0 %vm15124_vm2, %v15443_v11 }
 0x22c   : > { %2585 = vmatpush1.bf16.msra.mxu0 %v13416_v12  ;;  %2296 = vmatprep.mubr.bf16.mxu0 %v17056_v0  ;;  %v2424_v12 = vor.u32 %v2423_v54, %v2419_v10  ;;  %v17049_v54 = vshrl.u32 %v15599_v61, 16 }
 0x22d   : > { %2586 = vmatprep.subr.bf16.mxu0 %v13422_v20  ;;  %v2427_v20 = vrot.slane %v2425_v41, 1 }
 0x230   : > { %2587 = vmatpush1.bf16.msra.mxu0 %v13420_v35  ;;  %v13456_v35 = vld [vmem:[#allocation2 + $0x130] ss:$8 sps:$4 sm:$0xff]  }
 0x231   : > { %2588 = vmatprep.subr.bf16.mxu0 %v13426_v44  ;;  %v15566_v44 = vsel %vm671_vm0, %v15464_v22, 0 }
 0x233   : > { %10863 = vmatmul.mubr.msk.bf16.gmra.mrb[4].mxu0 %vm15124_vm2, %v15450_v4 }
 0x234   : > { %2306 = vmatprep.mubr.bf16.mxu0 %v17056_v0  ;;  %2589 = vmatpush1.bf16.msra.mxu0 %v13424_v28  ;;  %v13461_v28 = vld [vmem:[#allocation2 + $0x144] ss:$8 sps:$4 sm:$0xff]  }
 0x235   : > { %2590 = vmatprep.subr.bf16.mxu0 %v13430_v26  ;;  %v15569_v26 = vsel %vm777_vm1, %v2424_v12, %v2427_v20  ;;  %v15621_v12 = vsel %vm671_vm0, 0, %v15485_v46 }
 0x236   : > { %17149 = vst [vmem:[#allocation28_spill] sm:$0xff] %v15569_v26 }
 0x238   : > { %2591 = vmatpush1.bf16.msra.mxu0 %v13428_v16  ;;  %v2433_v16 = vrot.slane %v2431_v1, 1 }
 0x239   : > { %2592 = vmatprep.subr.bf16.mxu0 %v13434_v30  ;;  %v17053_v30 = vshll.u32 %v15566_v44, 16 }
 0x23b   : > { %10865 = vmatmul.mubr.msk.bf16.gmra.mrb[8].mxu0 %vm15124_vm2, %v15457_v29 }
 0x23c   : > { %2316 = vmatprep.mubr.bf16.mxu0 %v17056_v0  ;;  %2593 = vmatpush1.bf16.msra.mxu0 %v13432_v19  ;;  %v13459_v19 = vld [vmem:[#allocation2 + $0x140] ss:$8 sps:$4 sm:$0xff]  }
 0x23d   : > { %2594 = vmatprep.subr.bf16.mxu0 %v13438_v27  ;;  %v15577_v27 = vsel %vm671_vm0, 0, %v15471_v56 }
 0x23e   : > { %v17052_v48 = vshrl.u32 %v15577_v27, 16 }
 0x240   : > { %2595 = vmatpush1.bf16.msra.mxu0 %v13436_v33  ;;  %v2434_v33 = vor.u32 %v2433_v16, %v2429_v36  ;;  %v15632_v16 = vsel %vm671_vm0, %v15485_v46, 0 }
 0x241   : > { %2596 = vmatprep.subr.bf16.mxu0 %v13442_v7  ;;  %v2437_v7 = vrot.slane %v17053_v30, 1  ;;  %v13495_v30 = vld [vmem:[#allocation2 + $0x200] ss:$8 sps:$4 sm:$0xff]  }
 0x243   : > { %10867 = vmatmul.mubr.msk.bf16.gmra.mrb[12].mxu0 %vm15124_vm2, %v15464_v22 }
 0x244   : > { %2326 = vmatprep.mubr.bf16.mxu0 %v17056_v0  ;;  %2597 = vmatpush1.bf16.msra.mxu0 %v13440_v31  ;;  %v17051_v31 = vshll.u32 %v15577_v27, 16 }
 0x245   : > { %2598 = vmatprep.subr.bf16.mxu0 %v13446_v21  ;;  %v13462_v21 = vld [vmem:[#allocation2 + $0x150] ss:$8 sps:$4 sm:$0xff]  }
 0x246   : > { %v2443_v53 = vrot.slane %v17051_v31, 1 }
 0x248   : > { %2599 = vmatpush1.bf16.msra.mxu0 %v13444_v43  ;;  %v13467_v43 = vld [vmem:[#allocation2 + $0x164] ss:$8 sps:$4 sm:$0xff]  }
 0x249   : > { %2874 = vmatprep.subr.bf16.mxu0 %v13449_v42  ;;  %v15591_v42 = vsel %vm777_vm1, %v2434_v33, %v2437_v7  ;;  %v17042_v7 = vshll.u32 %v15632_v16, 16 }
 0x24a   : > { %17150 = vst [vmem:[#allocation29_spill] sm:$0xff] %v15591_v42 }
 0x24b   : > { %10869 = vmatmul.mubr.msk.bf16.gmra.mrb[16].mxu0 %vm15124_vm2, %v15471_v56 }
 0x24c   : > { %2336 = vmatprep.mubr.bf16.mxu0 %v17056_v0 }
 0x251   : > { %v17246_v8 = vld [vmem:[#allocation29_spill] sm:$0xff] }
 0x253   : > { %10871 = vmatmul.mubr.msk.bf16.gmra.mrb[20].mxu0 %vm15124_vm2, %v15478_v15 }
 0x254   : > { %2346 = vmatprep.mubr.bf16.mxu0 %v17056_v0 }
 0x25b   : > { %10873 = vmatmul.mubr.msk.bf16.gmra.mrb[24].mxu0 %vm15124_vm2, %v15485_v46 }
 0x25c   : > { %2356 = vmatprep.mubr.bf16.mxu0 %v17056_v0 }
 0x263   : > { %10875 = vmatmul.mubr.msk.bf16.gmra.mrb[28].mxu0 %vm15124_vm2, %v15501_v58 }
 0x264   : > { %2616 = vmatprep.mubr.bf16.mxu0 %v17056_v0 }
 0x26b   : > { %2617 = vmatmul.mubr.bf16.vlgmr.msra.gmra.mrb[0].mxu0 %v15525_v49 }
 0x26c   : > { %2875 = vmatpush1.bf16.msra.mxu0 %v13447_v55  ;;  %2626 = vmatprep.mubr.bf16.mxu0 %v17056_v0  ;;  %v2444_v55 = vor.u32 %v2443_v53, %v17052_v48  ;;  %v2467_v53 = vrot.slane %v17042_v7, 1  ;;  %v13476_v7 = vld [vmem:[#allocation2 + $0x194] ss:$8 sps:$4 sm:$0xff]   ;;  %v3031_v48 = vshrl.u32 %v15522_v6, 16 }
 0x26d   : > { %2876 = vmatprep.subr.bf16.mxu0 %v13452_v47  ;;  %v17048_v47 = vshll.u32 %v15599_v61, 16 }
 0x270   : > { %2877 = vmatpush1.bf16.msra.mxu0 %v13450_v62  ;;  %v13473_v62 = vld [vmem:[#allocation2 + $0x184] ss:$8 sps:$4 sm:$0xff]  }
 0x271   : > { %2878 = vmatprep.subr.bf16.mxu0 %v13455_v25  ;;  %v15613_v25 = vsel %vm777_vm1, %v2444_v55, %v2447_v45 }
 0x272   : > { %17151 = vst [vmem:[#allocation30_spill] sm:$0xff] %v15613_v25 }
 0x273   : > { %2627 = vmatmul.mubr.bf16.gmra.mrb[4].mxu0 %v15547_v38 }
 0x274   : > { %2636 = vmatprep.mubr.bf16.mxu0 %v17056_v0  ;;  %2879 = vmatpush1.bf16.msra.mxu0 %v13453_v51  ;;  %v2453_v51 = vrot.slane %v17048_v47, 1 }
 0x275   : > { %2880 = vmatprep.subr.bf16.mxu0 %v13458_v60  ;;  %v17047_v60 = vshll.u32 %v15610_v9, 16 }
 0x276   : > { %v2454_v20 = vor.u32 %v2453_v51, %v17049_v54 }
 0x278   : > { %2881 = vmatpush1.bf16.msra.mxu0 %v13456_v35  ;;  %v2457_v35 = vrot.slane %v17047_v60, 1 }
 0x279   : > { %2882 = vmatprep.subr.bf16.mxu0 %v13461_v28  ;;  %v17045_v28 = vshll.u32 %v15621_v12, 16 }
 0x27b   : > { %2637 = vmatmul.mubr.bf16.gmra.mrb[8].mxu0 %v15569_v26  ;;  %v2463_v33 = vrot.slane %v17045_v28, 1  ;;  %v2752_v28 = vrot.slane %v15544_v57, 1 }
 0x27c   : > { %2646 = vmatprep.mubr.bf16.mxu0 %v17056_v0  ;;  %2883 = vmatpush1.bf16.msra.mxu0 %v13459_v19  ;;  %v15635_v19 = vsel %vm777_vm1, %v2454_v20, %v2457_v35 }
 0x27d   : > { %2884 = vmatprep.subr.bf16.mxu0 %v13464_v17  ;;  %17152 = vst [vmem:[#allocation31_spill] sm:$0xff] %v15635_v19  ;;  %v17046_v17 = vshrl.u32 %v15621_v12, 16 }
 0x280   : > { %2885 = vmatpush1.bf16.msra.mxu0 %v13462_v21  ;;  %v15643_v21 = vsel %vm671_vm0, 0, %v15501_v58 }
 0x281   : > { %2886 = vmatprep.subr.bf16.mxu0 %v13467_v43  ;;  %v2464_v43 = vor.u32 %v2463_v33, %v17046_v17  ;;  %v17044_v45 = vshrl.u32 %v15643_v21, 16  ;;  %v2745_v33 = vrot.slane %v15489_v34, 1  ;;  %v13480_v17 = vld [vmem:[#allocation2 + $0x1b0] ss:$8 sps:$4 sm:$0xff]  }
 0x283   : > { %2647 = vmatmul.mubr.bf16.gmra.mrb[12].mxu0 %v15591_v42  ;;  %v15657_v55 = vsel %vm777_vm1, %v2464_v43, %v2467_v53  ;;  %v2746_v43 = vrot.slane %v15499_v50, 1 }
 0x284   : > { %2656 = vmatprep.mubr.bf16.mxu0 %v17056_v0  ;;  %2887 = vmatpush1.bf16.msra.mxu0 %v13465_v32  ;;  %v17041_v32 = vshll.u32 %v15643_v21, 16  ;;  %17153 = vst [vmem:[#allocation32_spill] sm:$0xff] %v15657_v55 }
 0x285   : > { %2888 = vmatprep.subr.bf16.mxu0 %v13470_v63  ;;  %v15654_v63 = vsel %vm671_vm0, %v15501_v58, 0  ;;  %v15677_v53 = vsel %vm1285_vm4, %v2745_v33, %v2746_v43  ;;  %v13477_v33 = vld [vmem:[#allocation2 + $0x1a0] ss:$8 sps:$4 sm:$0xff]   ;;  %v13482_v43 = vld [vmem:[#allocation2 + $0x1b4] ss:$8 sps:$4 sm:$0xff]  }
 0x286   : > { %17155 = vst [vmem:[#allocation34_spill] sm:$0xff] %v15677_v53 }
 0x288   : > { %2889 = vmatpush1.bf16.msra.mxu0 %v13468_v2  ;;  %v2473_v2 = vrot.slane %v17041_v32, 1  ;;  %v13471_v32 = vld [vmem:[#allocation2 + $0x180] ss:$8 sps:$4 sm:$0xff]  }
 0x289   : > { %3196 = vmatprep.subr.bf16.mxu0 %v13473_v62  ;;  %v17043_v62 = vshll.u32 %v15654_v63, 16 }
 0x28a   : > { %v2474_v51 = vor.u32 %v2473_v2, %v17044_v45  ;;  %v2748_v2 = vrot.slane %v15509_v24, 1 }
 0x28b   : > { %2657 = vmatmul.mubr.bf16.gmra.mrb[16].mxu0 %v15613_v25  ;;  %v2477_v20 = vrot.slane %v17043_v62, 1  ;;  %v13479_v62 = vld [vmem:[#allocation2 + $0x1a4] ss:$8 sps:$4 sm:$0xff]  }
 0x28c   : > { %2666 = vmatprep.mubr.bf16.mxu0 %v17056_v0 }
 0x28d   : > { %v15670_v35 = vsel %vm777_vm1, %v2474_v51, %v2477_v20  ;;  %v2749_v51 = vrot.slane %v15522_v6, 1  ;;  %v13474_v20 = vld [vmem:[#allocation2 + $0x190] ss:$8 sps:$4 sm:$0xff]  }
 0x28e   : > { %17154 = vst [vmem:[#allocation33_spill] sm:$0xff] %v15670_v35 }
 0x28f   : > { %v15684_v45 = vsel %vm1285_vm4, %v2748_v2, %v2749_v51  ;;  %v13483_v2 = vld [vmem:[#allocation2 + $0x1c0] ss:$8 sps:$4 sm:$0xff]   ;;  %v2754_v51 = vrot.slane %v15555_v3, 1 }
 0x290   : > { %17156 = vst [vmem:[#allocation35_spill] sm:$0xff] %v15684_v45 }
 0x293   : > { %2667 = vmatmul.mubr.bf16.gmra.mrb[20].mxu0 %v15635_v19 }
 0x294   : > { %2676 = vmatprep.mubr.bf16.mxu0 %v17056_v0 }
 0x29b   : > { %2677 = vmatmul.mubr.bf16.gmra.mrb[24].mxu0 %v15657_v55 }
 0x29c   : > { %2686 = vmatprep.mubr.bf16.mxu0 %v17056_v0 }
 0x2a3   : > { %2687 = vmatmul.mubr.bf16.gmra.mrb[28].mxu0 %v15670_v35 }
 0x2a4   : > { %2906 = vmatprep.mubr.bf16.mxu0 %v17056_v0 }
 0x2ab   : > { %2907 = vmatmul.mubr.bf16.vlgmr.msra.gmra.mrb[0].mxu0 %v15677_v53  ;;  %v14254_v53 = vld [vmem:[%s14852_s19 + $0x78] sm:$0xff] }
 0x2ac   : > { %3197 = vmatpush1.bf16.msra.mxu0 %v13471_v32  ;;  %2916 = vmatprep.mubr.bf16.mxu0 %v17056_v0  ;;  %v2751_v32 = vrot.slane %v15533_v13, 1 }
 0x2ad   : > { %3198 = vmatprep.subr.bf16.mxu0 %v13476_v7  ;;  %v13485_v7 = vld [vmem:[#allocation2 + $0x1c4] ss:$8 sps:$4 sm:$0xff]  }
 0x2ae   : > { %v15691_v60 = vsel %vm1285_vm4, %v2751_v32, %v2752_v28  ;;  %v13489_v28 = vld [vmem:[#allocation2 + $0x1e0] ss:$8 sps:$4 sm:$0xff]   ;;  %v2757_v32 = vrot.slane %v15577_v27, 1 }
 0x2af   : > { %17157 = vst [vmem:[#allocation36_spill] sm:$0xff] %v15691_v60 }
 0x2b0   : > { %3199 = vmatpush1.bf16.msra.mxu0 %v13474_v20  ;;  %v2755_v20 = vrot.slane %v15566_v44, 1 }
 0x2b1   : > { %3200 = vmatprep.subr.bf16.mxu0 %v13479_v62  ;;  %v13488_v62 = vld [vmem:[#allocation2 + $0x1d4] ss:$8 sps:$4 sm:$0xff]  }
 0x2b2   : > { %v15698_v47 = vsel %vm1285_vm4, %v2754_v51, %v2755_v20  ;;  %v2760_v51 = vrot.slane %v15599_v61, 1  ;;  %v2761_v20 = vrot.slane %v15610_v9, 1 }
 0x2b3   : > { %2917 = vmatmul.mubr.bf16.gmra.mrb[4].mxu0 %v15684_v45  ;;  %17158 = vst [vmem:[#allocation37_spill] sm:$0xff] %v15698_v47 }
 0x2b4   : > { %2926 = vmatprep.mubr.bf16.mxu0 %v17056_v0  ;;  %3201 = vmatpush1.bf16.msra.mxu0 %v13477_v33  ;;  %v13486_v33 = vld [vmem:[#allocation2 + $0x1d0] ss:$8 sps:$4 sm:$0xff]  }
 0x2b5   : > { %3202 = vmatprep.subr.bf16.mxu0 %v13482_v43  ;;  %v13491_v43 = vld [vmem:[#allocation2 + $0x1e4] ss:$8 sps:$4 sm:$0xff]  }
 0x2b8   : > { %3203 = vmatpush1.bf16.msra.mxu0 %v13480_v17  ;;  %v13494_v17 = vld [vmem:[#allocation2 + $0x1f4] ss:$8 sps:$4 sm:$0xff]  }
 0x2b9   : > { %3204 = vmatprep.subr.bf16.mxu0 %v13485_v7  ;;  %v2758_v7 = vrot.slane %v15588_v52, 1 }
 0x2bb   : > { %2927 = vmatmul.mubr.bf16.gmra.mrb[8].mxu0 %v15691_v60  ;;  %v15705_v54 = vsel %vm1285_vm4, %v2757_v32, %v2758_v7  ;;  %v3022_v32 = vshrl.u32 %v15499_v50, 16  ;;  %v2766_v7 = vrot.slane %v15643_v21, 1 }
 0x2bc   : > { %2936 = vmatprep.mubr.bf16.mxu0 %v17056_v0  ;;  %3205 = vmatpush1.bf16.msra.mxu0 %v13483_v2  ;;  %v13492_v2 = vld [vmem:[#allocation2 + $0x1f0] ss:$8 sps:$4 sm:$0xff]   ;;  %17159 = vst [vmem:[#allocation38_spill] sm:$0xff] %v15705_v54 }
 0x2bd   : > { %3206 = vmatprep.subr.bf16.mxu0 %v13488_v62  ;;  %v13497_v62 = vld [vmem:[#allocation2 + $0x204] ss:$8 sps:$4 sm:$0xff]  }
 0x2c0   : > { %3207 = vmatpush1.bf16.msra.mxu0 %v13486_v33  ;;  %v15712_v33 = vsel %vm1285_vm4, %v2760_v51, %v2761_v20  ;;  %v3020_v51 = vrot.slane %v2401_v23, 2  ;;  %v3024_v20 = vrot.slane %v3022_v32, 1  ;;  %v3028_v23 = vrot.slane %v2409_v40, 1  ;;  %v13503_v40 = vld [vmem:[#allocation2 + $0x224] ss:$8 sps:$4 sm:$0xff]  }
 0x2c1   : > { %3208 = vmatprep.subr.bf16.mxu0 %v13491_v43  ;;  %17160 = vst [vmem:[#allocation39_spill] sm:$0xff] %v15712_v33  ;;  %v2763_v43 = vrot.slane %v15621_v12, 1  ;;  %v3033_v32 = vrot.slane %v3031_v48, 1  ;;  %v3038_v48 = vrot.slane %v2421_v14, 2  ;;  %v3049_v14 = vshrl.u32 %v15566_v44, 16 }
 0x2c3   : > { %2937 = vmatmul.mubr.bf16.gmra.mrb[12].mxu0 %v15698_v47 }
 0x2c4   : > { %2946 = vmatprep.mubr.bf16.mxu0 %v17056_v0  ;;  %3209 = vmatpush1.bf16.msra.mxu0 %v13489_v28  ;;  %v2764_v28 = vrot.slane %v15632_v16, 1 }
 0x2c5   : > { %3210 = vmatprep.subr.bf16.mxu0 %v13494_v17 }
 0x2c6   : > { %v15719_v17 = vsel %vm1285_vm4, %v2763_v43, %v2764_v28  ;;  %v3025_v43 = vrot.slane %v2405_v39, 2  ;;  %v3029_v39 = vrot.slane %v2411_v5, 2  ;;  %v3037_v5 = vrot.slane %v2419_v10, 1  ;;  %v13504_v10 = vld [vmem:[#allocation2 + $0x230] ss:$8 sps:$4 sm:$0xff]  }
 0x2c7   : > { %17161 = vst [vmem:[#allocation40_spill] sm:$0xff] %v15719_v17 }
 0x2c8   : > { %3211 = vmatpush1.bf16.msra.mxu0 %v13492_v2  ;;  %v2767_v2 = vrot.slane %v15654_v63, 1  ;;  %v3026_v31 = vor.u32 %v3025_v43, %v3024_v20  ;;  %v3043_v20 = vrot.slane %v2425_v41, 2 }
 0x2c9   : > { %3470 = vmatprep.subr.bf16.mxu0 %v13497_v62  ;;  %v3019_v62 = vrot.slane %v2399_v59, 1 }
 0x2ca   : > { %v15733_v28 = vsel %vm1285_vm4, %v2766_v7, %v2767_v2  ;;  %v3034_v7 = vrot.slane %v2415_v37, 2  ;;  %v13500_v2 = vld [vmem:[#allocation2 + $0x214] ss:$8 sps:$4 sm:$0xff]  }
 0x2cb   : > { %2947 = vmatmul.mubr.bf16.gmra.mrb[16].mxu0 %v15705_v54  ;;  %17162 = vst [vmem:[#allocation41_spill] sm:$0xff] %v15733_v28  ;;  %v3021_v18 = vor.u32 %v3020_v51, %v3019_v62  ;;  %v3040_v62 = vshrl.u32 %v15544_v57, 16  ;;  %v13498_v51 = vld [vmem:[#allocation2 + $0x210] ss:$8 sps:$4 sm:$0xff]  }
 0x2cc   : > { %2956 = vmatprep.mubr.bf16.mxu0 %v17056_v0 }
 0x2cd   : > { %v15739_v59 = vsel %vm1560_vm3, %v3021_v18, %v3026_v31  ;;  %v3030_v31 = vor.u32 %v3029_v39, %v3028_v23  ;;  %v3035_v18 = vor.u32 %v3034_v7, %v3033_v32  ;;  %v3042_v37 = vrot.slane %v3040_v62, 1  ;;  %v13506_v23 = vld [vmem:[#allocation2 + $0x234] ss:$8 sps:$4 sm:$0xff]   ;;  %v13509_v7 = vld [vmem:[#allocation2 + $0x244] ss:$8 sps:$4 sm:$0xff]  }
 0x2ce   : > { %17163 = vst [vmem:[#allocation42_spill] sm:$0xff] %v15739_v59  ;;  %v3039_v39 = vor.u32 %v3038_v48, %v3037_v5  ;;  %v3047_v62 = vrot.slane %v2431_v1, 2  ;;  %v13512_v5 = vld [vmem:[#allocation2 + $0x254] ss:$8 sps:$4 sm:$0xff]   ;;  %v3058_v48 = vshrl.u32 %v15588_v52, 16 }
 0x2cf   : > { %v15757_v43 = vsel %vm1560_vm3, %v3030_v31, %v3035_v18  ;;  %v3044_v32 = vor.u32 %v3043_v20, %v3042_v37  ;;  %v3051_v31 = vrot.slane %v3049_v14, 1  ;;  %v17166_v18 = vshll.u32 %v15566_v44, 16  ;;  %v13515_v1 = vld [vmem:[#allocation2 + $0x264] ss:$8 sps:$4 sm:$0xff]  }
 0x2d0   : > { %17164 = vst [vmem:[#allocation43_spill] sm:$0xff] %v15757_v43  ;;  %v3060_v14 = vrot.slane %v3058_v48, 1 }
 0x2d1   : > { %v15763_v41 = vsel %vm1560_vm3, %v3039_v39, %v3044_v32  ;;  %v17168_v39 = vshll.u32 %v15577_v27, 16 }
 0x2d2   : > { %17165 = vst [vmem:[#allocation44_spill] sm:$0xff] %v15763_v41 }
 0x2d3   : > { %2957 = vmatmul.mubr.bf16.gmra.mrb[20].mxu0 %v15712_v33  ;;  %v3056_v32 = vrot.slane %v17168_v39, 2 }
 0x2d4   : > { %2966 = vmatprep.mubr.bf16.mxu0 %v17056_v0 }
 0x2db   : > { %2967 = vmatmul.mubr.bf16.gmra.mrb[24].mxu0 %v15719_v17 }
 0x2dc   : > { %2976 = vmatprep.mubr.bf16.mxu0 %v17056_v0 }
 0x2e3   : > { %2977 = vmatmul.mubr.bf16.gmra.mrb[28].mxu0 %v15733_v28  ;;  %v14252_v28 = vld [vmem:[%s14852_s19 + $0x68] sm:$0xff] }
 0x2e4   : > { %3228 = vmatprep.mubr.bf16.mxu0 %v17056_v0 }
 0x2eb   : > { %3229 = vmatmul.mubr.bf16.vlgmr.msra.gmra.mrb[0].mxu0 %v15739_v59 }
 0x2ec   : > { %3471 = vmatpush1.bf16.msra.mxu0 %v13495_v30  ;;  %3238 = vmatprep.mubr.bf16.mxu0 %v17056_v0  ;;  %v13501_v30 = vld [vmem:[#allocation2 + $0x220] ss:$8 sps:$4 sm:$0xff]  }
 0x2ed   : > { %3472 = vmatprep.subr.bf16.mxu0 %v13500_v2  ;;  %v3046_v2 = vrot.slane %v2429_v36, 1  ;;  %v13510_v36 = vld [vmem:[#allocation2 + $0x250] ss:$8 sps:$4 sm:$0xff]  }
 0x2ef   : > { %v3048_v37 = vor.u32 %v3047_v62, %v3046_v2  ;;  %v13513_v2 = vld [vmem:[#allocation2 + $0x260] ss:$8 sps:$4 sm:$0xff]   ;;  %v13518_v62 = vld [vmem:[#allocation2 + $0x274] ss:$8 sps:$4 sm:$0xff]  }
 0x2f0   : > { %3473 = vmatpush1.bf16.msra.mxu0 %v13498_v51  ;;  %v3052_v51 = vrot.slane %v17166_v18, 2 }
 0x2f1   : > { %3474 = vmatprep.subr.bf16.mxu0 %v13503_v40  ;;  %v13507_v40 = vld [vmem:[#allocation2 + $0x240] ss:$8 sps:$4 sm:$0xff]  }
 0x2f2   : > { %v3053_v20 = vor.u32 %v3052_v51, %v3051_v31 }
 0x2f3   : > { %3239 = vmatmul.mubr.bf16.gmra.mrb[4].mxu0 %v15757_v43 }
 0x2f4   : > { %3248 = vmatprep.mubr.bf16.mxu0 %v17056_v0  ;;  %3475 = vmatpush1.bf16.msra.mxu0 %v13501_v30  ;;  %v17167_v30 = vshrl.u32 %v15577_v27, 16  ;;  %v15781_v18 = vsel %vm1560_vm3, %v3048_v37, %v3053_v20  ;;  %v17172_v37 = vshrl.u32 %v15599_v61, 16 }
 0x2f5   : > { %3476 = vmatprep.subr.bf16.mxu0 %v13506_v23  ;;  %17170 = vst [vmem:[#allocation45_spill] sm:$0xff] %v15781_v18 }
 0x2f6   : > { %v3055_v23 = vrot.slane %v17167_v30, 1  ;;  %v3064_v20 = vrot.slane %v17172_v37, 1 }
 0x2f8   : > { %3477 = vmatpush1.bf16.msra.mxu0 %v13504_v10  ;;  %v17169_v10 = vshll.u32 %v15588_v52, 16  ;;  %v3057_v31 = vor.u32 %v3056_v32, %v3055_v23  ;;  %v17174_v23 = vshll.u32 %v15610_v9, 16  ;;  %v3076_v32 = vshrl.u32 %v15632_v16, 16 }
 0x2f9   : > { %3478 = vmatprep.subr.bf16.mxu0 %v13509_v7 }
 0x2fa   : > { %v3061_v7 = vrot.slane %v17169_v10, 2  ;;  %v3070_v39 = vrot.slane %v17174_v23, 2 }
 0x2fb   : > { %3249 = vmatmul.mubr.bf16.gmra.mrb[8].mxu0 %v15763_v41 }
 0x2fc   : > { %3258 = vmatprep.mubr.bf16.mxu0 %v17056_v0  ;;  %3479 = vmatpush1.bf16.msra.mxu0 %v13507_v40  ;;  %v3062_v51 = vor.u32 %v3061_v7, %v3060_v14  ;;  %v3067_v40 = vshrl.u32 %v15610_v9, 16  ;;  %v17175_v7 = vshrl.u32 %v15621_v12, 16 }
 0x2fd   : > { %3480 = vmatprep.subr.bf16.mxu0 %v13512_v5  ;;  %v13516_v5 = vld [vmem:[#allocation2 + $0x270] ss:$8 sps:$4 sm:$0xff]  }
 0x2fe   : > { %v15787_v48 = vsel %vm1560_vm3, %v3057_v31, %v3062_v51  ;;  %v3069_v30 = vrot.slane %v3067_v40, 1  ;;  %v3078_v51 = vrot.slane %v3076_v32, 1  ;;  %v17177_v40 = vshll.u32 %v15632_v16, 16 }
 0x2ff   : > { %17171 = vst [vmem:[#allocation46_spill] sm:$0xff] %v15787_v48  ;;  %v17181_v32 = vshll.u32 %v15643_v21, 16 }
 0x300   : > { %3481 = vmatpush1.bf16.msra.mxu0 %v13510_v36  ;;  %v17173_v36 = vshll.u32 %v15599_v61, 16  ;;  %v3071_v10 = vor.u32 %v3070_v39, %v3069_v30  ;;  %v3079_v37 = vrot.slane %v17177_v40, 2  ;;  %v17180_v30 = vshrl.u32 %v15643_v21, 16 }
 0x301   : > { %3482 = vmatprep.subr.bf16.mxu0 %v13515_v1  ;;  %v3341_v40 = vrot.slane %v15489_v34, 2  ;;  %v3347_v34 = vrot.slane %v15533_v13, 2  ;;  %v3353_v13 = vrot.slane %v15577_v27, 2  ;;  %v3359_v27 = vrot.slane %v15621_v12, 2 }
 0x302   : > { %v3065_v1 = vrot.slane %v17173_v36, 2  ;;  %v3080_v23 = vor.u32 %v3079_v37, %v3078_v51  ;;  %v3082_v39 = vrot.slane %v17180_v30, 1  ;;  %v3342_v37 = vrot.slane %v15499_v50, 2 }
 0x303   : > { %3259 = vmatmul.mubr.bf16.gmra.mrb[12].mxu0 %v15781_v18  ;;  %v3348_v50 = vrot.slane %v15544_v57, 2  ;;  %v3354_v57 = vrot.slane %v15588_v52, 2  ;;  %v3360_v52 = vrot.slane %v15632_v16, 2  ;;  %v13520_v16 = vld [vmem:[#allocation4 + $0x48] sm:$0xff]  }
 0x304   : > { %3268 = vmatprep.mubr.bf16.mxu0 %v17056_v0  ;;  %3483 = vmatpush1.bf16.msra.mxu0 %v13513_v2  ;;  %v3066_v14 = vor.u32 %v3065_v1, %v3064_v20  ;;  %v3073_v2 = vrot.slane %v17175_v7, 1  ;;  %v3085_v20 = vshrl.u32 %v15654_v63, 16  ;;  %v3083_v7 = vrot.slane %v17181_v32, 2 }
 0x305   : > { %3484 = vmatprep.subr.bf16.mxu0 %v13518_v62  ;;  %v17176_v62 = vshll.u32 %v15621_v12, 16  ;;  %v13519_v12 = vld [vmem:[#allocation4 + $0x40] sm:$0xff]  }
 0x306   : > { %11683 = vmatprep.subr.bf16.mxu1 %v13519_v12 }
 0x307   : > { %v3074_v31 = vrot.slane %v17176_v62, 2  ;;  %v3087_v62 = vrot.slane %v3085_v20, 1  ;;  %v3345_v20 = vrot.slane %v15522_v6, 2  ;;  %v3351_v6 = vrot.slane %v15566_v44, 2  ;;  %11684 = vmatpush3.bf16.msra.mxu1 %v13519_v12 }
 0x308   : > { %3485 = vmatpush1.bf16.msra.mxu0 %v13516_v5  ;;  %v15805_v5 = vsel %vm1560_vm3, %v3066_v14, %v3071_v10  ;;  %v17182_v14 = vshll.u32 %v15654_v63, 16  ;;  %v3357_v44 = vrot.slane %v15610_v9, 2  ;;  %v3363_v9 = vrot.slane %v15654_v63, 2  ;;  %11685 = vmatprep.subr.bf16.mxu1 %v13520_v16  ;;  %v13524_v63 = vld [vmem:[#allocation4 + $0x68] sm:$0xff]  }
 0x309   : > { %17178 = vst [vmem:[#allocation47_spill] sm:$0xff] %v15805_v5  ;;  %v3075_v36 = vor.u32 %v3074_v31, %v3073_v2  ;;  %v3084_v2 = vor.u32 %v3083_v7, %v3082_v39  ;;  %v15843_v39 = vsel %vm1883_vm5, %v3347_v34, %v3348_v50  ;;  %v15857_v7 = vsel %vm1883_vm5, %v3353_v13, %v3354_v57 }
 0x30a   : > { %v3088_v10 = vrot.slane %v17182_v14, 2  ;;  %17186 = vst [vmem:[#allocation52_spill] sm:$0xff] %v15843_v39  ;;  %17188 = vst [vmem:[#allocation54_spill] sm:$0xff] %v15857_v7  ;;  %v15871_v14 = vsel %vm1883_vm5, %v3359_v27, %v3360_v52 }
 0x30b   : > { %3269 = vmatmul.mubr.bf16.gmra.mrb[16].mxu0 %v15787_v48  ;;  %v15811_v1 = vsel %vm1560_vm3, %v3075_v36, %v3080_v23  ;;  %v15829_v36 = vsel %vm1883_vm5, %v3341_v40, %v3342_v37  ;;  %v3344_v23 = vrot.slane %v15509_v24, 2  ;;  %v3350_v24 = vrot.slane %v15555_v3, 2  ;;  %17190 = vst [vmem:[#allocation56_spill] sm:$0xff] %v15871_v14  ;;  %11686 = vmatpush3.bf16.msra.mxu1 %v13520_v16  ;;  %v13525_v40 = vld [vmem:[#allocation4 + $0x70] sm:$0xff]   ;;  %v13526_v37 = vld [vmem:[#allocation4 + $0x78] sm:$0xff]  }
 0x30c   : > { %3278 = vmatprep.mubr.bf16.mxu0 %v17056_v0  ;;  %17179 = vst [vmem:[#allocation48_spill] sm:$0xff] %v15811_v1  ;;  %v3089_v31 = vor.u32 %v3088_v10, %v3087_v62  ;;  %17184 = vst [vmem:[#allocation50_spill] sm:$0xff] %v15829_v36  ;;  %v3356_v3 = vrot.slane %v15599_v61, 2  ;;  %v3362_v61 = vrot.slane %v15643_v21, 2  ;;  %v13523_v21 = vld [vmem:[#allocation4 + $0x60] sm:$0xff]  }
 0x30d   : > { %v15836_v30 = vsel %vm1883_vm5, %v3344_v23, %v3345_v20  ;;  %v15850_v32 = vsel %vm1883_vm5, %v3350_v24, %v3351_v6  ;;  %v15882_v23 = vld [vmem:[#allocation4] sm:$0xff]   ;;  %v3617_v20 = vlaneseq }
 0x30e   : > { %v15822_v51 = vsel %vm1560_vm3, %v3084_v2, %v3089_v31  ;;  %17185 = vst [vmem:[#allocation51_spill] sm:$0xff] %v15836_v30  ;;  %17187 = vst [vmem:[#allocation53_spill] sm:$0xff] %v15850_v32  ;;  %v15864_v62 = vsel %vm1883_vm5, %v3356_v3, %v3357_v44  ;;  %v15878_v10 = vsel %vm1883_vm5, %v3362_v61, %v3363_v9  ;;  %v13521_v2 = vld [vmem:[#allocation4 + $0x50] sm:$0xff]   ;;  %v13522_v31 = vld [vmem:[#allocation4 + $0x58] sm:$0xff]  }
 0x30f   : > { %17183 = vst [vmem:[#allocation49_spill] sm:$0xff] %v15822_v51  ;;  %17189 = vst [vmem:[#allocation55_spill] sm:$0xff] %v15864_v62  ;;  %11687 = vmatprep.subr.bf16.mxu1 %v13521_v2  ;;  %v15885_v34 = vshrl.u32 %v3617_v20, 7  ;;  %v3615_v24 = vld [vmem:[%s17019_s4] sm:$0x3] }
 0x310   : > { %17191 = vst [vmem:[#allocation57_spill] sm:$0xff] %v15878_v10  ;;  %11688 = vmatpush3.bf16.msra.mxu1 %v13521_v2 }
 0x311   : > { %11689 = vmatprep.subr.bf16.mxu1 %v13522_v31  ;;  %17192 = vst [vmem:[#allocation58_spill] sm:$0xff] %v15885_v34  ;;  %v17055_v50 = vsub.s32 0, %v15885_v34  ;;  %v17054_v6 = vsub.s32 1, %v15885_v34 }
 0x313   : > { %3279 = vmatmul.mubr.bf16.gmra.mrb[20].mxu0 %v15805_v5  ;;  %v15894_v13 = vrot.slane %v3615_v24, %v17055_v50  ;;  %v15898_v57 = vrot.slane %v3615_v24, %v17054_v6 }
 0x314   : > { %3288 = vmatprep.mubr.bf16.mxu0 %v17056_v0  ;;  %11690 = vmatpush3.bf16.msra.mxu1 %v13522_v31 }
 0x315   : > { %11691 = vmatprep.subr.bf16.mxu1 %v13523_v21 }
 0x318   : > { %11692 = vmatpush3.bf16.msra.mxu1 %v13523_v21 }
 0x319   : > { %11693 = vmatprep.subr.bf16.mxu1 %v13524_v63 }
 0x31b   : > { %3289 = vmatmul.mubr.bf16.gmra.mrb[24].mxu0 %v15811_v1 }
 0x31c   : > { %3298 = vmatprep.mubr.bf16.mxu0 %v17056_v0  ;;  %11694 = vmatpush3.bf16.msra.mxu1 %v13524_v63 }
 0x31d   : > { %11695 = vmatprep.subr.bf16.mxu1 %v13525_v40 }
 0x320   : > { %11696 = vmatpush3.bf16.msra.mxu1 %v13525_v40 }
 0x321   : > { %11697 = vmatprep.subr.bf16.mxu1 %v13526_v37 }
 0x323   : > { %3299 = vmatmul.mubr.bf16.gmra.mrb[28].mxu0 %v15822_v51 }
 0x324   : > { %3502 = vmatprep.mubr.bf16.mxu0 %v17056_v0  ;;  %11698 = vmatpush3.bf16.msra.mxu1 %v13526_v37 }
 0x325   : > { %11715 = vmatprep.subr.bf16.mxu1 %v15882_v23 }
 0x32b   : > { %3503 = vmatmul.mubr.bf16.vlgmr.msra.gmra.mrb[0].mxu0 %v15829_v36 }
 0x32c   : > { %3512 = vmatprep.mubr.bf16.mxu0 %v17056_v0 }
 0x333   : > { %3513 = vmatmul.mubr.bf16.gmra.mrb[4].mxu0 %v15836_v30  ;;  %v13528_v30 = vld [vmem:[#allocation4 + $0x8] sm:$0xff]  }
 0x334   : > { %3522 = vmatprep.mubr.bf16.mxu0 %v17056_v0 }
 0x33b   : > { %3523 = vmatmul.mubr.bf16.gmra.mrb[8].mxu0 %v15843_v39 }
 0x33c   : > { %3532 = vmatprep.mubr.bf16.mxu0 %v17056_v0 }
 0x343   : > { %3533 = vmatmul.mubr.bf16.gmra.mrb[12].mxu0 %v15850_v32 }
 0x344   : > { %3542 = vmatprep.mubr.bf16.mxu0 %v17056_v0 }
 0x34b   : > { %3543 = vmatmul.mubr.bf16.gmra.mrb[16].mxu0 %v15857_v7 }
 0x34c   : > { %3552 = vmatprep.mubr.bf16.mxu0 %v17056_v0 }
 0x353   : > { %3553 = vmatmul.mubr.bf16.gmra.mrb[20].mxu0 %v15864_v62 }
 0x354   : > { %3562 = vmatprep.mubr.bf16.mxu0 %v17056_v0 }
 0x35b   : > { %3563 = vmatmul.mubr.bf16.gmra.mrb[24].mxu0 %v15871_v14 }
 0x35c   : > { %3572 = vmatprep.mubr.bf16.mxu0 %v17056_v0 }
 0x363   : > { %3573 = vmatmul.mubr.bf16.gmra.mrb[28].mxu0 %v15878_v10 }
 0x364   : > { %12019 = vmatprep.mubr.bf16.mxu0 %v17056_v0 }
 0x3fe   : > { %v3504_v3 = vpop.f32.mrb[0].mxu0 }
 0x3ff   : > { %v15901_v44 = vadd.f32 %v15894_v13, %v3504_v3  ;;  %v3506_v27 = vpop.f32.mrb[1].mxu0 }
 0x400   : > { %v3628_v52 = vadd.f32 %v15898_v57, %v3506_v27  ;;  %v3508_v61 = vpop.f32.mrb[2].mxu0 }
 0x401   : > { %17193 = vst [vmem:[#allocation59_spill] sm:$0xff] %v15901_v44  ;;  %v15905_v9 = vadd.f32 %v15894_v13, %v3508_v61  ;;  %v3510_v12 = vpop.f32.mrb[3].mxu0 }
 0x402   : > { %v10956_v16 = vmul.f32 -1.442695, %v3628_v52  ;;  %v3630_v2 = vadd.f32 %v15898_v57, %v3510_v12 }
 0x403   : > { %17194 = vst [vmem:[#allocation60_spill] sm:$0xff] %v15905_v9 }
 0x404   : > { %13919 = vpow2.f32 %v10956_v16  ;;  %v10957_v31 = vmul.f32 -1.442695, %v3630_v2 }
 0x406   : > { %13921 = vpow2.f32 %v10957_v31  ;;  %v3514_v21 = vpop.f32.mrb[4].mxu0 }
 0x407   : > { %v15909_v63 = vadd.f32 %v15894_v13, %v3514_v21  ;;  %v3516_v40 = vpop.f32.mrb[5].mxu0 }
 0x408   : > { %v3632_v37 = vadd.f32 %v15898_v57, %v3516_v40  ;;  %v3518_v20 = vpop.f32.mrb[6].mxu0 }
 0x409   : > { %17195 = vst [vmem:[#allocation61_spill] sm:$0xff] %v15909_v63  ;;  %v15913_v24 = vadd.f32 %v15894_v13, %v3518_v20  ;;  %v3520_v3 = vpop.f32.mrb[7].mxu0 }
 0x40a   : > { %v10958_v27 = vmul.f32 -1.442695, %v3632_v37  ;;  %v3634_v52 = vadd.f32 %v15898_v57, %v3520_v3 }
 0x40b   : > { %17196 = vst [vmem:[#allocation62_spill] sm:$0xff] %v15913_v24 }
 0x40c   : > { %13923 = vpow2.f32 %v10958_v27  ;;  %v10959_v61 = vmul.f32 -1.442695, %v3634_v52 }
 0x40e   : > { %v13920_v12 = vpop.eup %13919  ;;  %13925 = vpow2.f32 %v10959_v61  ;;  %v3524_v16 = vpop.f32.mrb[8].mxu0 }
 0x40f   : > { %v3803_v2 = vadd.f32 1.0, %v13920_v12  ;;  %v15917_v31 = vadd.f32 %v15894_v13, %v3524_v16  ;;  %v3526_v21 = vpop.f32.mrb[9].mxu0 }
 0x410   : > { %v13922_v6 = vpop.eup %13921  ;;  %v3636_v40 = vadd.f32 %v15898_v57, %v3526_v21  ;;  %v3528_v50 = vpop.f32.mrb[10].mxu0 }
 0x411   : > { %17197 = vst [vmem:[#allocation63_spill] sm:$0xff] %v15917_v31  ;;  %13927 = vrcp.f32 %v3803_v2  ;;  %v3804_v20 = vadd.f32 1.0, %v13922_v6  ;;  %v15921_v37 = vadd.f32 %v15894_v13, %v3528_v50  ;;  %v3530_v3 = vpop.f32.mrb[11].mxu0  ;;  %v14240_v31 = vld [vmem:[%s14852_s19 + $0x8] sm:$0xff] }
 0x412   : > { %v10960_v27 = vmul.f32 -1.442695, %v3636_v40  ;;  %v3638_v52 = vadd.f32 %v15898_v57, %v3530_v3 }
 0x413   : > { %17198 = vst [vmem:[#allocation64_spill] sm:$0xff] %v15921_v37  ;;  %13929 = vrcp.f32 %v3804_v20 }
 0x414   : > { %v10961_v61 = vmul.f32 -1.442695, %v3638_v52  ;;  %13931 = vpow2.f32 %v10960_v27 }
 0x416   : > { %v13924_v12 = vpop.eup %13923  ;;  %v3534_v16 = vpop.f32.mrb[12].mxu0  ;;  %13933 = vpow2.f32 %v10961_v61 }
 0x417   : > { %v15925_v0 = vadd.f32 %v15894_v13, %v3534_v16  ;;  %v3536_v21 = vpop.f32.mrb[13].mxu0  ;;  %v3805_v6 = vadd.f32 1.0, %v13924_v12 }
 0x418   : > { %v13926_v2 = vpop.eup %13925  ;;  %v3640_v50 = vadd.f32 %v15898_v57, %v3536_v21  ;;  %v3538_v34 = vpop.f32.mrb[14].mxu0 }
 0x419   : > { %17199 = vst [vmem:[#allocation65_spill] sm:$0xff] %v15925_v0  ;;  %v3806_v40 = vadd.f32 1.0, %v13926_v2  ;;  %v15929_v3 = vadd.f32 %v15894_v13, %v3538_v34  ;;  %v3540_v20 = vpop.f32.mrb[15].mxu0  ;;  %v14239_v0 = vld [vmem:[%s14852_s19] sm:$0xff] }
 0x41a   : > { %v10962_v52 = vmul.f32 -1.442695, %v3640_v50  ;;  %v3642_v27 = vadd.f32 %v15898_v57, %v3540_v20 }
 0x41b   : > { %17200 = vst [vmem:[#allocation66_spill] sm:$0xff] %v15929_v3  ;;  %v13928_v61 = vpop.eup %13927  ;;  %13935 = vrcp.f32 %v3806_v40 }
 0x41c   : > { %13937 = vrcp.f32 %v3805_v6  ;;  %v10963_v16 = vmul.f32 -1.442695, %v3642_v27  ;;  %v3851_v12 = vmul.f32 %v14239_v0, %v13928_v61 }
 0x41d   : > { %v13930_v37 = vpop.eup %13929  ;;  %13939 = vpow2.f32 %v10962_v52 }
 0x41e   : > { %v3852_v24 = vmul.f32 %v14240_v31, %v13930_v37  ;;  %v3544_v21 = vpop.f32.mrb[16].mxu0  ;;  %13941 = vpow2.f32 %v10963_v16  ;;  %v13932_v3 = vpop.eup %13931 }
 0x41f   : > { %v15935_v2 = vadd.f32 %v15894_v13, %v3544_v21  ;;  %v3546_v34 = vpop.f32.mrb[17].mxu0  ;;  %v3807_v37 = vadd.f32 1.0, %v13932_v3 }
 0x420   : > { %v3644_v50 = vadd.f32 %v15898_v57, %v3546_v34  ;;  %v3548_v20 = vpop.f32.mrb[18].mxu0  ;;  %v3867_v63 = vpack.c.bf16 %v3852_v24, %v3851_v12  ;;  %v13934_v40 = vpop.eup %13933 }
 0x421   : > { %17201 = vst [vmem:[#allocation67_spill] sm:$0xff] %v15935_v2  ;;  %v15939_v6 = vadd.f32 %v15894_v13, %v3548_v20  ;;  %v3550_v52 = vpop.f32.mrb[19].mxu0  ;;  %v3808_v27 = vadd.f32 1.0, %v13934_v40 }
 0x422   : > { %v10964_v0 = vmul.f32 -1.442695, %v3644_v50  ;;  %v3646_v31 = vadd.f32 %v15898_v57, %v3550_v52  ;;  %v15942_v61 = vrot.slane %v3867_v63, 7 }
 0x423   : > { %17202 = vst [vmem:[#allocation68_spill] sm:$0xff] %v15939_v6  ;;  %13943 = vrcp.f32 %v3808_v27  ;;  %v14241_v27 = vld [vmem:[%s14852_s19 + $0x18] sm:$0xff] }
 0x424   : > { %v10965_v16 = vmul.f32 -1.442695, %v3646_v31  ;;  %v15946_v34 = vsel %vm671_vm0, 0, %v15942_v61  ;;  %v15950_v24 = vsel %vm671_vm0, %v15942_v61, 0  ;;  %13945 = vpow2.f32 %v10964_v0 }
 0x425   : > { %v13936_v21 = vpop.eup %13935  ;;  %v17063_v20 = vshll.u32 %v15946_v34, 16  ;;  %13947 = vrcp.f32 %v3807_v37  ;;  %v4563_v47 = vshrl.u32 %v15950_v24, 16 }
 0x426   : > { %v13938_v12 = vpop.eup %13937  ;;  %v3554_v50 = vpop.f32.mrb[20].mxu0  ;;  %v3854_v31 = vmul.f32 %v14241_v27, %v13936_v21  ;;  %13949 = vpow2.f32 %v10965_v16 }
 0x427   : > { %v13940_v3 = vpop.eup %13939  ;;  %v15954_v63 = vadd.f32 %v15894_v13, %v3554_v50  ;;  %v3556_v40 = vpop.f32.mrb[21].mxu0  ;;  %v3943_v0 = vrot.slane %v17063_v20, 1  ;;  %v17064_v50 = vshrl.u32 %v15946_v34, 16 }
 0x428   : > { %v3648_v6 = vadd.f32 %v15898_v57, %v3556_v40  ;;  %v3558_v2 = vpop.f32.mrb[22].mxu0  ;;  %v13942_v9 = vpop.eup %13941  ;;  %v3809_v44 = vadd.f32 1.0, %v13940_v3  ;;  %v17205_v40 = vshll.u32 %v15950_v24, 16 }
 0x429   : > { %17203 = vst [vmem:[#allocation69_spill] sm:$0xff] %v15954_v63  ;;  %v15962_v10 = vadd.f32 %v15894_v13, %v3558_v2  ;;  %v3560_v37 = vpop.f32.mrb[23].mxu0  ;;  %v14242_v63 = vld [vmem:[%s14852_s19 + $0x10] sm:$0xff]  ;;  %v3810_v52 = vadd.f32 1.0, %v13942_v9  ;;  %v3944_v21 = vor.u32 %v3943_v0, %v17064_v50 }
 0x42a   : > { %v3853_v14 = vmul.f32 %v14242_v63, %v13938_v12  ;;  %v10966_v62 = vmul.f32 -1.442695, %v3648_v6  ;;  %v3650_v16 = vadd.f32 %v15898_v57, %v3560_v37  ;;  %v3947_v27 = vrot.slane %v17205_v40, 1  ;;  %v14243_v40 = vld [vmem:[%s14852_s19 + $0x28] sm:$0xff] }
 0x42b   : > { %17204 = vst [vmem:[#allocation70_spill] sm:$0xff] %v15962_v10  ;;  %13951 = vrcp.f32 %v3810_v52 }
 0x42c   : > { %v10967_v3 = vmul.f32 -1.442695, %v3650_v16  ;;  %v3868_v20 = vpack.c.bf16 %v3854_v31, %v3853_v14  ;;  %13953 = vrcp.f32 %v3809_v44  ;;  %v3948_v2 = vsel %vm777_vm1, %v3944_v21, %v3947_v27 }
 0x42d   : > { %13955 = vpow2.f32 %v10966_v62  ;;  %11699 = vmatprep.mubr.bf16.mxu1 %v3948_v2  ;;  %v13944_v6 = vpop.eup %13943 }
 0x42e   : > { %v3564_v12 = vpop.f32.mrb[24].mxu0  ;;  %v15972_v9 = vrot.slane %v3868_v20, 7  ;;  %v13946_v37 = vpop.eup %13945  ;;  %13957 = vpow2.f32 %v10967_v3  ;;  %v3856_v27 = vmul.f32 %v14243_v40, %v13944_v6 }
 0x42f   : > { %v15975_v63 = vadd.f32 %v15894_v13, %v3564_v12  ;;  %v3566_v0 = vpop.f32.mrb[25].mxu0  ;;  %v13948_v44 = vpop.eup %13947  ;;  %v3811_v31 = vadd.f32 1.0, %v13946_v37  ;;  %v14244_v37 = vld [vmem:[%s14852_s19 + $0x20] sm:$0xff] }
 0x430   : > { %v3652_v52 = vadd.f32 %v15898_v57, %v3566_v0  ;;  %v3568_v14 = vpop.f32.mrb[26].mxu0  ;;  %v15983_v20 = vsel %vm671_vm0, 0, %v15972_v9  ;;  %v13950_v21 = vpop.eup %13949  ;;  %v15989_v3 = vsel %vm671_vm0, %v15972_v9, 0 }
 0x431   : > { %17206 = vst [vmem:[#allocation71_spill] sm:$0xff] %v15975_v63  ;;  %v15979_v62 = vadd.f32 %v15894_v13, %v3568_v14  ;;  %v3570_v16 = vpop.f32.mrb[27].mxu0  ;;  %13959 = vrcp.f32 %v3811_v31  ;;  %v3812_v12 = vadd.f32 1.0, %v13950_v21  ;;  %v3855_v14 = vmul.f32 %v14244_v37, %v13948_v44  ;;  %v14245_v44 = vld [vmem:[%s14852_s19 + $0x38] sm:$0xff] }
 0x432   : > { %v3654_v2 = vadd.f32 %v15898_v57, %v3570_v16  ;;  %v10968_v0 = vmul.f32 -1.442695, %v3652_v52  ;;  %v17068_v50 = vshll.u32 %v15983_v20, 16  ;;  %v17071_v63 = vshll.u32 %v15989_v3, 16 }
 0x433   : > { %17207 = vst [vmem:[#allocation72_spill] sm:$0xff] %v15979_v62  ;;  %13961 = vrcp.f32 %v3812_v12  ;;  %v17073_v6 = vshrl.u32 %v15983_v20, 16  ;;  %v3869_v7 = vpack.c.bf16 %v3856_v27, %v3855_v14 }
 0x434   : > { %v10969_v62 = vmul.f32 -1.442695, %v3654_v2  ;;  %v3953_v16 = vrot.slane %v17068_v50, 1  ;;  %13963 = vpow2.f32 %v10968_v0  ;;  %v3957_v12 = vrot.slane %v17071_v63, 1 }
 0x435   : > { %v13952_v10 = vpop.eup %13951 }
 0x436   : > { %v3574_v40 = vpop.f32.mrb[28].mxu0  ;;  %v13954_v31 = vpop.eup %13953  ;;  %v3858_v37 = vmul.f32 %v14245_v44, %v13952_v10  ;;  %v3954_v2 = vor.u32 %v3953_v16, %v17073_v6  ;;  %13965 = vpow2.f32 %v10969_v62  ;;  %v14246_v44 = vld [vmem:[%s14852_s19 + $0x30] sm:$0xff]  ;;  %v13531_v6 = vld [vmem:[#allocation4 + $0x20] sm:$0xff]  }
 0x437   : > { %v3576_v52 = vpop.f32.mrb[29].mxu0  ;;  %v13956_v21 = vpop.eup %13955  ;;  %v16003_v32 = vadd.f32 %v15894_v13, %v3574_v40  ;;  %v3857_v36 = vmul.f32 %v14246_v44, %v13954_v31 }
 0x438   : > { %v3578_v39 = vpop.f32.mrb[30].mxu0  ;;  %v3813_v50 = vadd.f32 1.0, %v13956_v21  ;;  %v3656_v27 = vadd.f32 %v15898_v57, %v3576_v52  ;;  %v13958_v10 = vpop.eup %13957  ;;  %v3958_v16 = vsel %vm777_vm1, %v3954_v2, %v3957_v12  ;;  %v16012_v21 = vrot.slane %v3869_v7, 7  ;;  %v14247_v7 = vld [vmem:[%s14852_s19 + $0x40] sm:$0xff] }
 0x439   : > { %17208 = vst [vmem:[#allocation73_spill] sm:$0xff] %v16003_v32  ;;  %v16007_v0 = vadd.f32 %v15894_v13, %v3578_v39  ;;  %v3580_v14 = vpop.f32.mrb[31].mxu0  ;;  %v3814_v63 = vadd.f32 1.0, %v13958_v10  ;;  %11700 = vmatmul.mubr.bf16.vlgmr.msra.gmra.mrb[0].mxu1 %v3958_v16  ;;  %v3870_v52 = vpack.c.bf16 %v3858_v37, %v3857_v36  ;;  %v13529_v13 = vld [vmem:[#allocation4 + $0x10] sm:$0xff]   ;;  %v14248_v36 = vld [vmem:[%s14852_s19 + $0x48] sm:$0xff]  ;;  %v13530_v10 = vld [vmem:[#allocation4 + $0x18] sm:$0xff]  }
 0x43a   : > { %13967 = vrcp.f32 %v3813_v50  ;;  %v10970_v40 = vmul.f32 -1.442695, %v3656_v27  ;;  %v3658_v62 = vadd.f32 %v15898_v57, %v3580_v14  ;;  %11716 = vmatpush3.bf16.msra.mxu1 %v15882_v23  ;;  %v16017_v50 = vsel %vm671_vm0, 0, %v16012_v21 }
 0x43b   : > { %17209 = vst [vmem:[#allocation74_spill] sm:$0xff] %v16007_v0  ;;  %v13960_v39 = vpop.eup %13959  ;;  %13969 = vrcp.f32 %v3814_v63  ;;  %11717 = vmatprep.subr.bf16.mxu1 %v13528_v30  ;;  %v16021_v12 = vsel %vm671_vm0, %v16012_v21, 0  ;;  %v17072_v23 = vshll.u32 %v16017_v50, 16  ;;  %v16027_v14 = vrot.slane %v3870_v52, 7 }
 0x43c   : > { %v10971_v31 = vmul.f32 -1.442695, %v3658_v62  ;;  %13971 = vpow2.f32 %v10970_v40  ;;  %v3859_v57 = vmul.f32 %v14247_v7, %v13960_v39  ;;  %v17074_v63 = vshll.u32 %v16021_v12, 16 }
 0x43d   : > { %v13962_v2 = vpop.eup %13961  ;;  %v17075_v16 = vshrl.u32 %v16017_v50, 16  ;;  %v3963_v40 = vrot.slane %v17072_v23, 1  ;;  %v4353_v52 = vrot.slane %v15983_v20, 1  ;;  %v14250_v23 = vld [vmem:[%s14852_s19 + $0x58] sm:$0xff]  ;;  %v4357_v1 = vrot.slane %v16021_v12, 1 }
 0x43e   : > { %v3860_v37 = vmul.f32 %v14248_v36, %v13962_v2  ;;  %11718 = vmatpush3.bf16.msra.mxu1 %v13528_v30  ;;  %v13964_v27 = vpop.eup %13963  ;;  %13973 = vpow2.f32 %v10971_v31  ;;  %v16034_v2 = vsel %vm671_vm0, 0, %v16027_v14  ;;  %v16038_v30 = vsel %vm671_vm0, %v16027_v14, 0 }
 0x43f   : > { %11719 = vmatprep.subr.bf16.mxu1 %v13529_v13  ;;  %v3815_v44 = vadd.f32 1.0, %v13964_v27  ;;  %v4354_v31 = vrot.slane %v15989_v3, 1  ;;  %v3964_v36 = vor.u32 %v3963_v40, %v17075_v16  ;;  %v17077_v27 = vshll.u32 %v16034_v2, 16  ;;  %v14249_v16 = vld [vmem:[%s14852_s19 + $0x50] sm:$0xff] }
 0x440   : > { %v3871_v62 = vpack.c.bf16 %v3860_v37, %v3859_v57  ;;  %v13966_v39 = vpop.eup %13965  ;;  %v3967_v57 = vrot.slane %v17074_v63, 1  ;;  %v17080_v40 = vshrl.u32 %v16034_v2, 16  ;;  %v4360_v43 = vrot.slane %v16038_v30, 1 }
 0x441   : > { %13975 = vrcp.f32 %v3815_v44  ;;  %v3816_v7 = vadd.f32 1.0, %v13966_v39  ;;  %v16055_v63 = vsel %vm1285_vm4, %v4353_v52, %v4354_v31  ;;  %v17210_v52 = vshll.u32 %v16038_v30, 16 }
 0x442   : > { %11720 = vmatpush3.bf16.msra.mxu1 %v13529_v13  ;;  %v3968_v44 = vsel %vm777_vm1, %v3964_v36, %v3967_v57  ;;  %v16049_v39 = vrot.slane %v3871_v62, 7  ;;  %v3973_v13 = vrot.slane %v17077_v27, 1  ;;  %v13532_v27 = vld [vmem:[#allocation4 + $0x28] sm:$0xff]   ;;  %v4590_v58 = vshrl.u32 %v16038_v30, 16 }
 0x443   : > { %11721 = vmatprep.subr.bf16.mxu1 %v13530_v10  ;;  %13977 = vrcp.f32 %v3816_v7  ;;  %11703 = vmatprep.mubr.bf16.mxu1 %v3968_v44  ;;  %v3977_v31 = vrot.slane %v17210_v52, 1 }
 0x444   : > { %v13968_v37 = vpop.eup %13967  ;;  %v16061_v7 = vsel %vm671_vm0, 0, %v16049_v39  ;;  %v16065_v62 = vsel %vm671_vm0, %v16049_v39, 0  ;;  %v3974_v57 = vor.u32 %v3973_v13, %v17080_v40 }
 0x445   : > { %v13970_v0 = vpop.eup %13969  ;;  %v3861_v32 = vmul.f32 %v14249_v16, %v13968_v37  ;;  %v17082_v16 = vshll.u32 %v16061_v7, 16  ;;  %v17083_v13 = vshrl.u32 %v16061_v7, 16  ;;  %v4362_v59 = vrot.slane %v16061_v7, 1 }
 0x446   : > { %v3862_v51 = vmul.f32 %v14250_v23, %v13970_v0  ;;  %11722 = vmatpush3.bf16.msra.mxu1 %v13530_v10  ;;  %v13972_v36 = vpop.eup %13971  ;;  %v4356_v0 = vrot.slane %v16017_v50, 1  ;;  %v3978_v5 = vsel %vm777_vm1, %v3974_v57, %v3977_v31  ;;  %v17213_v31 = vshll.u32 %v16065_v62, 16 }
 0x447   : > { %11723 = vmatprep.subr.bf16.mxu1 %v13531_v6  ;;  %v3817_v23 = vadd.f32 1.0, %v13972_v36  ;;  %v3983_v52 = vrot.slane %v17082_v16, 1  ;;  %11704 = vmatmul.mubr.bf16.gmra.mrb[4].mxu1 %v3978_v5  ;;  %v17211_v36 = vshrl.u32 %v15946_v34, 16 }
 0x448   : > { %v3872_v44 = vpack.c.bf16 %v3862_v51, %v3861_v32  ;;  %v13974_v10 = vpop.eup %13973  ;;  %v17212_v32 = vshrl.u32 %v15983_v20, 16  ;;  %v3987_v16 = vrot.slane %v17213_v31, 1 }
 0x449   : > { %13979 = vrcp.f32 %v3817_v23  ;;  %v3818_v40 = vadd.f32 1.0, %v13974_v10  ;;  %v16083_v51 = vrot.slane %v17211_v36, 1  ;;  %v3984_v57 = vor.u32 %v3983_v52, %v17083_v13  ;;  %v13533_v52 = vld [vmem:[#allocation4 + $0x30] sm:$0xff]  }
 0x44a   : > { %v16079_v48 = vrot.slane %v3872_v44, 7  ;;  %v16087_v37 = vrot.slane %v17212_v32, 1  ;;  %11724 = vmatpush3.bf16.msra.mxu1 %v13531_v6  ;;  %v16094_v23 = vsel %vm1285_vm4, %v4356_v0, %v4357_v1  ;;  %v4359_v36 = vrot.slane %v16034_v2, 1  ;;  %v14251_v32 = vld [vmem:[%s14852_s19 + $0x60] sm:$0xff] }
 0x44b   : > { %v13976_v5 = vpop.eup %13975  ;;  %13981 = vrcp.f32 %v3818_v40  ;;  %11725 = vmatprep.subr.bf16.mxu1 %v13532_v27  ;;  %v17214_v1 = vshll.u32 %v15989_v3, 16  ;;  %v3988_v40 = vsel %vm777_vm1, %v3984_v57, %v3987_v16  ;;  %v4363_v16 = vrot.slane %v16065_v62, 1 }
 0x44c   : > { %v16098_v44 = vsel %vm671_vm0, 0, %v16079_v48  ;;  %v16102_v10 = vsel %vm671_vm0, %v16079_v48, 0  ;;  %v3863_v6 = vmul.f32 %v14251_v32, %v13976_v5  ;;  %11707 = vmatprep.mubr.bf16.mxu1 %v3988_v40  ;;  %v13534_v40 = vld [vmem:[#allocation4 + $0x38] sm:$0xff]   ;;  %v16124_v18 = vsel %vm1285_vm4, %v4359_v36, %v4360_v43 }
 0x44d   : > { %v16108_v0 = vrot.slane %v17214_v1, 2  ;;  %v17090_v31 = vshll.u32 %v16098_v44, 16  ;;  %v13978_v13 = vpop.eup %13977  ;;  %v17094_v41 = vshll.u32 %v16102_v10, 16  ;;  %v4365_v57 = vrot.slane %v16098_v44, 1 }
 0x44e   : > { %v3864_v5 = vmul.f32 %v14252_v28, %v13978_v13  ;;  %11726 = vmatpush3.bf16.msra.mxu1 %v13532_v27  ;;  %v4366_v17 = vrot.slane %v16102_v10, 1  ;;  %v17215_v28 = vshll.u32 %v15946_v34, 16  ;;  %v16132_v54 = vsel %vm1285_vm4, %v4362_v59, %v4363_v16 }
 0x44f   : > { %v3993_v32 = vrot.slane %v17090_v31, 1  ;;  %v3997_v1 = vrot.slane %v17094_v41, 1  ;;  %11727 = vmatprep.subr.bf16.mxu1 %v13533_v52  ;;  %v17216_v31 = vshrl.u32 %v16098_v44, 16  ;;  %v17217_v36 = vshll.u32 %v15950_v24, 16 }
 0x450   : > { %v4561_v13 = vrot.slane %v17215_v28, 2  ;;  %v3873_v33 = vpack.c.bf16 %v3864_v5, %v3863_v6  ;;  %v16136_v41 = vsel %vm1285_vm4, %v4365_v57, %v4366_v17  ;;  %v17218_v28 = vshll.u32 %v15983_v20, 16  ;;  %v16147_v17 = vld [vmem:[#allocation4 + $0x80] sm:$0xff]  }
 0x451   : > { %v3994_v27 = vor.u32 %v3993_v32, %v17216_v31  ;;  %v4566_v60 = vrot.slane %v17217_v36, 2  ;;  %v4565_v59 = vrot.slane %v4563_v47, 1  ;;  %v4572_v5 = vshrl.u32 %v15989_v3, 16 }
 0x452   : > { %v4562_v43 = vor.u32 %v4561_v13, %v16083_v51  ;;  %v4570_v45 = vrot.slane %v17218_v28, 2  ;;  %v16144_v6 = vrot.slane %v3873_v33, 7  ;;  %11728 = vmatpush3.bf16.msra.mxu1 %v13533_v52  ;;  %v17219_v16 = vshrl.u32 %v16017_v50, 16  ;;  %v14253_v52 = vld [vmem:[%s14852_s19 + $0x70] sm:$0xff] }
 0x453   : > { %v3998_v31 = vsel %vm777_vm1, %v3994_v27, %v3997_v1  ;;  %v13980_v32 = vpop.eup %13979  ;;  %11729 = vmatprep.subr.bf16.mxu1 %v13534_v40  ;;  %v17220_v13 = vshll.u32 %v16017_v50, 16  ;;  %v4581_v33 = vshrl.u32 %v16021_v12, 16  ;;  %v4567_v28 = vor.u32 %v4566_v60, %v4565_v59 }
 0x454   : > { %11708 = vmatmul.mubr.bf16.gmra.mrb[8].mxu1 %v3998_v31  ;;  %v4571_v51 = vor.u32 %v4570_v45, %v16087_v37  ;;  %v4578_v57 = vrot.slane %v17219_v16, 1  ;;  %v3865_v47 = vmul.f32 %v14253_v52, %v13980_v32  ;;  %v16158_v27 = vsel %vm671_vm0, 0, %v16144_v6 }
 0x455   : > { %v4579_v1 = vrot.slane %v17220_v13, 2  ;;  %v16162_v36 = vsel %vm671_vm0, %v16144_v6, 0  ;;  %v13982_v45 = vpop.eup %13981  ;;  %v3999_v37 = vshrl.u32 %v16158_v27, 16  ;;  %v4001_v31 = vshll.u32 %v16158_v27, 16 }
 0x456   : > { %v4005_v16 = vshll.u32 %v16162_v36, 16  ;;  %v4368_v13 = vrot.slane %v16158_v27, 1  ;;  %v3866_v32 = vmul.f32 %v14254_v53, %v13982_v45  ;;  %11730 = vmatpush3.bf16.msra.mxu1 %v13534_v40  ;;  %v4369_v52 = vrot.slane %v16162_v36, 1 }
 0x457   : > { %v16171_v35 = vsel %vm1560_vm3, %v4562_v43, %v4567_v28  ;;  %v4574_v55 = vrot.slane %v4572_v5, 1  ;;  %v4003_v19 = vrot.slane %v4001_v31, 1  ;;  %11747 = vmatprep.subr.bf16.mxu1 %v16147_v17  ;;  %v4580_v59 = vor.u32 %v4579_v1, %v4578_v57 }
 0x458   : > { %v4007_v60 = vrot.slane %v4005_v16, 1  ;;  %v4583_v25 = vrot.slane %v4581_v33, 1  ;;  %v3874_v42 = vpack.c.bf16 %v3866_v32, %v3865_v47  ;;  %v16175_v26 = vsel %vm1285_vm4, %v4368_v13, %v4369_v52 }
 0x459   : > { %v4576_v38 = vor.u32 %v16108_v0, %v4574_v55  ;;  %v17221_v53 = vshll.u32 %v16021_v12, 16  ;;  %v4004_v45 = vor.u32 %v4003_v19, %v3999_v37  ;;  %v17222_v43 = vshrl.u32 %v16034_v2, 16 }
 0x45a   : > { %v17223_v5 = vshll.u32 %v16034_v2, 16  ;;  %v16185_v57 = vrot.slane %v3874_v42, 7  ;;  %v17224_v55 = vshll.u32 %v16038_v30, 16  ;;  %v4592_v13 = vrot.slane %v4590_v58, 1 }
 0x45b   : > { %v4584_v40 = vrot.slane %v17221_v53, 2  ;;  %v4587_v28 = vrot.slane %v17222_v43, 1  ;;  %v16188_v1 = vsel %vm1560_vm3, %v4571_v51, %v4576_v38  ;;  %v4008_v47 = vsel %vm777_vm1, %v4004_v45, %v4007_v60 }
 0x45c   : > { %v4588_v49 = vrot.slane %v17223_v5, 2  ;;  %v4593_v0 = vrot.slane %v17224_v55, 2  ;;  %v17225_v32 = vshrl.u32 %v16061_v7, 16  ;;  %11711 = vmatprep.mubr.bf16.mxu1 %v4008_v47  ;;  %v16197_v53 = vsel %vm671_vm0, 0, %v16185_v57 }
 0x45d   : > { %v4585_v33 = vor.u32 %v4584_v40, %v4583_v25  ;;  %v16201_v38 = vsel %vm671_vm0, %v16185_v57, 0  ;;  %v17227_v25 = vshll.u32 %v16061_v7, 16  ;;  %v4009_v58 = vshrl.u32 %v16197_v53, 16 }
 0x45e   : > { %v4589_v19 = vor.u32 %v4588_v49, %v4587_v28  ;;  %v4596_v52 = vrot.slane %v17225_v32, 1  ;;  %v4011_v49 = vshll.u32 %v16197_v53, 16  ;;  %v4015_v60 = vshll.u32 %v16201_v38, 16 }
 0x45f   : > { %v16204_v42 = vsel %vm1560_vm3, %v4580_v59, %v4585_v33  ;;  %v4597_v51 = vrot.slane %v17227_v25, 2  ;;  %v4371_v40 = vrot.slane %v16197_v53, 1  ;;  %v4372_v45 = vrot.slane %v16201_v38, 1 }
 0x460   : > { %17226 = vst [vmem:[#allocation75_spill] sm:$0xff] %v16204_v42  ;;  %v4594_v43 = vor.u32 %v4593_v0, %v4592_v13  ;;  %v4599_v5 = vshrl.u32 %v16065_v62, 16  ;;  %v4013_v55 = vrot.slane %v4011_v49, 1  ;;  %v4017_v59 = vrot.slane %v4015_v60, 1 }
 0x461   : > { %v4598_v28 = vor.u32 %v4597_v51, %v4596_v52  ;;  %v17228_v33 = vshll.u32 %v16065_v62, 16  ;;  %v17229_v32 = vshrl.u32 %v16098_v44, 16  ;;  %v16219_v46 = vsel %vm1285_vm4, %v4371_v40, %v4372_v45 }
 0x462   : > { %v16222_v15 = vsel %vm1560_vm3, %v4589_v19, %v4594_v43  ;;  %v4601_v56 = vrot.slane %v4599_v5, 1  ;;  %v17231_v0 = vshll.u32 %v16098_v44, 16  ;;  %v4014_v52 = vor.u32 %v4013_v55, %v4009_v58 }
 0x463   : > { %v4602_v47 = vrot.slane %v17228_v33, 2  ;;  %v4605_v25 = vrot.slane %v17229_v32, 1  ;;  %17230 = vst [vmem:[#allocation76_spill] sm:$0xff] %v16222_v15  ;;  %v4608_v51 = vshrl.u32 %v16102_v10, 16  ;;  %v17232_v22 = vshll.u32 %v16102_v10, 16 }
 0x464   : > { %v4606_v13 = vrot.slane %v17231_v0, 2  ;;  %v4614_v33 = vrot.slane %v3999_v37, 1  ;;  %v4615_v32 = vrot.slane %v4001_v31, 2  ;;  %v4617_v40 = vshrl.u32 %v16162_v36, 16 }
 0x465   : > { %v4611_v29 = vrot.slane %v17232_v22, 2  ;;  %v4603_v4 = vor.u32 %v4602_v47, %v4601_v56  ;;  %v4018_v45 = vsel %vm777_vm1, %v4014_v52, %v4017_v59  ;;  %v4610_v19 = vrot.slane %v4608_v51, 1  ;;  %v13538_v51 = vld [vmem:[#allocation4 + $0x98] sm:$0xff]  }
 0x466   : > { %v4607_v11 = vor.u32 %v4606_v13, %v4605_v25  ;;  %v4620_v43 = vrot.slane %v4005_v16, 2  ;;  %v4623_v5 = vrot.slane %v4009_v58, 1  ;;  %11712 = vmatmul.mubr.bf16.gmra.mrb[12].mxu1 %v4018_v45  ;;  %v4616_v55 = vor.u32 %v4615_v32, %v4614_v33  ;;  %v13544_v33 = vld [vmem:[#allocation4 + $0xc8] sm:$0xff]   ;;  %v13545_v32 = vld [vmem:[#allocation4 + $0xd0] sm:$0xff]  }
 0x467   : > { %v16232_v0 = vsel %vm1560_vm3, %v4598_v28, %v4603_v4  ;;  %v4619_v15 = vrot.slane %v4617_v40, 1  ;;  %v4624_v42 = vrot.slane %v4011_v49, 2  ;;  %11731 = vmatprep.mubr.msk.bf16.mxu1 %vm15124_vm2, %v15942_v61  ;;  %v4612_v22 = vor.u32 %v4611_v29, %v4610_v19  ;;  %v13546_v40 = vld [vmem:[#allocation4 + $0xd8] sm:$0xff]   ;;  %v13548_v45 = vld [vmem:[#allocation4 + $0xe8] sm:$0xff]  }
 0x468   : > { %v4626_v56 = vshrl.u32 %v16201_v38, 16  ;;  %v4629_v37 = vrot.slane %v4015_v60, 2  ;;  %v4821_v16 = vrot.slane %v15983_v20, 2  ;;  %v4822_v28 = vrot.slane %v15989_v3, 2  ;;  %v13554_v19 = vld [vmem:[#allocation4 + $0x118] sm:$0xff]  }
 0x469   : > { %v4621_v31 = vor.u32 %v4620_v43, %v4619_v15  ;;  %v4625_v59 = vor.u32 %v4624_v42, %v4623_v5  ;;  %v16240_v58 = vsel %vm1560_vm3, %v4607_v11, %v4612_v22  ;;  %v4824_v49 = vrot.slane %v16017_v50, 2  ;;  %v13536_v42 = vld [vmem:[#allocation4 + $0x88] sm:$0xff]  }
 0x46a   : > { %v4628_v4 = vrot.slane %v4626_v56, 1  ;;  %v4825_v29 = vrot.slane %v16021_v12, 2  ;;  %v4827_v61 = vrot.slane %v16034_v2, 2  ;;  %v16250_v15 = vsel %vm1883_vm5, %v4821_v16, %v4822_v28  ;;  %v17234_v43 = vld [vmem:[#allocation76_spill] sm:$0xff]  ;;  %v13559_v56 = vld [vmem:[#allocation6] sm:$0xff]  }
 0x46b   : > { %v16245_v47 = vsel %vm1560_vm3, %v4616_v55, %v4621_v31  ;;  %v4828_v20 = vrot.slane %v16038_v30, 2  ;;  %v4830_v11 = vrot.slane %v16061_v7, 2  ;;  %v4831_v50 = vrot.slane %v16065_v62, 2  ;;  %v13563_v31 = vld [vmem:[#allocation6 + $0x20] sm:$0xff]   ;;  %v13565_v16 = vld [vmem:[#allocation6 + $0x30] sm:$0xff]  }
 0x46c   : > { %v4630_v60 = vor.u32 %v4629_v37, %v4628_v4  ;;  %v16255_v3 = vsel %vm1883_vm5, %v4824_v49, %v4825_v29  ;;  %v4833_v25 = vrot.slane %v16098_v44, 2  ;;  %v4834_v12 = vrot.slane %v16102_v10, 2  ;;  %v13560_v37 = vld [vmem:[#allocation6 + $0x8] sm:$0xff]   ;;  %v17235_v4 = vld [vmem:[#allocation18_spill] sm:$0xff]  ;;  %v17237_v29 = vld [vmem:[#allocation20_spill] sm:$0xff] }
 0x46d   : > { %v16264_v13 = vsel %vm1883_vm5, %v4827_v61, %v4828_v20  ;;  %v4836_v30 = vrot.slane %v16158_v27, 2  ;;  %v4837_v7 = vrot.slane %v16162_v36, 2  ;;  %v16272_v62 = vsel %vm1883_vm5, %v4830_v11, %v4831_v50  ;;  %v13567_v28 = vld [vmem:[#allocation6 + $0x40] sm:$0xff]   ;;  %v13568_v49 = vld [vmem:[#allocation6 + $0x48] sm:$0xff]   ;;  %v13569_v61 = vld [vmem:[#allocation6 + $0x50] sm:$0xff]  }
 0x46e   : > { %v16261_v2 = vsel %vm1560_vm3, %v4625_v59, %v4630_v60  ;;  %11732 = vmatmul.mubr.msk.bf16.vlgmr.msra.gmra.mrb[0].mxu1 %vm15124_vm2, %v15972_v9  ;;  %v16275_v44 = vsel %vm1883_vm5, %v4833_v25, %v4834_v12  ;;  %v4839_v10 = vrot.slane %v16197_v53, 2  ;;  %v4840_v52 = vrot.slane %v16201_v38, 2  ;;  %v13537_v9 = vld [vmem:[#allocation4 + $0x90] sm:$0xff]   ;;  %v13542_v38 = vld [vmem:[#allocation4 + $0xb8] sm:$0xff]   ;;  %v13564_v59 = vld [vmem:[#allocation6 + $0x28] sm:$0xff]  }
 0x46f   : > { %11735 = vmatprep.mubr.msk.bf16.mxu1 %vm15124_vm2, %v16012_v21  ;;  %11748 = vmatpush3.bf16.msra.mxu1 %v16147_v17  ;;  %v16284_v27 = vsel %vm1883_vm5, %v4836_v30, %v4837_v7  ;;  %v13539_v21 = vld [vmem:[#allocation4 + $0xa0] sm:$0xff]   ;;  %v13540_v17 = vld [vmem:[#allocation4 + $0xa8] sm:$0xff]   ;;  %v4350_v53 = vrot.slane %v15946_v34, 1  ;;  %v4818_v5 = vrot.slane %v15946_v34, 2  ;;  %v4819_v55 = vrot.slane %v15950_v24, 2  ;;  %v13561_v34 = vld [vmem:[#allocation6 + $0x10] sm:$0xff]  }
 0x470   : > { %11749 = vmatprep.subr.bf16.mxu1 %v13536_v42  ;;  %v16287_v36 = vsel %vm1883_vm5, %v4839_v10, %v4840_v52  ;;  %v13570_v60 = vld [vmem:[#allocation6 + $0x58] sm:$0xff]   ;;  %v17239_v20 = vld [vmem:[#allocation22_spill] sm:$0xff]  ;;  %v17241_v50 = vld [vmem:[#allocation24_spill] sm:$0xff] }
 0x471   : > { %v4820_v22 = vsel %vm1883_vm5, %v4818_v5, %v4819_v55  ;;  %v13571_v11 = vld [vmem:[#allocation6 + $0x60] sm:$0xff]   ;;  %v13573_v25 = vld [vmem:[#allocation6 + $0x70] sm:$0xff]   ;;  %v13574_v12 = vld [vmem:[#allocation6 + $0x78] sm:$0xff]  }
 0x472   : > { %v13575_v30 = vld [vmem:[#allocation6 + $0x80] sm:$0xff]   ;;  %v13576_v7 = vld [vmem:[#allocation6 + $0x88] sm:$0xff]   ;;  %v13577_v10 = vld [vmem:[#allocation6 + $0x90] sm:$0xff]  }
 0x473   : > { %11750 = vmatpush3.bf16.msra.mxu1 %v13536_v42  ;;  %v13572_v42 = vld [vmem:[#allocation6 + $0x68] sm:$0xff]   ;;  %v13578_v52 = vld [vmem:[#allocation6 + $0x98] sm:$0xff]   ;;  %v17261_v5 = vld [vmem:[#allocation44_spill] sm:$0xff] }
 0x474   : > { %11751 = vmatprep.subr.bf16.mxu1 %v13537_v9  ;;  %v13593_v55 = vld [vmem:[#allocation6 + $0x110] sm:$0xff]  }
 0x476   : > { %11736 = vmatmul.mubr.msk.bf16.gmra.mrb[4].mxu1 %vm15124_vm2, %v16027_v14  ;;  %v13541_v14 = vld [vmem:[#allocation4 + $0xb0] sm:$0xff]  }
 0x477   : > { %11739 = vmatprep.mubr.msk.bf16.mxu1 %vm15124_vm2, %v16049_v39  ;;  %11752 = vmatpush3.bf16.msra.mxu1 %v13537_v9  ;;  %v4351_v39 = vrot.slane %v15950_v24, 1  ;;  %v13562_v24 = vld [vmem:[#allocation6 + $0x18] sm:$0xff]   ;;  %v13579_v9 = vld [vmem:[#allocation6 + $0xa0] sm:$0xff]  }
 0x478   : > { %11753 = vmatprep.subr.bf16.mxu1 %v13538_v51 }
 0x47b   : > { %11754 = vmatpush3.bf16.msra.mxu1 %v13538_v51  ;;  %v17248_v51 = vld [vmem:[#allocation31_spill] sm:$0xff] }
 0x47c   : > { %11755 = vmatprep.subr.bf16.mxu1 %v13539_v21 }
 0x47e   : > { %11740 = vmatmul.mubr.msk.bf16.gmra.mrb[8].mxu1 %vm15124_vm2, %v16079_v48  ;;  %v4352_v48 = vsel %vm1285_vm4, %v4350_v53, %v4351_v39  ;;  %v17250_v53 = vld [vmem:[#allocation33_spill] sm:$0xff]  ;;  %v17251_v39 = vld [vmem:[#allocation34_spill] sm:$0xff] }
 0x47f   : > { %11743 = vmatprep.mubr.msk.bf16.mxu1 %vm15124_vm2, %v16144_v6  ;;  %11756 = vmatpush3.bf16.msra.mxu1 %v13539_v21  ;;  %v13543_v6 = vld [vmem:[#allocation4 + $0xc0] sm:$0xff]   ;;  %v17249_v21 = vld [vmem:[#allocation32_spill] sm:$0xff] }
 0x480   : > { %11757 = vmatprep.subr.bf16.mxu1 %v13540_v17 }
 0x483   : > { %11758 = vmatpush3.bf16.msra.mxu1 %v13540_v17  ;;  %v13581_v17 = vld [vmem:[#allocation6 + $0xb0] sm:$0xff]  }
 0x484   : > { %11759 = vmatprep.subr.bf16.mxu1 %v13541_v14 }
 0x486   : > { %11744 = vmatmul.mubr.msk.bf16.gmra.mrb[12].mxu1 %vm15124_vm2, %v16185_v57  ;;  %v13547_v57 = vld [vmem:[#allocation4 + $0xe0] sm:$0xff]  }
 0x487   : > { %11760 = vmatpush3.bf16.msra.mxu1 %v13541_v14  ;;  %11763 = vmatprep.mubr.bf16.mxu1 %v4352_v48  ;;  %v13582_v14 = vld [vmem:[#allocation6 + $0xb8] sm:$0xff]   ;;  %v13584_v48 = vld [vmem:[#allocation6 + $0xc8] sm:$0xff]  }
 0x488   : > { %11761 = vmatprep.subr.bf16.mxu1 %v13542_v38 }
 0x48b   : > { %11762 = vmatpush3.bf16.msra.mxu1 %v13542_v38  ;;  %v13583_v38 = vld [vmem:[#allocation6 + $0xc0] sm:$0xff]  }
 0x48c   : > { %11779 = vmatprep.subr.bf16.mxu1 %v13543_v6 }
 0x48e   : > { %11764 = vmatmul.mubr.bf16.vlgmr.msra.gmra.mrb[0].mxu1 %v16055_v63  ;;  %v13549_v63 = vld [vmem:[#allocation4 + $0xf0] sm:$0xff]  }
 0x48f   : > { %11767 = vmatprep.mubr.bf16.mxu1 %v16094_v23  ;;  %11780 = vmatpush3.bf16.msra.mxu1 %v13543_v6  ;;  %v13550_v23 = vld [vmem:[#allocation4 + $0xf8] sm:$0xff]   ;;  %v17252_v6 = vld [vmem:[#allocation35_spill] sm:$0xff] }
 0x490   : > { %11781 = vmatprep.subr.bf16.mxu1 %v13544_v33 }
 0x493   : > { %11782 = vmatpush3.bf16.msra.mxu1 %v13544_v33  ;;  %v17253_v33 = vld [vmem:[#allocation36_spill] sm:$0xff] }
 0x494   : > { %11783 = vmatprep.subr.bf16.mxu1 %v13545_v32 }
 0x496   : > { %11768 = vmatmul.mubr.bf16.gmra.mrb[4].mxu1 %v16124_v18  ;;  %v13552_v18 = vld [vmem:[#allocation4 + $0x108] sm:$0xff]  }
 0x497   : > { %11771 = vmatprep.mubr.bf16.mxu1 %v16132_v54  ;;  %11784 = vmatpush3.bf16.msra.mxu1 %v13545_v32  ;;  %v13551_v54 = vld [vmem:[#allocation4 + $0x100] sm:$0xff]   ;;  %v13585_v32 = vld [vmem:[#allocation6 + $0xd0] sm:$0xff]  }
 0x498   : > { %11785 = vmatprep.subr.bf16.mxu1 %v13546_v40 }
 0x49b   : > { %11786 = vmatpush3.bf16.msra.mxu1 %v13546_v40  ;;  %v13586_v40 = vld [vmem:[#allocation6 + $0xd8] sm:$0xff]  }
 0x49c   : > { %11787 = vmatprep.subr.bf16.mxu1 %v13547_v57 }
 0x49e   : > { %11772 = vmatmul.mubr.bf16.gmra.mrb[8].mxu1 %v16136_v41  ;;  %v17233_v41 = vld [vmem:[#allocation75_spill] sm:$0xff] }
 0x49f   : > { %11775 = vmatprep.mubr.bf16.mxu1 %v16175_v26  ;;  %11788 = vmatpush3.bf16.msra.mxu1 %v13547_v57  ;;  %v13553_v26 = vld [vmem:[#allocation4 + $0x110] sm:$0xff]   ;;  %v17254_v57 = vld [vmem:[#allocation37_spill] sm:$0xff] }
 0x4a0   : > { %11789 = vmatprep.subr.bf16.mxu1 %v13548_v45 }
 0x4a3   : > { %11790 = vmatpush3.bf16.msra.mxu1 %v13548_v45  ;;  %v17255_v45 = vld [vmem:[#allocation38_spill] sm:$0xff] }
 0x4a4   : > { %11791 = vmatprep.subr.bf16.mxu1 %v13549_v63 }
 0x4a6   : > { %11776 = vmatmul.mubr.bf16.gmra.mrb[12].mxu1 %v16219_v46  ;;  %v13555_v46 = vld [vmem:[#allocation4 + $0x120] sm:$0xff]  }
 0x4a7   : > { %11792 = vmatpush3.bf16.msra.mxu1 %v13549_v63  ;;  %11795 = vmatprep.mubr.bf16.mxu1 %v16171_v35  ;;  %v13556_v35 = vld [vmem:[#allocation4 + $0x128] sm:$0xff]   ;;  %v13587_v63 = vld [vmem:[#allocation6 + $0xe0] sm:$0xff]  }
 0x4a8   : > { %11793 = vmatprep.subr.bf16.mxu1 %v13550_v23 }
 0x4ab   : > { %11794 = vmatpush3.bf16.msra.mxu1 %v13550_v23  ;;  %v13588_v23 = vld [vmem:[#allocation6 + $0xe8] sm:$0xff]  }
 0x4ac   : > { %11811 = vmatprep.subr.bf16.mxu1 %v13551_v54 }
 0x4ae   : > { %11796 = vmatmul.mubr.bf16.vlgmr.msra.gmra.mrb[0].mxu1 %v16188_v1  ;;  %v13557_v1 = vld [vmem:[#allocation4 + $0x130] sm:$0xff]  }
 0x4af   : > { %11799 = vmatprep.mubr.bf16.mxu1 %v17233_v41  ;;  %11812 = vmatpush3.bf16.msra.mxu1 %v13551_v54  ;;  %v17256_v54 = vld [vmem:[#allocation39_spill] sm:$0xff]  ;;  %v13589_v41 = vld [vmem:[#allocation6 + $0xf0] sm:$0xff]  }
 0x4b0   : > { %11813 = vmatprep.subr.bf16.mxu1 %v13552_v18 }
 0x4b3   : > { %11814 = vmatpush3.bf16.msra.mxu1 %v13552_v18  ;;  %v17257_v18 = vld [vmem:[#allocation40_spill] sm:$0xff] }
 0x4b4   : > { %11815 = vmatprep.subr.bf16.mxu1 %v13553_v26 }
 0x4b6   : > { %11800 = vmatmul.mubr.bf16.gmra.mrb[4].mxu1 %v17234_v43  ;;  %v17259_v43 = vld [vmem:[#allocation42_spill] sm:$0xff] }
 0x4b7   : > { %11803 = vmatprep.mubr.bf16.mxu1 %v16232_v0  ;;  %11816 = vmatpush3.bf16.msra.mxu1 %v13553_v26  ;;  %v13558_v0 = vld [vmem:[#allocation4 + $0x138] sm:$0xff]  }
 0x4b8   : > { %11817 = vmatprep.subr.bf16.mxu1 %v13554_v19  ;;  %v13590_v26 = vld [vmem:[#allocation6 + $0xf8] sm:$0xff]  }
 0x4bb   : > { %11818 = vmatpush3.bf16.msra.mxu1 %v13554_v19  ;;  %v17258_v19 = vld [vmem:[#allocation41_spill] sm:$0xff] }
 0x4bc   : > { %11819 = vmatprep.subr.bf16.mxu1 %v13555_v46 }
 0x4be   : > { %11804 = vmatmul.mubr.bf16.gmra.mrb[8].mxu1 %v16240_v58  ;;  %v13566_v58 = vld [vmem:[#allocation6 + $0x38] sm:$0xff]  }
 0x4bf   : > { %11807 = vmatprep.mubr.bf16.mxu1 %v16245_v47  ;;  %11820 = vmatpush3.bf16.msra.mxu1 %v13555_v46  ;;  %v17236_v47 = vld [vmem:[#allocation19_spill] sm:$0xff]  ;;  %v13591_v46 = vld [vmem:[#allocation6 + $0x100] sm:$0xff]  }
 0x4c0   : > { %11821 = vmatprep.subr.bf16.mxu1 %v13556_v35 }
 0x4c3   : > { %11822 = vmatpush3.bf16.msra.mxu1 %v13556_v35  ;;  %v13592_v35 = vld [vmem:[#allocation6 + $0x108] sm:$0xff]  }
 0x4c4   : > { %11823 = vmatprep.subr.bf16.mxu1 %v13557_v1 }
 0x4c6   : > { %11808 = vmatmul.mubr.bf16.gmra.mrb[12].mxu1 %v16261_v2  ;;  %v17242_v2 = vld [vmem:[#allocation25_spill] sm:$0xff] }
 0x4c7   : > { %11824 = vmatpush3.bf16.msra.mxu1 %v13557_v1  ;;  %11827 = vmatprep.mubr.bf16.mxu1 %v4820_v22  ;;  %v17260_v1 = vld [vmem:[#allocation43_spill] sm:$0xff]  ;;  %v17262_v22 = vld [vmem:[#allocation45_spill] sm:$0xff] }
 0x4c8   : > { %11825 = vmatprep.subr.bf16.mxu1 %v13558_v0 }
 0x4cb   : > { %11826 = vmatpush3.bf16.msra.mxu1 %v13558_v0  ;;  %v13594_v0 = vld [vmem:[#allocation6 + $0x118] sm:$0xff]  }
 0x4cc   : > { %11843 = vmatprep.subr.bf16.mxu1 %v13559_v56 }
 0x4ce   : > { %11828 = vmatmul.mubr.bf16.vlgmr.msra.gmra.mrb[0].mxu1 %v16250_v15  ;;  %v17238_v15 = vld [vmem:[#allocation21_spill] sm:$0xff] }
 0x4cf   : > { %11831 = vmatprep.mubr.bf16.mxu1 %v16255_v3  ;;  %11844 = vmatpush3.bf16.msra.mxu1 %v13559_v56  ;;  %v17240_v3 = vld [vmem:[#allocation23_spill] sm:$0xff]  ;;  %v17263_v56 = vld [vmem:[#allocation46_spill] sm:$0xff] }
 0x4d0   : > { %11845 = vmatprep.subr.bf16.mxu1 %v13560_v37 }
 0x4d3   : > { %11846 = vmatpush3.bf16.msra.mxu1 %v13560_v37  ;;  %v13595_v37 = vld [vmem:[#allocation6 + $0x120] sm:$0xff]  }
 0x4d4   : > { %11847 = vmatprep.subr.bf16.mxu1 %v13561_v34 }
 0x4d6   : > { %11832 = vmatmul.mubr.bf16.gmra.mrb[4].mxu1 %v16264_v13  ;;  %v17243_v13 = vld [vmem:[#allocation26_spill] sm:$0xff] }
 0x4d7   : > { %11835 = vmatprep.mubr.bf16.mxu1 %v16272_v62  ;;  %11848 = vmatpush3.bf16.msra.mxu1 %v13561_v34  ;;  %v17244_v62 = vld [vmem:[#allocation27_spill] sm:$0xff] }
 0x4d8   : > { %11849 = vmatprep.subr.bf16.mxu1 %v13562_v24  ;;  %v13596_v34 = vld [vmem:[#allocation6 + $0x128] sm:$0xff]  }
 0x4db   : > { %11850 = vmatpush3.bf16.msra.mxu1 %v13562_v24  ;;  %v17264_v24 = vld [vmem:[#allocation47_spill] sm:$0xff] }
 0x4dc   : > { %11851 = vmatprep.subr.bf16.mxu1 %v13563_v31 }
 0x4de   : > { %11836 = vmatmul.mubr.bf16.gmra.mrb[8].mxu1 %v16275_v44  ;;  %v17245_v44 = vld [vmem:[#allocation28_spill] sm:$0xff] }
 0x4df   : > { %11839 = vmatprep.mubr.bf16.mxu1 %v16284_v27  ;;  %11852 = vmatpush3.bf16.msra.mxu1 %v13563_v31  ;;  %v17247_v27 = vld [vmem:[#allocation30_spill] sm:$0xff]  ;;  %v17265_v31 = vld [vmem:[#allocation48_spill] sm:$0xff] }
 0x4e0   : > { %11853 = vmatprep.subr.bf16.mxu1 %v13564_v59 }
 0x4e3   : > { %11854 = vmatpush3.bf16.msra.mxu1 %v13564_v59  ;;  %v13597_v59 = vld [vmem:[#allocation6 + $0x130] sm:$0xff]  }
 0x4e4   : > { %11855 = vmatprep.subr.bf16.mxu1 %v13565_v16 }
 0x4e6   : > { %11840 = vmatmul.mubr.bf16.gmra.mrb[12].mxu1 %v16287_v36  ;;  %v13580_v36 = vld [vmem:[#allocation6 + $0xa8] sm:$0xff]  }
 0x4e7   : > { %11856 = vmatpush3.bf16.msra.mxu1 %v13565_v16  ;;  %11859 = vmatprep.mubr.msk.bf16.mxu1 %vm15124_vm2, %v17235_v4  ;;  %v13598_v16 = vld [vmem:[#allocation6 + $0x138] sm:$0xff]   ;;  %v17267_v4 = vld [vmem:[#allocation50_spill] sm:$0xff] }
 0x4e8   : > { %11857 = vmatprep.subr.bf16.mxu1 %v13566_v58 }
 0x4eb   : > { %11858 = vmatpush3.bf16.msra.mxu1 %v13566_v58  ;;  %v17266_v58 = vld [vmem:[#allocation49_spill] sm:$0xff] }
 0x4ec   : > { %11875 = vmatprep.subr.bf16.mxu1 %v13567_v28 }
 0x4ee   : > { %11860 = vmatmul.mubr.msk.bf16.vlgmr.msra.gmra.mrb[0].mxu1 %vm15124_vm2, %v17236_v47  ;;  %v13604_v47 = vld [vmem:[#allocation7 + $0x94] ss:$8 sps:$4 sm:$0xff]  }
 0x4ef   : > { %11876 = vmatpush3.bf16.msra.mxu1 %v13567_v28  ;;  %11863 = vmatprep.mubr.msk.bf16.mxu1 %vm15124_vm2, %v17237_v29  ;;  %v13601_v28 = vld [vmem:[#allocation7 + $0x84] ss:$8 sps:$4 sm:$0xff]  }
 0x4f0   : > { %11877 = vmatprep.subr.bf16.mxu1 %v13568_v49  ;;  %v17268_v29 = vld [vmem:[#allocation51_spill] sm:$0xff] }
 0x4f3   : > { %11878 = vmatpush3.bf16.msra.mxu1 %v13568_v49  ;;  %v13599_v49 = vld [vmem:[#allocation7 + $0x80] ss:$8 sps:$4 sm:$0xff]  }
 0x4f4   : > { %11879 = vmatprep.subr.bf16.mxu1 %v13569_v61 }
 0x4f6   : > { %11864 = vmatmul.mubr.msk.bf16.gmra.mrb[4].mxu1 %vm15124_vm2, %v17238_v15  ;;  %v13607_v15 = vld [vmem:[#allocation7 + $0xa4] ss:$8 sps:$4 sm:$0xff]  }
 0x4f7   : > { %11880 = vmatpush3.bf16.msra.mxu1 %v13569_v61  ;;  %11867 = vmatprep.mubr.msk.bf16.mxu1 %vm15124_vm2, %v17239_v20  ;;  %v17269_v61 = vld [vmem:[#allocation52_spill] sm:$0xff]  ;;  %v13605_v20 = vld [vmem:[#allocation7 + $0xa0] ss:$8 sps:$4 sm:$0xff]  }
 0x4f8   : > { %11881 = vmatprep.subr.bf16.mxu1 %v13570_v60 }
 0x4fb   : > { %11882 = vmatpush3.bf16.msra.mxu1 %v13570_v60  ;;  %v13602_v60 = vld [vmem:[#allocation7 + $0x90] ss:$8 sps:$4 sm:$0xff]  }
 0x4fc   : > { %11883 = vmatprep.subr.bf16.mxu1 %v13571_v11 }
 0x4fe   : > { %11868 = vmatmul.mubr.msk.bf16.gmra.mrb[8].mxu1 %vm15124_vm2, %v17240_v3  ;;  %v17271_v3 = vld [vmem:[#allocation54_spill] sm:$0xff] }
 0x4ff   : > { %11884 = vmatpush3.bf16.msra.mxu1 %v13571_v11  ;;  %11871 = vmatprep.mubr.msk.bf16.mxu1 %vm15124_vm2, %v17241_v50  ;;  %v13610_v11 = vld [vmem:[#allocation7 + $0xb4] ss:$8 sps:$4 sm:$0xff]   ;;  %v13608_v50 = vld [vmem:[#allocation7 + $0xb0] ss:$8 sps:$4 sm:$0xff]  }
 0x500   : > { %11885 = vmatprep.subr.bf16.mxu1 %v13572_v42 }
 0x503   : > { %11886 = vmatpush3.bf16.msra.mxu1 %v13572_v42  ;;  %v17270_v42 = vld [vmem:[#allocation53_spill] sm:$0xff] }
 0x504   : > { %11887 = vmatprep.subr.bf16.mxu1 %v13573_v25 }
 0x506   : > { %11872 = vmatmul.mubr.msk.bf16.gmra.mrb[12].mxu1 %vm15124_vm2, %v17242_v2  ;;  %v17272_v2 = vld [vmem:[#allocation55_spill] sm:$0xff] }
 0x507   : > { %11888 = vmatpush3.bf16.msra.mxu1 %v13573_v25  ;;  %11891 = vmatprep.mubr.bf16.mxu1 %v17243_v13  ;;  %v13613_v25 = vld [vmem:[#allocation7 + $0xc4] ss:$8 sps:$4 sm:$0xff]   ;;  %v17273_v13 = vld [vmem:[#allocation56_spill] sm:$0xff] }
 0x508   : > { %11889 = vmatprep.subr.bf16.mxu1 %v13574_v12 }
 0x50b   : > { %11890 = vmatpush3.bf16.msra.mxu1 %v13574_v12  ;;  %v13611_v12 = vld [vmem:[#allocation7 + $0xc0] ss:$8 sps:$4 sm:$0xff]  }
 0x50c   : > { %11907 = vmatprep.subr.bf16.mxu1 %v13575_v30 }
 0x50e   : > { %11892 = vmatmul.mubr.bf16.vlgmr.msra.gmra.mrb[0].mxu1 %v17244_v62  ;;  %v13614_v62 = vld [vmem:[#allocation7 + $0xd0] ss:$8 sps:$4 sm:$0xff]  }
 0x50f   : > { %11908 = vmatpush3.bf16.msra.mxu1 %v13575_v30  ;;  %11895 = vmatprep.mubr.bf16.mxu1 %v17245_v44  ;;  %v17274_v30 = vld [vmem:[#allocation57_spill] sm:$0xff] }
 0x510   : > { %11909 = vmatprep.subr.bf16.mxu1 %v13576_v7  ;;  %v13616_v44 = vld [vmem:[#allocation7 + $0xd4] ss:$8 sps:$4 sm:$0xff]  }
 0x513   : > { %11910 = vmatpush3.bf16.msra.mxu1 %v13576_v7  ;;  %v17275_v7 = vmov 0  }
 0x514   : > { %11911 = vmatprep.subr.bf16.mxu1 %v13577_v10 }
 0x516   : > { %11896 = vmatmul.mubr.bf16.gmra.mrb[4].mxu1 %v17246_v8  ;;  %v13620_v8 = vld [vmem:[#allocation7 + $0xf0] ss:$8 sps:$4 sm:$0xff]  }
 0x517   : > { %11912 = vmatpush3.bf16.msra.mxu1 %v13577_v10  ;;  %11899 = vmatprep.mubr.bf16.mxu1 %v17247_v27  ;;  %v13619_v10 = vld [vmem:[#allocation7 + $0xe4] ss:$8 sps:$4 sm:$0xff]   ;;  %v13622_v27 = vld [vmem:[#allocation7 + $0xf4] ss:$8 sps:$4 sm:$0xff]  }
 0x518   : > { %11913 = vmatprep.subr.bf16.mxu1 %v13578_v52 }
 0x51b   : > { %11914 = vmatpush3.bf16.msra.mxu1 %v13578_v52  ;;  %v13617_v52 = vld [vmem:[#allocation7 + $0xe0] ss:$8 sps:$4 sm:$0xff]  }
 0x51c   : > { %11915 = vmatprep.subr.bf16.mxu1 %v13579_v9 }
 0x51e   : > { %11900 = vmatmul.mubr.bf16.gmra.mrb[8].mxu1 %v17248_v51  ;;  %v13626_v51 = vld [vmem:[#allocation7 + $0x10] ss:$8 sps:$4 sm:$0xff]  }
 0x51f   : > { %11916 = vmatpush3.bf16.msra.mxu1 %v13579_v9  ;;  %11903 = vmatprep.mubr.bf16.mxu1 %v17249_v21  ;;  %v13625_v9 = vld [vmem:[#allocation7 + $0x4] ss:$8 sps:$4 sm:$0xff]   ;;  %v13628_v21 = vld [vmem:[#allocation7 + $0x14] ss:$8 sps:$4 sm:$0xff]  }
 0x520   : > { %11917 = vmatprep.subr.bf16.mxu1 %v13580_v36 }
 0x523   : > { %11918 = vmatpush3.bf16.msra.mxu1 %v13580_v36  ;;  %v13623_v36 = vld [vmem:[#allocation7] ss:$8 sps:$4 sm:$0xff]  }
 0x524   : > { %11919 = vmatprep.subr.bf16.mxu1 %v13581_v17 }
 0x526   : > { %11904 = vmatmul.mubr.bf16.gmra.mrb[12].mxu1 %v17250_v53  ;;  %v13634_v53 = vld [vmem:[#allocation7 + $0x34] ss:$8 sps:$4 sm:$0xff]  }
 0x527   : > { %11920 = vmatpush3.bf16.msra.mxu1 %v13581_v17  ;;  %11923 = vmatprep.mubr.bf16.mxu1 %v17251_v39  ;;  %v13629_v17 = vld [vmem:[#allocation7 + $0x20] ss:$8 sps:$4 sm:$0xff]   ;;  %v13632_v39 = vld [vmem:[#allocation7 + $0x30] ss:$8 sps:$4 sm:$0xff]  }
 0x528   : > { %11921 = vmatprep.subr.bf16.mxu1 %v13582_v14 }
 0x52b   : > { %11922 = vmatpush3.bf16.msra.mxu1 %v13582_v14  ;;  %v13631_v14 = vld [vmem:[#allocation7 + $0x24] ss:$8 sps:$4 sm:$0xff]  }
 0x52c   : > { %11939 = vmatprep.subr.bf16.mxu1 %v13583_v38 }
 0x52e   : > { %11924 = vmatmul.mubr.bf16.vlgmr.msra.gmra.mrb[0].mxu1 %v17252_v6  ;;  %v13638_v6 = vld [vmem:[#allocation7 + $0x50] ss:$8 sps:$4 sm:$0xff]  }
 0x52f   : > { %11940 = vmatpush3.bf16.msra.mxu1 %v13583_v38  ;;  %11927 = vmatprep.mubr.bf16.mxu1 %v17253_v33  ;;  %v13637_v38 = vld [vmem:[#allocation7 + $0x44] ss:$8 sps:$4 sm:$0xff]   ;;  %v13640_v33 = vld [vmem:[#allocation7 + $0x54] ss:$8 sps:$4 sm:$0xff]  }
 0x530   : > { %11941 = vmatprep.subr.bf16.mxu1 %v13584_v48 }
 0x533   : > { %11942 = vmatpush3.bf16.msra.mxu1 %v13584_v48  ;;  %v13635_v48 = vld [vmem:[#allocation7 + $0x40] ss:$8 sps:$4 sm:$0xff]  }
 0x534   : > { %11943 = vmatprep.subr.bf16.mxu1 %v13585_v32 }
 0x536   : > { %11928 = vmatmul.mubr.bf16.gmra.mrb[4].mxu1 %v17254_v57  ;;  %v13644_v57 = vld [vmem:[#allocation7 + $0x70] ss:$8 sps:$4 sm:$0xff]  }
 0x537   : > { %11944 = vmatpush3.bf16.msra.mxu1 %v13585_v32  ;;  %11931 = vmatprep.mubr.bf16.mxu1 %v17255_v45  ;;  %v13641_v32 = vld [vmem:[#allocation7 + $0x60] ss:$8 sps:$4 sm:$0xff]   ;;  %v13646_v45 = vld [vmem:[#allocation7 + $0x74] ss:$8 sps:$4 sm:$0xff]  }
 0x538   : > { %11945 = vmatprep.subr.bf16.mxu1 %v13586_v40 }
 0x53b   : > { %11946 = vmatpush3.bf16.msra.mxu1 %v13586_v40  ;;  %v13643_v40 = vld [vmem:[#allocation7 + $0x64] ss:$8 sps:$4 sm:$0xff]  }
 0x53c   : > { %11947 = vmatprep.subr.bf16.mxu1 %v13587_v63 }
 0x53e   : > { %11932 = vmatmul.mubr.bf16.gmra.mrb[8].mxu1 %v17256_v54 }
 0x53f   : > { %11948 = vmatpush3.bf16.msra.mxu1 %v13587_v63  ;;  %11935 = vmatprep.mubr.bf16.mxu1 %v17257_v18  ;;  %v13649_v63 = vld [vmem:[#allocation7 + $0x104] ss:$8 sps:$4 sm:$0xff]   ;;  %v17277_v18 = vld [vmem:[#allocation60_spill] sm:$0xff] }
 0x540   : > { %11949 = vmatprep.subr.bf16.mxu1 %v13588_v23 }
 0x543   : > { %11950 = vmatpush3.bf16.msra.mxu1 %v13588_v23  ;;  %v17276_v23 = vld [vmem:[#allocation59_spill] sm:$0xff] }
 0x544   : > { %11951 = vmatprep.subr.bf16.mxu1 %v13589_v41  ;;  %v10940_v54 = vmul.f32 -1.442695, %v17276_v23 }
 0x546   : > { %11936 = vmatmul.mubr.bf16.gmra.mrb[12].mxu1 %v17258_v19  ;;  %13983 = vpow2.f32 %v10940_v54 }
 0x547   : > { %11952 = vmatpush3.bf16.msra.mxu1 %v13589_v41  ;;  %11955 = vmatprep.mubr.bf16.mxu1 %v17259_v43  ;;  %v10941_v41 = vmul.f32 -1.442695, %v17277_v18  ;;  %v17279_v43 = vld [vmem:[#allocation62_spill] sm:$0xff] }
 0x548   : > { %11953 = vmatprep.subr.bf16.mxu1 %v13590_v26 }
 0x549   : > { %13985 = vpow2.f32 %v10941_v41 }
 0x54b   : > { %11954 = vmatpush3.bf16.msra.mxu1 %v13590_v26  ;;  %v17278_v26 = vld [vmem:[#allocation61_spill] sm:$0xff] }
 0x54c   : > { %11971 = vmatprep.subr.bf16.mxu1 %v13591_v46  ;;  %v10942_v19 = vmul.f32 -1.442695, %v17278_v26 }
 0x54e   : > { %11956 = vmatmul.mubr.bf16.vlgmr.msra.gmra.mrb[0].mxu1 %v17260_v1  ;;  %13987 = vpow2.f32 %v10942_v19 }
 0x54f   : > { %11972 = vmatpush3.bf16.msra.mxu1 %v13591_v46  ;;  %11959 = vmatprep.mubr.bf16.mxu1 %v17261_v5  ;;  %v10943_v46 = vmul.f32 -1.442695, %v17279_v43  ;;  %v17281_v5 = vld [vmem:[#allocation65_spill] sm:$0xff] }
 0x550   : > { %11973 = vmatprep.subr.bf16.mxu1 %v13592_v35 }
 0x551   : > { %13989 = vpow2.f32 %v10943_v46 }
 0x553   : > { %11974 = vmatpush3.bf16.msra.mxu1 %v13592_v35  ;;  %v17280_v35 = vld [vmem:[#allocation63_spill] sm:$0xff] }
 0x554   : > { %11975 = vmatprep.subr.bf16.mxu1 %v13593_v55  ;;  %v10944_v1 = vmul.f32 -1.442695, %v17280_v35 }
 0x556   : > { %11960 = vmatmul.mubr.bf16.gmra.mrb[4].mxu1 %v17262_v22  ;;  %13991 = vpow2.f32 %v10944_v1 }
 0x557   : > { %11976 = vmatpush3.bf16.msra.mxu1 %v13593_v55  ;;  %11963 = vmatprep.mubr.bf16.mxu1 %v17263_v56  ;;  %v10946_v55 = vmul.f32 -1.442695, %v17281_v5  ;;  %v13984_v56 = vpop.eup %13983 }
 0x558   : > { %11977 = vmatprep.subr.bf16.mxu1 %v13594_v0 }
 0x559   : > { %13993 = vpow2.f32 %v10946_v55 }
 0x55b   : > { %11978 = vmatpush3.bf16.msra.mxu1 %v13594_v0  ;;  %v17282_v0 = vld [vmem:[#allocation66_spill] sm:$0xff] }
 0x55c   : > { %11979 = vmatprep.subr.bf16.mxu1 %v13595_v37  ;;  %v10947_v22 = vmul.f32 -1.442695, %v17282_v0 }
 0x55e   : > { %11964 = vmatmul.mubr.bf16.gmra.mrb[8].mxu1 %v17264_v24  ;;  %13995 = vpow2.f32 %v10947_v22  ;;  %v3707_v24 = vadd.f32 1.0, %v13984_v56 }
 0x55f   : > { %11980 = vmatpush3.bf16.msra.mxu1 %v13595_v37  ;;  %11967 = vmatprep.mubr.bf16.mxu1 %v17265_v31  ;;  %v13986_v37 = vpop.eup %13985 }
 0x560   : > { %11981 = vmatprep.subr.bf16.mxu1 %v13596_v34  ;;  %v3708_v31 = vadd.f32 1.0, %v13986_v37  ;;  %13997 = vrcp.f32 %v3707_v24 }
 0x562   : > { %13999 = vrcp.f32 %v3708_v31 }
 0x563   : > { %11982 = vmatpush3.bf16.msra.mxu1 %v13596_v34  ;;  %v13988_v34 = vpop.eup %13987 }
 0x564   : > { %11983 = vmatprep.subr.bf16.mxu1 %v13597_v59 }
 0x566   : > { %11968 = vmatmul.mubr.bf16.gmra.mrb[12].mxu1 %v17266_v58  ;;  %v13990_v58 = vpop.eup %13989 }
 0x567   : > { %11984 = vmatpush3.bf16.msra.mxu1 %v13597_v59  ;;  %11987 = vmatprep.mubr.bf16.mxu1 %v17267_v4  ;;  %v17283_v59 = vld [vmem:[#allocation64_spill] sm:$0xff]  ;;  %v3709_v4 = vadd.f32 1.0, %v13988_v34 }
 0x568   : > { %11985 = vmatprep.subr.bf16.mxu1 %v13598_v16 }
 0x56b   : > { %11986 = vmatpush3.bf16.msra.mxu1 %v13598_v16  ;;  %v10945_v16 = vmul.f32 -1.442695, %v17283_v59 }
 0x56c   : > { %6149 = vmatprep.subr.bf16.mxu1 %v13601_v28  ;;  %v13992_v28 = vpop.eup %13991 }
 0x56d   : > { %14001 = vpow2.f32 %v10945_v16 }
 0x56e   : > { %11988 = vmatmul.mubr.bf16.vlgmr.msra.gmra.mrb[0].mxu1 %v17268_v29  ;;  %v17285_v29 = vld [vmem:[#allocation69_spill] sm:$0xff]  ;;  %14003 = vrcp.f32 %v3709_v4 }
 0x56f   : > { %11991 = vmatprep.mubr.bf16.mxu1 %v17269_v61  ;;  %6150 = vmatpush1.bf16.msra.mxu1 %v13599_v49  ;;  %v17284_v49 = vld [vmem:[#allocation67_spill] sm:$0xff]  ;;  %v10950_v61 = vmul.f32 -1.442695, %v17285_v29  ;;  %v14255_v29 = vld [vmem:[%s14852_s19] sm:$0xff] }
 0x570   : > { %6151 = vmatprep.subr.bf16.mxu1 %v13604_v47  ;;  %v10948_v47 = vmul.f32 -1.442695, %v17284_v49 }
 0x572   : > { %14005 = vpow2.f32 %v10948_v47 }
 0x573   : > { %6152 = vmatpush1.bf16.msra.mxu1 %v13602_v60  ;;  %v13994_v60 = vpop.eup %13993  ;;  %14007 = vpow2.f32 %v10950_v61 }
 0x574   : > { %6153 = vmatprep.subr.bf16.mxu1 %v13607_v15  ;;  %v3710_v15 = vadd.f32 1.0, %v13990_v58 }
 0x576   : > { %11992 = vmatmul.mubr.bf16.gmra.mrb[4].mxu1 %v17270_v42  ;;  %v17286_v42 = vld [vmem:[#allocation68_spill] sm:$0xff]  ;;  %14009 = vrcp.f32 %v3710_v15 }
 0x577   : > { %11995 = vmatprep.mubr.bf16.mxu1 %v17271_v3  ;;  %6154 = vmatpush1.bf16.msra.mxu1 %v13605_v20  ;;  %v3711_v20 = vadd.f32 1.0, %v13992_v28  ;;  %v10949_v3 = vmul.f32 -1.442695, %v17286_v42 }
 0x578   : > { %6155 = vmatprep.subr.bf16.mxu1 %v13610_v11  ;;  %v13996_v11 = vpop.eup %13995 }
 0x579   : > { %14011 = vrcp.f32 %v3711_v20 }
 0x57a   : > { %14013 = vpow2.f32 %v10949_v3 }
 0x57b   : > { %6156 = vmatpush1.bf16.msra.mxu1 %v13608_v50  ;;  %v3713_v50 = vadd.f32 1.0, %v13994_v60 }
 0x57c   : > { %6157 = vmatprep.subr.bf16.mxu1 %v13613_v25  ;;  %v17287_v25 = vld [vmem:[#allocation70_spill] sm:$0xff] }
 0x57d   : > { %14015 = vrcp.f32 %v3713_v50 }
 0x57e   : > { %11996 = vmatmul.mubr.bf16.gmra.mrb[8].mxu1 %v17272_v2  ;;  %v3714_v2 = vadd.f32 1.0, %v13996_v11  ;;  %v14256_v11 = vld [vmem:[%s14852_s19 + $0x10] sm:$0xff] }
 0x57f   : > { %11999 = vmatprep.mubr.bf16.mxu1 %v17273_v13  ;;  %6158 = vmatpush1.bf16.msra.mxu1 %v13611_v12  ;;  %v10951_v12 = vmul.f32 -1.442695, %v17287_v25  ;;  %v17288_v13 = vld [vmem:[#allocation71_spill] sm:$0xff] }
 0x580   : > { %6159 = vmatprep.subr.bf16.mxu1 %v13616_v44  ;;  %v14257_v25 = vld [vmem:[%s14852_s19 + $0x8] sm:$0xff] }
 0x581   : > { %14017 = vpow2.f32 %v10951_v12 }
 0x582   : > { %14019 = vrcp.f32 %v3714_v2 }
 0x583   : > { %6160 = vmatpush1.bf16.msra.mxu1 %v13614_v62  ;;  %v17289_v62 = vld [vmem:[#allocation73_spill] sm:$0xff] }
 0x584   : > { %6161 = vmatprep.subr.bf16.mxu1 %v13619_v10  ;;  %v10954_v44 = vmul.f32 -1.442695, %v17289_v62  ;;  %v16405_v10 = vpop.eup %13997 }
 0x585   : > { %v5956_v5 = vsub.f32 1.0, %v16405_v10 }
 0x586   : > { %12000 = vmatmul.mubr.bf16.gmra.mrb[12].mxu1 %v17274_v30  ;;  %v10952_v30 = vmul.f32 -1.442695, %v17288_v13 }
 0x587   : > { %6181 = vmatprep.mubr.bf16.mxu1 %v17275_v7  ;;  %6162 = vmatpush1.bf16.msra.mxu1 %v13617_v52  ;;  %v17290_v52 = vld [vmem:[#allocation74_spill] sm:$0xff]  ;;  %v5972_v61 = vmul.f32 %v14255_v29, %v5956_v5 }
 0x588   : > { %6163 = vmatprep.subr.bf16.mxu1 %v13622_v27  ;;  %v16411_v27 = vld [vmem:[%s17022_s7] ss:$0 sm:$0xff]  ;;  %14021 = vpow2.f32 %v10952_v30 }
 0x589   : > { %14023 = vpow2.f32 %v10954_v44  ;;  %v14258_v44 = vld [vmem:[%s14852_s19 + $0x18] sm:$0xff] }
 0x58b   : > { %6164 = vmatpush1.bf16.msra.mxu1 %v13620_v8  ;;  %v10955_v8 = vmul.f32 -1.442695, %v17290_v52 }
 0x58c   : > { %6342 = vmatprep.subr.bf16.mxu1 %v13625_v9  ;;  %v16413_v9 = vpop.eup %13999 }
 0x58d   : > { %14025 = vpow2.f32 %v10955_v8  ;;  %v5957_v59 = vsub.f32 1.0, %v16413_v9 }
 0x58e   : > { %6182 = vmatmul.mubr.bf16.vlgmr.msra.gmra.mrb[16].mxu1 %v17275_v7 }
 0x58f   : > { %6343 = vmatpush1.bf16.msra.mxu1 %v13623_v36  ;;  %6191 = vmatprep.mubr.bf16.mxu1 %v17275_v7  ;;  %v14002_v36 = vpop.eup %14001  ;;  %v5973_v12 = vmul.f32 %v14257_v25, %v5957_v59 }
 0x590   : > { %6344 = vmatprep.subr.bf16.mxu1 %v13628_v21  ;;  %v14004_v21 = vpop.eup %14003 }
 0x591   : > { %v5958_v0 = vsub.f32 1.0, %v14004_v21 }
 0x593   : > { %6345 = vmatpush1.bf16.msra.mxu1 %v13626_v51  ;;  %v5974_v42 = vmul.f32 %v14256_v11, %v5958_v0  ;;  %v14260_v0 = vld [vmem:[%s14852_s19 + $0x20] sm:$0xff] }
 0x594   : > { %6346 = vmatprep.subr.bf16.mxu1 %v13631_v14 }
 0x597   : > { %6347 = vmatpush1.bf16.msra.mxu1 %v13629_v17 }
 0x598   : > { %6348 = vmatprep.subr.bf16.mxu1 %v13634_v53  ;;  %v14006_v53 = vpop.eup %14005 }
 0x599   : > { %v3715_v54 = vadd.f32 1.0, %v14006_v53 }
 0x59b   : > { %6349 = vmatpush1.bf16.msra.mxu1 %v13632_v39 }
 0x59c   : > { %6350 = vmatprep.subr.bf16.mxu1 %v13637_v38 }
 0x59f   : > { %6351 = vmatpush1.bf16.msra.mxu1 %v13635_v48  ;;  %v14008_v48 = vpop.eup %14007 }
 0x5a0   : > { %6352 = vmatprep.subr.bf16.mxu1 %v13640_v33  ;;  %v3717_v41 = vadd.f32 1.0, %v14008_v48 }
 0x5a3   : > { %6353 = vmatpush1.bf16.msra.mxu1 %v13638_v6  ;;  %v17291_v6 = vld [vmem:[#allocation72_spill] sm:$0xff] }
 0x5a4   : > { %6354 = vmatprep.subr.bf16.mxu1 %v13643_v40  ;;  %v10953_v33 = vmul.f32 -1.442695, %v17291_v6 }
 0x5a7   : > { %6355 = vmatpush1.bf16.msra.mxu1 %v13641_v32 }
 0x5a8   : > { %6356 = vmatprep.subr.bf16.mxu1 %v13646_v45  ;;  %v3712_v45 = vadd.f32 1.0, %v14002_v36 }
 0x5ab   : > { %6357 = vmatpush1.bf16.msra.mxu1 %v13644_v57  ;;  %v14010_v57 = vpop.eup %14009 }
 0x5ac   : > { %6552 = vmatprep.subr.bf16.mxu1 %v13649_v63  ;;  %v16420_v23 = vpop.eup %14011  ;;  %v5959_v58 = vsub.f32 1.0, %v14010_v57 }
 0x5ad   : > { %v14014_v18 = vpop.eup %14013  ;;  %v5960_v50 = vsub.f32 1.0, %v16420_v23 }
 0x5ae   : > { %v16422_v26 = vpop.eup %14015  ;;  %v3716_v4 = vadd.f32 1.0, %v14014_v18  ;;  %v5975_v52 = vmul.f32 %v14258_v44, %v5959_v58 }
 0x5af   : > { %v14018_v19 = vpop.eup %14017 }
 0x5b0   : > { %v16424_v46 = vpop.eup %14019  ;;  %v3718_v34 = vadd.f32 1.0, %v14018_v19 }
 0x5b1   : > { %v14022_v55 = vpop.eup %14021 }
 0x5b2   : > { %v14024_v37 = vpop.eup %14023  ;;  %v3719_v47 = vadd.f32 1.0, %v14022_v55 }
 0x5b3   : > { %v14026_v16 = vpop.eup %14025  ;;  %v3721_v15 = vadd.f32 1.0, %v14024_v37 }
 0x641   : > { %v11989_v51 = vpop.f32.mrb[0].mxu1 }
 0x642   : > { %v5926_v17 = vadd.f32 %v11989_v51, %v16411_v27  ;;  %v5838_v14 = vpop.f32.mrb[1].mxu1 }
 0x643   : > { %v5924_v39 = vadd.f32 %v16411_v27, %v5838_v14  ;;  %v11990_v38 = vpop.f32.mrb[2].mxu1 }
 0x644   : > { %14027 = vtanh.f32 %v5926_v17  ;;  %v5927_v32 = vadd.f32 %v11990_v38, %v16411_v27  ;;  %v5841_v40 = vpop.f32.mrb[3].mxu1 }
 0x645   : > { %14029 = vtanh.f32 %v5924_v39  ;;  %v5925_v63 = vadd.f32 %v16411_v27, %v5841_v40 }
 0x646   : > { %14031 = vtanh.f32 %v5927_v32 }
 0x647   : > { %14033 = vtanh.f32 %v5925_v63 }
 0x648   : > { %14035 = vpow2.f32 %v10953_v33  ;;  %v3722_v33 = vadd.f32 1.0, %v14026_v16 }
 0x649   : > { %14037 = vrcp.f32 %v3712_v45  ;;  %v11993_v43 = vpop.f32.mrb[4].mxu1  ;;  %v5963_v45 = vsub.f32 1.0, %v16424_v46 }
 0x64a   : > { %14039 = vrcp.f32 %v3715_v54  ;;  %v5930_v35 = vadd.f32 %v11993_v43, %v16411_v27  ;;  %v5854_v1 = vpop.f32.mrb[5].mxu1 }
 0x64b   : > { %14041 = vrcp.f32 %v3717_v41  ;;  %v5928_v22 = vadd.f32 %v16411_v27, %v5854_v1  ;;  %v11994_v56 = vpop.f32.mrb[6].mxu1 }
 0x64c   : > { %14043 = vtanh.f32 %v5930_v35  ;;  %v5931_v24 = vadd.f32 %v11994_v56, %v16411_v27  ;;  %v5857_v31 = vpop.f32.mrb[7].mxu1  ;;  %v14259_v35 = vld [vmem:[%s14852_s19 + $0x30] sm:$0xff] }
 0x64d   : > { %14045 = vtanh.f32 %v5928_v22  ;;  %v5929_v28 = vadd.f32 %v16411_v27, %v5857_v31  ;;  %v5976_v22 = vmul.f32 %v14260_v0, %v5960_v50 }
 0x64e   : > { %v14028_v49 = vpop.eup %14027  ;;  %14047 = vtanh.f32 %v5931_v24  ;;  %v14261_v24 = vld [vmem:[%s14852_s19 + $0x38] sm:$0xff] }
 0x64f   : > { %v14030_v60 = vpop.eup %14029  ;;  %v5990_v20 = vmul.f32 %v14028_v49, %v14004_v21  ;;  %14049 = vtanh.f32 %v5929_v28  ;;  %v5979_v31 = vmul.f32 %v14261_v24, %v5963_v45 }
 0x650   : > { %v14032_v3 = vpop.eup %14031  ;;  %14051 = vrcp.f32 %v3718_v34  ;;  %v5988_v2 = vmul.f32 %v14030_v60, %v16405_v10  ;;  %v5962_v10 = vsub.f32 1.0, %v16422_v26 }
 0x651   : > { %v14034_v13 = vpop.eup %14033  ;;  %14053 = vrcp.f32 %v3716_v4  ;;  %v5991_v30 = vmul.f32 %v14032_v3, %v14010_v57  ;;  %v11997_v62 = vpop.f32.mrb[8].mxu1  ;;  %v16438_v8 = vadd.f32 %v5990_v20, %v5974_v42  ;;  %v14262_v4 = vld [vmem:[%s14852_s19 + $0x28] sm:$0xff] }
 0x652   : > { %v14036_v36 = vpop.eup %14035  ;;  %14055 = vrcp.f32 %v3719_v47  ;;  %v5934_v51 = vadd.f32 %v11997_v62, %v16411_v27  ;;  %v5870_v21 = vpop.f32.mrb[9].mxu1  ;;  %v5989_v17 = vmul.f32 %v14034_v13, %v16413_v9  ;;  %v16442_v14 = vadd.f32 %v5988_v2, %v5972_v61 }
 0x653   : > { %v14038_v53 = vpop.eup %14037  ;;  %14057 = vrcp.f32 %v3721_v15  ;;  %v5932_v39 = vadd.f32 %v16411_v27, %v5870_v21  ;;  %v11998_v38 = vpop.f32.mrb[10].mxu1  ;;  %v16446_v48 = vadd.f32 %v5991_v30, %v5975_v52  ;;  %v3720_v63 = vadd.f32 1.0, %v14036_v36  ;;  %v14263_v52 = vld [vmem:[%s14852_s19 + $0x50] sm:$0xff] }
 0x654   : > { %v16448_v6 = vpop.eup %14039  ;;  %14059 = vtanh.f32 %v5934_v51  ;;  %v5935_v32 = vadd.f32 %v11998_v38, %v16411_v27  ;;  %v5873_v40 = vpop.f32.mrb[11].mxu1  ;;  %v16451_v9 = vadd.f32 %v5989_v17, %v5973_v12  ;;  %v5961_v41 = vsub.f32 1.0, %v14038_v53  ;;  %v14264_v17 = vld [vmem:[%s14852_s19 + $0x40] sm:$0xff]  ;;  %v14265_v38 = vld [vmem:[%s14852_s19 + $0x58] sm:$0xff] }
 0x655   : > { %v14042_v57 = vpop.eup %14041  ;;  %14061 = vtanh.f32 %v5932_v39  ;;  %v5933_v54 = vadd.f32 %v16411_v27, %v5873_v40  ;;  %v5978_v1 = vmul.f32 %v14259_v35, %v5962_v10  ;;  %v5964_v11 = vsub.f32 1.0, %v16448_v6 }
 0x656   : > { %v14044_v18 = vpop.eup %14043  ;;  %14063 = vtanh.f32 %v5935_v32  ;;  %v16457_v19 = vpack.c.bf16 %v16451_v9, %v16442_v14  ;;  %v5977_v28 = vmul.f32 %v14262_v4, %v5961_v41  ;;  %v5966_v61 = vsub.f32 1.0, %v14042_v57 }
 0x657   : > { %v14046_v43 = vpop.eup %14045  ;;  %v5994_v5 = vmul.f32 %v14044_v18, %v16422_v26  ;;  %14065 = vtanh.f32 %v5933_v54  ;;  %v16483_v62 = vpack.c.bf16 %v16446_v48, %v16438_v8 }
 0x658   : > { %v14048_v55 = vpop.eup %14047  ;;  %14067 = vrcp.f32 %v3722_v33  ;;  %v5992_v56 = vmul.f32 %v14046_v43, %v16420_v23  ;;  %6192 = vmatmul.mubr.bf16.gmra.mrb[20].mxu1 %v16457_v19  ;;  %v5982_v36 = vmul.f32 %v14263_v52, %v5966_v61  ;;  %v14270_v61 = vld [vmem:[%s14852_s19 + $0x68] sm:$0xff] }
 0x659   : > { %v14050_v37 = vpop.eup %14049  ;;  %14069 = vrcp.f32 %v3720_v63  ;;  %v16464_v34 = vadd.f32 %v5994_v5, %v5978_v1  ;;  %v5995_v59 = vmul.f32 %v14048_v55, %v16424_v46  ;;  %v12001_v16 = vpop.f32.mrb[12].mxu1  ;;  %6201 = vmatprep.mubr.bf16.mxu1 %v17275_v7  ;;  %v13653_v52 = vld [vmem:[#allocation7 + $0x120] ss:$8 sps:$4 sm:$0xff]  }
 0x65a   : > { %v14052_v26 = vpop.eup %14051  ;;  %v16469_v58 = vadd.f32 %v5992_v56, %v5976_v22  ;;  %v5993_v49 = vmul.f32 %v14050_v37, %v14038_v53  ;;  %v5938_v23 = vadd.f32 %v12001_v16, %v16411_v27  ;;  %v5886_v47 = vpop.f32.mrb[13].mxu1  ;;  %v5980_v53 = vmul.f32 %v14264_v17, %v5964_v11  ;;  %v14267_v56 = vld [vmem:[%s14852_s19 + $0x70] sm:$0xff]  ;;  %v14268_v16 = vld [vmem:[%s14852_s19 + $0x60] sm:$0xff] }
 0x65b   : > { %v14054_v29 = vpop.eup %14053  ;;  %v16473_v60 = vadd.f32 %v5995_v59, %v5979_v31  ;;  %v5936_v15 = vadd.f32 %v16411_v27, %v5886_v47  ;;  %v12002_v20 = vpop.f32.mrb[14].mxu1  ;;  %v5967_v12 = vsub.f32 1.0, %v14052_v26  ;;  %v13659_v17 = vld [vmem:[#allocation7 + $0x140] ss:$8 sps:$4 sm:$0xff]  }
 0x65c   : > { %v14056_v46 = vpop.eup %14055  ;;  %v16477_v42 = vadd.f32 %v5993_v49, %v5977_v28  ;;  %14071 = vtanh.f32 %v5938_v23  ;;  %v5939_v3 = vadd.f32 %v12002_v20, %v16411_v27  ;;  %v5889_v50 = vpop.f32.mrb[15].mxu1  ;;  %v5965_v30 = vsub.f32 1.0, %v14054_v29  ;;  %v14269_v28 = vld [vmem:[%s14852_s19 + $0x78] sm:$0xff] }
 0x65d   : > { %v14058_v25 = vpop.eup %14057  ;;  %14073 = vtanh.f32 %v5936_v15  ;;  %v5937_v2 = vadd.f32 %v16411_v27, %v5889_v50  ;;  %v5983_v33 = vmul.f32 %v14265_v38, %v5967_v12  ;;  %v5968_v43 = vsub.f32 1.0, %v14056_v46  ;;  %v13665_v38 = vld [vmem:[#allocation7 + $0x160] ss:$8 sps:$4 sm:$0xff]  }
 0x65e   : > { %v14060_v13 = vpop.eup %14059  ;;  %14075 = vtanh.f32 %v5939_v3  ;;  %v5970_v41 = vsub.f32 1.0, %v14058_v25  ;;  %v16502_v0 = vpack.c.bf16 %v16477_v42, %v16469_v58  ;;  %v16520_v3 = vpack.c.bf16 %v16473_v60, %v16464_v34 }
 0x65f   : > { %v14062_v44 = vpop.eup %14061  ;;  %v5998_v51 = vmul.f32 %v14060_v13, %v14042_v57  ;;  %14077 = vtanh.f32 %v5937_v2  ;;  %v14266_v57 = vld [vmem:[%s14852_s19 + $0x48] sm:$0xff]  ;;  %v13652_v13 = vld [vmem:[#allocation7 + $0x114] ss:$8 sps:$4 sm:$0xff]  }
 0x660   : > { %v14064_v21 = vpop.eup %14063  ;;  %v5996_v10 = vmul.f32 %v14062_v44, %v16448_v6  ;;  %6202 = vmatmul.mubr.bf16.gmra.mrb[24].mxu1 %v16483_v62  ;;  %v5981_v63 = vmul.f32 %v14266_v57, %v5965_v30  ;;  %v5986_v37 = vmul.f32 %v14267_v56, %v5970_v41  ;;  %v13647_v2 = vld [vmem:[#allocation7 + $0x100] ss:$8 sps:$4 sm:$0xff]   ;;  %v13650_v30 = vld [vmem:[#allocation7 + $0x110] ss:$8 sps:$4 sm:$0xff]   ;;  %v13655_v44 = vld [vmem:[#allocation7 + $0x124] ss:$8 sps:$4 sm:$0xff]  }
 0x661   : > { %v14066_v27 = vpop.eup %14065  ;;  %v16489_v39 = vadd.f32 %v5998_v51, %v5982_v36  ;;  %v5999_v32 = vmul.f32 %v14064_v21, %v14052_v26  ;;  %6211 = vmatprep.mubr.bf16.mxu1 %v17275_v7  ;;  %v5984_v26 = vmul.f32 %v14268_v16, %v5968_v43  ;;  %v13658_v36 = vld [vmem:[#allocation7 + $0x134] ss:$8 sps:$4 sm:$0xff]   ;;  %v13656_v51 = vld [vmem:[#allocation7 + $0x130] ss:$8 sps:$4 sm:$0xff]   ;;  %v13661_v21 = vld [vmem:[#allocation7 + $0x144] ss:$8 sps:$4 sm:$0xff]  }
 0x662   : > { %v14068_v40 = vpop.eup %14067  ;;  %v16493_v45 = vadd.f32 %v5996_v10, %v5980_v53  ;;  %v5997_v54 = vmul.f32 %v14066_v27, %v14054_v29  ;;  %v13664_v53 = vld [vmem:[#allocation7 + $0x154] ss:$8 sps:$4 sm:$0xff]   ;;  %v13662_v10 = vld [vmem:[#allocation7 + $0x150] ss:$8 sps:$4 sm:$0xff]   ;;  %v13667_v27 = vld [vmem:[#allocation7 + $0x164] ss:$8 sps:$4 sm:$0xff]  }
 0x663   : > { %v14070_v18 = vpop.eup %14069  ;;  %v16496_v6 = vadd.f32 %v5999_v32, %v5983_v33  ;;  %v5971_v1 = vsub.f32 1.0, %v14068_v40  ;;  %v13670_v33 = vld [vmem:[#allocation7 + $0x174] ss:$8 sps:$4 sm:$0xff]   ;;  %v13668_v32 = vld [vmem:[#allocation7 + $0x170] ss:$8 sps:$4 sm:$0xff]  }
 0x664   : > { %v16498_v35 = vadd.f32 %v5997_v54, %v5981_v63  ;;  %v5969_v55 = vsub.f32 1.0, %v14070_v18  ;;  %v13671_v57 = vld [vmem:[#allocation7 + $0x180] ss:$8 sps:$4 sm:$0xff]   ;;  %v13676_v63 = vld [vmem:[#allocation7 + $0x194] ss:$8 sps:$4 sm:$0xff]  }
 0x665   : > { %v5987_v49 = vmul.f32 %v14269_v28, %v5971_v1  ;;  %v13674_v54 = vld [vmem:[#allocation7 + $0x190] ss:$8 sps:$4 sm:$0xff]   ;;  %v13677_v41 = vld [vmem:[#allocation7 + $0x1a0] ss:$8 sps:$4 sm:$0xff]   ;;  %v13682_v43 = vld [vmem:[#allocation7 + $0x1b4] ss:$8 sps:$4 sm:$0xff]  }
 0x666   : > { %v14072_v5 = vpop.eup %14071  ;;  %v5985_v15 = vmul.f32 %v14270_v61, %v5969_v55  ;;  %v16526_v50 = vpack.c.bf16 %v16498_v35, %v16493_v45  ;;  %v13680_v1 = vld [vmem:[#allocation7 + $0x1b0] ss:$8 sps:$4 sm:$0xff]   ;;  %v13688_v55 = vld [vmem:[#allocation7 + $0x1d4] ss:$8 sps:$4 sm:$0xff]   ;;  %v13691_v56 = vld [vmem:[#allocation7 + $0x1e4] ss:$8 sps:$4 sm:$0xff]  }
 0x667   : > { %v14074_v22 = vpop.eup %14073  ;;  %v6002_v24 = vmul.f32 %v14072_v5, %v14058_v25  ;;  %v16532_v25 = vpack.c.bf16 %v16496_v6, %v16489_v39  ;;  %v13685_v5 = vld [vmem:[#allocation7 + $0x1c4] ss:$8 sps:$4 sm:$0xff]   ;;  %v13698_v28 = vld [vmem:[#allocation7 + $0x210] ss:$8 sps:$4 sm:$0xff]  }
 0x668   : > { %v14076_v31 = vpop.eup %14075  ;;  %v6000_v59 = vmul.f32 %v14074_v22, %v14056_v46  ;;  %6212 = vmatmul.mubr.bf16.gmra.mrb[28].mxu1 %v16502_v0  ;;  %v13686_v22 = vld [vmem:[#allocation7 + $0x1d0] ss:$8 sps:$4 sm:$0xff]  }
 0x669   : > { %v14078_v4 = vpop.eup %14077  ;;  %6221 = vmatprep.mubr.bf16.mxu1 %v17275_v7  ;;  %v6003_v23 = vmul.f32 %v14076_v31, %v14068_v40  ;;  %v16509_v47 = vadd.f32 %v6002_v24, %v5986_v37  ;;  %v13673_v40 = vld [vmem:[#allocation7 + $0x184] ss:$8 sps:$4 sm:$0xff]   ;;  %v13689_v37 = vld [vmem:[#allocation7 + $0x1e0] ss:$8 sps:$4 sm:$0xff]   ;;  %v13694_v24 = vld [vmem:[#allocation7 + $0x1f4] ss:$8 sps:$4 sm:$0xff]  }
 0x66a   : > { %v6001_v29 = vmul.f32 %v14078_v4, %v14070_v18  ;;  %v16512_v20 = vadd.f32 %v6000_v59, %v5984_v26  ;;  %v13679_v18 = vld [vmem:[#allocation7 + $0x1a4] ss:$8 sps:$4 sm:$0xff]   ;;  %v13692_v31 = vld [vmem:[#allocation7 + $0x1f0] ss:$8 sps:$4 sm:$0xff]   ;;  %v13695_v26 = vld [vmem:[#allocation7 + $0x200] ss:$8 sps:$4 sm:$0xff]  }
 0x66b   : > { %v16514_v11 = vadd.f32 %v6003_v23, %v5987_v49  ;;  %v13697_v59 = vld [vmem:[#allocation7 + $0x204] ss:$8 sps:$4 sm:$0xff]   ;;  %v13700_v4 = vld [vmem:[#allocation7 + $0x214] ss:$8 sps:$4 sm:$0xff]   ;;  %v13701_v23 = vld [vmem:[#allocation7 + $0x220] ss:$8 sps:$4 sm:$0xff]  }
 0x66c   : > { %v16516_v46 = vadd.f32 %v6001_v29, %v5985_v15  ;;  %v13703_v49 = vld [vmem:[#allocation7 + $0x224] ss:$8 sps:$4 sm:$0xff]   ;;  %v13706_v29 = vld [vmem:[#allocation7 + $0x234] ss:$8 sps:$4 sm:$0xff]   ;;  %v13704_v61 = vld [vmem:[#allocation7 + $0x230] ss:$8 sps:$4 sm:$0xff]  }
 0x66d   : > { %v16574_v16 = vpack.c.bf16 %v16514_v11, %v16509_v47  ;;  %v13709_v15 = vld [vmem:[#allocation7 + $0x244] ss:$8 sps:$4 sm:$0xff]  }
 0x66e   : > { %v16538_v12 = vpack.c.bf16 %v16516_v46, %v16512_v20 }
 0x670   : > { %6222 = vmatmul.mubr.bf16.gmra.mrb[32].mxu1 %v16520_v3 }
 0x671   : > { %6231 = vmatprep.mubr.bf16.mxu1 %v17275_v7 }
 0x678   : > { %6232 = vmatmul.mubr.bf16.gmra.mrb[36].mxu1 %v16526_v50 }
 0x679   : > { %6241 = vmatprep.mubr.bf16.mxu1 %v17275_v7 }
 0x680   : > { %6242 = vmatmul.mubr.bf16.gmra.mrb[40].mxu1 %v16532_v25 }
 0x681   : > { %6251 = vmatprep.mubr.bf16.mxu1 %v17275_v7 }
 0x688   : > { %6252 = vmatmul.mubr.bf16.gmra.mrb[44].mxu1 %v16538_v12 }
 0x689   : > { %6374 = vmatprep.mubr.bf16.mxu1 %v17275_v7 }
 0x690   : > { %6375 = vmatmul.mubr.bf16.vlgmr.msra.gmra.mrb[16].mxu1 %v17275_v7 }
 0x691   : > { %6553 = vmatpush1.bf16.msra.mxu1 %v13647_v2  ;;  %6384 = vmatprep.mubr.bf16.mxu1 %v17275_v7  ;;  %v13712_v2 = vld [vmem:[#allocation7 + $0x254] ss:$8 sps:$4 sm:$0xff]  }
 0x692   : > { %6554 = vmatprep.subr.bf16.mxu1 %v13652_v13  ;;  %v13710_v13 = vld [vmem:[#allocation7 + $0x250] ss:$8 sps:$4 sm:$0xff]  }
 0x695   : > { %6555 = vmatpush1.bf16.msra.mxu1 %v13650_v30  ;;  %v13715_v30 = vld [vmem:[#allocation7 + $0x264] ss:$8 sps:$4 sm:$0xff]  }
 0x696   : > { %6556 = vmatprep.subr.bf16.mxu1 %v13655_v44  ;;  %v13713_v44 = vld [vmem:[#allocation7 + $0x260] ss:$8 sps:$4 sm:$0xff]  }
 0x698   : > { %6385 = vmatmul.mubr.bf16.gmra.mrb[20].mxu1 %v17275_v7 }
 0x699   : > { %6394 = vmatprep.mubr.bf16.mxu1 %v17275_v7  ;;  %6557 = vmatpush1.bf16.msra.mxu1 %v13653_v52  ;;  %v13718_v52 = vld [vmem:[#allocation7 + $0x274] ss:$8 sps:$4 sm:$0xff]  }
 0x69a   : > { %6558 = vmatprep.subr.bf16.mxu1 %v13658_v36  ;;  %v13716_v36 = vld [vmem:[#allocation7 + $0x270] ss:$8 sps:$4 sm:$0xff]  }
 0x69d   : > { %6559 = vmatpush1.bf16.msra.mxu1 %v13656_v51  ;;  %v13721_v51 = vld [vmem:[#allocation9 + $0x4] ss:$8 sps:$4 sm:$0xff]  }
 0x69e   : > { %6560 = vmatprep.subr.bf16.mxu1 %v13661_v21  ;;  %v13719_v21 = vld [vmem:[#allocation9] ss:$8 sps:$4 sm:$0xff]  }
 0x6a0   : > { %6395 = vmatmul.mubr.bf16.gmra.mrb[24].mxu1 %v16457_v19 }
 0x6a1   : > { %6404 = vmatprep.mubr.bf16.mxu1 %v17275_v7  ;;  %6561 = vmatpush1.bf16.msra.mxu1 %v13659_v17  ;;  %v13724_v17 = vld [vmem:[#allocation9 + $0x14] ss:$8 sps:$4 sm:$0xff]  }
 0x6a2   : > { %6562 = vmatprep.subr.bf16.mxu1 %v13664_v53  ;;  %v13722_v53 = vld [vmem:[#allocation9 + $0x10] ss:$8 sps:$4 sm:$0xff]  }
 0x6a5   : > { %6563 = vmatpush1.bf16.msra.mxu1 %v13662_v10  ;;  %v13727_v10 = vld [vmem:[#allocation9 + $0x24] ss:$8 sps:$4 sm:$0xff]  }
 0x6a6   : > { %6564 = vmatprep.subr.bf16.mxu1 %v13667_v27  ;;  %v13725_v27 = vld [vmem:[#allocation9 + $0x20] ss:$8 sps:$4 sm:$0xff]  }
 0x6a8   : > { %6405 = vmatmul.mubr.bf16.gmra.mrb[28].mxu1 %v16483_v62 }
 0x6a9   : > { %6414 = vmatprep.mubr.bf16.mxu1 %v17275_v7  ;;  %6565 = vmatpush1.bf16.msra.mxu1 %v13665_v38  ;;  %v13730_v38 = vld [vmem:[#allocation9 + $0x34] ss:$8 sps:$4 sm:$0xff]  }
 0x6aa   : > { %6566 = vmatprep.subr.bf16.mxu1 %v13670_v33  ;;  %v13728_v33 = vld [vmem:[#allocation9 + $0x30] ss:$8 sps:$4 sm:$0xff]  }
 0x6ad   : > { %6567 = vmatpush1.bf16.msra.mxu1 %v13668_v32  ;;  %v13733_v32 = vld [vmem:[#allocation9 + $0x44] ss:$8 sps:$4 sm:$0xff]  }
 0x6ae   : > { %6794 = vmatprep.subr.bf16.mxu1 %v13673_v40  ;;  %v13736_v40 = vld [vmem:[#allocation9 + $0x54] ss:$8 sps:$4 sm:$0xff]  }
 0x6b0   : > { %6415 = vmatmul.mubr.bf16.gmra.mrb[32].mxu1 %v16502_v0 }
 0x6b1   : > { %6424 = vmatprep.mubr.bf16.mxu1 %v17275_v7 }
 0x6b8   : > { %6425 = vmatmul.mubr.bf16.gmra.mrb[36].mxu1 %v16520_v3 }
 0x6b9   : > { %6434 = vmatprep.mubr.bf16.mxu1 %v17275_v7 }
 0x6c0   : > { %6435 = vmatmul.mubr.bf16.gmra.mrb[40].mxu1 %v16526_v50 }
 0x6c1   : > { %6444 = vmatprep.mubr.bf16.mxu1 %v17275_v7 }
 0x6c8   : > { %6445 = vmatmul.mubr.bf16.gmra.mrb[44].mxu1 %v16532_v25 }
 0x6c9   : > { %6584 = vmatprep.mubr.bf16.mxu1 %v17275_v7 }
 0x6d0   : > { %6585 = vmatmul.mubr.bf16.vlgmr.msra.gmra.mrb[16].mxu1 %v16457_v19  ;;  %v13683_v19 = vld [vmem:[#allocation7 + $0x1c0] ss:$8 sps:$4 sm:$0xff]  }
 0x6d1   : > { %6795 = vmatpush1.bf16.msra.mxu1 %v13671_v57  ;;  %6594 = vmatprep.mubr.bf16.mxu1 %v17275_v7  ;;  %v13734_v57 = vld [vmem:[#allocation9 + $0x50] ss:$8 sps:$4 sm:$0xff]  }
 0x6d2   : > { %6796 = vmatprep.subr.bf16.mxu1 %v13676_v63  ;;  %v13739_v63 = vld [vmem:[#allocation9 + $0x64] ss:$8 sps:$4 sm:$0xff]  }
 0x6d5   : > { %6797 = vmatpush1.bf16.msra.mxu1 %v13674_v54  ;;  %v13742_v54 = vld [vmem:[#allocation9 + $0x74] ss:$8 sps:$4 sm:$0xff]  }
 0x6d6   : > { %6798 = vmatprep.subr.bf16.mxu1 %v13679_v18  ;;  %v13740_v18 = vld [vmem:[#allocation9 + $0x70] ss:$8 sps:$4 sm:$0xff]  }
 0x6d8   : > { %6595 = vmatmul.mubr.bf16.gmra.mrb[20].mxu1 %v16483_v62 }
 0x6d9   : > { %6604 = vmatprep.mubr.bf16.mxu1 %v17275_v7  ;;  %6799 = vmatpush1.bf16.msra.mxu1 %v13677_v41  ;;  %v13745_v41 = vld [vmem:[#allocation9 + $0x84] ss:$8 sps:$4 sm:$0xff]  }
 0x6da   : > { %6800 = vmatprep.subr.bf16.mxu1 %v13682_v43  ;;  %v13751_v43 = vld [vmem:[#allocation9 + $0xa4] ss:$8 sps:$4 sm:$0xff]  }
 0x6dd   : > { %6801 = vmatpush1.bf16.msra.mxu1 %v13680_v1  ;;  %v13749_v1 = vld [vmem:[#allocation9 + $0xa0] ss:$8 sps:$4 sm:$0xff]  }
 0x6de   : > { %6802 = vmatprep.subr.bf16.mxu1 %v13685_v5  ;;  %v13754_v5 = vld [vmem:[#allocation9 + $0xb4] ss:$8 sps:$4 sm:$0xff]  }
 0x6e0   : > { %6605 = vmatmul.mubr.bf16.gmra.mrb[24].mxu1 %v16502_v0 }
 0x6e1   : > { %6614 = vmatprep.mubr.bf16.mxu1 %v17275_v7  ;;  %6803 = vmatpush1.bf16.msra.mxu1 %v13683_v19  ;;  %v13752_v19 = vld [vmem:[#allocation9 + $0xb0] ss:$8 sps:$4 sm:$0xff]  }
 0x6e2   : > { %6804 = vmatprep.subr.bf16.mxu1 %v13688_v55  ;;  %v13757_v55 = vld [vmem:[#allocation9 + $0xc4] ss:$8 sps:$4 sm:$0xff]  }
 0x6e5   : > { %6805 = vmatpush1.bf16.msra.mxu1 %v13686_v22  ;;  %v13755_v22 = vld [vmem:[#allocation9 + $0xc0] ss:$8 sps:$4 sm:$0xff]  }
 0x6e6   : > { %6806 = vmatprep.subr.bf16.mxu1 %v13691_v56  ;;  %v13760_v56 = vld [vmem:[#allocation9 + $0xd4] ss:$8 sps:$4 sm:$0xff]  }
 0x6e8   : > { %6615 = vmatmul.mubr.bf16.gmra.mrb[28].mxu1 %v16520_v3 }
 0x6e9   : > { %6624 = vmatprep.mubr.bf16.mxu1 %v17275_v7  ;;  %6807 = vmatpush1.bf16.msra.mxu1 %v13689_v37  ;;  %v16615_v37 = vld [vmem:[%s15307_s15] sm:$0xff]  }
 0x6ea   : > { %6808 = vmatprep.subr.bf16.mxu1 %v13694_v24  ;;  %v13758_v24 = vld [vmem:[#allocation9 + $0xd0] ss:$8 sps:$4 sm:$0xff]  }
 0x6ed   : > { %6809 = vmatpush1.bf16.msra.mxu1 %v13692_v31  ;;  %v13763_v31 = vld [vmem:[#allocation9 + $0xe4] ss:$8 sps:$4 sm:$0xff]  }
 0x6ee   : > { %7036 = vmatprep.subr.bf16.mxu1 %v13697_v59  ;;  %v13761_v59 = vld [vmem:[#allocation9 + $0xe0] ss:$8 sps:$4 sm:$0xff]  }
 0x6f0   : > { %6625 = vmatmul.mubr.bf16.gmra.mrb[32].mxu1 %v16526_v50 }
 0x6f1   : > { %6634 = vmatprep.mubr.bf16.mxu1 %v17275_v7 }
 0x6f8   : > { %6635 = vmatmul.mubr.bf16.gmra.mrb[36].mxu1 %v16532_v25 }
 0x6f9   : > { %6644 = vmatprep.mubr.bf16.mxu1 %v17275_v7 }
 0x700   : > { %6645 = vmatmul.mubr.bf16.gmra.mrb[40].mxu1 %v16538_v12 }
 0x701   : > { %6654 = vmatprep.mubr.bf16.mxu1 %v17275_v7 }
 0x708   : > { %6655 = vmatmul.mubr.bf16.gmra.mrb[44].mxu1 %v16574_v16 }
 0x709   : > { %6826 = vmatprep.mubr.bf16.mxu1 %v17275_v7 }
 0x710   : > { %6827 = vmatmul.mubr.bf16.vlgmr.msra.gmra.mrb[16].mxu1 %v16483_v62  ;;  %v13707_v62 = vld [vmem:[#allocation7 + $0x240] ss:$8 sps:$4 sm:$0xff]  }
 0x711   : > { %7037 = vmatpush1.bf16.msra.mxu1 %v13695_v26  ;;  %6836 = vmatprep.mubr.bf16.mxu1 %v17275_v7  ;;  %v16620_v26 = vld [vmem:[%s15307_s15 + $0x8] sm:$0xff]  }
 0x712   : > { %7038 = vmatprep.subr.bf16.mxu1 %v13700_v4  ;;  %v13764_v4 = vld [vmem:[#allocation9 + $0xf0] ss:$8 sps:$4 sm:$0xff]  }
 0x715   : > { %7039 = vmatpush1.bf16.msra.mxu1 %v13698_v28  ;;  %v13769_v28 = vld [vmem:[#allocation9 + $0x104] ss:$8 sps:$4 sm:$0xff]  }
 0x716   : > { %7040 = vmatprep.subr.bf16.mxu1 %v13703_v49  ;;  %v16625_v49 = vld [vmem:[%s15307_s15 + $0x10] sm:$0xff]  }
 0x718   : > { %6837 = vmatmul.mubr.bf16.gmra.mrb[20].mxu1 %v16502_v0 }
 0x719   : > { %6846 = vmatprep.mubr.bf16.mxu1 %v17275_v7  ;;  %7041 = vmatpush1.bf16.msra.mxu1 %v13701_v23  ;;  %v16630_v23 = vld [vmem:[%s15307_s15 + $0x18] sm:$0xff]  }
 0x71a   : > { %7042 = vmatprep.subr.bf16.mxu1 %v13706_v29  ;;  %v16635_v29 = vld [vmem:[%s15307_s15 + $0x20] sm:$0xff]  }
 0x71d   : > { %7043 = vmatpush1.bf16.msra.mxu1 %v13704_v61  ;;  %v16640_v61 = vld [vmem:[%s15307_s15 + $0x28] sm:$0xff]  }
 0x71e   : > { %7044 = vmatprep.subr.bf16.mxu1 %v13709_v15  ;;  %v13767_v15 = vld [vmem:[#allocation9 + $0x100] ss:$8 sps:$4 sm:$0xff]  }
 0x720   : > { %6847 = vmatmul.mubr.bf16.gmra.mrb[24].mxu1 %v16520_v3 }
 0x721   : > { %6856 = vmatprep.mubr.bf16.mxu1 %v17275_v7  ;;  %7045 = vmatpush1.bf16.msra.mxu1 %v13707_v62  ;;  %v13772_v62 = vld [vmem:[#allocation9 + $0x114] ss:$8 sps:$4 sm:$0xff]  }
 0x722   : > { %7046 = vmatprep.subr.bf16.mxu1 %v13712_v2  ;;  %v13770_v2 = vld [vmem:[#allocation9 + $0x110] ss:$8 sps:$4 sm:$0xff]  }
 0x725   : > { %7047 = vmatpush1.bf16.msra.mxu1 %v13710_v13  ;;  %v13775_v13 = vld [vmem:[#allocation9 + $0x124] ss:$8 sps:$4 sm:$0xff]  }
 0x726   : > { %7048 = vmatprep.subr.bf16.mxu1 %v13715_v30  ;;  %v13773_v30 = vld [vmem:[#allocation9 + $0x120] ss:$8 sps:$4 sm:$0xff]  }
 0x728   : > { %6857 = vmatmul.mubr.bf16.gmra.mrb[28].mxu1 %v16526_v50 }
 0x729   : > { %6866 = vmatprep.mubr.bf16.mxu1 %v17275_v7  ;;  %7049 = vmatpush1.bf16.msra.mxu1 %v13713_v44  ;;  %v13778_v44 = vld [vmem:[#allocation9 + $0x134] ss:$8 sps:$4 sm:$0xff]  }
 0x72a   : > { %7050 = vmatprep.subr.bf16.mxu1 %v13718_v52  ;;  %v13776_v52 = vld [vmem:[#allocation9 + $0x130] ss:$8 sps:$4 sm:$0xff]  }
 0x72d   : > { %7051 = vmatpush1.bf16.msra.mxu1 %v13716_v36  ;;  %v13781_v36 = vld [vmem:[#allocation9 + $0x144] ss:$8 sps:$4 sm:$0xff]  }
 0x72e   : > { %7277 = vmatprep.subr.bf16.mxu1 %v13721_v51  ;;  %v13779_v51 = vld [vmem:[#allocation9 + $0x140] ss:$8 sps:$4 sm:$0xff]  }
 0x730   : > { %6867 = vmatmul.mubr.bf16.gmra.mrb[32].mxu1 %v16532_v25 }
 0x731   : > { %6876 = vmatprep.mubr.bf16.mxu1 %v17275_v7 }
 0x738   : > { %6877 = vmatmul.mubr.bf16.gmra.mrb[36].mxu1 %v16538_v12 }
 0x739   : > { %6886 = vmatprep.mubr.bf16.mxu1 %v17275_v7 }
 0x740   : > { %6887 = vmatmul.mubr.bf16.gmra.mrb[40].mxu1 %v16574_v16 }
 0x741   : > { %6896 = vmatprep.mubr.bf16.mxu1 %v17275_v7 }
 0x748   : > { %6897 = vmatmul.mubr.bf16.gmra.mrb[44].mxu1 %v17275_v7 }
 0x749   : > { %7068 = vmatprep.mubr.bf16.mxu1 %v17275_v7 }
 0x750   : > { %7069 = vmatmul.mubr.bf16.vlgmr.msra.gmra.mrb[16].mxu1 %v16502_v0  ;;  %v13731_v0 = vld [vmem:[#allocation9 + $0x40] ss:$8 sps:$4 sm:$0xff]  }
 0x751   : > { %7278 = vmatpush1.bf16.msra.mxu1 %v13719_v21  ;;  %7078 = vmatprep.mubr.bf16.mxu1 %v17275_v7  ;;  %v13784_v21 = vld [vmem:[#allocation9 + $0x154] ss:$8 sps:$4 sm:$0xff]  }
 0x752   : > { %7279 = vmatprep.subr.bf16.mxu1 %v13724_v17  ;;  %v13782_v17 = vld [vmem:[#allocation9 + $0x150] ss:$8 sps:$4 sm:$0xff]  }
 0x755   : > { %7280 = vmatpush1.bf16.msra.mxu1 %v13722_v53  ;;  %v13787_v53 = vld [vmem:[#allocation9 + $0x164] ss:$8 sps:$4 sm:$0xff]  }
 0x756   : > { %7281 = vmatprep.subr.bf16.mxu1 %v13727_v10  ;;  %v13785_v10 = vld [vmem:[#allocation9 + $0x160] ss:$8 sps:$4 sm:$0xff]  }
 0x758   : > { %7079 = vmatmul.mubr.bf16.gmra.mrb[20].mxu1 %v16520_v3  ;;  %v13737_v3 = vld [vmem:[#allocation9 + $0x60] ss:$8 sps:$4 sm:$0xff]  }
 0x759   : > { %7088 = vmatprep.mubr.bf16.mxu1 %v17275_v7  ;;  %7282 = vmatpush1.bf16.msra.mxu1 %v13725_v27  ;;  %v13790_v27 = vld [vmem:[#allocation9 + $0x174] ss:$8 sps:$4 sm:$0xff]  }
 0x75a   : > { %7283 = vmatprep.subr.bf16.mxu1 %v13730_v38  ;;  %v13788_v38 = vld [vmem:[#allocation9 + $0x170] ss:$8 sps:$4 sm:$0xff]  }
 0x75d   : > { %7284 = vmatpush1.bf16.msra.mxu1 %v13728_v33  ;;  %v13793_v33 = vld [vmem:[#allocation9 + $0x184] ss:$8 sps:$4 sm:$0xff]  }
 0x75e   : > { %7285 = vmatprep.subr.bf16.mxu1 %v13733_v32  ;;  %v16659_v32 = vld [vmem:[%s15307_s15 + $0x30] sm:$0xff]  }
 0x760   : > { %7089 = vmatmul.mubr.bf16.gmra.mrb[24].mxu1 %v16526_v50  ;;  %v13743_v50 = vld [vmem:[#allocation9 + $0x80] ss:$8 sps:$4 sm:$0xff]  }
 0x761   : > { %7098 = vmatprep.mubr.bf16.mxu1 %v17275_v7  ;;  %7286 = vmatpush1.bf16.msra.mxu1 %v13731_v0  ;;  %v13791_v0 = vld [vmem:[#allocation9 + $0x180] ss:$8 sps:$4 sm:$0xff]  }
 0x762   : > { %7287 = vmatprep.subr.bf16.mxu1 %v13736_v40  ;;  %v13796_v40 = vld [vmem:[#allocation9 + $0x194] ss:$8 sps:$4 sm:$0xff]  }
 0x765   : > { %7288 = vmatpush1.bf16.msra.mxu1 %v13734_v57  ;;  %v13794_v57 = vld [vmem:[#allocation9 + $0x190] ss:$8 sps:$4 sm:$0xff]  }
 0x766   : > { %7289 = vmatprep.subr.bf16.mxu1 %v13739_v63  ;;  %v13799_v63 = vld [vmem:[#allocation9 + $0x1a4] ss:$8 sps:$4 sm:$0xff]  }
 0x768   : > { %7099 = vmatmul.mubr.bf16.gmra.mrb[28].mxu1 %v16532_v25  ;;  %v13748_v25 = vld [vmem:[#allocation9 + $0x94] ss:$8 sps:$4 sm:$0xff]  }
 0x769   : > { %7108 = vmatprep.mubr.bf16.mxu1 %v17275_v7  ;;  %7290 = vmatpush1.bf16.msra.mxu1 %v13737_v3  ;;  %v13797_v3 = vld [vmem:[#allocation9 + $0x1a0] ss:$8 sps:$4 sm:$0xff]  }
 0x76a   : > { %7291 = vmatprep.subr.bf16.mxu1 %v13742_v54  ;;  %v13802_v54 = vld [vmem:[#allocation9 + $0x1b4] ss:$8 sps:$4 sm:$0xff]  }
 0x76d   : > { %7292 = vmatpush1.bf16.msra.mxu1 %v13740_v18  ;;  %v13800_v18 = vld [vmem:[#allocation9 + $0x1b0] ss:$8 sps:$4 sm:$0xff]  }
 0x76e   : > { %7519 = vmatprep.subr.bf16.mxu1 %v13745_v41  ;;  %v13805_v41 = vld [vmem:[#allocation9 + $0x1c4] ss:$8 sps:$4 sm:$0xff]  }
 0x770   : > { %7109 = vmatmul.mubr.bf16.gmra.mrb[32].mxu1 %v16538_v12  ;;  %v13746_v12 = vld [vmem:[#allocation9 + $0x90] ss:$8 sps:$4 sm:$0xff]  }
 0x771   : > { %7118 = vmatprep.mubr.bf16.mxu1 %v17275_v7 }
 0x778   : > { %7119 = vmatmul.mubr.bf16.gmra.mrb[36].mxu1 %v16574_v16  ;;  %v13766_v16 = vld [vmem:[#allocation9 + $0xf4] ss:$8 sps:$4 sm:$0xff]  }
 0x779   : > { %7128 = vmatprep.mubr.bf16.mxu1 %v17275_v7 }
 0x780   : > { %7129 = vmatmul.mubr.bf16.gmra.mrb[40].mxu1 %v17275_v7 }
 0x781   : > { %7138 = vmatprep.mubr.bf16.mxu1 %v17275_v7 }
 0x788   : > { %7139 = vmatmul.mubr.bf16.gmra.mrb[44].mxu1 %v17275_v7 }
 0x789   : > { %7309 = vmatprep.mubr.bf16.mxu1 %v17275_v7 }
 0x790   : > { %7310 = vmatmul.mubr.bf16.vlgmr.msra.gmra.mrb[16].mxu1 %v17275_v7 }
 0x791   : > { %7520 = vmatpush1.bf16.msra.mxu1 %v13743_v50  ;;  %7319 = vmatprep.mubr.bf16.mxu1 %v17275_v7  ;;  %v13803_v50 = vld [vmem:[#allocation9 + $0x1c0] ss:$8 sps:$4 sm:$0xff]  }
 0x792   : > { %7521 = vmatprep.subr.bf16.mxu1 %v13748_v25  ;;  %v13808_v25 = vld [vmem:[#allocation9 + $0x1d4] ss:$8 sps:$4 sm:$0xff]  }
 0x795   : > { %7522 = vmatpush1.bf16.msra.mxu1 %v13746_v12  ;;  %v13806_v12 = vld [vmem:[#allocation9 + $0x1d0] ss:$8 sps:$4 sm:$0xff]  }
 0x796   : > { %7523 = vmatprep.subr.bf16.mxu1 %v13751_v43  ;;  %v13811_v43 = vld [vmem:[#allocation9 + $0x1e4] ss:$8 sps:$4 sm:$0xff]  }
 0x798   : > { %7320 = vmatmul.mubr.bf16.gmra.mrb[20].mxu1 %v17275_v7 }
 0x799   : > { %7329 = vmatprep.mubr.bf16.mxu1 %v17275_v7  ;;  %7524 = vmatpush1.bf16.msra.mxu1 %v13749_v1  ;;  %v13809_v1 = vld [vmem:[#allocation9 + $0x1e0] ss:$8 sps:$4 sm:$0xff]  }
 0x79a   : > { %7525 = vmatprep.subr.bf16.mxu1 %v13754_v5  ;;  %v13814_v5 = vld [vmem:[#allocation9 + $0x1f4] ss:$8 sps:$4 sm:$0xff]  }
 0x79d   : > { %7526 = vmatpush1.bf16.msra.mxu1 %v13752_v19  ;;  %v13812_v19 = vld [vmem:[#allocation9 + $0x1f0] ss:$8 sps:$4 sm:$0xff]  }
 0x79e   : > { %7527 = vmatprep.subr.bf16.mxu1 %v13757_v55  ;;  %v13817_v55 = vld [vmem:[#allocation9 + $0x204] ss:$8 sps:$4 sm:$0xff]  }
 0x7a0   : > { %7330 = vmatmul.mubr.bf16.gmra.mrb[24].mxu1 %v16615_v37 }
 0x7a1   : > { %7339 = vmatprep.mubr.bf16.mxu1 %v17275_v7  ;;  %7528 = vmatpush1.bf16.msra.mxu1 %v13755_v22  ;;  %v14278_v22 = vld [vmem:[%s15307_s15 + $0x38] sm:$0xff]  }
 0x7a2   : > { %7529 = vmatprep.subr.bf16.mxu1 %v13760_v56  ;;  %v13839_v56 = vld [vmem:[#allocation10 + $0x40] sm:$0xff]  }
 0x7a3   : > { %12003 = vmatprep.subr.bf16.mxu0 %v13839_v56 }
 0x7a4   : > { %12004 = vmatpush3.bf16.msra.mxu0 %v13839_v56 }
 0x7a5   : > { %7530 = vmatpush1.bf16.msra.mxu1 %v13758_v24  ;;  %v13820_v24 = vld [vmem:[#allocation9 + $0x214] ss:$8 sps:$4 sm:$0xff]  }
 0x7a6   : > { %7531 = vmatprep.subr.bf16.mxu1 %v13763_v31  ;;  %v13818_v31 = vld [vmem:[#allocation9 + $0x210] ss:$8 sps:$4 sm:$0xff]  }
 0x7a8   : > { %7340 = vmatmul.mubr.bf16.gmra.mrb[28].mxu1 %v16620_v26 }
 0x7a9   : > { %7349 = vmatprep.mubr.bf16.mxu1 %v17275_v7  ;;  %7532 = vmatpush1.bf16.msra.mxu1 %v13761_v59  ;;  %v13823_v59 = vld [vmem:[#allocation9 + $0x224] ss:$8 sps:$4 sm:$0xff]  }
 0x7aa   : > { %7533 = vmatprep.subr.bf16.mxu1 %v13766_v16  ;;  %v13821_v16 = vld [vmem:[#allocation9 + $0x220] ss:$8 sps:$4 sm:$0xff]  }
 0x7ad   : > { %7534 = vmatpush1.bf16.msra.mxu1 %v13764_v4  ;;  %v13826_v4 = vld [vmem:[#allocation9 + $0x234] ss:$8 sps:$4 sm:$0xff]  }
 0x7ae   : > { %7761 = vmatprep.subr.bf16.mxu1 %v13769_v28  ;;  %v13824_v28 = vld [vmem:[#allocation9 + $0x230] ss:$8 sps:$4 sm:$0xff]  }
 0x7b0   : > { %7350 = vmatmul.mubr.bf16.gmra.mrb[32].mxu1 %v16625_v49 }
 0x7b1   : > { %7359 = vmatprep.mubr.bf16.mxu1 %v17275_v7 }
 0x7b8   : > { %7360 = vmatmul.mubr.bf16.gmra.mrb[36].mxu1 %v16630_v23 }
 0x7b9   : > { %7369 = vmatprep.mubr.bf16.mxu1 %v17275_v7 }
 0x7c0   : > { %7370 = vmatmul.mubr.bf16.gmra.mrb[40].mxu1 %v16635_v29 }
 0x7c1   : > { %7379 = vmatprep.mubr.bf16.mxu1 %v17275_v7 }
 0x7c8   : > { %7380 = vmatmul.mubr.bf16.gmra.mrb[44].mxu1 %v16640_v61 }
 0x7c9   : > { %7551 = vmatprep.mubr.bf16.mxu1 %v17275_v7 }
 0x7d0   : > { %7552 = vmatmul.mubr.bf16.vlgmr.msra.gmra.mrb[16].mxu1 %v17275_v7 }
 0x7d1   : > { %7762 = vmatpush1.bf16.msra.mxu1 %v13767_v15  ;;  %7561 = vmatprep.mubr.bf16.mxu1 %v17275_v7  ;;  %v13829_v15 = vld [vmem:[#allocation9 + $0x244] ss:$8 sps:$4 sm:$0xff]  }
 0x7d2   : > { %7763 = vmatprep.subr.bf16.mxu1 %v13772_v62  ;;  %v13832_v62 = vld [vmem:[#allocation9 + $0x254] ss:$8 sps:$4 sm:$0xff]  }
 0x7d5   : > { %7764 = vmatpush1.bf16.msra.mxu1 %v13770_v2  ;;  %v13830_v2 = vld [vmem:[#allocation9 + $0x250] ss:$8 sps:$4 sm:$0xff]  }
 0x7d6   : > { %7765 = vmatprep.subr.bf16.mxu1 %v13775_v13  ;;  %v13835_v13 = vld [vmem:[#allocation9 + $0x264] ss:$8 sps:$4 sm:$0xff]  }
 0x7d8   : > { %7562 = vmatmul.mubr.bf16.gmra.mrb[20].mxu1 %v16615_v37 }
 0x7d9   : > { %7571 = vmatprep.mubr.bf16.mxu1 %v17275_v7  ;;  %7766 = vmatpush1.bf16.msra.mxu1 %v13773_v30  ;;  %v13833_v30 = vld [vmem:[#allocation9 + $0x260] ss:$8 sps:$4 sm:$0xff]  }
 0x7da   : > { %7767 = vmatprep.subr.bf16.mxu1 %v13778_v44  ;;  %v13838_v44 = vld [vmem:[#allocation9 + $0x274] ss:$8 sps:$4 sm:$0xff]  }
 0x7dd   : > { %7768 = vmatpush1.bf16.msra.mxu1 %v13776_v52  ;;  %v13836_v52 = vld [vmem:[#allocation9 + $0x270] ss:$8 sps:$4 sm:$0xff]  }
 0x7de   : > { %7769 = vmatprep.subr.bf16.mxu1 %v13781_v36  ;;  %v13844_v36 = vld [vmem:[#allocation10 + $0x68] sm:$0xff]  }
 0x7e0   : > { %7572 = vmatmul.mubr.bf16.gmra.mrb[24].mxu1 %v16620_v26 }
 0x7e1   : > { %7581 = vmatprep.mubr.bf16.mxu1 %v17275_v7  ;;  %7770 = vmatpush1.bf16.msra.mxu1 %v13779_v51  ;;  %v13845_v51 = vld [vmem:[#allocation10 + $0x70] sm:$0xff]  }
 0x7e2   : > { %7771 = vmatprep.subr.bf16.mxu1 %v13784_v21  ;;  %v13846_v21 = vld [vmem:[#allocation10 + $0x78] sm:$0xff]  }
 0x7e5   : > { %7772 = vmatpush1.bf16.msra.mxu1 %v13782_v17  ;;  %v16708_v17 = vld [vmem:[#allocation10] sm:$0xff]  }
 0x7e6   : > { %7773 = vmatprep.subr.bf16.mxu1 %v13787_v53  ;;  %v8390_v53 = vld [vmem:[%s17025_s10] sm:$0x3] }
 0x7e8   : > { %7582 = vmatmul.mubr.bf16.gmra.mrb[28].mxu1 %v16625_v49 }
 0x7e9   : > { %7591 = vmatprep.mubr.bf16.mxu1 %v17275_v7  ;;  %7774 = vmatpush1.bf16.msra.mxu1 %v13785_v10  ;;  %v17292_v10 = vld [vmem:[#allocation58_spill] sm:$0xff] }
 0x7ea   : > { %7775 = vmatprep.subr.bf16.mxu1 %v13790_v27  ;;  %v17293_v27 = vsub.s32 0, %v17292_v10 }
 0x7ed   : > { %7776 = vmatpush1.bf16.msra.mxu1 %v13788_v38  ;;  %v16716_v38 = vrot.slane %v8390_v53, %v17293_v27 }
 0x7ee   : > { %8003 = vmatprep.subr.bf16.mxu1 %v13793_v33  ;;  %v17294_v33 = vsub.s32 1, %v17292_v10 }
 0x7f0   : > { %7592 = vmatmul.mubr.bf16.gmra.mrb[32].mxu1 %v16630_v23 }
 0x7f1   : > { %7601 = vmatprep.mubr.bf16.mxu1 %v17275_v7 }
 0x7f8   : > { %7602 = vmatmul.mubr.bf16.gmra.mrb[36].mxu1 %v16635_v29 }
 0x7f9   : > { %7611 = vmatprep.mubr.bf16.mxu1 %v17275_v7 }
 0x800   : > { %7612 = vmatmul.mubr.bf16.gmra.mrb[40].mxu1 %v16640_v61 }
 0x801   : > { %7621 = vmatprep.mubr.bf16.mxu1 %v17275_v7 }
 0x808   : > { %7622 = vmatmul.mubr.bf16.gmra.mrb[44].mxu1 %v16659_v32 }
 0x809   : > { %7793 = vmatprep.mubr.bf16.mxu1 %v17275_v7 }
 0x810   : > { %7794 = vmatmul.mubr.bf16.vlgmr.msra.gmra.mrb[16].mxu1 %v16615_v37  ;;  %v13815_v37 = vld [vmem:[#allocation9 + $0x200] ss:$8 sps:$4 sm:$0xff]  }
 0x811   : > { %8004 = vmatpush1.bf16.msra.mxu1 %v13791_v0  ;;  %7803 = vmatprep.mubr.bf16.mxu1 %v17275_v7 }
 0x812   : > { %8005 = vmatprep.subr.bf16.mxu1 %v13796_v40 }
 0x815   : > { %8006 = vmatpush1.bf16.msra.mxu1 %v13794_v57 }
 0x816   : > { %8007 = vmatprep.subr.bf16.mxu1 %v13799_v63 }
 0x818   : > { %7804 = vmatmul.mubr.bf16.gmra.mrb[20].mxu1 %v16620_v26 }
 0x819   : > { %7813 = vmatprep.mubr.bf16.mxu1 %v17275_v7  ;;  %8008 = vmatpush1.bf16.msra.mxu1 %v13797_v3 }
 0x81a   : > { %8009 = vmatprep.subr.bf16.mxu1 %v13802_v54 }
 0x81d   : > { %8010 = vmatpush1.bf16.msra.mxu1 %v13800_v18 }
 0x81e   : > { %8011 = vmatprep.subr.bf16.mxu1 %v13805_v41 }
 0x820   : > { %7814 = vmatmul.mubr.bf16.gmra.mrb[24].mxu1 %v16625_v49 }
 0x821   : > { %7823 = vmatprep.mubr.bf16.mxu1 %v17275_v7  ;;  %8012 = vmatpush1.bf16.msra.mxu1 %v13803_v50 }
 0x822   : > { %8013 = vmatprep.subr.bf16.mxu1 %v13808_v25 }
 0x825   : > { %8014 = vmatpush1.bf16.msra.mxu1 %v13806_v12 }
 0x826   : > { %8015 = vmatprep.subr.bf16.mxu1 %v13811_v43 }
 0x828   : > { %7824 = vmatmul.mubr.bf16.gmra.mrb[28].mxu1 %v16630_v23 }
 0x829   : > { %7833 = vmatprep.mubr.bf16.mxu1 %v17275_v7  ;;  %8016 = vmatpush1.bf16.msra.mxu1 %v13809_v1 }
 0x82a   : > { %8017 = vmatprep.subr.bf16.mxu1 %v13814_v5 }
 0x82d   : > { %8018 = vmatpush1.bf16.msra.mxu1 %v13812_v19 }
 0x82e   : > { %8245 = vmatprep.subr.bf16.mxu1 %v13817_v55 }
 0x830   : > { %7834 = vmatmul.mubr.bf16.gmra.mrb[32].mxu1 %v16635_v29 }
 0x831   : > { %7843 = vmatprep.mubr.bf16.mxu1 %v17275_v7 }
 0x838   : > { %7844 = vmatmul.mubr.bf16.gmra.mrb[36].mxu1 %v16640_v61 }
 0x839   : > { %7853 = vmatprep.mubr.bf16.mxu1 %v17275_v7 }
 0x840   : > { %7854 = vmatmul.mubr.bf16.gmra.mrb[40].mxu1 %v16659_v32 }
 0x841   : > { %7863 = vmatprep.mubr.bf16.mxu1 %v17275_v7 }
 0x848   : > { %7864 = vmatmul.mubr.bf16.gmra.mrb[44].mxu1 %v14278_v22 }
 0x849   : > { %8035 = vmatprep.mubr.bf16.mxu1 %v17275_v7 }
 0x850   : > { %8036 = vmatmul.mubr.bf16.vlgmr.msra.gmra.mrb[16].mxu1 %v16620_v26  ;;  %v13827_v26 = vld [vmem:[#allocation9 + $0x240] ss:$8 sps:$4 sm:$0xff]  }
 0x851   : > { %8246 = vmatpush1.bf16.msra.mxu1 %v13815_v37  ;;  %8045 = vmatprep.mubr.bf16.mxu1 %v17275_v7 }
 0x852   : > { %8247 = vmatprep.subr.bf16.mxu1 %v13820_v24 }
 0x855   : > { %8248 = vmatpush1.bf16.msra.mxu1 %v13818_v31 }
 0x856   : > { %8249 = vmatprep.subr.bf16.mxu1 %v13823_v59 }
 0x858   : > { %8046 = vmatmul.mubr.bf16.gmra.mrb[20].mxu1 %v16625_v49 }
 0x859   : > { %8055 = vmatprep.mubr.bf16.mxu1 %v17275_v7  ;;  %8250 = vmatpush1.bf16.msra.mxu1 %v13821_v16 }
 0x85a   : > { %8251 = vmatprep.subr.bf16.mxu1 %v13826_v4 }
 0x85d   : > { %8252 = vmatpush1.bf16.msra.mxu1 %v13824_v28 }
 0x85e   : > { %8253 = vmatprep.subr.bf16.mxu1 %v13829_v15 }
 0x860   : > { %8056 = vmatmul.mubr.bf16.gmra.mrb[24].mxu1 %v16630_v23 }
 0x861   : > { %8065 = vmatprep.mubr.bf16.mxu1 %v17275_v7  ;;  %8254 = vmatpush1.bf16.msra.mxu1 %v13827_v26 }
 0x862   : > { %8255 = vmatprep.subr.bf16.mxu1 %v13832_v62 }
 0x865   : > { %8256 = vmatpush1.bf16.msra.mxu1 %v13830_v2 }
 0x866   : > { %8257 = vmatprep.subr.bf16.mxu1 %v13835_v13 }
 0x868   : > { %8066 = vmatmul.mubr.bf16.gmra.mrb[28].mxu1 %v16635_v29 }
 0x869   : > { %8075 = vmatprep.mubr.bf16.mxu1 %v17275_v7  ;;  %8258 = vmatpush1.bf16.msra.mxu1 %v13833_v30 }
 0x86a   : > { %8259 = vmatprep.subr.bf16.mxu1 %v13838_v44 }
 0x86d   : > { %8260 = vmatpush1.bf16.msra.mxu1 %v13836_v52 }
 0x870   : > { %8076 = vmatmul.mubr.bf16.gmra.mrb[32].mxu1 %v16640_v61 }
 0x871   : > { %8085 = vmatprep.mubr.bf16.mxu1 %v17275_v7 }
 0x878   : > { %8086 = vmatmul.mubr.bf16.gmra.mrb[36].mxu1 %v16659_v32 }
 0x879   : > { %8095 = vmatprep.mubr.bf16.mxu1 %v17275_v7 }
 0x880   : > { %8096 = vmatmul.mubr.bf16.gmra.mrb[40].mxu1 %v14278_v22 }
 0x881   : > { %8105 = vmatprep.mubr.bf16.mxu1 %v17275_v7 }
 0x888   : > { %8106 = vmatmul.mubr.bf16.gmra.mrb[44].mxu1 %v17275_v7 }
 0x889   : > { %8277 = vmatprep.mubr.bf16.mxu1 %v17275_v7 }
 0x890   : > { %8278 = vmatmul.mubr.bf16.vlgmr.msra.gmra.mrb[16].mxu1 %v16625_v49  ;;  %v13840_v49 = vld [vmem:[#allocation10 + $0x48] sm:$0xff]  }
 0x891   : > { %8287 = vmatprep.mubr.bf16.mxu1 %v17275_v7  ;;  %12005 = vmatprep.subr.bf16.mxu0 %v13840_v49 }
 0x892   : > { %12006 = vmatpush3.bf16.msra.mxu0 %v13840_v49 }
 0x898   : > { %8288 = vmatmul.mubr.bf16.gmra.mrb[20].mxu1 %v16630_v23  ;;  %v13841_v23 = vld [vmem:[#allocation10 + $0x50] sm:$0xff]  }
 0x899   : > { %8297 = vmatprep.mubr.bf16.mxu1 %v17275_v7  ;;  %12007 = vmatprep.subr.bf16.mxu0 %v13841_v23 }
 0x89a   : > { %12008 = vmatpush3.bf16.msra.mxu0 %v13841_v23 }
 0x8a0   : > { %8298 = vmatmul.mubr.bf16.gmra.mrb[24].mxu1 %v16635_v29  ;;  %v13842_v29 = vld [vmem:[#allocation10 + $0x58] sm:$0xff]  }
 0x8a1   : > { %8307 = vmatprep.mubr.bf16.mxu1 %v17275_v7  ;;  %12009 = vmatprep.subr.bf16.mxu0 %v13842_v29 }
 0x8a2   : > { %12010 = vmatpush3.bf16.msra.mxu0 %v13842_v29 }
 0x8a8   : > { %8308 = vmatmul.mubr.bf16.gmra.mrb[28].mxu1 %v16640_v61  ;;  %v13843_v61 = vld [vmem:[#allocation10 + $0x60] sm:$0xff]  }
 0x8a9   : > { %8317 = vmatprep.mubr.bf16.mxu1 %v17275_v7  ;;  %12011 = vmatprep.subr.bf16.mxu0 %v13843_v61 }
 0x8aa   : > { %12012 = vmatpush3.bf16.msra.mxu0 %v13843_v61 }
 0x8ab   : > { %12013 = vmatprep.subr.bf16.mxu0 %v13844_v36 }
 0x8ae   : > { %12014 = vmatpush3.bf16.msra.mxu0 %v13844_v36 }
 0x8af   : > { %12015 = vmatprep.subr.bf16.mxu0 %v13845_v51 }
 0x8b0   : > { %8318 = vmatmul.mubr.bf16.gmra.mrb[32].mxu1 %v16659_v32  ;;  %v16720_v32 = vrot.slane %v8390_v53, %v17294_v33 }
 0x8b1   : > { %8327 = vmatprep.mubr.bf16.mxu1 %v17275_v7 }
 0x8b2   : > { %12016 = vmatpush3.bf16.msra.mxu0 %v13845_v51 }
 0x8b3   : > { %12017 = vmatprep.subr.bf16.mxu0 %v13846_v21 }
 0x8b6   : > { %12018 = vmatpush3.bf16.msra.mxu0 %v13846_v21 }
 0x8b7   : > { %12035 = vmatprep.subr.bf16.mxu0 %v16708_v17 }
 0x8b8   : > { %8328 = vmatmul.mubr.bf16.gmra.mrb[36].mxu1 %v14278_v22 }
 0x8b9   : > { %8337 = vmatprep.mubr.bf16.mxu1 %v17275_v7 }
 0x8c0   : > { %8338 = vmatmul.mubr.bf16.gmra.mrb[40].mxu1 %v17275_v7 }
 0x8c1   : > { %8347 = vmatprep.mubr.bf16.mxu1 %v17275_v7 }
 0x8c8   : > { %8348 = vmatmul.mubr.bf16.gmra.mrb[44].mxu1 %v17275_v7 }
 0x963   : > { %v8279_v0 = vpop.f32.mrb[16].mxu1 }
 0x964   : > { %v16723_v40 = vadd.f32 %v16716_v38, %v8279_v0  ;;  %v8281_v57 = vpop.f32.mrb[17].mxu1 }
 0x965   : > { %v8403_v63 = vadd.f32 %v16720_v32, %v8281_v57  ;;  %v8283_v3 = vpop.f32.mrb[18].mxu1 }
 0x966   : > { %v16727_v54 = vadd.f32 %v16716_v38, %v8283_v3  ;;  %v8285_v18 = vpop.f32.mrb[19].mxu1 }
 0x967   : > { %v11261_v41 = vmul.f32 -1.442695, %v8403_v63  ;;  %v8405_v50 = vadd.f32 %v16720_v32, %v8285_v18 }
 0x969   : > { %14079 = vpow2.f32 %v11261_v41  ;;  %v11262_v25 = vmul.f32 -1.442695, %v8405_v50 }
 0x96b   : > { %14081 = vpow2.f32 %v11262_v25  ;;  %v8289_v12 = vpop.f32.mrb[20].mxu1 }
 0x96c   : > { %v16731_v43 = vadd.f32 %v16716_v38, %v8289_v12  ;;  %v8291_v1 = vpop.f32.mrb[21].mxu1 }
 0x96d   : > { %v8407_v5 = vadd.f32 %v16720_v32, %v8291_v1  ;;  %v8293_v19 = vpop.f32.mrb[22].mxu1 }
 0x96e   : > { %v16735_v55 = vadd.f32 %v16716_v38, %v8293_v19  ;;  %v8295_v22 = vpop.f32.mrb[23].mxu1 }
 0x96f   : > { %v11263_v56 = vmul.f32 -1.442695, %v8407_v5  ;;  %v8409_v37 = vadd.f32 %v16720_v32, %v8295_v22 }
 0x971   : > { %14083 = vpow2.f32 %v11263_v56  ;;  %v11264_v24 = vmul.f32 -1.442695, %v8409_v37 }
 0x973   : > { %v14080_v31 = vpop.eup %14079  ;;  %14085 = vpow2.f32 %v11264_v24  ;;  %v8299_v59 = vpop.f32.mrb[24].mxu1 }
 0x974   : > { %v8578_v16 = vadd.f32 1.0, %v14080_v31  ;;  %v16739_v4 = vadd.f32 %v16716_v38, %v8299_v59  ;;  %v8301_v28 = vpop.f32.mrb[25].mxu1  ;;  %v13848_v31 = vld [vmem:[#allocation10 + $0x8] sm:$0xff]  }
 0x975   : > { %v14082_v15 = vpop.eup %14081  ;;  %v8411_v26 = vadd.f32 %v16720_v32, %v8301_v28  ;;  %v8303_v62 = vpop.f32.mrb[26].mxu1 }
 0x976   : > { %14087 = vrcp.f32 %v8578_v16  ;;  %v8579_v2 = vadd.f32 1.0, %v14082_v15  ;;  %v16743_v13 = vadd.f32 %v16716_v38, %v8303_v62  ;;  %v8305_v30 = vpop.f32.mrb[27].mxu1 }
 0x977   : > { %v11265_v44 = vmul.f32 -1.442695, %v8411_v26  ;;  %v8413_v52 = vadd.f32 %v16720_v32, %v8305_v30 }
 0x978   : > { %14089 = vrcp.f32 %v8579_v2 }
 0x979   : > { %v11266_v49 = vmul.f32 -1.442695, %v8413_v52  ;;  %14091 = vpow2.f32 %v11265_v44  ;;  %v13849_v44 = vld [vmem:[#allocation10 + $0x10] sm:$0xff]  }
 0x97b   : > { %v14084_v23 = vpop.eup %14083  ;;  %v8309_v29 = vpop.f32.mrb[28].mxu1  ;;  %14093 = vpow2.f32 %v11266_v49 }
 0x97c   : > { %v8580_v61 = vadd.f32 1.0, %v14084_v23  ;;  %v16747_v36 = vadd.f32 %v16716_v38, %v8309_v29  ;;  %v8311_v51 = vpop.f32.mrb[29].mxu1 }
 0x97d   : > { %v14086_v21 = vpop.eup %14085  ;;  %v8415_v53 = vadd.f32 %v16720_v32, %v8311_v51  ;;  %v8313_v10 = vpop.f32.mrb[30].mxu1 }
 0x97e   : > { %14095 = vrcp.f32 %v8580_v61  ;;  %v8581_v27 = vadd.f32 1.0, %v14086_v21  ;;  %v16751_v33 = vadd.f32 %v16716_v38, %v8313_v10  ;;  %v8315_v0 = vpop.f32.mrb[31].mxu1 }
 0x97f   : > { %v11267_v57 = vmul.f32 -1.442695, %v8415_v53  ;;  %v8417_v63 = vadd.f32 %v16720_v32, %v8315_v0  ;;  %v13850_v0 = vld [vmem:[#allocation10 + $0x18] sm:$0xff]  }
 0x980   : > { %v14088_v3 = vpop.eup %14087  ;;  %14097 = vrcp.f32 %v8581_v27 }
 0x981   : > { %v11268_v18 = vmul.f32 -1.442695, %v8417_v63  ;;  %14099 = vpow2.f32 %v11267_v57  ;;  %v8626_v25 = vmul.f32 %v14088_v3, %v16442_v14 }
 0x982   : > { %v14090_v41 = vpop.eup %14089 }
 0x983   : > { %v8319_v50 = vpop.f32.mrb[32].mxu1  ;;  %v8627_v12 = vmul.f32 %v14090_v41, %v16451_v9  ;;  %v14092_v1 = vpop.eup %14091  ;;  %14101 = vpow2.f32 %v11268_v18 }
 0x984   : > { %v16757_v5 = vadd.f32 %v16716_v38, %v8319_v50  ;;  %v8321_v19 = vpop.f32.mrb[33].mxu1  ;;  %v8582_v22 = vadd.f32 1.0, %v14092_v1  ;;  %v13851_v1 = vld [vmem:[#allocation10 + $0x20] sm:$0xff]  }
 0x985   : > { %v8419_v56 = vadd.f32 %v16720_v32, %v8321_v19  ;;  %v8323_v37 = vpop.f32.mrb[34].mxu1  ;;  %v16760_v24 = vpack.c.bf16 %v8627_v12, %v8626_v25  ;;  %v14094_v59 = vpop.eup %14093 }
 0x986   : > { %v16763_v16 = vadd.f32 %v16716_v38, %v8323_v37  ;;  %v8325_v28 = vpop.f32.mrb[35].mxu1  ;;  %14103 = vrcp.f32 %v8582_v22  ;;  %v8583_v15 = vadd.f32 1.0, %v14094_v59 }
 0x987   : > { %v11269_v26 = vmul.f32 -1.442695, %v8419_v56  ;;  %v8421_v62 = vadd.f32 %v16720_v32, %v8325_v28  ;;  %12020 = vmatmul.mubr.bf16.vlgmr.msra.gmra.mrb[32].mxu0 %v16760_v24 }
 0x988   : > { %v14096_v2 = vpop.eup %14095  ;;  %12036 = vmatpush3.bf16.msra.mxu0 %v16708_v17  ;;  %14105 = vrcp.f32 %v8583_v15 }
 0x989   : > { %v11270_v30 = vmul.f32 -1.442695, %v8421_v62  ;;  %12037 = vmatprep.subr.bf16.mxu0 %v13848_v31  ;;  %14107 = vpow2.f32 %v11269_v26  ;;  %v8628_v23 = vmul.f32 %v14096_v2, %v16438_v8 }
 0x98a   : > { %v14098_v52 = vpop.eup %14097 }
 0x98b   : > { %v8329_v49 = vpop.f32.mrb[36].mxu1  ;;  %v8629_v29 = vmul.f32 %v14098_v52, %v16446_v48  ;;  %v14100_v61 = vpop.eup %14099  ;;  %14109 = vpow2.f32 %v11270_v30  ;;  %v13852_v52 = vld [vmem:[#allocation10 + $0x28] sm:$0xff]  }
 0x98c   : > { %v16771_v51 = vadd.f32 %v16716_v38, %v8329_v49  ;;  %v8331_v21 = vpop.f32.mrb[37].mxu1  ;;  %12038 = vmatpush3.bf16.msra.mxu0 %v13848_v31  ;;  %v8584_v53 = vadd.f32 1.0, %v14100_v61 }
 0x98d   : > { %v8423_v17 = vadd.f32 %v16720_v32, %v8331_v21  ;;  %v8333_v10 = vpop.f32.mrb[38].mxu1  ;;  %v16774_v27 = vpack.c.bf16 %v8629_v29, %v8628_v23  ;;  %12039 = vmatprep.subr.bf16.mxu0 %v13849_v44  ;;  %v14102_v57 = vpop.eup %14101 }
 0x98e   : > { %v16777_v63 = vadd.f32 %v16716_v38, %v8333_v10  ;;  %v8335_v3 = vpop.f32.mrb[39].mxu1  ;;  %v8585_v18 = vadd.f32 1.0, %v14102_v57  ;;  %14111 = vrcp.f32 %v8584_v53 }
 0x98f   : > { %v11271_v41 = vmul.f32 -1.442695, %v8423_v17  ;;  %v8425_v50 = vadd.f32 %v16720_v32, %v8335_v3  ;;  %12023 = vmatprep.mubr.bf16.mxu0 %v16774_v27  ;;  %v13853_v17 = vld [vmem:[#allocation10 + $0x30] sm:$0xff]  }
 0x990   : > { %12040 = vmatpush3.bf16.msra.mxu0 %v13849_v44  ;;  %v14104_v25 = vpop.eup %14103  ;;  %14113 = vrcp.f32 %v8585_v18 }
 0x991   : > { %v11272_v12 = vmul.f32 -1.442695, %v8425_v50  ;;  %12041 = vmatprep.subr.bf16.mxu0 %v13850_v0  ;;  %14115 = vpow2.f32 %v11271_v41  ;;  %v8630_v31 = vmul.f32 %v14104_v25, %v16469_v58 }
 0x992   : > { %v14106_v19 = vpop.eup %14105 }
 0x993   : > { %v8339_v22 = vpop.f32.mrb[40].mxu1  ;;  %v8631_v59 = vmul.f32 %v14106_v19, %v16477_v42  ;;  %v14108_v28 = vpop.eup %14107  ;;  %14117 = vpow2.f32 %v11272_v12 }
 0x994   : > { %v16782_v56 = vadd.f32 %v16716_v38, %v8339_v22  ;;  %v8341_v37 = vpop.f32.mrb[41].mxu1  ;;  %12042 = vmatpush3.bf16.msra.mxu0 %v13850_v0  ;;  %v8586_v62 = vadd.f32 1.0, %v14108_v28 }
 0x995   : > { %v8427_v15 = vadd.f32 %v16720_v32, %v8341_v37  ;;  %v8343_v26 = vpop.f32.mrb[42].mxu1  ;;  %12043 = vmatprep.subr.bf16.mxu0 %v13851_v1  ;;  %v16790_v44 = vpack.c.bf16 %v8631_v59, %v8630_v31  ;;  %v14110_v49 = vpop.eup %14109  ;;  %v13854_v37 = vld [vmem:[#allocation10 + $0x38] sm:$0xff]  }
 0x996   : > { %v16788_v2 = vadd.f32 %v16716_v38, %v8343_v26  ;;  %v8345_v30 = vpop.f32.mrb[43].mxu1  ;;  %14119 = vrcp.f32 %v8586_v62  ;;  %v8587_v29 = vadd.f32 1.0, %v14110_v49 }
 0x997   : > { %v8429_v23 = vadd.f32 %v16720_v32, %v8345_v30  ;;  %v11273_v61 = vmul.f32 -1.442695, %v8427_v15  ;;  %12024 = vmatmul.mubr.bf16.gmra.mrb[36].mxu0 %v16790_v44 }
 0x998   : > { %12044 = vmatpush3.bf16.msra.mxu0 %v13851_v1  ;;  %v14112_v21 = vpop.eup %14111  ;;  %14121 = vrcp.f32 %v8587_v29 }
 0x999   : > { %v11274_v53 = vmul.f32 -1.442695, %v8429_v23  ;;  %12045 = vmatprep.subr.bf16.mxu0 %v13852_v52  ;;  %14123 = vpow2.f32 %v11273_v61  ;;  %v8632_v22 = vmul.f32 %v14112_v21, %v16464_v34 }
 0x99a   : > { %v14114_v10 = vpop.eup %14113 }
 0x99b   : > { %v8349_v0 = vpop.f32.mrb[44].mxu1  ;;  %v8633_v18 = vmul.f32 %v14114_v10, %v16473_v60  ;;  %v14116_v41 = vpop.eup %14115  ;;  %14125 = vpow2.f32 %v11274_v53 }
 0x99c   : > { %v16795_v57 = vadd.f32 %v16716_v38, %v8349_v0  ;;  %v8351_v3 = vpop.f32.mrb[45].mxu1  ;;  %12046 = vmatpush3.bf16.msra.mxu0 %v13852_v52  ;;  %v8588_v12 = vadd.f32 1.0, %v14116_v41 }
 0x99d   : > { %v8431_v50 = vadd.f32 %v16720_v32, %v8351_v3  ;;  %v8353_v25 = vpop.f32.mrb[46].mxu1  ;;  %12047 = vmatprep.subr.bf16.mxu0 %v13853_v17  ;;  %v14118_v31 = vpop.eup %14117  ;;  %v16804_v26 = vpack.c.bf16 %v8633_v18, %v8632_v22 }
 0x99e   : > { %v16800_v1 = vadd.f32 %v16716_v38, %v8353_v25  ;;  %v8355_v19 = vpop.f32.mrb[47].mxu1  ;;  %14127 = vrcp.f32 %v8588_v12  ;;  %v8589_v28 = vadd.f32 1.0, %v14118_v31  ;;  %v13855_v38 = vld [vmem:[#allocation10 + $0x80] sm:$0xff]  }
 0x99f   : > { %v8433_v59 = vadd.f32 %v16720_v32, %v8355_v19  ;;  %v11275_v15 = vmul.f32 -1.442695, %v8431_v50  ;;  %12027 = vmatprep.mubr.bf16.mxu0 %v16804_v26 }
 0x9a0   : > { %12048 = vmatpush3.bf16.msra.mxu0 %v13853_v17  ;;  %v14120_v62 = vpop.eup %14119  ;;  %14129 = vrcp.f32 %v8589_v28 }
 0x9a1   : > { %v11276_v30 = vmul.f32 -1.442695, %v8433_v59  ;;  %12049 = vmatprep.subr.bf16.mxu0 %v13854_v37  ;;  %14131 = vpow2.f32 %v11275_v15  ;;  %v8634_v49 = vmul.f32 %v14120_v62, %v16493_v45 }
 0x9a2   : > { %v14122_v52 = vpop.eup %14121 }
 0x9a3   : > { %v8635_v23 = vmul.f32 %v14122_v52, %v16498_v35  ;;  %v14124_v32 = vpop.eup %14123  ;;  %14133 = vpow2.f32 %v11276_v30  ;;  %v13856_v52 = vld [vmem:[#allocation10 + $0x88] sm:$0xff]  }
 0x9a4   : > { %12050 = vmatpush3.bf16.msra.mxu0 %v13854_v37  ;;  %v8590_v29 = vadd.f32 1.0, %v14124_v32  ;;  %v13858_v32 = vld [vmem:[#allocation10 + $0x98] sm:$0xff]  }
 0x9a5   : > { %12067 = vmatprep.subr.bf16.mxu0 %v13855_v38  ;;  %v16809_v61 = vpack.c.bf16 %v8635_v23, %v8634_v49  ;;  %v14126_v21 = vpop.eup %14125  ;;  %v13857_v23 = vld [vmem:[#allocation10 + $0x90] sm:$0xff]  }
 0x9a6   : > { %14135 = vrcp.f32 %v8590_v29  ;;  %v8591_v53 = vadd.f32 1.0, %v14126_v21  ;;  %v13859_v29 = vld [vmem:[#allocation10 + $0xa0] sm:$0xff]   ;;  %v13860_v21 = vld [vmem:[#allocation10 + $0xa8] sm:$0xff]  }
 0x9a7   : > { %12028 = vmatmul.mubr.bf16.gmra.mrb[40].mxu0 %v16809_v61 }
 0x9a8   : > { %v14128_v17 = vpop.eup %14127  ;;  %14137 = vrcp.f32 %v8591_v53  ;;  %v13862_v53 = vld [vmem:[#allocation10 + $0xb8] sm:$0xff]  }
 0x9a9   : > { %v8636_v0 = vmul.f32 %v14128_v17, %v16489_v39  ;;  %v13863_v17 = vld [vmem:[#allocation10 + $0xc0] sm:$0xff]  }
 0x9aa   : > { %v14130_v10 = vpop.eup %14129 }
 0x9ab   : > { %v8637_v3 = vmul.f32 %v14130_v10, %v16496_v6  ;;  %v14132_v18 = vpop.eup %14131  ;;  %v13864_v10 = vld [vmem:[#allocation10 + $0xc8] sm:$0xff]  }
 0x9ac   : > { %v8592_v41 = vadd.f32 1.0, %v14132_v18  ;;  %v13868_v18 = vld [vmem:[#allocation10 + $0xe8] sm:$0xff]  }
 0x9ad   : > { %v16814_v50 = vpack.c.bf16 %v8637_v3, %v8636_v0  ;;  %v14134_v25 = vpop.eup %14133  ;;  %v13865_v0 = vld [vmem:[#allocation10 + $0xd0] sm:$0xff]   ;;  %v13866_v3 = vld [vmem:[#allocation10 + $0xd8] sm:$0xff]  }
 0x9ae   : > { %14139 = vrcp.f32 %v8592_v41  ;;  %v8593_v12 = vadd.f32 1.0, %v14134_v25  ;;  %v13869_v41 = vld [vmem:[#allocation10 + $0xf0] sm:$0xff]   ;;  %v13870_v25 = vld [vmem:[#allocation10 + $0xf8] sm:$0xff]  }
 0x9af   : > { %12031 = vmatprep.mubr.bf16.mxu0 %v16814_v50 }
 0x9b0   : > { %v14136_v19 = vpop.eup %14135  ;;  %14141 = vrcp.f32 %v8593_v12  ;;  %v13871_v12 = vld [vmem:[#allocation10 + $0x100] sm:$0xff]  }
 0x9b1   : > { %v8638_v37 = vmul.f32 %v14136_v19, %v16512_v20  ;;  %v13872_v19 = vld [vmem:[#allocation10 + $0x108] sm:$0xff]  }
 0x9b2   : > { %v14138_v22 = vpop.eup %14137 }
 0x9b3   : > { %v8639_v31 = vmul.f32 %v14138_v22, %v16516_v46  ;;  %v13873_v22 = vld [vmem:[#allocation10 + $0x110] sm:$0xff]  }
 0x9b5   : > { %v16819_v59 = vpack.c.bf16 %v8639_v31, %v8638_v37  ;;  %v13874_v37 = vld [vmem:[#allocation10 + $0x118] sm:$0xff]   ;;  %v13876_v31 = vld [vmem:[#allocation10 + $0x128] sm:$0xff]  }
 0x9b7   : > { %12032 = vmatmul.mubr.bf16.gmra.mrb[44].mxu0 %v16819_v59 }
 0x9b8   : > { %v14140_v28 = vpop.eup %14139  ;;  %12051 = vmatprep.mubr.bf16.mxu0 %v17275_v7 }
 0x9b9   : > { %v8640_v62 = vmul.f32 %v14140_v28, %v16509_v47  ;;  %v13877_v28 = vld [vmem:[#allocation10 + $0x130] sm:$0xff]  }
 0x9ba   : > { %v14142_v15 = vpop.eup %14141 }
 0x9bb   : > { %v8641_v30 = vmul.f32 %v14142_v15, %v16514_v11  ;;  %v13878_v15 = vld [vmem:[#allocation10 + $0x138] sm:$0xff]  }
 0x9bd   : > { %v16825_v49 = vpack.c.bf16 %v8641_v30, %v8640_v62  ;;  %v13879_v62 = vld [vmem:[#allocation12] sm:$0xff]   ;;  %v13880_v30 = vld [vmem:[#allocation12 + $0x8] sm:$0xff]  }
 0x9bf   : > { %12052 = vmatmul.mubr.bf16.vlgmr.msra.gmra.mrb[32].mxu0 %v17275_v7 }
 0x9c0   : > { %12055 = vmatprep.mubr.bf16.mxu0 %v16760_v24  ;;  %12068 = vmatpush3.bf16.msra.mxu0 %v13855_v38  ;;  %v13861_v38 = vld [vmem:[#allocation10 + $0xb0] sm:$0xff]  }
 0x9c1   : > { %12069 = vmatprep.subr.bf16.mxu0 %v13856_v52 }
 0x9c4   : > { %12070 = vmatpush3.bf16.msra.mxu0 %v13856_v52  ;;  %v13881_v52 = vld [vmem:[#allocation12 + $0x10] sm:$0xff]  }
 0x9c5   : > { %12071 = vmatprep.subr.bf16.mxu0 %v13857_v23 }
 0x9c7   : > { %12056 = vmatmul.mubr.bf16.gmra.mrb[36].mxu0 %v16774_v27 }
 0x9c8   : > { %12059 = vmatprep.mubr.bf16.mxu0 %v16790_v44  ;;  %12072 = vmatpush3.bf16.msra.mxu0 %v13857_v23  ;;  %v13882_v23 = vld [vmem:[#allocation12 + $0x18] sm:$0xff]  }
 0x9c9   : > { %12073 = vmatprep.subr.bf16.mxu0 %v13858_v32 }
 0x9cc   : > { %12074 = vmatpush3.bf16.msra.mxu0 %v13858_v32  ;;  %v13884_v32 = vld [vmem:[#allocation12 + $0x28] sm:$0xff]  }
 0x9cd   : > { %12075 = vmatprep.subr.bf16.mxu0 %v13859_v29 }
 0x9cf   : > { %12060 = vmatmul.mubr.bf16.gmra.mrb[40].mxu0 %v16804_v26 }
 0x9d0   : > { %12063 = vmatprep.mubr.bf16.mxu0 %v16809_v61  ;;  %12076 = vmatpush3.bf16.msra.mxu0 %v13859_v29  ;;  %v13889_v29 = vld [vmem:[#allocation12 + $0x50] sm:$0xff]  }
 0x9d1   : > { %12077 = vmatprep.subr.bf16.mxu0 %v13860_v21 }
 0x9d4   : > { %12078 = vmatpush3.bf16.msra.mxu0 %v13860_v21  ;;  %v13890_v21 = vld [vmem:[#allocation12 + $0x58] sm:$0xff]  }
 0x9d5   : > { %12079 = vmatprep.subr.bf16.mxu0 %v13861_v38 }
 0x9d7   : > { %12064 = vmatmul.mubr.bf16.gmra.mrb[44].mxu0 %v16814_v50 }
 0x9d8   : > { %12080 = vmatpush3.bf16.msra.mxu0 %v13861_v38  ;;  %12083 = vmatprep.mubr.bf16.mxu0 %v16760_v24  ;;  %v13867_v24 = vld [vmem:[#allocation10 + $0xe0] sm:$0xff]   ;;  %v16862_v38 = vld [vmem:[%s15307_s15 + $0x8] sm:$0xff]  }
 0x9d9   : > { %12081 = vmatprep.subr.bf16.mxu0 %v13862_v53 }
 0x9dc   : > { %12082 = vmatpush3.bf16.msra.mxu0 %v13862_v53  ;;  %v16866_v53 = vld [vmem:[%s15307_s15 + $0x10] sm:$0xff]  }
 0x9dd   : > { %12099 = vmatprep.subr.bf16.mxu0 %v13863_v17 }
 0x9df   : > { %12084 = vmatmul.mubr.bf16.vlgmr.msra.gmra.mrb[32].mxu0 %v16774_v27 }
 0x9e0   : > { %12087 = vmatprep.mubr.bf16.mxu0 %v16790_v44  ;;  %12100 = vmatpush3.bf16.msra.mxu0 %v13863_v17  ;;  %v13891_v17 = vld [vmem:[#allocation12 + $0x60] sm:$0xff]  }
 0x9e1   : > { %12101 = vmatprep.subr.bf16.mxu0 %v13864_v10 }
 0x9e4   : > { %12102 = vmatpush3.bf16.msra.mxu0 %v13864_v10  ;;  %v13892_v10 = vld [vmem:[#allocation12 + $0x68] sm:$0xff]  }
 0x9e5   : > { %12103 = vmatprep.subr.bf16.mxu0 %v13865_v0 }
 0x9e7   : > { %12088 = vmatmul.mubr.bf16.gmra.mrb[36].mxu0 %v16804_v26 }
 0x9e8   : > { %12091 = vmatprep.mubr.bf16.mxu0 %v16809_v61  ;;  %12104 = vmatpush3.bf16.msra.mxu0 %v13865_v0  ;;  %v16870_v0 = vld [vmem:[%s15307_s15 + $0x18] sm:$0xff]  }
 0x9e9   : > { %12105 = vmatprep.subr.bf16.mxu0 %v13866_v3 }
 0x9ec   : > { %12106 = vmatpush3.bf16.msra.mxu0 %v13866_v3  ;;  %v16874_v3 = vld [vmem:[%s15307_s15 + $0x20] sm:$0xff]  }
 0x9ed   : > { %12107 = vmatprep.subr.bf16.mxu0 %v13867_v24 }
 0x9ef   : > { %12092 = vmatmul.mubr.bf16.gmra.mrb[40].mxu0 %v16814_v50 }
 0x9f0   : > { %12095 = vmatprep.mubr.bf16.mxu0 %v16819_v59  ;;  %12108 = vmatpush3.bf16.msra.mxu0 %v13867_v24  ;;  %v13893_v24 = vld [vmem:[#allocation12 + $0x70] sm:$0xff]  }
 0x9f1   : > { %12109 = vmatprep.subr.bf16.mxu0 %v13868_v18 }
 0x9f4   : > { %12110 = vmatpush3.bf16.msra.mxu0 %v13868_v18  ;;  %v13894_v18 = vld [vmem:[#allocation12 + $0x78] sm:$0xff]  }
 0x9f5   : > { %12111 = vmatprep.subr.bf16.mxu0 %v13869_v41 }
 0x9f7   : > { %12096 = vmatmul.mubr.bf16.gmra.mrb[44].mxu0 %v16825_v49 }
 0x9f8   : > { %12112 = vmatpush3.bf16.msra.mxu0 %v13869_v41  ;;  %12115 = vmatprep.mubr.bf16.mxu0 %v16774_v27  ;;  %v13875_v27 = vld [vmem:[#allocation10 + $0x120] sm:$0xff]   ;;  %v16878_v41 = vld [vmem:[%s15307_s15 + $0x28] sm:$0xff]  }
 0x9f9   : > { %12113 = vmatprep.subr.bf16.mxu0 %v13870_v25 }
 0x9fc   : > { %12114 = vmatpush3.bf16.msra.mxu0 %v13870_v25  ;;  %v13895_v25 = vld [vmem:[#allocation12 + $0x80] sm:$0xff]  }
 0x9fd   : > { %12131 = vmatprep.subr.bf16.mxu0 %v13871_v12 }
 0x9ff   : > { %12116 = vmatmul.mubr.bf16.vlgmr.msra.gmra.mrb[32].mxu0 %v16790_v44 }
 0xa00   : > { %12119 = vmatprep.mubr.bf16.mxu0 %v16804_v26  ;;  %12132 = vmatpush3.bf16.msra.mxu0 %v13871_v12  ;;  %v13896_v12 = vld [vmem:[#allocation12 + $0x88] sm:$0xff]  }
 0xa01   : > { %12133 = vmatprep.subr.bf16.mxu0 %v13872_v19 }
 0xa04   : > { %12134 = vmatpush3.bf16.msra.mxu0 %v13872_v19  ;;  %v13897_v19 = vld [vmem:[#allocation12 + $0x90] sm:$0xff]  }
 0xa05   : > { %12135 = vmatprep.subr.bf16.mxu0 %v13873_v22 }
 0xa07   : > { %12120 = vmatmul.mubr.bf16.gmra.mrb[36].mxu0 %v16809_v61 }
 0xa08   : > { %12123 = vmatprep.mubr.bf16.mxu0 %v16814_v50  ;;  %12136 = vmatpush3.bf16.msra.mxu0 %v13873_v22  ;;  %v13898_v22 = vld [vmem:[#allocation12 + $0x98] sm:$0xff]  }
 0xa09   : > { %12137 = vmatprep.subr.bf16.mxu0 %v13874_v37 }
 0xa0c   : > { %12138 = vmatpush3.bf16.msra.mxu0 %v13874_v37  ;;  %v13899_v37 = vld [vmem:[#allocation12 + $0xa0] sm:$0xff]  }
 0xa0d   : > { %12139 = vmatprep.subr.bf16.mxu0 %v13875_v27 }
 0xa0f   : > { %12124 = vmatmul.mubr.bf16.gmra.mrb[40].mxu0 %v16819_v59 }
 0xa10   : > { %12127 = vmatprep.mubr.bf16.mxu0 %v16825_v49  ;;  %12140 = vmatpush3.bf16.msra.mxu0 %v13875_v27  ;;  %v13900_v27 = vld [vmem:[#allocation12 + $0xa8] sm:$0xff]  }
 0xa11   : > { %12141 = vmatprep.subr.bf16.mxu0 %v13876_v31 }
 0xa14   : > { %12142 = vmatpush3.bf16.msra.mxu0 %v13876_v31  ;;  %v13901_v31 = vld [vmem:[#allocation12 + $0xb0] sm:$0xff]  }
 0xa15   : > { %12143 = vmatprep.subr.bf16.mxu0 %v13877_v28 }
 0xa17   : > { %12128 = vmatmul.mubr.bf16.gmra.mrb[44].mxu0 %v17275_v7 }
 0xa18   : > { %12144 = vmatpush3.bf16.msra.mxu0 %v13877_v28  ;;  %12147 = vmatprep.mubr.bf16.mxu0 %v16790_v44  ;;  %v13883_v44 = vld [vmem:[#allocation12 + $0x20] sm:$0xff]   ;;  %v13902_v28 = vld [vmem:[#allocation12 + $0xb8] sm:$0xff]  }
 0xa19   : > { %12145 = vmatprep.subr.bf16.mxu0 %v13878_v15 }
 0xa1c   : > { %12146 = vmatpush3.bf16.msra.mxu0 %v13878_v15  ;;  %v16888_v15 = vld [vmem:[%s15307_s15 + $0x30] sm:$0xff]  }
 0xa1d   : > { %12163 = vmatprep.subr.bf16.mxu0 %v13879_v62 }
 0xa1f   : > { %12148 = vmatmul.mubr.bf16.vlgmr.msra.gmra.mrb[32].mxu0 %v16804_v26  ;;  %v13885_v26 = vld [vmem:[#allocation12 + $0x30] sm:$0xff]  }
 0xa20   : > { %12151 = vmatprep.mubr.bf16.mxu0 %v16809_v61  ;;  %12164 = vmatpush3.bf16.msra.mxu0 %v13879_v62  ;;  %v13886_v61 = vld [vmem:[#allocation12 + $0x38] sm:$0xff]   ;;  %v13903_v62 = vld [vmem:[#allocation12 + $0xc0] sm:$0xff]  }
 0xa21   : > { %12165 = vmatprep.subr.bf16.mxu0 %v13880_v30 }
 0xa24   : > { %12166 = vmatpush3.bf16.msra.mxu0 %v13880_v30  ;;  %v13904_v30 = vld [vmem:[#allocation12 + $0xc8] sm:$0xff]  }
 0xa25   : > { %12167 = vmatprep.subr.bf16.mxu0 %v13881_v52 }
 0xa27   : > { %12152 = vmatmul.mubr.bf16.gmra.mrb[36].mxu0 %v16814_v50  ;;  %v13887_v50 = vld [vmem:[#allocation12 + $0x40] sm:$0xff]  }
 0xa28   : > { %12155 = vmatprep.mubr.bf16.mxu0 %v16819_v59  ;;  %12168 = vmatpush3.bf16.msra.mxu0 %v13881_v52  ;;  %v13888_v59 = vld [vmem:[#allocation12 + $0x48] sm:$0xff]   ;;  %v13905_v52 = vld [vmem:[#allocation12 + $0xd0] sm:$0xff]  }
 0xa29   : > { %12169 = vmatprep.subr.bf16.mxu0 %v13882_v23 }
 0xa2c   : > { %12170 = vmatpush3.bf16.msra.mxu0 %v13882_v23  ;;  %v13906_v23 = vld [vmem:[#allocation12 + $0xd8] sm:$0xff]  }
 0xa2d   : > { %12171 = vmatprep.subr.bf16.mxu0 %v13883_v44 }
 0xa2f   : > { %12156 = vmatmul.mubr.bf16.gmra.mrb[40].mxu0 %v16825_v49  ;;  %v14279_v49 = vld [vmem:[%s15307_s15] sm:$0xff]  }
 0xa30   : > { %12172 = vmatpush3.bf16.msra.mxu0 %v13883_v44  ;;  %12159 = vmatprep.mubr.bf16.mxu0 %v17275_v7  ;;  %v13907_v44 = vld [vmem:[#allocation12 + $0xe0] sm:$0xff]  }
 0xa31   : > { %12173 = vmatprep.subr.bf16.mxu0 %v13884_v32 }
 0xa34   : > { %12174 = vmatpush3.bf16.msra.mxu0 %v13884_v32  ;;  %v13908_v32 = vld [vmem:[#allocation12 + $0xe8] sm:$0xff]  }
 0xa35   : > { %12175 = vmatprep.subr.bf16.mxu0 %v13885_v26 }
 0xa37   : > { %12160 = vmatmul.mubr.bf16.gmra.mrb[44].mxu0 %v17275_v7 }
 0xa38   : > { %12176 = vmatpush3.bf16.msra.mxu0 %v13885_v26  ;;  %12179 = vmatprep.mubr.bf16.mxu0 %v17275_v7  ;;  %v13909_v26 = vld [vmem:[#allocation12 + $0xf0] sm:$0xff]  }
 0xa39   : > { %12177 = vmatprep.subr.bf16.mxu0 %v13886_v61 }
 0xa3c   : > { %12178 = vmatpush3.bf16.msra.mxu0 %v13886_v61  ;;  %v13910_v61 = vld [vmem:[#allocation12 + $0xf8] sm:$0xff]  }
 0xa3d   : > { %12195 = vmatprep.subr.bf16.mxu0 %v13887_v50 }
 0xa3f   : > { %12180 = vmatmul.mubr.bf16.vlgmr.msra.gmra.mrb[32].mxu0 %v17275_v7 }
 0xa40   : > { %12196 = vmatpush3.bf16.msra.mxu0 %v13887_v50  ;;  %12183 = vmatprep.mubr.bf16.mxu0 %v14279_v49  ;;  %v14286_v50 = vld [vmem:[%s15307_s15 + $0x38] sm:$0xff]  }
 0xa41   : > { %12197 = vmatprep.subr.bf16.mxu0 %v13888_v59 }
 0xa44   : > { %12198 = vmatpush3.bf16.msra.mxu0 %v13888_v59  ;;  %v13911_v59 = vld [vmem:[#allocation12 + $0x100] sm:$0xff]  }
 0xa45   : > { %12199 = vmatprep.subr.bf16.mxu0 %v13889_v29 }
 0xa47   : > { %12184 = vmatmul.mubr.bf16.gmra.mrb[36].mxu0 %v16862_v38 }
 0xa48   : > { %12200 = vmatpush3.bf16.msra.mxu0 %v13889_v29  ;;  %12187 = vmatprep.mubr.bf16.mxu0 %v16866_v53  ;;  %v13913_v29 = vld [vmem:[#allocation12 + $0x110] sm:$0xff]  }
 0xa49   : > { %12201 = vmatprep.subr.bf16.mxu0 %v13890_v21 }
 0xa4c   : > { %12202 = vmatpush3.bf16.msra.mxu0 %v13890_v21  ;;  %v13914_v21 = vld [vmem:[#allocation12 + $0x118] sm:$0xff]  }
 0xa4d   : > { %12203 = vmatprep.subr.bf16.mxu0 %v13891_v17 }
 0xa4f   : > { %12188 = vmatmul.mubr.bf16.gmra.mrb[40].mxu0 %v16870_v0 }
 0xa50   : > { %12204 = vmatpush3.bf16.msra.mxu0 %v13891_v17  ;;  %12191 = vmatprep.mubr.bf16.mxu0 %v16874_v3  ;;  %v13916_v17 = vld [vmem:[#allocation12 + $0x128] sm:$0xff]  }
 0xa51   : > { %12205 = vmatprep.subr.bf16.mxu0 %v13892_v10 }
 0xa54   : > { %12206 = vmatpush3.bf16.msra.mxu0 %v13892_v10  ;;  %v13917_v10 = vld [vmem:[#allocation12 + $0x130] sm:$0xff]  }
 0xa55   : > { %12207 = vmatprep.subr.bf16.mxu0 %v13893_v24 }
 0xa57   : > { %12192 = vmatmul.mubr.bf16.gmra.mrb[44].mxu0 %v16878_v41 }
 0xa58   : > { %12208 = vmatpush3.bf16.msra.mxu0 %v13893_v24  ;;  %12211 = vmatprep.mubr.bf16.mxu0 %v17275_v7  ;;  %v13918_v24 = vld [vmem:[#allocation12 + $0x138] sm:$0xff]  }
 0xa59   : > { %12209 = vmatprep.subr.bf16.mxu0 %v13894_v18 }
 0xa5c   : > { %12210 = vmatpush3.bf16.msra.mxu0 %v13894_v18  ;;  %v11245_v18 = vmul.f32 -1.442695, %v16723_v40 }
 0xa5d   : > { %12227 = vmatprep.subr.bf16.mxu0 %v13895_v25 }
 0xa5e   : > { %14143 = vpow2.f32 %v11245_v18 }
 0xa5f   : > { %12212 = vmatmul.mubr.bf16.vlgmr.msra.gmra.mrb[32].mxu0 %v14279_v49 }
 0xa60   : > { %12228 = vmatpush3.bf16.msra.mxu0 %v13895_v25  ;;  %12215 = vmatprep.mubr.bf16.mxu0 %v16862_v38  ;;  %v11246_v25 = vmul.f32 -1.442695, %v16727_v54 }
 0xa61   : > { %12229 = vmatprep.subr.bf16.mxu0 %v13896_v12 }
 0xa62   : > { %14145 = vpow2.f32 %v11246_v25 }
 0xa64   : > { %12230 = vmatpush3.bf16.msra.mxu0 %v13896_v12  ;;  %v11252_v12 = vmul.f32 -1.442695, %v16751_v33 }
 0xa65   : > { %12231 = vmatprep.subr.bf16.mxu0 %v13897_v19 }
 0xa67   : > { %12216 = vmatmul.mubr.bf16.gmra.mrb[36].mxu0 %v16866_v53 }
 0xa68   : > { %12232 = vmatpush3.bf16.msra.mxu0 %v13897_v19  ;;  %12219 = vmatprep.mubr.bf16.mxu0 %v16870_v0 }
 0xa69   : > { %12233 = vmatprep.subr.bf16.mxu0 %v13898_v22 }
 0xa6c   : > { %12234 = vmatpush3.bf16.msra.mxu0 %v13898_v22  ;;  %v11250_v22 = vmul.f32 -1.442695, %v16743_v13  ;;  %v11256_v13 = vmul.f32 -1.442695, %v16777_v63 }
 0xa6d   : > { %12235 = vmatprep.subr.bf16.mxu0 %v13899_v37 }
 0xa6f   : > { %12220 = vmatmul.mubr.bf16.gmra.mrb[40].mxu0 %v16874_v3 }
 0xa70   : > { %12236 = vmatpush3.bf16.msra.mxu0 %v13899_v37  ;;  %12223 = vmatprep.mubr.bf16.mxu0 %v16878_v41 }
 0xa71   : > { %12237 = vmatprep.subr.bf16.mxu0 %v13900_v27 }
 0xa74   : > { %12238 = vmatpush3.bf16.msra.mxu0 %v13900_v27 }
 0xa75   : > { %12239 = vmatprep.subr.bf16.mxu0 %v13901_v31 }
 0xa77   : > { %12224 = vmatmul.mubr.bf16.gmra.mrb[44].mxu0 %v16888_v15 }
 0xa78   : > { %12240 = vmatpush3.bf16.msra.mxu0 %v13901_v31  ;;  %12243 = vmatprep.mubr.bf16.mxu0 %v14279_v49  ;;  %v13912_v49 = vld [vmem:[#allocation12 + $0x108] sm:$0xff]  }
 0xa79   : > { %12241 = vmatprep.subr.bf16.mxu0 %v13902_v28 }
 0xa7c   : > { %12242 = vmatpush3.bf16.msra.mxu0 %v13902_v28 }
 0xa7d   : > { %12259 = vmatprep.subr.bf16.mxu0 %v13903_v62 }
 0xa7f   : > { %12244 = vmatmul.mubr.bf16.vlgmr.msra.gmra.mrb[32].mxu0 %v16862_v38 }
 0xa80   : > { %12260 = vmatpush3.bf16.msra.mxu0 %v13903_v62  ;;  %12247 = vmatprep.mubr.bf16.mxu0 %v16866_v53  ;;  %v11254_v62 = vmul.f32 -1.442695, %v16763_v16  ;;  %v16932_v16 = vld [vmem:[%s17295_s24] ss:$0 sm:$0xff] }
 0xa81   : > { %12261 = vmatprep.subr.bf16.mxu0 %v13904_v30 }
 0xa84   : > { %12262 = vmatpush3.bf16.msra.mxu0 %v13904_v30 }
 0xa85   : > { %12263 = vmatprep.subr.bf16.mxu0 %v13905_v52 }
 0xa87   : > { %12248 = vmatmul.mubr.bf16.gmra.mrb[36].mxu0 %v16870_v0 }
 0xa88   : > { %12264 = vmatpush3.bf16.msra.mxu0 %v13905_v52  ;;  %12251 = vmatprep.mubr.bf16.mxu0 %v16874_v3 }
 0xa89   : > { %12265 = vmatprep.subr.bf16.mxu0 %v13906_v23 }
 0xa8c   : > { %12266 = vmatpush3.bf16.msra.mxu0 %v13906_v23 }
 0xa8d   : > { %12267 = vmatprep.subr.bf16.mxu0 %v13907_v44 }
 0xa8f   : > { %12252 = vmatmul.mubr.bf16.gmra.mrb[40].mxu0 %v16878_v41 }
 0xa90   : > { %12268 = vmatpush3.bf16.msra.mxu0 %v13907_v44  ;;  %12255 = vmatprep.mubr.bf16.mxu0 %v16888_v15  ;;  %v11260_v44 = vmul.f32 -1.442695, %v16800_v1 }
 0xa91   : > { %12269 = vmatprep.subr.bf16.mxu0 %v13908_v32 }
 0xa94   : > { %12270 = vmatpush3.bf16.msra.mxu0 %v13908_v32 }
 0xa95   : > { %12271 = vmatprep.subr.bf16.mxu0 %v13909_v26 }
 0xa97   : > { %12256 = vmatmul.mubr.bf16.gmra.mrb[44].mxu0 %v14286_v50 }
 0xa98   : > { %12272 = vmatpush3.bf16.msra.mxu0 %v13909_v26  ;;  %12275 = vmatprep.mubr.bf16.mxu0 %v16862_v38  ;;  %v13915_v38 = vld [vmem:[#allocation12 + $0x120] sm:$0xff]  }
 0xa99   : > { %12273 = vmatprep.subr.bf16.mxu0 %v13910_v61 }
 0xa9c   : > { %12274 = vmatpush3.bf16.msra.mxu0 %v13910_v61 }
 0xa9d   : > { %12291 = vmatprep.subr.bf16.mxu0 %v13911_v59 }
 0xa9f   : > { %12276 = vmatmul.mubr.bf16.vlgmr.msra.gmra.mrb[32].mxu0 %v16866_v53 }
 0xaa0   : > { %12292 = vmatpush3.bf16.msra.mxu0 %v13911_v59  ;;  %12279 = vmatprep.mubr.bf16.mxu0 %v16870_v0 }
 0xaa1   : > { %12293 = vmatprep.subr.bf16.mxu0 %v13912_v49 }
 0xaa4   : > { %12294 = vmatpush3.bf16.msra.mxu0 %v13912_v49 }
 0xaa5   : > { %12295 = vmatprep.subr.bf16.mxu0 %v13913_v29 }
 0xaa7   : > { %12280 = vmatmul.mubr.bf16.gmra.mrb[36].mxu0 %v16874_v3 }
 0xaa8   : > { %12296 = vmatpush3.bf16.msra.mxu0 %v13913_v29  ;;  %12283 = vmatprep.mubr.bf16.mxu0 %v16878_v41  ;;  %v11258_v29 = vmul.f32 -1.442695, %v16788_v2 }
 0xaa9   : > { %12297 = vmatprep.subr.bf16.mxu0 %v13914_v21 }
 0xaac   : > { %12298 = vmatpush3.bf16.msra.mxu0 %v13914_v21 }
 0xaad   : > { %12299 = vmatprep.subr.bf16.mxu0 %v13915_v38 }
 0xaaf   : > { %12284 = vmatmul.mubr.bf16.gmra.mrb[40].mxu0 %v16888_v15 }
 0xab0   : > { %12300 = vmatpush3.bf16.msra.mxu0 %v13915_v38  ;;  %12287 = vmatprep.mubr.bf16.mxu0 %v14286_v50 }
 0xab1   : > { %12301 = vmatprep.subr.bf16.mxu0 %v13916_v17 }
 0xab4   : > { %12302 = vmatpush3.bf16.msra.mxu0 %v13916_v17 }
 0xab5   : > { %12303 = vmatprep.subr.bf16.mxu0 %v13917_v10 }
 0xab7   : > { %12288 = vmatmul.mubr.bf16.gmra.mrb[44].mxu0 %v17275_v7 }
 0xab8   : > { %12304 = vmatpush3.bf16.msra.mxu0 %v13917_v10  ;;  %12307 = vmatprep.mubr.bf16.mxu0 %v16866_v53  ;;  %v11247_v53 = vmul.f32 -1.442695, %v16731_v43 }
 0xab9   : > { %12305 = vmatprep.subr.bf16.mxu0 %v13918_v24 }
 0xaba   : > { %14147 = vpow2.f32 %v11247_v53 }
 0xabc   : > { %12306 = vmatpush3.bf16.msra.mxu0 %v13918_v24 }
 0xabf   : > { %12308 = vmatmul.mubr.bf16.vlgmr.msra.gmra.mrb[32].mxu0 %v16870_v0  ;;  %v11248_v0 = vmul.f32 -1.442695, %v16735_v55 }
 0xac0   : > { %12311 = vmatprep.mubr.bf16.mxu0 %v16874_v3  ;;  %v11249_v3 = vmul.f32 -1.442695, %v16739_v4  ;;  %v11253_v4 = vmul.f32 -1.442695, %v16757_v5  ;;  %v11257_v5 = vmul.f32 -1.442695, %v16782_v56 }
 0xac1   : > { %14149 = vpow2.f32 %v11248_v0 }
 0xac2   : > { %14151 = vpow2.f32 %v11249_v3 }
 0xac7   : > { %12312 = vmatmul.mubr.bf16.gmra.mrb[36].mxu0 %v16878_v41  ;;  %v11251_v41 = vmul.f32 -1.442695, %v16747_v36  ;;  %v11255_v36 = vmul.f32 -1.442695, %v16771_v51  ;;  %v11259_v51 = vmul.f32 -1.442695, %v16795_v57 }
 0xac8   : > { %12315 = vmatprep.mubr.bf16.mxu0 %v16888_v15 }
 0xac9   : > { %14153 = vpow2.f32 %v11251_v41 }
 0xaca   : > { %14155 = vpow2.f32 %v11252_v12 }
 0xacf   : > { %12316 = vmatmul.mubr.bf16.gmra.mrb[40].mxu0 %v14286_v50 }
 0xad0   : > { %12319 = vmatprep.mubr.bf16.mxu0 %v17275_v7 }
 0xad7   : > { %12320 = vmatmul.mubr.bf16.gmra.mrb[44].mxu0 %v17275_v7  ;;  %v14144_v7 = vpop.eup %14143 }
 0xad8   : > { %v14146_v40 = vpop.eup %14145  ;;  %v8482_v19 = vadd.f32 1.0, %v14144_v7 }
 0xad9   : > { %v14148_v54 = vpop.eup %14147  ;;  %v8483_v43 = vadd.f32 1.0, %v14146_v40 }
 0xada   : > { %v14150_v37 = vpop.eup %14149  ;;  %v8484_v55 = vadd.f32 1.0, %v14148_v54  ;;  %14157 = vrcp.f32 %v8482_v19 }
 0xadb   : > { %v14152_v27 = vpop.eup %14151  ;;  %14159 = vrcp.f32 %v8483_v43  ;;  %v8485_v33 = vadd.f32 1.0, %v14150_v37 }
 0xadc   : > { %v14154_v31 = vpop.eup %14153  ;;  %14161 = vpow2.f32 %v11250_v22  ;;  %v8486_v28 = vadd.f32 1.0, %v14152_v27 }
 0xadd   : > { %14163 = vrcp.f32 %v8484_v55  ;;  %v14156_v15 = vpop.eup %14155  ;;  %v8488_v30 = vadd.f32 1.0, %v14154_v31 }
 0xade   : > { %14165 = vpow2.f32 %v11253_v4  ;;  %v8489_v52 = vadd.f32 1.0, %v14156_v15 }
 0xadf   : > { %14167 = vpow2.f32 %v11255_v36 }
 0xae0   : > { %14169 = vrcp.f32 %v8485_v33 }
 0xae1   : > { %14171 = vrcp.f32 %v8486_v28 }
 0xae2   : > { %14173 = vpow2.f32 %v11254_v62 }
 0xae3   : > { %14175 = vrcp.f32 %v8488_v30 }
 0xae4   : > { %v16926_v23 = vpop.eup %14157  ;;  %14177 = vpow2.f32 %v11256_v13 }
 0xae5   : > { %v16934_v32 = vpop.eup %14159  ;;  %14179 = vrcp.f32 %v8489_v52  ;;  %v10435_v7 = vsub.f32 1.0, %v16926_v23 }
 0xae6   : > { %v14162_v63 = vpop.eup %14161  ;;  %14181 = vpow2.f32 %v11257_v5  ;;  %v10436_v43 = vsub.f32 1.0, %v16934_v32 }
 0xae7   : > { %v14164_v56 = vpop.eup %14163  ;;  %14183 = vpow2.f32 %v11259_v51  ;;  %v8487_v10 = vadd.f32 1.0, %v14162_v63  ;;  %v10451_v52 = vmul.f32 %v10435_v7, %v16442_v14 }
 0xae8   : > { %v14166_v50 = vpop.eup %14165  ;;  %14185 = vpow2.f32 %v11260_v44  ;;  %v10437_v22 = vsub.f32 1.0, %v14164_v56  ;;  %v10452_v14 = vmul.f32 %v10436_v43, %v16451_v9 }
 0xae9   : > { %v14168_v49 = vpop.eup %14167  ;;  %v8490_v25 = vadd.f32 1.0, %v14166_v50 }
 0xaea   : > { %v14170_v17 = vpop.eup %14169  ;;  %v8492_v0 = vadd.f32 1.0, %v14168_v49  ;;  %v10453_v44 = vmul.f32 %v10437_v22, %v16438_v8 }
 0xaeb   : > { %v16941_v18 = vpop.eup %14171  ;;  %v10438_v4 = vsub.f32 1.0, %v14170_v17 }
 0xaec   : > { %v14174_v53 = vpop.eup %14173  ;;  %v10439_v8 = vsub.f32 1.0, %v16941_v18 }
 0xaed   : > { %v16943_v3 = vpop.eup %14175  ;;  %v8491_v15 = vadd.f32 1.0, %v14174_v53 }
 0xaee   : > { %v14178_v2 = vpop.eup %14177  ;;  %v10441_v9 = vsub.f32 1.0, %v16943_v3 }
 0xaef   : > { %v16945_v12 = vpop.eup %14179  ;;  %v8493_v36 = vadd.f32 1.0, %v14178_v2 }
 0xaf0   : > { %v14182_v19 = vpop.eup %14181  ;;  %v10442_v7 = vsub.f32 1.0, %v16945_v12 }
 0xaf1   : > { %v14184_v27 = vpop.eup %14183  ;;  %v8494_v13 = vadd.f32 1.0, %v14182_v19 }
 0xaf2   : > { %v14186_v28 = vpop.eup %14185  ;;  %v8496_v51 = vadd.f32 1.0, %v14184_v27 }
 0xaf3   : > { %v8497_v53 = vadd.f32 1.0, %v14186_v28  ;;  %v10458_v28 = vmul.f32 %v10442_v7, %v16473_v60 }
 0xb92   : > { %v12309_v26 = vpop.f32.mrb[32].mxu0 }
 0xb93   : > { %v10405_v57 = vadd.f32 %v12309_v26, %v16932_v16  ;;  %v10317_v61 = vpop.f32.mrb[33].mxu0 }
 0xb94   : > { %v10403_v1 = vadd.f32 %v16932_v16, %v10317_v61  ;;  %v12310_v59 = vpop.f32.mrb[34].mxu0  ;;  %v10454_v61 = vmul.f32 %v10438_v4, %v16446_v48  ;;  %v10455_v4 = vmul.f32 %v10439_v8, %v16469_v58 }
 0xb95   : > { %14187 = vtanh.f32 %v10405_v57  ;;  %v10406_v21 = vadd.f32 %v12310_v59, %v16932_v16  ;;  %v10320_v38 = vpop.f32.mrb[35].mxu0 }
 0xb96   : > { %14189 = vtanh.f32 %v10403_v1  ;;  %v10404_v24 = vadd.f32 %v16932_v16, %v10320_v38 }
 0xb97   : > { %14191 = vtanh.f32 %v10406_v21 }
 0xb98   : > { %14193 = vtanh.f32 %v10404_v24 }
 0xb99   : > { %14195 = vpow2.f32 %v11258_v29 }
 0xb9a   : > { %14197 = vrcp.f32 %v8487_v10  ;;  %v12313_v41 = vpop.f32.mrb[36].mxu0 }
 0xb9b   : > { %14199 = vrcp.f32 %v8490_v25  ;;  %v10409_v40 = vadd.f32 %v12313_v41, %v16932_v16  ;;  %v10333_v54 = vpop.f32.mrb[37].mxu0 }
 0xb9c   : > { %14201 = vrcp.f32 %v8492_v0  ;;  %v10407_v37 = vadd.f32 %v16932_v16, %v10333_v54  ;;  %v12314_v55 = vpop.f32.mrb[38].mxu0 }
 0xb9d   : > { %14203 = vtanh.f32 %v10409_v40  ;;  %v10410_v31 = vadd.f32 %v12314_v55, %v16932_v16  ;;  %v10336_v33 = vpop.f32.mrb[39].mxu0 }
 0xb9e   : > { %14205 = vtanh.f32 %v10407_v37  ;;  %v10408_v62 = vadd.f32 %v16932_v16, %v10336_v33  ;;  %v10457_v37 = vmul.f32 %v10441_v9, %v16464_v34 }
 0xb9f   : > { %v14188_v30 = vpop.eup %14187  ;;  %14207 = vtanh.f32 %v10410_v31 }
 0xba0   : > { %v14190_v5 = vpop.eup %14189  ;;  %v10469_v63 = vmul.f32 %v14188_v30, %v14164_v56  ;;  %14209 = vtanh.f32 %v10408_v62 }
 0xba1   : > { %v14192_v26 = vpop.eup %14191  ;;  %14211 = vrcp.f32 %v8493_v36  ;;  %v10467_v57 = vmul.f32 %v14190_v5, %v16926_v23 }
 0xba2   : > { %v14194_v50 = vpop.eup %14193  ;;  %14213 = vrcp.f32 %v8491_v15  ;;  %v10485_v56 = vadd.f32 %v10469_v63, %v10453_v44  ;;  %v10470_v1 = vmul.f32 %v14192_v26, %v14170_v17  ;;  %v12317_v59 = vpop.f32.mrb[40].mxu0 }
 0xba3   : > { %v14196_v49 = vpop.eup %14195  ;;  %14215 = vrcp.f32 %v8494_v13  ;;  %v10483_v29 = vadd.f32 %v10467_v57, %v10451_v52  ;;  %v10468_v21 = vmul.f32 %v14194_v50, %v16934_v32  ;;  %v10413_v23 = vadd.f32 %v12317_v59, %v16932_v16  ;;  %v10349_v38 = vpop.f32.mrb[41].mxu0 }
 0xba4   : > { %v14198_v48 = vpop.eup %14197  ;;  %14217 = vrcp.f32 %v8496_v51  ;;  %10501 = vst [vmem:[%s16960_s5 + $0x10] sm:$0xff] %v10485_v56  ;;  %v10486_v10 = vadd.f32 %v10470_v1, %v10454_v61  ;;  %v10411_v24 = vadd.f32 %v16932_v16, %v10349_v38  ;;  %v12318_v17 = vpop.f32.mrb[42].mxu0  ;;  %v8495_v40 = vadd.f32 1.0, %v14196_v49 }
 0xba5   : > { %v16971_v25 = vpop.eup %14199  ;;  %10499 = vst [vmem:[%s16960_s5] sm:$0xff] %v10483_v29  ;;  %v10484_v0 = vadd.f32 %v10468_v21, %v10452_v14  ;;  %14219 = vtanh.f32 %v10413_v23  ;;  %v10414_v32 = vadd.f32 %v12318_v17, %v16932_v16  ;;  %v10352_v2 = vpop.f32.mrb[43].mxu0  ;;  %v10440_v43 = vsub.f32 1.0, %v14198_v48 }
 0xba6   : > { %v14202_v41 = vpop.eup %14201  ;;  %10502 = vst [vmem:[%s16960_s5 + $0x18] sm:$0xff] %v10486_v10  ;;  %14221 = vtanh.f32 %v10411_v24  ;;  %v10412_v54 = vadd.f32 %v16932_v16, %v10352_v2  ;;  %v10443_v63 = vsub.f32 1.0, %v16971_v25 }
 0xba7   : > { %v14204_v19 = vpop.eup %14203  ;;  %10500 = vst [vmem:[%s16960_s5 + $0x8] sm:$0xff] %v10484_v0  ;;  %14223 = vtanh.f32 %v10414_v32 }
 0xba8   : > { %v14206_v22 = vpop.eup %14205  ;;  %v10473_v55 = vmul.f32 %v14204_v19, %v16943_v3  ;;  %14225 = vtanh.f32 %v10412_v54  ;;  %v10456_v3 = vmul.f32 %v10440_v43, %v16477_v42  ;;  %v10459_v21 = vmul.f32 %v10443_v63, %v16493_v45 }
 0xba9   : > { %v14208_v27 = vpop.eup %14207  ;;  %14227 = vrcp.f32 %v8497_v53  ;;  %v10471_v36 = vmul.f32 %v14206_v22, %v16941_v18  ;;  %v10445_v18 = vsub.f32 1.0, %v14202_v41 }
 0xbaa   : > { %v14210_v31 = vpop.eup %14209  ;;  %14229 = vrcp.f32 %v8495_v40  ;;  %v10489_v33 = vadd.f32 %v10473_v55, %v10457_v37  ;;  %v10474_v15 = vmul.f32 %v14208_v27, %v16945_v12  ;;  %v12321_v62 = vpop.f32.mrb[44].mxu0 }
 0xbab   : > { %v14212_v34 = vpop.eup %14211  ;;  %v10487_v30 = vadd.f32 %v10471_v36, %v10455_v4  ;;  %v10472_v13 = vmul.f32 %v14210_v31, %v14198_v48  ;;  %v10417_v52 = vadd.f32 %v12321_v62, %v16932_v16  ;;  %v10365_v58 = vpop.f32.mrb[45].mxu0  ;;  %v10461_v59 = vmul.f32 %v10445_v18, %v16489_v39 }
 0xbac   : > { %v14214_v5 = vpop.eup %14213  ;;  %10505 = vst [vmem:[%s16960_s5 + $0x30] sm:$0xff] %v10489_v33  ;;  %v10490_v51 = vadd.f32 %v10474_v15, %v10458_v28  ;;  %v10415_v44 = vadd.f32 %v16932_v16, %v10365_v58  ;;  %v12322_v60 = vpop.f32.mrb[46].mxu0  ;;  %v10446_v14 = vsub.f32 1.0, %v14212_v34 }
 0xbad   : > { %v14216_v12 = vpop.eup %14215  ;;  %10503 = vst [vmem:[%s16960_s5 + $0x20] sm:$0xff] %v10487_v30  ;;  %v10488_v26 = vadd.f32 %v10472_v13, %v10456_v3  ;;  %14231 = vtanh.f32 %v10417_v52  ;;  %v10418_v42 = vadd.f32 %v12322_v60, %v16932_v16  ;;  %v10368_v57 = vpop.f32.mrb[47].mxu0  ;;  %v10444_v56 = vsub.f32 1.0, %v14214_v5 }
 0xbae   : > { %v14218_v61 = vpop.eup %14217  ;;  %10506 = vst [vmem:[%s16960_s5 + $0x38] sm:$0xff] %v10490_v51  ;;  %14233 = vtanh.f32 %v10415_v44  ;;  %v10416_v50 = vadd.f32 %v16932_v16, %v10368_v57  ;;  %v10462_v16 = vmul.f32 %v10446_v14, %v16496_v6  ;;  %v10447_v2 = vsub.f32 1.0, %v14216_v12 }
 0xbaf   : > { %v14220_v8 = vpop.eup %14219  ;;  %10504 = vst [vmem:[%s16960_s5 + $0x28] sm:$0xff] %v10488_v26  ;;  %14235 = vtanh.f32 %v10418_v42  ;;  %v10460_v39 = vmul.f32 %v10444_v56, %v16498_v35  ;;  %v10449_v0 = vsub.f32 1.0, %v14218_v61 }
 0xbb0   : > { %v14222_v1 = vpop.eup %14221  ;;  %v10477_v49 = vmul.f32 %v14220_v8, %v14202_v41  ;;  %14237 = vtanh.f32 %v10416_v50  ;;  %v10463_v19 = vmul.f32 %v10447_v2, %v16512_v20 }
 0xbb1   : > { %v14224_v29 = vpop.eup %14223  ;;  %v10475_v23 = vmul.f32 %v14222_v1, %v16971_v25  ;;  %v10465_v40 = vmul.f32 %v10449_v0, %v16509_v47 }
 0xbb2   : > { %v14226_v38 = vpop.eup %14225  ;;  %v10493_v48 = vadd.f32 %v10477_v49, %v10461_v59  ;;  %v10478_v9 = vmul.f32 %v14224_v29, %v14212_v34 }
 0xbb3   : > { %v14228_v10 = vpop.eup %14227  ;;  %v10491_v24 = vadd.f32 %v10475_v23, %v10459_v21  ;;  %v10476_v17 = vmul.f32 %v14226_v38, %v14214_v5 }
 0xbb4   : > { %v14230_v53 = vpop.eup %14229  ;;  %10509 = vst [vmem:[%s16960_s5 + $0x50] sm:$0xff] %v10493_v48  ;;  %v10494_v32 = vadd.f32 %v10478_v9, %v10462_v16  ;;  %v10450_v25 = vsub.f32 1.0, %v14228_v10 }
 0xbb5   : > { %10507 = vst [vmem:[%s16960_s5 + $0x40] sm:$0xff] %v10491_v24  ;;  %v10492_v45 = vadd.f32 %v10476_v17, %v10460_v39  ;;  %v10448_v7 = vsub.f32 1.0, %v14230_v53 }
 0xbb6   : > { %10510 = vst [vmem:[%s16960_s5 + $0x58] sm:$0xff] %v10494_v32  ;;  %v10466_v55 = vmul.f32 %v10450_v25, %v16514_v11 }
 0xbb7   : > { %v14232_v41 = vpop.eup %14231  ;;  %10508 = vst [vmem:[%s16960_s5 + $0x48] sm:$0xff] %v10492_v45  ;;  %v10464_v36 = vmul.f32 %v10448_v7, %v16516_v46 }
 0xbb8   : > { %v14234_v6 = vpop.eup %14233  ;;  %v10481_v35 = vmul.f32 %v14232_v41, %v14218_v61 }
 0xbb9   : > { %v14236_v54 = vpop.eup %14235  ;;  %v10479_v43 = vmul.f32 %v14234_v6, %v14216_v12 }
 0xbba   : > { %v14238_v22 = vpop.eup %14237  ;;  %v10497_v37 = vadd.f32 %v10481_v35, %v10465_v40  ;;  %v10482_v27 = vmul.f32 %v14236_v54, %v14228_v10 }
 0xbbb   : > { %v10495_v4 = vadd.f32 %v10479_v43, %v10463_v19  ;;  %v10480_v31 = vmul.f32 %v14238_v22, %v14230_v53 }
 0xbbc   : > { %10513 = vst [vmem:[%s16960_s5 + $0x70] sm:$0xff] %v10497_v37  ;;  %v10498_v33 = vadd.f32 %v10482_v27, %v10466_v55 }
 0xbbd   : > { %10511 = vst [vmem:[%s16960_s5 + $0x60] sm:$0xff] %v10495_v4  ;;  %v10496_v47 = vadd.f32 %v10480_v31, %v10464_v36 }
 0xbbe   : > { %10514 = vst [vmem:[%s16960_s5 + $0x78] sm:$0xff] %v10498_v33 }
 0xbbf   : > { %10512 = vst [vmem:[%s16960_s5 + $0x68] sm:$0xff] %v10496_v47 }
 0xbc0 PF: > { %s17297_s16 = sld [smem:[#allocation17_spill]] }
 0xbc6   : > { %s28_s29 = sadd.s32 1, %s17297_s16  }
 0xbc7   : > { %p25_p9 = scmp.ge.s32.totalorder %s28_s29, 4  }
 0xbc9   :  { %27 = sbr.rel (!%p25_p9) target bundleno = 9 (0x9), region = 170 }
 0xbd0   :  { %10536 = vsyncpa [#allocation3], 1 }
 0xbd1   :  { %10538 = vsyncpa [#allocation3 + $0x1], 1 }
 0xbd2   :  { %10539 = vsyncpa [#allocation5], 1 }
 0xbd3   :  { %10540 = vsyncpa [#allocation8], 1 }
 0xbd4   :  { %10541 = vsyncpa [#allocation11], 1 }

</bundles_post_ra>
